<compile_context>
chip_gen: v7x
topology: tpu7x:2x2x1
jax: 0.10.0
libtpu: 0.0.40
codegen_flags: <defaults>
</compile_context>

<pallas_src>
import functools
import math

import jax
import jax.numpy as jnp
from jax.experimental import pallas as pl
from jax.experimental.pallas import tpu as pltpu

LRELU_SLOPE = 0.1
VMEM_LIMIT = 32 * 1024 * 1024   # safe on v5e/v6e/v7x (v7x physical VMEM = 64 MiB)


def _lrelu(y):
    return jnp.where(y >= 0.0, y, LRELU_SLOPE * y)


def _round_up(x, m):
    return ((x + m - 1) // m) * m


def _pad_rows(x, rows):
    if x.shape[0] == rows:
        return x
    pad = [(0, rows - x.shape[0])] + [(0, 0)] * (x.ndim - 1)
    return jnp.pad(x, pad)


def _row_tile(M, requested):
    """Pick the row tile (multiple of 8, capped at `requested`) and the padded M."""
    tm = min(requested, _round_up(M, 8))
    return tm, _round_up(M, tm)


# ---------------------------------------------------------------------------
# Pallas kernels
# ---------------------------------------------------------------------------
def _pointnet_kernel(x_ref, w1_ref, b1_ref, w2_ref, b2_ref, o_ref):
    # Both PointNet layers fused: no HBM round trip of the hidden activations.
    h = jnp.dot(x_ref[...], w1_ref[...], preferred_element_type=jnp.float32) + b1_ref[...]
    h = jnp.maximum(h, 0.0)
    y = jnp.dot(h, w2_ref[...], preferred_element_type=jnp.float32) + b2_ref[...]
    o_ref[...] = jnp.maximum(y, 0.0)


def pallas_pointnet(x, w1, b1, w2, b2, tile_m=512):
    M, cin = x.shape
    hid, out_c = w1.shape[1], w2.shape[1]
    tm, Mp = _row_tile(M, tile_m)
    out = pl.pallas_call(
        _pointnet_kernel,
        out_shape=jax.ShapeDtypeStruct((Mp, out_c), jnp.float32),
        grid=(Mp // tm,),
        in_specs=[pl.BlockSpec((tm, cin), lambda i: (i, 0)),
                  pl.BlockSpec((cin, hid), lambda i: (0, 0)),
                  pl.BlockSpec((1, hid), lambda i: (0, 0)),
                  pl.BlockSpec((hid, out_c), lambda i: (0, 0)),
                  pl.BlockSpec((1, out_c), lambda i: (0, 0))],
        out_specs=pl.BlockSpec((tm, out_c), lambda i: (i, 0)),
        compiler_params=pltpu.CompilerParams(dimension_semantics=("parallel",),
                                             vmem_limit_bytes=VMEM_LIMIT),
    )(_pad_rows(x, Mp), w1, b1.reshape(1, -1), w2, b2.reshape(1, -1))
    return out[:M]


def _unary_kernel(x_ref, w_ref, b_ref, o_ref):
    y = jnp.dot(x_ref[...], w_ref[...], preferred_element_type=jnp.float32) + b_ref[...]
    o_ref[...] = _lrelu(y)


def _unary_shortcut_kernel(x_ref, w_ref, b_ref, ws_ref, bs_ref, mid_ref, sc_ref):
    # unary1 and the 1x1 shortcut projection read the same x tile -> one fused kernel.
    x = x_ref[...]
    y = jnp.dot(x, w_ref[...], preferred_element_type=jnp.float32) + b_ref[...]
    mid_ref[...] = _lrelu(y)
    sc_ref[...] = jnp.dot(x, ws_ref[...], preferred_element_type=jnp.float32) + bs_ref[...]


def pallas_unary_shortcut(x, w1, b1, ws, bs, tile_m=512):
    """(mid, shortcut) = (lrelu(x@w1+b1), x@ws+bs); identity shortcut if ws is None."""
    M, cin = x.shape
    mid_c = w1.shape[1]
    tm, Mp = _row_tile(M, tile_m)
    xp = _pad_rows(x, Mp)
    grid = (Mp // tm,)
    x_spec = pl.BlockSpec((tm, cin), lambda i: (i, 0))
    w1_spec = pl.BlockSpec((cin, mid_c), lambda i: (0, 0))
    b1_spec = pl.BlockSpec((1, mid_c), lambda i: (0, 0))
    mid_spec = pl.BlockSpec((tm, mid_c), lambda i: (i, 0))
    cp = pltpu.CompilerParams(dimension_semantics=("parallel",),
                              vmem_limit_bytes=VMEM_LIMIT)
    if ws is None:
        mid = pl.pallas_call(
            _unary_kernel,
            out_shape=jax.ShapeDtypeStruct((Mp, mid_c), jnp.float32),
            grid=grid, in_specs=[x_spec, w1_spec, b1_spec], out_specs=mid_spec,
            compiler_params=cp,
        )(xp, w1, b1.reshape(1, -1))
        return mid[:M], x
    out_c = ws.shape[1]
    mid, sc = pl.pallas_call(
        _unary_shortcut_kernel,
        out_shape=(jax.ShapeDtypeStruct((Mp, mid_c), jnp.float32),
                   jax.ShapeDtypeStruct((Mp, out_c), jnp.float32)),
        grid=grid,
        in_specs=[x_spec, w1_spec, b1_spec,
                  pl.BlockSpec((cin, out_c), lambda i: (0, 0)),
                  pl.BlockSpec((1, out_c), lambda i: (0, 0))],
        out_specs=(mid_spec, pl.BlockSpec((tm, out_c), lambda i: (i, 0))),
        compiler_params=cp,
    )(xp, w1, b1.reshape(1, -1), ws, bs.reshape(1, -1))
    return mid[:M], sc[:M]


def _pdist_kernel(c_ref, ct_ref, o_ref):
    c = c_ref[0]                                        # [tn, 3]
    ct = ct_ref[0]                                      # [3, N]
    row = jnp.sum(c * c, axis=-1, keepdims=True)        # [tn, 1]
    col = jnp.sum(ct * ct, axis=0, keepdims=True)       # [1, N]
    o_ref[0] = row + col - 2.0 * jnp.dot(c, ct, preferred_element_type=jnp.float32)


def pallas_pairwise_sqdist(coords, row_tile=256):
    """Squared pairwise distances per batch: [B, N, 3] -> [B, N, N], row-tiled."""
    B, N, D = coords.shape
    tn, Np = _row_tile(N, row_tile)
    coords_rows = coords if Np == N else jnp.pad(coords, ((0, 0), (0, Np - N), (0, 0)))
    coords_t = jnp.transpose(coords, (0, 2, 1))         # columns stay un-padded
    out = pl.pallas_call(
        _pdist_kernel,
        out_shape=jax.ShapeDtypeStruct((B, Np, N), jnp.float32),
        grid=(B, Np // tn),
        in_specs=[pl.BlockSpec((1, tn, D), lambda b, r: (b, r, 0)),
                  pl.BlockSpec((1, D, N), lambda b, r: (b, 0, 0))],
        out_specs=pl.BlockSpec((1, tn, N), lambda b, r: (b, r, 0)),
        compiler_params=pltpu.CompilerParams(
            dimension_semantics=("parallel", "parallel"),
            vmem_limit_bytes=VMEM_LIMIT),
    )(coords_rows, coords_t)
    return out[:, :N, :]


def _kpconv_block_kernel(rel_ref, f_ref, sc_ref, kpt_ref, kp2_ref, kw_ref,
                         u2w_ref, u2b_ref, o_ref, *, num_kp, kp_extent):
    rel = rel_ref[...]                                  # [tm, K, 3]
    f = f_ref[...]                                      # [tm, K, C]
    # KPConv linear influence weights, computed in-register (no [M,K,Kp] HBM tensor).
    r2 = jnp.sum(rel * rel, axis=-1, keepdims=True)     # [tm, K, 1]
    cross = (rel[:, :, 0:1] * kpt_ref[0:1, :]           # (tm,K,1)*(1,Kp) -> (tm,K,Kp)
             + rel[:, :, 1:2] * kpt_ref[1:2, :]
             + rel[:, :, 2:3] * kpt_ref[2:3, :])
    sq = r2 + kp2_ref[...] - 2.0 * cross
    dist = jnp.sqrt(jnp.maximum(sq, 0.0))
    w = jnp.maximum(1.0 - dist / kp_extent, 0.0)        # [tm, K, Kp]
    # Weighted neighbor features stacked over kernel points -> ONE MXU matmul with
    # contraction dim Kp*C (instead of Kp tiny matmuls). The per-kp weighted sums stay
    # on the VPU (batched (Kp,K)@(K,C) matmuls would badly under-fill the MXU).
    wf = jnp.concatenate(
        [jnp.sum(w[:, :, k:k + 1] * f, axis=1) for k in range(num_kp)], axis=-1)
    conv = _lrelu(jnp.dot(wf, kw_ref[...], preferred_element_type=jnp.float32))
    # fused unary2 + residual add
    y = jnp.dot(conv, u2w_ref[...], preferred_element_type=jnp.float32)
    o_ref[...] = _lrelu(y + u2b_ref[...] + sc_ref[...])


def pallas_resnet_kpconv(rel, f_nb, shortcut, kernel_points, kp_w, u2_w, u2_b,
                         kp_extent, tile_m=256):
    M, K, _ = rel.shape
    C = f_nb.shape[2]
    Kp = kernel_points.shape[0]
    mid_c = kp_w.shape[2]
    out_c = u2_w.shape[1]
    tm, Mp = _row_tile(M, tile_m)
    kpt = kernel_points.T                               # [3, Kp]
    kp2 = jnp.sum(kernel_points * kernel_points, axis=-1).reshape(1, Kp)
    kw2d = kp_w.reshape(Kp * C, mid_c)                  # kw2d[k*C + c, :] == kp_w[k, c, :]
    out = pl.pallas_call(
        functools.partial(_kpconv_block_kernel, num_kp=Kp, kp_extent=float(kp_extent)),
        out_shape=jax.ShapeDtypeStruct((Mp, out_c), jnp.float32),
        grid=(Mp // tm,),
        in_specs=[pl.BlockSpec((tm, K, 3), lambda i: (i, 0, 0)),
                  pl.BlockSpec((tm, K, C), lambda i: (i, 0, 0)),
                  pl.BlockSpec((tm, out_c), lambda i: (i, 0)),
                  pl.BlockSpec((3, Kp), lambda i: (0, 0)),
                  pl.BlockSpec((1, Kp), lambda i: (0, 0)),
                  pl.BlockSpec((Kp * C, mid_c), lambda i: (0, 0)),
                  pl.BlockSpec((mid_c, out_c), lambda i: (0, 0)),
                  pl.BlockSpec((1, out_c), lambda i: (0, 0))],
        out_specs=pl.BlockSpec((tm, out_c), lambda i: (i, 0)),
        compiler_params=pltpu.CompilerParams(dimension_semantics=("parallel",),
                                             vmem_limit_bytes=VMEM_LIMIT),
    )(_pad_rows(rel, Mp), _pad_rows(f_nb, Mp), _pad_rows(shortcut, Mp),
      kpt, kp2, kw2d, u2_w, u2_b.reshape(1, -1))
    return out[:M]


def _vlad_kernel(f_ref, v_ref, wa_ref, ba_ref, cent_ref, wout_ref, o_ref):
    # NetVLAD aggregation + output projection + final L2 normalize (F.normalize(dim=-1)).
    Kc = cent_ref.shape[0]
    f = f_ref[0]                                        # [N, C]
    v = v_ref[0]                                        # [N, 1]  (1 = valid point)
    logits = jnp.dot(f, wa_ref[...], preferred_element_type=jnp.float32) + ba_ref[...]
    logits = logits - jnp.max(logits, axis=-1, keepdims=True)
    e = jnp.exp(logits)
    inv_den = pl.reciprocal(jnp.sum(e, axis=-1, keepdims=True), approx=True)
    a = (e * inv_den) * v                               # soft assignment, padded pts masked
    dn = (((0,), (0,)), ((), ()))                       # contract over points
    vlad = jax.lax.dot_general(a, f, dn, preferred_element_type=jnp.float32)      # [Kc, C]
    asum = jax.lax.dot_general(a, jnp.ones_like(v), dn,
                               preferred_element_type=jnp.float32)                # [Kc, 1]
    vlad = vlad - asum * cent_ref[...]
    vlad = vlad * jax.lax.rsqrt(jnp.sum(vlad * vlad, axis=-1, keepdims=True) + 1e-12)
    # Row-major flatten via lane-concat, then ONE (1, Kc*C)@(Kc*C, D) projection matmul.
    flat = jnp.concatenate([vlad[k:k + 1, :] for k in range(Kc)], axis=-1)         # [1,Kc*C]
    out = jnp.dot(flat, wout_ref[...], preferred_element_type=jnp.float32)         # [1, D]
    out = out * jax.lax.rsqrt(jnp.sum(out * out, axis=-1, keepdims=True) + 1e-12)
    o_ref[0] = out


def pallas_vlad(feats, valid, wa, ba, centers, wout2d):
    B, N, C = feats.shape
    Kc = centers.shape[0]
    D = wout2d.shape[1]
    out = pl.pallas_call(
        _vlad_kernel,
        out_shape=jax.ShapeDtypeStruct((B, 1, D), jnp.float32),
        grid=(B,),
        in_specs=[pl.BlockSpec((1, N, C), lambda b: (b, 0, 0)),
                  pl.BlockSpec((1, N, 1), lambda b: (b, 0, 0)),
                  pl.BlockSpec((C, Kc), lambda b: (0, 0)),
                  pl.BlockSpec((1, Kc), lambda b: (0, 0)),
                  pl.BlockSpec((Kc, C), lambda b: (0, 0)),
                  pl.BlockSpec((Kc * C, D), lambda b: (0, 0))],
        out_specs=pl.BlockSpec((1, 1, D), lambda b: (b, 0, 0)),
        compiler_params=pltpu.CompilerParams(dimension_semantics=("parallel",),
                                             vmem_limit_bytes=VMEM_LIMIT),
    )(feats, valid, wa, ba.reshape(1, -1), centers, wout2d)
    return out.reshape(B, D)


# ---------------------------------------------------------------------------
# Model glue (knn / gathers / parameter plumbing stay in plain JAX)
# ---------------------------------------------------------------------------
def pointnet_feat(p, x):
    """Shared per-point MLP: [B, N, in_dim] -> [B, N, out_dim]."""
    B, N, cin = x.shape
    out = pallas_pointnet(x.reshape(B * N, cin), p["w1"], p["b1"], p["w2"], p["b2"])
    return out.reshape(B, N, -1)


def resnet_kpconv_fast(p, kernel_points, rel, idx, feats, kp_extent):
    """ResnetKPConv.fast_forward: unary1 [+ shortcut] -> KPConv -> unary2 + residual."""
    B, N, _ = feats.shape
    K = idx.shape[-1]
    M = B * N
    x = feats.reshape(M, -1)
    mid, shortcut = pallas_unary_shortcut(x, p["u1_w"], p["u1_b"], p["sc_w"], p["sc_b"])
    # TODO(synk): neighbor feature gather stays in plain JAX (no clean in-kernel
    #             dynamic-gather / scalar-prefetch K-row gather path implemented yet).
    nb = jax.vmap(lambda fb, ib: fb[ib])(mid.reshape(B, N, -1), idx)     # [B, N, K, Cmid]
    out = pallas_resnet_kpconv(rel, nb.reshape(M, K, mid.shape[1]), shortcut,
                               kernel_points, p["kp_w"], p["u2_w"], p["u2_b"], kp_extent)
    return out.reshape(B, N, -1)


def convnet(p, hp, coords, feats, mask):
    """ConvNet.forward: mask coords, knn, run ResnetKPConv blocks."""
    if hp["num_layer"] == 0:
        return feats
    B, N, _ = coords.shape
    K = hp["num_neighbors"]
    kp_extent = hp["KP_extent"] if hp["KP_extent"] is not None else 1.2 * hp["radius"]
    coords = jnp.where(mask, 1.0e6, coords)             # coords[mask.expand_as(coords)] = 1e6
    # TODO(synk): k-NN top-k selection stays in plain JAX (no clean Pallas sort); the
    #             pairwise-distance reduction itself runs in a row-tiled Pallas kernel.
    sqdist = pallas_pairwise_sqdist(coords)
    idx = jax.lax.top_k(-sqdist, K)[1]                  # [B, N, K]
    nb_coords = jax.vmap(lambda cb, ib: cb[ib])(coords, idx)
    rel = (nb_coords - coords[:, :, None, :]).reshape(B * N, K, 3)
    for bp in p["blocks"]:
        feats = resnet_kpconv_fast(bp, p["kernel_points"], rel, idx, feats, kp_extent)
    return feats


def kppr_forward(params, hp, x, m):
    """KPPRNet.forward. x: [B, N, in_dim] float32, m: [B, N] bool (True = padded)."""
    coords = x[..., :3]
    m1 = m[..., None]                                   # m.unsqueeze(-1)
    feats = pointnet_feat(params["pn"], x)              # self.pn(x)
    feats = convnet(params["conv"], hp["kpconv"], coords, feats, m1)   # self.conv(...)
    valid = (~m1).astype(jnp.float32)
    vp = params["vlad"]
    # VLAD aggregation + F.normalize(dim=-1) both inside the Pallas kernel
    return pallas_vlad(feats, valid, vp["wa"], vp["ba"], vp["centers"], vp["wout"])


# ---------------------------------------------------------------------------
# Deterministic parameter init
# ---------------------------------------------------------------------------
def _linear_init(key, fan_in, fan_out):
    k1, k2 = jax.random.split(key)
    lim = 1.0 / math.sqrt(fan_in)
    w = jax.random.uniform(k1, (fan_in, fan_out), jnp.float32, -lim, lim)
    b = jax.random.uniform(k2, (fan_out,), jnp.float32, -lim, lim)
    return w, b


def init_params(key, hp):
    pn_hp, kp_hp = hp["point_net"], hp["kpconv"]
    ag_hp = hp["aggregation"][hp["aggregation"]["method"]]
    keys = jax.random.split(key, 8)

    w1, b1 = _linear_init(keys[0], pn_hp["in_dim"], pn_hp["hidden_dim"])
    w2, b2 = _linear_init(keys[1], pn_hp["hidden_dim"], pn_hp["out_dim"])
    pn = {"w1": w1, "b1": b1, "w2": w2, "b2": b2}

    out_c = kp_hp["out_channels"]
    mid_c = out_c // kp_hp["f_dscale"]
    Kp = kp_hp["kernel_size"]
    in_cs = [kp_hp["in_channels"]] + kp_hp["num_layer"] * [out_c]
    blk_keys = jax.random.split(keys[2], max(kp_hp["num_layer"], 1))
    blocks = []
    for li in range(kp_hp["num_layer"]):
        in_c = in_cs[li]
        bk = jax.random.split(blk_keys[li], 4)
        u1_w, u1_b = _linear_init(bk[0], in_c, mid_c)
        lim = 1.0 / math.sqrt(Kp * mid_c)
        kp_w = jax.random.uniform(bk[1], (Kp, mid_c, mid_c), jnp.float32, -lim, lim)
        u2_w, u2_b = _linear_init(bk[2], mid_c, out_c)
        sc_w, sc_b = (None, None) if in_c == out_c else _linear_init(bk[3], in_c, out_c)
        blocks.append({"u1_w": u1_w, "u1_b": u1_b, "kp_w": kp_w,
                       "u2_w": u2_w, "u2_b": u2_b, "sc_w": sc_w, "sc_b": sc_b})
    kpts = jax.random.normal(keys[3], (Kp, 3), jnp.float32)
    kpts = kpts / (jnp.linalg.norm(kpts, axis=-1, keepdims=True) + 1e-6)
    kpts = (kpts * 0.66 * kp_hp["radius"]).at[0].set(0.0)   # kernel point 0 at origin
    conv = {"blocks": blocks, "kernel_points": kpts}

    C, Kc, D = ag_hp["feature_dim"], ag_hp["num_clusters"], ag_hp["out_dim"]
    wa, ba = _linear_init(keys[4], C, Kc)
    centers = jax.random.normal(keys[5], (Kc, C), jnp.float32) * 0.1
    wout, _ = _linear_init(keys[6], Kc * C, D)              # stored flattened [Kc*C, D]
    vlad = {"wa": wa, "ba": ba, "centers": centers, "wout": wout}

    return {"pn": pn, "conv": conv, "vlad": vlad}


if __name__ == "__main__":
    hparams = {
        "point_net": {"in_dim": 4, "hidden_dim": 16, "out_dim": 16},
        "kpconv": {"in_channels": 16, "out_channels": 32, "radius": 1.0,
                   "num_layer": 2, "num_neighbors": 8, "kernel_size": 5,
                   "KP_extent": None, "p_dim": 3, "f_dscale": 2,
                   "precompute_weights": True},
        "aggregation": {"method": "vlad",
                        "vlad": {"feature_dim": 32, "num_clusters": 8, "out_dim": 64}},
    }
    B, N = 2, 16
    key = jax.random.PRNGKey(0)
    pkey, xkey = jax.random.split(key)
    params = init_params(pkey, hparams)
    x = jax.random.normal(xkey, (B, N, hparams["point_net"]["in_dim"]), jnp.float32)
    # last 4 points of each cloud are padding (mask == True means invalid)
    m = jnp.broadcast_to(jnp.arange(N)[None, :] >= N - 4, (B, N))

    fwd = jax.jit(functools.partial(kppr_forward, params, hparams))
    out = jax.block_until_ready(fwd(x, m))
    assert out.shape == (B, hparams["aggregation"]["vlad"]["out_dim"])
    assert bool(jnp.all(jnp.isfinite(out)))
    print("KERNEL_OK")
</pallas_src>

<mosaic_0001>
module attributes {stable_mosaic.version = 11 : i64} {
  func.func @_pdist_kernel(%arg0: i32, %arg1: i32, %arg2: memref<1x16x3xf32, #tpu.memory_space<vmem>>, %arg3: memref<1x3x16xf32, #tpu.memory_space<vmem>>, %arg4: memref<1x16x16xf32, #tpu.memory_space<vmem>>) attributes {dimension_semantics = [#tpu.dimension_semantics<parallel>, #tpu.dimension_semantics<parallel>], iteration_bounds = array<i64: 2, 1>, scalar_prefetch = 0 : i64, scratch_operands = 0 : i64, tpu.core_type = #tpu.core_type<tc>, window_params = [{transform_indices = @transform_0, window_bounds = array<i64: 1, 16, 3>}, {transform_indices = @transform_1, window_bounds = array<i64: 1, 3, 16>}, {transform_indices = @transform_2, window_bounds = array<i64: 1, 16, 16>}]} {
    %c0 = arith.constant 0 : index
    %c0_0 = arith.constant 0 : index
    %c0_1 = arith.constant 0 : index
    %0 = vector.load %arg2[%c0, %c0_0, %c0_1] : memref<1x16x3xf32, #tpu.memory_space<vmem>>, vector<1x16x3xf32>
    %1 = vector.shape_cast %0 : vector<1x16x3xf32> to vector<16x3xf32>
    %c0_2 = arith.constant 0 : index
    %c0_3 = arith.constant 0 : index
    %c0_4 = arith.constant 0 : index
    %2 = vector.load %arg3[%c0_2, %c0_3, %c0_4] : memref<1x3x16xf32, #tpu.memory_space<vmem>>, vector<1x3x16xf32>
    %3 = vector.shape_cast %2 : vector<1x3x16xf32> to vector<3x16xf32>
    %4 = arith.mulf %1, %1 : vector<16x3xf32>
    %cst = arith.constant dense<0.000000e+00> : vector<16xf32>
    %5 = vector.multi_reduction <add>, %4, %cst [1] : vector<16x3xf32> to vector<16xf32>
    %6 = vector.shape_cast %5 : vector<16xf32> to vector<16x1xf32>
    %7 = arith.mulf %3, %3 : vector<3x16xf32>
    %cst_5 = arith.constant dense<0.000000e+00> : vector<16xf32>
    %8 = vector.multi_reduction <add>, %7, %cst_5 [0] : vector<3x16xf32> to vector<16xf32>
    %9 = vector.shape_cast %8 : vector<16xf32> to vector<1x16xf32>
    %10 = vector.broadcast %6 : vector<16x1xf32> to vector<16x16xf32>
    %11 = vector.broadcast %9 : vector<1x16xf32> to vector<16x16xf32>
    %12 = arith.addf %10, %11 : vector<16x16xf32>
    %cst_6 = arith.constant dense<0.000000e+00> : vector<16x16xf32>
    %13 = tpu.matmul %1, %3, %cst_6 {dimension_numbers = #tpu.dot_dimension_numbers<[1], [0], [0], [1], [0, 0, 1, 1], [], []>} : vector<16x3xf32>, vector<3x16xf32>, vector<16x16xf32> -> vector<16x16xf32>
    %cst_7 = arith.constant 2.000000e+00 : f32
    %14 = vector.broadcast %cst_7 : f32 to vector<16x16xf32>
    %15 = arith.mulf %14, %13 : vector<16x16xf32>
    %16 = arith.subf %12, %15 : vector<16x16xf32>
    %c0_8 = arith.constant 0 : index
    %c0_9 = arith.constant 0 : index
    %c0_10 = arith.constant 0 : index
    %17 = vector.load %arg4[%c0_8, %c0_9, %c0_10] : memref<1x16x16xf32, #tpu.memory_space<vmem>>, vector<1x16x16xf32>
    %18 = vector.shape_cast %17 : vector<1x16x16xf32> to vector<16x16xf32>
    %19 = vector.shape_cast %16 : vector<16x16xf32> to vector<1x16x16xf32>
    tpu.vector_store %arg4[%c0_8, %c0_9, %c0_10], %19 {strides = array<i32>} : memref<1x16x16xf32, #tpu.memory_space<vmem>>, vector<1x16x16xf32>,
    return
  }
  func.func @transform_0(%arg0: i32, %arg1: i32) -> (i32, i32, i32) {
    %c0_i32 = arith.constant 0 : i32
    %c0_i32_0 = arith.constant 0 : i32
    return %arg0, %arg1, %c0_i32 : i32, i32, i32
  }
  func.func @transform_1(%arg0: i32, %arg1: i32) -> (i32, i32, i32) {
    %c0_i32 = arith.constant 0 : i32
    %c0_i32_0 = arith.constant 0 : i32
    %c0_i32_1 = arith.constant 0 : i32
    return %arg0, %c0_i32, %c0_i32_0 : i32, i32, i32
  }
  func.func @transform_2(%arg0: i32, %arg1: i32) -> (i32, i32, i32) {
    %c0_i32 = arith.constant 0 : i32
    %c0_i32_0 = arith.constant 0 : i32
    return %arg0, %arg1, %c0_i32 : i32, i32, i32
  }
}

module attributes {stable_mosaic.version = 11 : i64} {
  func.func @_unary_shortcut_kernel(%arg0: i32, %arg1: memref<32x16xf32, #tpu.memory_space<vmem>>, %arg2: memref<16x16xf32, #tpu.memory_space<vmem>>, %arg3: memref<1x16xf32, #tpu.memory_space<vmem>>, %arg4: memref<16x32xf32, #tpu.memory_space<vmem>>, %arg5: memref<1x32xf32, #tpu.memory_space<vmem>>, %arg6: memref<32x16xf32, #tpu.memory_space<vmem>>, %arg7: memref<32x32xf32, #tpu.memory_space<vmem>>) attributes {dimension_semantics = [#tpu.dimension_semantics<parallel>], iteration_bounds = array<i64: 1>, scalar_prefetch = 0 : i64, scratch_operands = 0 : i64, tpu.core_type = #tpu.core_type<tc>, window_params = [{transform_indices = @transform_0, window_bounds = array<i64: 32, 16>}, {pipeline_mode = #tpu.pipeline_mode<synchronous>, transform_indices = @transform_1, window_bounds = array<i64: 16, 16>}, {pipeline_mode = #tpu.pipeline_mode<synchronous>, transform_indices = @transform_2, window_bounds = array<i64: 1, 16>}, {pipeline_mode = #tpu.pipeline_mode<synchronous>, transform_indices = @transform_3, window_bounds = array<i64: 16, 32>}, {pipeline_mode = #tpu.pipeline_mode<synchronous>, transform_indices = @transform_4, window_bounds = array<i64: 1, 32>}, {transform_indices = @transform_5, window_bounds = array<i64: 32, 16>}, {transform_indices = @transform_6, window_bounds = array<i64: 32, 32>}]} {
    %c0 = arith.constant 0 : index
    %c0_0 = arith.constant 0 : index
    %0 = vector.load %arg1[%c0, %c0_0] : memref<32x16xf32, #tpu.memory_space<vmem>>, vector<32x16xf32>
    %c0_1 = arith.constant 0 : index
    %c0_2 = arith.constant 0 : index
    %1 = vector.load %arg2[%c0_1, %c0_2] : memref<16x16xf32, #tpu.memory_space<vmem>>, vector<16x16xf32>
    %cst = arith.constant dense<0.000000e+00> : vector<32x16xf32>
    %2 = tpu.matmul %0, %1, %cst {dimension_numbers = #tpu.dot_dimension_numbers<[1], [0], [0], [1], [0, 0, 1, 1], [], []>} : vector<32x16xf32>, vector<16x16xf32>, vector<32x16xf32> -> vector<32x16xf32>
    %c0_3 = arith.constant 0 : index
    %c0_4 = arith.constant 0 : index
    %3 = vector.load %arg3[%c0_3, %c0_4] : memref<1x16xf32, #tpu.memory_space<vmem>>, vector<1x16xf32>
    %4 = vector.broadcast %3 : vector<1x16xf32> to vector<32x16xf32>
    %5 = arith.addf %2, %4 : vector<32x16xf32>
    %cst_5 = arith.constant 0.000000e+00 : f32
    %6 = vector.broadcast %cst_5 : f32 to vector<32x16xf32>
    %7 = arith.cmpf oge, %5, %6 : vector<32x16xf32>
    %cst_6 = arith.constant 1.000000e-01 : f32
    %8 = vector.broadcast %cst_6 : f32 to vector<32x16xf32>
    %9 = arith.mulf %8, %5 : vector<32x16xf32>
    %10 = arith.select %7, %5, %9 : vector<32x16xi1>, vector<32x16xf32>
    %c0_7 = arith.constant 0 : index
    %c0_8 = arith.constant 0 : index
    %11 = vector.load %arg6[%c0_7, %c0_8] : memref<32x16xf32, #tpu.memory_space<vmem>>, vector<32x16xf32>
    tpu.vector_store %arg6[%c0_7, %c0_8], %10 {strides = array<i32>} : memref<32x16xf32, #tpu.memory_space<vmem>>, vector<32x16xf32>,
    %c0_9 = arith.constant 0 : index
    %c0_10 = arith.constant 0 : index
    %12 = vector.load %arg4[%c0_9, %c0_10] : memref<16x32xf32, #tpu.memory_space<vmem>>, vector<16x32xf32>
    %cst_11 = arith.constant dense<0.000000e+00> : vector<32x32xf32>
    %13 = tpu.matmul %0, %12, %cst_11 {dimension_numbers = #tpu.dot_dimension_numbers<[1], [0], [0], [1], [0, 0, 1, 1], [], []>} : vector<32x16xf32>, vector<16x32xf32>, vector<32x32xf32> -> vector<32x32xf32>
    %c0_12 = arith.constant 0 : index
    %c0_13 = arith.constant 0 : index
    %14 = vector.load %arg5[%c0_12, %c0_13] : memref<1x32xf32, #tpu.memory_space<vmem>>, vector<1x32xf32>
    %15 = vector.broadcast %14 : vector<1x32xf32> to vector<32x32xf32>
    %16 = arith.addf %13, %15 : vector<32x32xf32>
    %c0_14 = arith.constant 0 : index
    %c0_15 = arith.constant 0 : index
    %17 = vector.load %arg7[%c0_14, %c0_15] : memref<32x32xf32, #tpu.memory_space<vmem>>, vector<32x32xf32>
    tpu.vector_store %arg7[%c0_14, %c0_15], %16 {strides = array<i32>} : memref<32x32xf32, #tpu.memory_space<vmem>>, vector<32x32xf32>,
    return
  }
  func.func @transform_0(%arg0: i32) -> (i32, i32) {
    %c0_i32 = arith.constant 0 : i32
    %c0_i32_0 = arith.constant 0 : i32
    return %arg0, %c0_i32 : i32, i32
  }
  func.func @transform_1(%arg0: i32) -> (i32, i32) {
    %c0_i32 = arith.constant 0 : i32
    %c0_i32_0 = arith.constant 0 : i32
    %c0_i32_1 = arith.constant 0 : i32
    return %c0_i32, %c0_i32_0 : i32, i32
  }
  func.func @transform_2(%arg0: i32) -> (i32, i32) {
    %c0_i32 = arith.constant 0 : i32
    %c0_i32_0 = arith.constant 0 : i32
    %c0_i32_1 = arith.constant 0 : i32
    return %c0_i32, %c0_i32_0 : i32, i32
  }
  func.func @transform_3(%arg0: i32) -> (i32, i32) {
    %c0_i32 = arith.constant 0 : i32
    %c0_i32_0 = arith.constant 0 : i32
    %c0_i32_1 = arith.constant 0 : i32
    return %c0_i32, %c0_i32_0 : i32, i32
  }
  func.func @transform_4(%arg0: i32) -> (i32, i32) {
    %c0_i32 = arith.constant 0 : i32
    %c0_i32_0 = arith.constant 0 : i32
    %c0_i32_1 = arith.constant 0 : i32
    return %c0_i32, %c0_i32_0 : i32, i32
  }
  func.func @transform_5(%arg0: i32) -> (i32, i32) {
    %c0_i32 = arith.constant 0 : i32
    %c0_i32_0 = arith.constant 0 : i32
    return %arg0, %c0_i32 : i32, i32
  }
  func.func @transform_6(%arg0: i32) -> (i32, i32) {
    %c0_i32 = arith.constant 0 : i32
    %c0_i32_0 = arith.constant 0 : i32
    return %arg0, %c0_i32 : i32, i32
  }
}

module attributes {stable_mosaic.version = 11 : i64} {
  func.func @_pointnet_kernel(%arg0: i32, %arg1: memref<32x4xf32, #tpu.memory_space<vmem>>, %arg2: memref<4x16xf32, #tpu.memory_space<vmem>>, %arg3: memref<1x16xf32, #tpu.memory_space<vmem>>, %arg4: memref<16x16xf32, #tpu.memory_space<vmem>>, %arg5: memref<1x16xf32, #tpu.memory_space<vmem>>, %arg6: memref<32x16xf32, #tpu.memory_space<vmem>>) attributes {dimension_semantics = [#tpu.dimension_semantics<parallel>], iteration_bounds = array<i64: 1>, scalar_prefetch = 0 : i64, scratch_operands = 0 : i64, tpu.core_type = #tpu.core_type<tc>, window_params = [{transform_indices = @transform_0, window_bounds = array<i64: 32, 4>}, {pipeline_mode = #tpu.pipeline_mode<synchronous>, transform_indices = @transform_1, window_bounds = array<i64: 4, 16>}, {pipeline_mode = #tpu.pipeline_mode<synchronous>, transform_indices = @transform_2, window_bounds = array<i64: 1, 16>}, {pipeline_mode = #tpu.pipeline_mode<synchronous>, transform_indices = @transform_3, window_bounds = array<i64: 16, 16>}, {pipeline_mode = #tpu.pipeline_mode<synchronous>, transform_indices = @transform_4, window_bounds = array<i64: 1, 16>}, {transform_indices = @transform_5, window_bounds = array<i64: 32, 16>}]} {
    %c0 = arith.constant 0 : index
    %c0_0 = arith.constant 0 : index
    %0 = vector.load %arg1[%c0, %c0_0] : memref<32x4xf32, #tpu.memory_space<vmem>>, vector<32x4xf32>
    %c0_1 = arith.constant 0 : index
    %c0_2 = arith.constant 0 : index
    %1 = vector.load %arg2[%c0_1, %c0_2] : memref<4x16xf32, #tpu.memory_space<vmem>>, vector<4x16xf32>
    %cst = arith.constant dense<0.000000e+00> : vector<32x16xf32>
    %2 = tpu.matmul %0, %1, %cst {dimension_numbers = #tpu.dot_dimension_numbers<[1], [0], [0], [1], [0, 0, 1, 1], [], []>} : vector<32x4xf32>, vector<4x16xf32>, vector<32x16xf32> -> vector<32x16xf32>
    %c0_3 = arith.constant 0 : index
    %c0_4 = arith.constant 0 : index
    %3 = vector.load %arg3[%c0_3, %c0_4] : memref<1x16xf32, #tpu.memory_space<vmem>>, vector<1x16xf32>
    %4 = vector.broadcast %3 : vector<1x16xf32> to vector<32x16xf32>
    %5 = arith.addf %2, %4 : vector<32x16xf32>
    %cst_5 = arith.constant 0.000000e+00 : f32
    %6 = vector.broadcast %cst_5 : f32 to vector<32x16xf32>
    %7 = arith.maximumf %5, %6 : vector<32x16xf32>
    %c0_6 = arith.constant 0 : index
    %c0_7 = arith.constant 0 : index
    %8 = vector.load %arg4[%c0_6, %c0_7] : memref<16x16xf32, #tpu.memory_space<vmem>>, vector<16x16xf32>
    %cst_8 = arith.constant dense<0.000000e+00> : vector<32x16xf32>
    %9 = tpu.matmul %7, %8, %cst_8 {dimension_numbers = #tpu.dot_dimension_numbers<[1], [0], [0], [1], [0, 0, 1, 1], [], []>} : vector<32x16xf32>, vector<16x16xf32>, vector<32x16xf32> -> vector<32x16xf32>
    %c0_9 = arith.constant 0 : index
    %c0_10 = arith.constant 0 : index
    %10 = vector.load %arg5[%c0_9, %c0_10] : memref<1x16xf32, #tpu.memory_space<vmem>>, vector<1x16xf32>
    %11 = vector.broadcast %10 : vector<1x16xf32> to vector<32x16xf32>
    %12 = arith.addf %9, %11 : vector<32x16xf32>
    %cst_11 = arith.constant 0.000000e+00 : f32
    %13 = vector.broadcast %cst_11 : f32 to vector<32x16xf32>
    %14 = arith.maximumf %12, %13 : vector<32x16xf32>
    %c0_12 = arith.constant 0 : index
    %c0_13 = arith.constant 0 : index
    %15 = vector.load %arg6[%c0_12, %c0_13] : memref<32x16xf32, #tpu.memory_space<vmem>>, vector<32x16xf32>
    tpu.vector_store %arg6[%c0_12, %c0_13], %14 {strides = array<i32>} : memref<32x16xf32, #tpu.memory_space<vmem>>, vector<32x16xf32>,
    return
  }
  func.func @transform_0(%arg0: i32) -> (i32, i32) {
    %c0_i32 = arith.constant 0 : i32
    %c0_i32_0 = arith.constant 0 : i32
    return %arg0, %c0_i32 : i32, i32
  }
  func.func @transform_1(%arg0: i32) -> (i32, i32) {
    %c0_i32 = arith.constant 0 : i32
    %c0_i32_0 = arith.constant 0 : i32
    %c0_i32_1 = arith.constant 0 : i32
    return %c0_i32, %c0_i32_0 : i32, i32
  }
  func.func @transform_2(%arg0: i32) -> (i32, i32) {
    %c0_i32 = arith.constant 0 : i32
    %c0_i32_0 = arith.constant 0 : i32
    %c0_i32_1 = arith.constant 0 : i32
    return %c0_i32, %c0_i32_0 : i32, i32
  }
  func.func @transform_3(%arg0: i32) -> (i32, i32) {
    %c0_i32 = arith.constant 0 : i32
    %c0_i32_0 = arith.constant 0 : i32
    %c0_i32_1 = arith.constant 0 : i32
    return %c0_i32, %c0_i32_0 : i32, i32
  }
  func.func @transform_4(%arg0: i32) -> (i32, i32) {
    %c0_i32 = arith.constant 0 : i32
    %c0_i32_0 = arith.constant 0 : i32
    %c0_i32_1 = arith.constant 0 : i32
    return %c0_i32, %c0_i32_0 : i32, i32
  }
  func.func @transform_5(%arg0: i32) -> (i32, i32) {
    %c0_i32 = arith.constant 0 : i32
    %c0_i32_0 = arith.constant 0 : i32
    return %arg0, %c0_i32 : i32, i32
  }
}

module attributes {stable_mosaic.version = 11 : i64} {
  func.func @_kpconv_block_kernel(%arg0: i32, %arg1: memref<32x8x3xf32, #tpu.memory_space<vmem>>, %arg2: memref<32x8x16xf32, #tpu.memory_space<vmem>>, %arg3: memref<32x32xf32, #tpu.memory_space<vmem>>, %arg4: memref<3x5xf32, #tpu.memory_space<vmem>>, %arg5: memref<1x5xf32, #tpu.memory_space<vmem>>, %arg6: memref<80x16xf32, #tpu.memory_space<vmem>>, %arg7: memref<16x32xf32, #tpu.memory_space<vmem>>, %arg8: memref<1x32xf32, #tpu.memory_space<vmem>>, %arg9: memref<32x32xf32, #tpu.memory_space<vmem>>) attributes {dimension_semantics = [#tpu.dimension_semantics<parallel>], iteration_bounds = array<i64: 1>, scalar_prefetch = 0 : i64, scratch_operands = 0 : i64, tpu.core_type = #tpu.core_type<tc>, window_params = [{transform_indices = @transform_0, window_bounds = array<i64: 32, 8, 3>}, {transform_indices = @transform_1, window_bounds = array<i64: 32, 8, 16>}, {transform_indices = @transform_2, window_bounds = array<i64: 32, 32>}, {pipeline_mode = #tpu.pipeline_mode<synchronous>, transform_indices = @transform_3, window_bounds = array<i64: 3, 5>}, {pipeline_mode = #tpu.pipeline_mode<synchronous>, transform_indices = @transform_4, window_bounds = array<i64: 1, 5>}, {pipeline_mode = #tpu.pipeline_mode<synchronous>, transform_indices = @transform_5, window_bounds = array<i64: 80, 16>}, {pipeline_mode = #tpu.pipeline_mode<synchronous>, transform_indices = @transform_6, window_bounds = array<i64: 16, 32>}, {pipeline_mode = #tpu.pipeline_mode<synchronous>, transform_indices = @transform_7, window_bounds = array<i64: 1, 32>}, {transform_indices = @transform_8, window_bounds = array<i64: 32, 32>}]} {
    %c0 = arith.constant 0 : index
    %c0_0 = arith.constant 0 : index
    %c0_1 = arith.constant 0 : index
    %0 = vector.load %arg1[%c0, %c0_0, %c0_1] : memref<32x8x3xf32, #tpu.memory_space<vmem>>, vector<32x8x3xf32>
    %c0_2 = arith.constant 0 : index
    %c0_3 = arith.constant 0 : index
    %c0_4 = arith.constant 0 : index
    %1 = vector.load %arg2[%c0_2, %c0_3, %c0_4] : memref<32x8x16xf32, #tpu.memory_space<vmem>>, vector<32x8x16xf32>
    %2 = arith.mulf %0, %0 : vector<32x8x3xf32>
    %cst = arith.constant dense<0.000000e+00> : vector<32x8xf32>
    %3 = vector.multi_reduction <add>, %2, %cst [2] : vector<32x8x3xf32> to vector<32x8xf32>
    %4 = vector.shape_cast %3 : vector<32x8xf32> to vector<32x8x1xf32>
    %5 = vector.extract_strided_slice %0 {offsets = [0, 0, 0], sizes = [32, 8, 1], strides = [1, 1, 1]} : vector<32x8x3xf32> to vector<32x8x1xf32>
    %c0_5 = arith.constant 0 : index
    %c0_6 = arith.constant 0 : index
    %6 = vector.load %arg4[%c0_5, %c0_6] : memref<3x5xf32, #tpu.memory_space<vmem>>, vector<1x5xf32>
    %7 = vector.shape_cast %6 : vector<1x5xf32> to vector<1x1x5xf32>
    %8 = vector.broadcast %5 : vector<32x8x1xf32> to vector<32x8x5xf32>
    %9 = vector.broadcast %7 : vector<1x1x5xf32> to vector<32x8x5xf32>
    %10 = arith.mulf %8, %9 : vector<32x8x5xf32>
    %11 = vector.extract_strided_slice %0 {offsets = [0, 0, 1], sizes = [32, 8, 1], strides = [1, 1, 1]} : vector<32x8x3xf32> to vector<32x8x1xf32>
    %c1 = arith.constant 1 : index
    %c0_7 = arith.constant 0 : index
    %12 = vector.load %arg4[%c1, %c0_7] : memref<3x5xf32, #tpu.memory_space<vmem>>, vector<1x5xf32>
    %13 = vector.shape_cast %12 : vector<1x5xf32> to vector<1x1x5xf32>
    %14 = vector.broadcast %11 : vector<32x8x1xf32> to vector<32x8x5xf32>
    %15 = vector.broadcast %13 : vector<1x1x5xf32> to vector<32x8x5xf32>
    %16 = arith.mulf %14, %15 : vector<32x8x5xf32>
    %17 = arith.addf %10, %16 : vector<32x8x5xf32>
    %18 = vector.extract_strided_slice %0 {offsets = [0, 0, 2], sizes = [32, 8, 1], strides = [1, 1, 1]} : vector<32x8x3xf32> to vector<32x8x1xf32>
    %c2 = arith.constant 2 : index
    %c0_8 = arith.constant 0 : index
    %19 = vector.load %arg4[%c2, %c0_8] : memref<3x5xf32, #tpu.memory_space<vmem>>, vector<1x5xf32>
    %20 = vector.shape_cast %19 : vector<1x5xf32> to vector<1x1x5xf32>
    %21 = vector.broadcast %18 : vector<32x8x1xf32> to vector<32x8x5xf32>
    %22 = vector.broadcast %20 : vector<1x1x5xf32> to vector<32x8x5xf32>
    %23 = arith.mulf %21, %22 : vector<32x8x5xf32>
    %24 = arith.addf %17, %23 : vector<32x8x5xf32>
    %c0_9 = arith.constant 0 : index
    %c0_10 = arith.constant 0 : index
    %25 = vector.load %arg5[%c0_9, %c0_10] : memref<1x5xf32, #tpu.memory_space<vmem>>, vector<1x5xf32>
    %26 = vector.shape_cast %25 : vector<1x5xf32> to vector<1x1x5xf32>
    %27 = vector.broadcast %4 : vector<32x8x1xf32> to vector<32x8x5xf32>
    %28 = vector.broadcast %26 : vector<1x1x5xf32> to vector<32x8x5xf32>
    %29 = arith.addf %27, %28 : vector<32x8x5xf32>
    %cst_11 = arith.constant 2.000000e+00 : f32
    %30 = vector.broadcast %cst_11 : f32 to vector<32x8x5xf32>
    %31 = arith.mulf %30, %24 : vector<32x8x5xf32>
    %32 = arith.subf %29, %31 : vector<32x8x5xf32>
    %cst_12 = arith.constant 0.000000e+00 : f32
    %33 = vector.broadcast %cst_12 : f32 to vector<32x8x5xf32>
    %34 = arith.maximumf %32, %33 : vector<32x8x5xf32>
    %35 = math.sqrt %34 : vector<32x8x5xf32>
    %cst_13 = arith.constant 1.200000e+00 : f32
    %36 = vector.broadcast %cst_13 : f32 to vector<32x8x5xf32>
    %37 = arith.divf %35, %36 : vector<32x8x5xf32>
    %cst_14 = arith.constant 1.000000e+00 : f32
    %38 = vector.broadcast %cst_14 : f32 to vector<32x8x5xf32>
    %39 = arith.subf %38, %37 : vector<32x8x5xf32>
    %cst_15 = arith.constant 0.000000e+00 : f32
    %40 = vector.broadcast %cst_15 : f32 to vector<32x8x5xf32>
    %41 = arith.maximumf %39, %40 : vector<32x8x5xf32>
    %42 = vector.extract_strided_slice %41 {offsets = [0, 0, 0], sizes = [32, 8, 1], strides = [1, 1, 1]} : vector<32x8x5xf32> to vector<32x8x1xf32>
    %43 = vector.broadcast %42 : vector<32x8x1xf32> to vector<32x8x16xf32>
    %44 = arith.mulf %43, %1 : vector<32x8x16xf32>
    %cst_16 = arith.constant dense<0.000000e+00> : vector<32x16xf32>
    %45 = vector.multi_reduction <add>, %44, %cst_16 [1] : vector<32x8x16xf32> to vector<32x16xf32>
    %46 = vector.extract_strided_slice %41 {offsets = [0, 0, 1], sizes = [32, 8, 1], strides = [1, 1, 1]} : vector<32x8x5xf32> to vector<32x8x1xf32>
    %47 = vector.broadcast %46 : vector<32x8x1xf32> to vector<32x8x16xf32>
    %48 = arith.mulf %47, %1 : vector<32x8x16xf32>
    %cst_17 = arith.constant dense<0.000000e+00> : vector<32x16xf32>
    %49 = vector.multi_reduction <add>, %48, %cst_17 [1] : vector<32x8x16xf32> to vector<32x16xf32>
    %50 = vector.extract_strided_slice %41 {offsets = [0, 0, 2], sizes = [32, 8, 1], strides = [1, 1, 1]} : vector<32x8x5xf32> to vector<32x8x1xf32>
    %51 = vector.broadcast %50 : vector<32x8x1xf32> to vector<32x8x16xf32>
    %52 = arith.mulf %51, %1 : vector<32x8x16xf32>
    %cst_18 = arith.constant dense<0.000000e+00> : vector<32x16xf32>
    %53 = vector.multi_reduction <add>, %52, %cst_18 [1] : vector<32x8x16xf32> to vector<32x16xf32>
    %54 = vector.extract_strided_slice %41 {offsets = [0, 0, 3], sizes = [32, 8, 1], strides = [1, 1, 1]} : vector<32x8x5xf32> to vector<32x8x1xf32>
    %55 = vector.broadcast %54 : vector<32x8x1xf32> to vector<32x8x16xf32>
    %56 = arith.mulf %55, %1 : vector<32x8x16xf32>
    %cst_19 = arith.constant dense<0.000000e+00> : vector<32x16xf32>
    %57 = vector.multi_reduction <add>, %56, %cst_19 [1] : vector<32x8x16xf32> to vector<32x16xf32>
    %58 = vector.extract_strided_slice %41 {offsets = [0, 0, 4], sizes = [32, 8, 1], strides = [1, 1, 1]} : vector<32x8x5xf32> to vector<32x8x1xf32>
    %59 = vector.broadcast %58 : vector<32x8x1xf32> to vector<32x8x16xf32>
    %60 = arith.mulf %59, %1 : vector<32x8x16xf32>
    %cst_20 = arith.constant dense<0.000000e+00> : vector<32x16xf32>
    %61 = vector.multi_reduction <add>, %60, %cst_20 [1] : vector<32x8x16xf32> to vector<32x16xf32>
    %62 = tpu.concatenate %45, %49, %53, %57, %61 in 1 : vector<32x16xf32>, vector<32x16xf32>, vector<32x16xf32>, vector<32x16xf32>, vector<32x16xf32> -> vector<32x80xf32>
    %c0_21 = arith.constant 0 : index
    %c0_22 = arith.constant 0 : index
    %63 = vector.load %arg6[%c0_21, %c0_22] : memref<80x16xf32, #tpu.memory_space<vmem>>, vector<80x16xf32>
    %cst_23 = arith.constant dense<0.000000e+00> : vector<32x16xf32>
    %64 = tpu.matmul %62, %63, %cst_23 {dimension_numbers = #tpu.dot_dimension_numbers<[1], [0], [0], [1], [0, 0, 1, 1], [], []>} : vector<32x80xf32>, vector<80x16xf32>, vector<32x16xf32> -> vector<32x16xf32>
    %cst_24 = arith.constant 0.000000e+00 : f32
    %65 = vector.broadcast %cst_24 : f32 to vector<32x16xf32>
    %66 = arith.cmpf oge, %64, %65 : vector<32x16xf32>
    %cst_25 = arith.constant 1.000000e-01 : f32
    %67 = vector.broadcast %cst_25 : f32 to vector<32x16xf32>
    %68 = arith.mulf %67, %64 : vector<32x16xf32>
    %69 = arith.select %66, %64, %68 : vector<32x16xi1>, vector<32x16xf32>
    %c0_26 = arith.constant 0 : index
    %c0_27 = arith.constant 0 : index
    %70 = vector.load %arg7[%c0_26, %c0_27] : memref<16x32xf32, #tpu.memory_space<vmem>>, vector<16x32xf32>
    %cst_28 = arith.constant dense<0.000000e+00> : vector<32x32xf32>
    %71 = tpu.matmul %69, %70, %cst_28 {dimension_numbers = #tpu.dot_dimension_numbers<[1], [0], [0], [1], [0, 0, 1, 1], [], []>} : vector<32x16xf32>, vector<16x32xf32>, vector<32x32xf32> -> vector<32x32xf32>
    %c0_29 = arith.constant 0 : index
    %c0_30 = arith.constant 0 : index
    %72 = vector.load %arg8[%c0_29, %c0_30] : memref<1x32xf32, #tpu.memory_space<vmem>>, vector<1x32xf32>
    %73 = vector.broadcast %72 : vector<1x32xf32> to vector<32x32xf32>
    %74 = arith.addf %71, %73 : vector<32x32xf32>
    %c0_31 = arith.constant 0 : index
    %c0_32 = arith.constant 0 : index
    %75 = vector.load %arg3[%c0_31, %c0_32] : memref<32x32xf32, #tpu.memory_space<vmem>>, vector<32x32xf32>
    %76 = arith.addf %74, %75 : vector<32x32xf32>
    %cst_33 = arith.constant 0.000000e+00 : f32
    %77 = vector.broadcast %cst_33 : f32 to vector<32x32xf32>
    %78 = arith.cmpf oge, %76, %77 : vector<32x32xf32>
    %cst_34 = arith.constant 1.000000e-01 : f32
    %79 = vector.broadcast %cst_34 : f32 to vector<32x32xf32>
    %80 = arith.mulf %79, %76 : vector<32x32xf32>
    %81 = arith.select %78, %76, %80 : vector<32x32xi1>, vector<32x32xf32>
    %c0_35 = arith.constant 0 : index
    %c0_36 = arith.constant 0 : index
    %82 = vector.load %arg9[%c0_35, %c0_36] : memref<32x32xf32, #tpu.memory_space<vmem>>, vector<32x32xf32>
    tpu.vector_store %arg9[%c0_35, %c0_36], %81 {strides = array<i32>} : memref<32x32xf32, #tpu.memory_space<vmem>>, vector<32x32xf32>,
    return
  }
  func.func @transform_0(%arg0: i32) -> (i32, i32, i32) {
    %c0_i32 = arith.constant 0 : i32
    %c0_i32_0 = arith.constant 0 : i32
    %c0_i32_1 = arith.constant 0 : i32
    return %arg0, %c0_i32, %c0_i32_0 : i32, i32, i32
  }
  func.func @transform_1(%arg0: i32) -> (i32, i32, i32) {
    %c0_i32 = arith.constant 0 : i32
    %c0_i32_0 = arith.constant 0 : i32
    %c0_i32_1 = arith.constant 0 : i32
    return %arg0, %c0_i32, %c0_i32_0 : i32, i32, i32
  }
  func.func @transform_2(%arg0: i32) -> (i32, i32) {
    %c0_i32 = arith.constant 0 : i32
    %c0_i32_0 = arith.constant 0 : i32
    return %arg0, %c0_i32 : i32, i32
  }
  func.func @transform_3(%arg0: i32) -> (i32, i32) {
    %c0_i32 = arith.constant 0 : i32
    %c0_i32_0 = arith.constant 0 : i32
    %c0_i32_1 = arith.constant 0 : i32
    return %c0_i32, %c0_i32_0 : i32, i32
  }
  func.func @transform_4(%arg0: i32) -> (i32, i32) {
    %c0_i32 = arith.constant 0 : i32
    %c0_i32_0 = arith.constant 0 : i32
    %c0_i32_1 = arith.constant 0 : i32
    return %c0_i32, %c0_i32_0 : i32, i32
  }
  func.func @transform_5(%arg0: i32) -> (i32, i32) {
    %c0_i32 = arith.constant 0 : i32
    %c0_i32_0 = arith.constant 0 : i32
    %c0_i32_1 = arith.constant 0 : i32
    return %c0_i32, %c0_i32_0 : i32, i32
  }
  func.func @transform_6(%arg0: i32) -> (i32, i32) {
    %c0_i32 = arith.constant 0 : i32
    %c0_i32_0 = arith.constant 0 : i32
    %c0_i32_1 = arith.constant 0 : i32
    return %c0_i32, %c0_i32_0 : i32, i32
  }
  func.func @transform_7(%arg0: i32) -> (i32, i32) {
    %c0_i32 = arith.constant 0 : i32
    %c0_i32_0 = arith.constant 0 : i32
    %c0_i32_1 = arith.constant 0 : i32
    return %c0_i32, %c0_i32_0 : i32, i32
  }
  func.func @transform_8(%arg0: i32) -> (i32, i32) {
    %c0_i32 = arith.constant 0 : i32
    %c0_i32_0 = arith.constant 0 : i32
    return %arg0, %c0_i32 : i32, i32
  }
}

module attributes {stable_mosaic.version = 11 : i64} {
  func.func @_unary_kernel(%arg0: i32, %arg1: memref<32x32xf32, #tpu.memory_space<vmem>>, %arg2: memref<32x16xf32, #tpu.memory_space<vmem>>, %arg3: memref<1x16xf32, #tpu.memory_space<vmem>>, %arg4: memref<32x16xf32, #tpu.memory_space<vmem>>) attributes {dimension_semantics = [#tpu.dimension_semantics<parallel>], iteration_bounds = array<i64: 1>, scalar_prefetch = 0 : i64, scratch_operands = 0 : i64, tpu.core_type = #tpu.core_type<tc>, window_params = [{transform_indices = @transform_0, window_bounds = array<i64: 32, 32>}, {pipeline_mode = #tpu.pipeline_mode<synchronous>, transform_indices = @transform_1, window_bounds = array<i64: 32, 16>}, {pipeline_mode = #tpu.pipeline_mode<synchronous>, transform_indices = @transform_2, window_bounds = array<i64: 1, 16>}, {transform_indices = @transform_3, window_bounds = array<i64: 32, 16>}]} {
    %c0 = arith.constant 0 : index
    %c0_0 = arith.constant 0 : index
    %0 = vector.load %arg1[%c0, %c0_0] : memref<32x32xf32, #tpu.memory_space<vmem>>, vector<32x32xf32>
    %c0_1 = arith.constant 0 : index
    %c0_2 = arith.constant 0 : index
    %1 = vector.load %arg2[%c0_1, %c0_2] : memref<32x16xf32, #tpu.memory_space<vmem>>, vector<32x16xf32>
    %cst = arith.constant dense<0.000000e+00> : vector<32x16xf32>
    %2 = tpu.matmul %0, %1, %cst {dimension_numbers = #tpu.dot_dimension_numbers<[1], [0], [0], [1], [0, 0, 1, 1], [], []>} : vector<32x32xf32>, vector<32x16xf32>, vector<32x16xf32> -> vector<32x16xf32>
    %c0_3 = arith.constant 0 : index
    %c0_4 = arith.constant 0 : index
    %3 = vector.load %arg3[%c0_3, %c0_4] : memref<1x16xf32, #tpu.memory_space<vmem>>, vector<1x16xf32>
    %4 = vector.broadcast %3 : vector<1x16xf32> to vector<32x16xf32>
    %5 = arith.addf %2, %4 : vector<32x16xf32>
    %cst_5 = arith.constant 0.000000e+00 : f32
    %6 = vector.broadcast %cst_5 : f32 to vector<32x16xf32>
    %7 = arith.cmpf oge, %5, %6 : vector<32x16xf32>
    %cst_6 = arith.constant 1.000000e-01 : f32
    %8 = vector.broadcast %cst_6 : f32 to vector<32x16xf32>
    %9 = arith.mulf %8, %5 : vector<32x16xf32>
    %10 = arith.select %7, %5, %9 : vector<32x16xi1>, vector<32x16xf32>
    %c0_7 = arith.constant 0 : index
    %c0_8 = arith.constant 0 : index
    %11 = vector.load %arg4[%c0_7, %c0_8] : memref<32x16xf32, #tpu.memory_space<vmem>>, vector<32x16xf32>
    tpu.vector_store %arg4[%c0_7, %c0_8], %10 {strides = array<i32>} : memref<32x16xf32, #tpu.memory_space<vmem>>, vector<32x16xf32>,
    return
  }
  func.func @transform_0(%arg0: i32) -> (i32, i32) {
    %c0_i32 = arith.constant 0 : i32
    %c0_i32_0 = arith.constant 0 : i32
    return %arg0, %c0_i32 : i32, i32
  }
  func.func @transform_1(%arg0: i32) -> (i32, i32) {
    %c0_i32 = arith.constant 0 : i32
    %c0_i32_0 = arith.constant 0 : i32
    %c0_i32_1 = arith.constant 0 : i32
    return %c0_i32, %c0_i32_0 : i32, i32
  }
  func.func @transform_2(%arg0: i32) -> (i32, i32) {
    %c0_i32 = arith.constant 0 : i32
    %c0_i32_0 = arith.constant 0 : i32
    %c0_i32_1 = arith.constant 0 : i32
    return %c0_i32, %c0_i32_0 : i32, i32
  }
  func.func @transform_3(%arg0: i32) -> (i32, i32) {
    %c0_i32 = arith.constant 0 : i32
    %c0_i32_0 = arith.constant 0 : i32
    return %arg0, %c0_i32 : i32, i32
  }
}

module attributes {stable_mosaic.version = 11 : i64} {
  func.func @_vlad_kernel(%arg0: i32, %arg1: memref<1x16x32xf32, #tpu.memory_space<vmem>>, %arg2: memref<1x16x1xf32, #tpu.memory_space<vmem>>, %arg3: memref<32x8xf32, #tpu.memory_space<vmem>>, %arg4: memref<1x8xf32, #tpu.memory_space<vmem>>, %arg5: memref<8x32xf32, #tpu.memory_space<vmem>>, %arg6: memref<256x64xf32, #tpu.memory_space<vmem>>, %arg7: memref<1x1x64xf32, #tpu.memory_space<vmem>>) attributes {dimension_semantics = [#tpu.dimension_semantics<parallel>], iteration_bounds = array<i64: 2>, scalar_prefetch = 0 : i64, scratch_operands = 0 : i64, tpu.core_type = #tpu.core_type<tc>, window_params = [{transform_indices = @transform_0, window_bounds = array<i64: 1, 16, 32>}, {transform_indices = @transform_1, window_bounds = array<i64: 1, 16, 1>}, {pipeline_mode = #tpu.pipeline_mode<synchronous>, transform_indices = @transform_2, window_bounds = array<i64: 32, 8>}, {pipeline_mode = #tpu.pipeline_mode<synchronous>, transform_indices = @transform_3, window_bounds = array<i64: 1, 8>}, {pipeline_mode = #tpu.pipeline_mode<synchronous>, transform_indices = @transform_4, window_bounds = array<i64: 8, 32>}, {pipeline_mode = #tpu.pipeline_mode<synchronous>, transform_indices = @transform_5, window_bounds = array<i64: 256, 64>}, {transform_indices = @transform_6, window_bounds = array<i64: 1, 1, 64>}]} {
    %c0 = arith.constant 0 : index
    %c0_0 = arith.constant 0 : index
    %c0_1 = arith.constant 0 : index
    %0 = vector.load %arg1[%c0, %c0_0, %c0_1] : memref<1x16x32xf32, #tpu.memory_space<vmem>>, vector<1x16x32xf32>
    %1 = vector.shape_cast %0 : vector<1x16x32xf32> to vector<16x32xf32>
    %c0_2 = arith.constant 0 : index
    %c0_3 = arith.constant 0 : index
    %c0_4 = arith.constant 0 : index
    %2 = vector.load %arg2[%c0_2, %c0_3, %c0_4] : memref<1x16x1xf32, #tpu.memory_space<vmem>>, vector<1x16x1xf32>
    %3 = vector.shape_cast %2 : vector<1x16x1xf32> to vector<16x1xf32>
    %c0_5 = arith.constant 0 : index
    %c0_6 = arith.constant 0 : index
    %4 = vector.load %arg3[%c0_5, %c0_6] : memref<32x8xf32, #tpu.memory_space<vmem>>, vector<32x8xf32>
    %cst = arith.constant dense<0.000000e+00> : vector<16x8xf32>
    %5 = tpu.matmul %1, %4, %cst {dimension_numbers = #tpu.dot_dimension_numbers<[1], [0], [0], [1], [0, 0, 1, 1], [], []>} : vector<16x32xf32>, vector<32x8xf32>, vector<16x8xf32> -> vector<16x8xf32>
    %c0_7 = arith.constant 0 : index
    %c0_8 = arith.constant 0 : index
    %6 = vector.load %arg4[%c0_7, %c0_8] : memref<1x8xf32, #tpu.memory_space<vmem>>, vector<1x8xf32>
    %7 = vector.broadcast %6 : vector<1x8xf32> to vector<16x8xf32>
    %8 = arith.addf %5, %7 : vector<16x8xf32>
    %cst_9 = arith.constant dense<0xFF800000> : vector<16xf32>
    %9 = vector.multi_reduction <maximumf>, %8, %cst_9 [1] : vector<16x8xf32> to vector<16xf32>
    %10 = vector.shape_cast %9 : vector<16xf32> to vector<16x1xf32>
    %11 = vector.broadcast %10 : vector<16x1xf32> to vector<16x8xf32>
    %12 = arith.subf %8, %11 : vector<16x8xf32>
    %13 = math.exp %12 : vector<16x8xf32>
    %cst_10 = arith.constant dense<0.000000e+00> : vector<16xf32>
    %14 = vector.multi_reduction <add>, %13, %cst_10 [1] : vector<16x8xf32> to vector<16xf32>
    %15 = vector.shape_cast %14 : vector<16xf32> to vector<16x1xf32>
    %16 = tpu.reciprocal %15 {approx = true} : vector<16x1xf32> -> vector<16x1xf32>
    %17 = vector.broadcast %16 : vector<16x1xf32> to vector<16x8xf32>
    %18 = arith.mulf %13, %17 : vector<16x8xf32>
    %19 = vector.broadcast %3 : vector<16x1xf32> to vector<16x8xf32>
    %20 = arith.mulf %18, %19 : vector<16x8xf32>
    %cst_11 = arith.constant dense<0.000000e+00> : vector<8x32xf32>
    %21 = tpu.matmul %20, %1, %cst_11 {dimension_numbers = #tpu.dot_dimension_numbers<[0], [0], [1], [1], [0, 1, 1, 1], [], []>} : vector<16x8xf32>, vector<16x32xf32>, vector<8x32xf32> -> vector<8x32xf32>
    %cst_12 = arith.constant 1.000000e+00 : f32
    %22 = vector.broadcast %cst_12 : f32 to vector<16x1xf32>
    %cst_13 = arith.constant dense<0.000000e+00> : vector<8x1xf32>
    %23 = tpu.matmul %20, %22, %cst_13 {dimension_numbers = #tpu.dot_dimension_numbers<[0], [0], [1], [1], [0, 1, 1, 1], [], []>} : vector<16x8xf32>, vector<16x1xf32>, vector<8x1xf32> -> vector<8x1xf32>
    %c0_14 = arith.constant 0 : index
    %c0_15 = arith.constant 0 : index
    %24 = vector.load %arg5[%c0_14, %c0_15] : memref<8x32xf32, #tpu.memory_space<vmem>>, vector<8x32xf32>
    %25 = vector.broadcast %23 : vector<8x1xf32> to vector<8x32xf32>
    %26 = arith.mulf %25, %24 : vector<8x32xf32>
    %27 = arith.subf %21, %26 : vector<8x32xf32>
    %28 = arith.mulf %27, %27 : vector<8x32xf32>
    %cst_16 = arith.constant dense<0.000000e+00> : vector<8xf32>
    %29 = vector.multi_reduction <add>, %28, %cst_16 [1] : vector<8x32xf32> to vector<8xf32>
    %30 = vector.shape_cast %29 : vector<8xf32> to vector<8x1xf32>
    %cst_17 = arith.constant 9.99999996E-13 : f32
    %31 = vector.broadcast %cst_17 : f32 to vector<8x1xf32>
    %32 = arith.addf %30, %31 : vector<8x1xf32>
    %33 = math.rsqrt %32 : vector<8x1xf32>
    %34 = vector.broadcast %33 : vector<8x1xf32> to vector<8x32xf32>
    %35 = arith.mulf %27, %34 : vector<8x32xf32>
    %36 = vector.extract_strided_slice %35 {offsets = [0, 0], sizes = [1, 32], strides = [1, 1]} : vector<8x32xf32> to vector<1x32xf32>
    %37 = vector.extract_strided_slice %35 {offsets = [1, 0], sizes = [1, 32], strides = [1, 1]} : vector<8x32xf32> to vector<1x32xf32>
    %38 = vector.extract_strided_slice %35 {offsets = [2, 0], sizes = [1, 32], strides = [1, 1]} : vector<8x32xf32> to vector<1x32xf32>
    %39 = vector.extract_strided_slice %35 {offsets = [3, 0], sizes = [1, 32], strides = [1, 1]} : vector<8x32xf32> to vector<1x32xf32>
    %40 = vector.extract_strided_slice %35 {offsets = [4, 0], sizes = [1, 32], strides = [1, 1]} : vector<8x32xf32> to vector<1x32xf32>
    %41 = vector.extract_strided_slice %35 {offsets = [5, 0], sizes = [1, 32], strides = [1, 1]} : vector<8x32xf32> to vector<1x32xf32>
    %42 = vector.extract_strided_slice %35 {offsets = [6, 0], sizes = [1, 32], strides = [1, 1]} : vector<8x32xf32> to vector<1x32xf32>
    %43 = vector.extract_strided_slice %35 {offsets = [7, 0], sizes = [1, 32], strides = [1, 1]} : vector<8x32xf32> to vector<1x32xf32>
    %44 = tpu.concatenate %36, %37, %38, %39, %40, %41, %42, %43 in 1 : vector<1x32xf32>, vector<1x32xf32>, vector<1x32xf32>, vector<1x32xf32>, vector<1x32xf32>, vector<1x32xf32>, vector<1x32xf32>, vector<1x32xf32> -> vector<1x256xf32>
    %c0_18 = arith.constant 0 : index
    %c0_19 = arith.constant 0 : index
    %45 = vector.load %arg6[%c0_18, %c0_19] : memref<256x64xf32, #tpu.memory_space<vmem>>, vector<256x64xf32>
    %cst_20 = arith.constant dense<0.000000e+00> : vector<1x64xf32>
    %46 = tpu.matmul %44, %45, %cst_20 {dimension_numbers = #tpu.dot_dimension_numbers<[1], [0], [0], [1], [0, 0, 1, 1], [], []>} : vector<1x256xf32>, vector<256x64xf32>, vector<1x64xf32> -> vector<1x64xf32>
    %47 = arith.mulf %46, %46 : vector<1x64xf32>
    %cst_21 = arith.constant dense<0.000000e+00> : vector<1xf32>
    %48 = vector.multi_reduction <add>, %47, %cst_21 [1] : vector<1x64xf32> to vector<1xf32>
    %49 = vector.shape_cast %48 : vector<1xf32> to vector<1x1xf32>
    %cst_22 = arith.constant 9.99999996E-13 : f32
    %50 = vector.broadcast %cst_22 : f32 to vector<1x1xf32>
    %51 = arith.addf %49, %50 : vector<1x1xf32>
    %52 = math.rsqrt %51 : vector<1x1xf32>
    %53 = vector.broadcast %52 : vector<1x1xf32> to vector<1x64xf32>
    %54 = arith.mulf %46, %53 : vector<1x64xf32>
    %c0_23 = arith.constant 0 : index
    %c0_24 = arith.constant 0 : index
    %c0_25 = arith.constant 0 : index
    %55 = vector.load %arg7[%c0_23, %c0_24, %c0_25] : memref<1x1x64xf32, #tpu.memory_space<vmem>>, vector<1x1x64xf32>
    %56 = vector.shape_cast %55 : vector<1x1x64xf32> to vector<1x64xf32>
    %57 = vector.shape_cast %54 : vector<1x64xf32> to vector<1x1x64xf32>
    tpu.vector_store %arg7[%c0_23, %c0_24, %c0_25], %57 {strides = array<i32>} : memref<1x1x64xf32, #tpu.memory_space<vmem>>, vector<1x1x64xf32>,
    return
  }
  func.func @transform_0(%arg0: i32) -> (i32, i32, i32) {
    %c0_i32 = arith.constant 0 : i32
    %c0_i32_0 = arith.constant 0 : i32
    %c0_i32_1 = arith.constant 0 : i32
    return %arg0, %c0_i32, %c0_i32_0 : i32, i32, i32
  }
  func.func @transform_1(%arg0: i32) -> (i32, i32, i32) {
    %c0_i32 = arith.constant 0 : i32
    %c0_i32_0 = arith.constant 0 : i32
    %c0_i32_1 = arith.constant 0 : i32
    return %arg0, %c0_i32, %c0_i32_0 : i32, i32, i32
  }
  func.func @transform_2(%arg0: i32) -> (i32, i32) {
    %c0_i32 = arith.constant 0 : i32
    %c0_i32_0 = arith.constant 0 : i32
    %c0_i32_1 = arith.constant 0 : i32
    return %c0_i32, %c0_i32_0 : i32, i32
  }
  func.func @transform_3(%arg0: i32) -> (i32, i32) {
    %c0_i32 = arith.constant 0 : i32
    %c0_i32_0 = arith.constant 0 : i32
    %c0_i32_1 = arith.constant 0 : i32
    return %c0_i32, %c0_i32_0 : i32, i32
  }
  func.func @transform_4(%arg0: i32) -> (i32, i32) {
    %c0_i32 = arith.constant 0 : i32
    %c0_i32_0 = arith.constant 0 : i32
    %c0_i32_1 = arith.constant 0 : i32
    return %c0_i32, %c0_i32_0 : i32, i32
  }
  func.func @transform_5(%arg0: i32) -> (i32, i32) {
    %c0_i32 = arith.constant 0 : i32
    %c0_i32_0 = arith.constant 0 : i32
    %c0_i32_1 = arith.constant 0 : i32
    return %c0_i32, %c0_i32_0 : i32, i32
  }
  func.func @transform_6(%arg0: i32) -> (i32, i32, i32) {
    %c0_i32 = arith.constant 0 : i32
    %c0_i32_0 = arith.constant 0 : i32
    %c0_i32_1 = arith.constant 0 : i32
    return %arg0, %c0_i32, %c0_i32_0 : i32, i32, i32
  }
}

</mosaic_0001>

<bundles_post_ra>
// kernel: neg.1
= control target key start
LH: loop header
LB: loop body
LE: loop exit
PB: predicated region body
PF: predicated region fallthrough
CT: control target
= control target key end

     0   :  { %s72_s0 = inlined_call_operand.vmem [shape: f32[2,16,16], index: 0, kind: input, shape index: {}]   ;;  %s73_s1 = inlined_call_operand.vmem [shape: f32[2,16,16], index: 1, kind: output, shape index: {}]  }
   0x1   :  { %v2_v0 = vld [vmem:[%s72_s0] sm:$0xff]  ;;  %v32_v1 = vld [vmem:[%s72_s0 + $0x10] sm:$0xff]  ;;  %v34_v2 = vld [vmem:[%s72_s0 + $0x8] sm:$0xff] }
   0x2   :  { %v5_v3 = vxor.u32 2147483648, %v2_v0  ;;  %v12_v4 = vxor.u32 2147483648, %v32_v1  ;;  %v20_v5 = vxor.u32 2147483648, %v34_v2  ;;  %v36_v6 = vld [vmem:[%s72_s0 + $0x18] sm:$0xff] }
   0x3   :  { %v28_v7 = vxor.u32 2147483648, %v36_v6 }
   0x4   :  { %7 = vst [vmem:[%s73_s1] sm:$0xff] %v5_v3  ;;  %33 = vst [vmem:[%s73_s1 + $0x10] sm:$0xff] %v12_v4 }
   0x5   :  { %35 = vst [vmem:[%s73_s1 + $0x8] sm:$0xff] %v20_v5  ;;  %37 = vst [vmem:[%s73_s1 + $0x18] sm:$0xff] %v28_v7 }

// kernel: kppr_forward.8
= control target key start
LH: loop header
LB: loop body
LE: loop exit
PB: predicated region body
PF: predicated region fallthrough
CT: control target
= control target key end

     0   :  { %s502_s9 = smov 0   ;;  %s504_s10 = smov 0   ;;  %s546_s0 = inlined_call_operand.vmem [shape: f32[2,16,3], index: 0, kind: input, shape index: {}]   ;;  %s547_s1 = inlined_call_operand.vmem [shape: f32[2,3,16], index: 1, kind: input, shape index: {}]   ;;  %s548_s2 = inlined_call_operand.vmem [shape: f32[2,16,16], index: 2, kind: output, shape index: {}]  }
   0x1   :  { %s506_s11 = smov 0  }
   0x2 LB: > { %s24_s12 = sadd.s32 1, %s481_s10  ;;  %p418_p0 = scmp.ge.s32.totalorder %s485_s11, 1  ;;  %s485_s11 = sphi %s506_s11, %s12_s11   ;;  %s481_s10 = sphi %s504_s10, %s550_s10   ;;  %s477_s9 = sphi %s502_s9, %s549_s9  }
   0x3   : > { %p26_p1 = scmp.ge.s32.totalorder %s24_s12, 2  ;;  %p142_p2 = scmp.lt.s32.totalorder %s485_s11, 3 }
   0x5   : > { %s552_s12 = smov (%p26_p1, %s24_s12), 0  ;;  %p143_p3 = pnand %p418_p0, %p142_p2 }
   0x6   : > { %p177_p4 = scmp.lt.s32.totalorder (!%p143_p3), %s477_s9, 1  ;;  %vm229_vm0 = vcmask (!%p143_p3), 1042432   ;;  %vm205_vm1 = vcmask (!%p143_p3), 23552   ;;  %vm213_vm2 = vcmask (!%p143_p3), 124928   ;;  %vm312_vm3 = vcmask (!%p143_p3), 130048  }
   0x7   : > { %146 = sbr.rel (%p143_p3) target bundleno = 238 (0xee), region = 28 }
   0xe   : > { %s554_s9 = smov (!%p177_p4, %s477_s9), 1 }
   0xf   : > { %s421_s13 = sshll.u32 %s554_s9, 2  ;;  %s429_s14 = sshll.u32 %s554_s9, 4 }
  0x10   : > { %s189_s17 = scalar_lea.vmem %s547_s1, %s421_s13  ;;  %s184_s20 = scalar_lea.vmem %s546_s0, %s429_s14 }
  0x11   : > { %v202_v0 = vld [vmem:[%s189_s17] sm:$0x7]  ;;  %v201_v2 = vld [vmem:[%s184_s20 + $0x8] sm:$0xff]  ;;  %s198_s23 = scalar_lea.vmem %s548_s2, %s429_s14 }
  0x12   : > { %v200_v1 = vld [vmem:[%s184_s20] sm:$0xff]  ;;  %434 = vmatprep.subr.msk.mxu0 %vm229_vm0, %v202_v0  ;;  %v204_v4 = vmul.f32 %v201_v2, %v201_v2  ;;  %v212_v7 = vmul.f32 %v202_v0, %v202_v0 }
  0x13   : > { %v203_v3 = vmul.f32 %v200_v1, %v200_v1  ;;  %436 = vmatprep.mubr.msk.f32.mxu0 %vm205_vm1, %v200_v1  ;;  %435 = vmatpush3.msk.msra.mxu0 %vm229_vm0, %v202_v0 }
  0x14   : > { %437 = vmatmul.mubr.msk.f32.vlgmr.msra.gmra.mrb[0].mxu0 %vm205_vm1, %v201_v2  ;;  %v209_v6 = vsel %vm205_vm1, %v204_v4, 0.0  ;;  %v214_v8 = vsel %vm213_vm2, %v212_v7, 0.0 }
  0x15   : > { %v206_v5 = vsel %vm205_vm1, %v203_v3, 0.0  ;;  %v215_v9 = vrot.slane %v214_v8, 4 }
  0x16   : > { %207 = vadd.xlane.f32.xlu0 %v206_v5 }
  0x17   : > { %v216_v10 = vadd.f32 %v215_v9, %v214_v8 }
  0x19   : > { %v217_v11 = vrot.slane %v216_v10, 2 }
  0x1a   : > { %210 = vadd.xlane.f32.xlu0 %v209_v6 }
  0x1b   : > { %v218_v12 = vadd.f32 %v217_v11, %v216_v10 }
  0x1d   : > { %v219_v14 = vrot.slane %v218_v12, 1 }
  0x1f   : > { %v220_v16 = vadd.f32 %v219_v14, %v218_v12 }
  0xa3   : > { %v208_v13 = vpop.xlane.xlu0 %207 }
  0xa4   : > { %v221_v21 = vadd.f32 %v220_v16, %v208_v13 }
  0xa7   : > { %v211_v15 = vpop.xlane.xlu0 %210 }
  0xa8   : > { %v222_v17 = vadd.f32 %v220_v16, %v211_v15 }
  0xe7   : > { %v438_v18 = vpop.f32.mrb[0].mxu0 }
  0xe8   : > { %v309_v19 = vmul.f32 2.0, %v438_v18  ;;  %v299_v20 = vpop.f32.mrb[1].mxu0 }
  0xe9   : > { %v308_v22 = vmul.f32 2.0, %v299_v20 }
  0xea   : > { %v311_v23 = vsub.f32 %v222_v17, %v309_v19 }
  0xeb   : > { %v310_v24 = vsub.f32 %v221_v21, %v308_v22 }
  0xec   : > { %314 = vst.msk [vmem:[%s198_s23 + $0x8] sm:$0xff] %vm312_vm3, %v311_v23 }
  0xed   : > { %313 = vst.msk [vmem:[%s198_s23] sm:$0xff] %vm312_vm3, %v310_v24 }
  0xee PF: > { %s12_s11 = sadd.s32 1, %s485_s11   ;;  %s549_s9 = smov %s481_s10 }
  0xef   : > { %p9_p5 = scmp.ge.s32.totalorder %s12_s11, 4   ;;  %s550_s10 = smov %s552_s12 }
  0xf1   :  { %11 = sbr.rel (!%p9_p5) target bundleno = 2 (0x2), region = 61 }

// kernel: kppr_forward.9
= control target key start
LH: loop header
LB: loop body
LE: loop exit
PB: predicated region body
PF: predicated region fallthrough
CT: control target
= control target key end

     0   :  { %vm35_vm0 = vcmask 130048   ;;  %vm243_vm1 = vcmask 261120   ;;  %s411_s1 = inlined_call_operand.vmem [shape: f32[16,16], index: 1, kind: input, shape index: {}]   ;;  %s412_s3 = inlined_call_operand.vmem [shape: f32[16,32], index: 3, kind: input, shape index: {}]   ;;  %s413_s0 = inlined_call_operand.vmem [shape: f32[32,16], index: 0, kind: input, shape index: {}]   ;;  %s414_s2 = inlined_call_operand.vmem [shape: f32[1,16], index: 2, kind: input, shape index: {}]   ;;  %s415_s4 = inlined_call_operand.vmem [shape: f32[1,32], index: 4, kind: input, shape index: {}]   ;;  %s416_s6 = inlined_call_operand.vmem [shape: f32[32,32], index: 6, kind: output, shape index: {1}]   ;;  %s417_s5 = inlined_call_operand.vmem [shape: f32[32,16], index: 5, kind: output, shape index: {0}]  }
   0x1   :  { %v26_v0 = vld [vmem:[%s411_s1] sm:$0xff]  ;;  %v27_v1 = vld [vmem:[%s411_s1 + $0x8] sm:$0xff]  ;;  %v24_v8 = vld [vmem:[%s413_s0 + $0x10] sm:$0xff] }
   0x2   :  { %v149_v2 = vld [vmem:[%s412_s3] sm:$0xff]  ;;  %v298_v3 = vpack.c.bf16 %v27_v1, %v26_v0  ;;  %v150_v4 = vld [vmem:[%s412_s3 + $0x8] sm:$0xff]  ;;  %v25_v9 = vld [vmem:[%s413_s0 + $0x18] sm:$0xff] }
   0x3   :  { %v22_v5 = vld [vmem:[%s413_s0] sm:$0xff]  ;;  %v302_v6 = vpack.c.bf16 %v150_v4, %v149_v2  ;;  %v23_v7 = vld [vmem:[%s413_s0 + $0x8] sm:$0xff] }
   0x4   :  { %282 = vmatprep.mubr.msk.f32.mxu0 %vm35_vm0, %v22_v5  ;;  %292 = vmatprep.mubr.msk.f32.mxu1 %vm35_vm0, %v22_v5  ;;  %v256_v10 = vld [vmem:[%s414_s2] ss:$0 sm:$0xff] }
   0x5   :  { %299 = vmatprep.subr.bf16.mxu0 %v298_v3  ;;  %303 = vmatprep.subr.bf16.mxu1 %v302_v6  ;;  %v261_v11 = vld [vmem:[%s415_s4] ss:$0 sm:$0xff] }
   0x6   :  { %301 = vmatpush3.bf16.msra.mxu0 %v298_v3  ;;  %305 = vmatpush3.bf16.msra.mxu1 %v302_v6 }
   0x9   :  { %283 = vmatmul.mubr.msk.f32.vlgmr.msra.gmra.mrb[0].mxu0 %vm35_vm0, %v23_v7  ;;  %293 = vmatmul.mubr.msk.f32.vlgmr.msra.gmra.mrb[0].mxu1 %vm35_vm0, %v23_v7 }
   0xa   :  { %285 = vmatprep.mubr.msk.f32.mxu0 %vm35_vm0, %v24_v8  ;;  %295 = vmatprep.mubr.msk.f32.mxu1 %vm35_vm0, %v24_v8 }
   0xd   :  { %286 = vmatmul.mubr.msk.f32.gmra.mrb[2].mxu0 %vm35_vm0, %v25_v9  ;;  %296 = vmatmul.mubr.msk.f32.gmra.mrb[2].mxu1 %vm35_vm0, %v25_v9 }
  0xdc   :  { %v284_v12 = vpop.f32.mrb[0].mxu0  ;;  %v294_v15 = vpop.f32.mrb[0].mxu1 }
  0xdd   :  { %v120_v13 = vadd.f32 %v284_v12, %v256_v10  ;;  %v114_v14 = vpop.f32.mrb[1].mxu0  ;;  %v230_v17 = vadd.f32 %v294_v15, %v261_v11  ;;  %v224_v18 = vpop.f32.mrb[1].mxu1 }
  0xde   :  { %v115_v16 = vadd.f32 %v256_v10, %v114_v14  ;;  %v225_v20 = vadd.f32 %v261_v11, %v224_v18 }
  0xdf   :  { %vm134_vm2 = vcmp.ge.f32.partialorder %v120_v13, 0.0  ;;  %v138_v19 = vmul.f32 0.1, %v120_v13  ;;  %245 = vst.msk [vmem:[%s416_s6 + $0x8] sm:$0xff] %vm243_vm1, %v230_v17 }
  0xe0   :  { %vm133_vm3 = vcmp.ge.f32.partialorder %v115_v16, 0.0  ;;  %v137_v21 = vmul.f32 0.1, %v115_v16  ;;  %v287_v22 = vpop.f32.mrb[2].mxu0  ;;  %244 = vst.msk [vmem:[%s416_s6] sm:$0xff] %vm243_vm1, %v225_v20  ;;  %v297_v26 = vpop.f32.mrb[2].mxu1 }
  0xe1   :  { %v142_v23 = vsel %vm134_vm2, %v120_v13, %v138_v19  ;;  %v130_v24 = vadd.f32 %v287_v22, %v256_v10  ;;  %v124_v25 = vpop.f32.mrb[3].mxu0  ;;  %v240_v29 = vadd.f32 %v297_v26, %v261_v11  ;;  %v234_v30 = vpop.f32.mrb[3].mxu1 }
  0xe2   :  { %146 = vst.msk [vmem:[%s417_s5 + $0x8] sm:$0xff] %vm35_vm0, %v142_v23  ;;  %v141_v27 = vsel %vm133_vm3, %v115_v16, %v137_v21  ;;  %v125_v28 = vadd.f32 %v256_v10, %v124_v25  ;;  %v235_v32 = vadd.f32 %v261_v11, %v234_v30 }
  0xe3   :  { %145 = vst.msk [vmem:[%s417_s5] sm:$0xff] %vm35_vm0, %v141_v27  ;;  %vm136_vm4 = vcmp.ge.f32.partialorder %v130_v24, 0.0  ;;  %v140_v31 = vmul.f32 0.1, %v130_v24 }
  0xe4   :  { %vm135_vm5 = vcmp.ge.f32.partialorder %v125_v28, 0.0  ;;  %v139_v33 = vmul.f32 0.1, %v125_v28  ;;  %247 = vst.msk [vmem:[%s416_s6 + $0x18] sm:$0xff] %vm243_vm1, %v240_v29  ;;  %246 = vst.msk [vmem:[%s416_s6 + $0x10] sm:$0xff] %vm243_vm1, %v235_v32 }
  0xe5   :  { %v144_v34 = vsel %vm136_vm4, %v130_v24, %v140_v31 }
  0xe6   :  { %148 = vst.msk [vmem:[%s417_s5 + $0x18] sm:$0xff] %vm35_vm0, %v144_v34  ;;  %v143_v35 = vsel %vm135_vm5, %v125_v28, %v139_v33 }
  0xe7   :  { %147 = vst.msk [vmem:[%s417_s5 + $0x10] sm:$0xff] %vm35_vm0, %v143_v35 }

// kernel: kppr_forward.7
= control target key start
LH: loop header
LB: loop body
LE: loop exit
PB: predicated region body
PF: predicated region fallthrough
CT: control target
= control target key end

     0   :  { %vm45_vm0 = vcmask 1043456   ;;  %vm32_vm1 = vcmask 31744   ;;  %vm147_vm2 = vcmask 130048   ;;  %s378_s1 = inlined_call_operand.vmem [shape: f32[4,16], index: 1, kind: input, shape index: {}]   ;;  %s379_s0 = inlined_call_operand.vmem [shape: f32[32,4], index: 0, kind: input, shape index: {}]   ;;  %s380_s3 = inlined_call_operand.vmem [shape: f32[16,16], index: 3, kind: input, shape index: {}]   ;;  %s381_s2 = inlined_call_operand.vmem [shape: f32[1,16], index: 2, kind: input, shape index: {}]   ;;  %s382_s4 = inlined_call_operand.vmem [shape: f32[1,16], index: 4, kind: input, shape index: {}]   ;;  %s383_s5 = inlined_call_operand.vmem [shape: f32[32,16], index: 5, kind: output, shape index: {}]  }
   0x1   :  { %v24_v0 = vld [vmem:[%s378_s1] sm:$0xf]  ;;  %v21_v2 = vld [vmem:[%s379_s0 + $0x8] sm:$0xff]  ;;  %v22_v3 = vld [vmem:[%s379_s0 + $0x10] sm:$0xff] }
   0x2   :  { %v20_v1 = vld [vmem:[%s379_s0] sm:$0xff]  ;;  %279 = vmatprep.subr.msk.mxu0 %vm45_vm0, %v24_v0  ;;  %v23_v4 = vld [vmem:[%s379_s0 + $0x18] sm:$0xff]  ;;  %v139_v6 = vld [vmem:[%s380_s3 + $0x8] sm:$0xff] }
   0x3   :  { %281 = vmatprep.mubr.msk.f32.mxu0 %vm32_vm1, %v20_v1  ;;  %280 = vmatpush3.msk.msra.mxu0 %vm45_vm0, %v24_v0  ;;  %v138_v5 = vld [vmem:[%s380_s3] sm:$0xff] }
   0x4   :  { %282 = vmatmul.mubr.msk.f32.vlgmr.msra.gmra.mrb[0].mxu0 %vm32_vm1, %v21_v2  ;;  %v297_v7 = vpack.c.bf16 %v139_v6, %v138_v5  ;;  %v257_v8 = vld [vmem:[%s381_s2] ss:$0 sm:$0xff] }
   0x5   :  { %284 = vmatprep.mubr.msk.f32.mxu0 %vm32_vm1, %v22_v3  ;;  %v263_v21 = vld [vmem:[%s382_s4] ss:$0 sm:$0xff] }
   0x6   :  { %298 = vmatprep.subr.bf16.mxu1 %v297_v7 }
   0x7   :  { %300 = vmatpush3.bf16.msra.mxu1 %v297_v7 }
   0x8   :  { %285 = vmatmul.mubr.msk.f32.gmra.mrb[2].mxu0 %vm32_vm1, %v23_v4 }
  0xd7   :  { %v283_v9 = vpop.f32.mrb[0].mxu0 }
  0xd8   :  { %v121_v10 = vadd.f32 %v283_v9, %v257_v8  ;;  %v115_v11 = vpop.f32.mrb[1].mxu0 }
  0xd9   :  { %v116_v12 = vadd.f32 %v257_v8, %v115_v11 }
  0xda   :  { %v135_v15 = vmax.f32 %v121_v10, 0.0 }
  0xdb   :  { %v134_v13 = vmax.f32 %v116_v12, 0.0  ;;  %v286_v14 = vpop.f32.mrb[2].mxu0 }
  0xdc   :  { %v131_v16 = vadd.f32 %v286_v14, %v257_v8  ;;  %v125_v17 = vpop.f32.mrb[3].mxu0 }
  0xdd   :  { %v126_v18 = vadd.f32 %v257_v8, %v125_v17  ;;  %291 = vmatprep.mubr.msk.f32.mxu1 %vm147_vm2, %v134_v13 }
  0xde   :  { %292 = vmatmul.mubr.msk.f32.vlgmr.msra.gmra.mrb[0].mxu1 %vm147_vm2, %v135_v15  ;;  %v137_v20 = vmax.f32 %v131_v16, 0.0 }
  0xdf   :  { %v136_v19 = vmax.f32 %v126_v18, 0.0 }
  0xe1   :  { %294 = vmatprep.mubr.msk.f32.mxu1 %vm147_vm2, %v136_v19 }
  0xe2   :  { %295 = vmatmul.mubr.msk.f32.gmra.mrb[2].mxu1 %vm147_vm2, %v137_v20 }
 0x1b1   :  { %v293_v22 = vpop.f32.mrb[0].mxu1 }
 0x1b2   :  { %v232_v23 = vadd.f32 %v293_v22, %v263_v21  ;;  %v226_v24 = vpop.f32.mrb[1].mxu1 }
 0x1b3   :  { %v227_v25 = vadd.f32 %v263_v21, %v226_v24 }
 0x1b4   :  { %v246_v26 = vmax.f32 %v232_v23, 0.0 }
 0x1b5   :  { %v245_v27 = vmax.f32 %v227_v25, 0.0  ;;  %v296_v28 = vpop.f32.mrb[2].mxu1 }
 0x1b6   :  { %250 = vst.msk [vmem:[%s383_s5 + $0x8] sm:$0xff] %vm147_vm2, %v246_v26  ;;  %v242_v29 = vadd.f32 %v296_v28, %v263_v21  ;;  %v236_v30 = vpop.f32.mrb[3].mxu1 }
 0x1b7   :  { %249 = vst.msk [vmem:[%s383_s5] sm:$0xff] %vm147_vm2, %v245_v27  ;;  %v237_v31 = vadd.f32 %v263_v21, %v236_v30 }
 0x1b8   :  { %v248_v32 = vmax.f32 %v242_v29, 0.0 }
 0x1b9   :  { %v247_v33 = vmax.f32 %v237_v31, 0.0 }
 0x1ba   :  { %252 = vst.msk [vmem:[%s383_s5 + $0x18] sm:$0xff] %vm147_vm2, %v248_v32 }
 0x1bb   :  { %251 = vst.msk [vmem:[%s383_s5 + $0x10] sm:$0xff] %vm147_vm2, %v247_v33 }

// kernel: kppr_forward.11
= control target key start
LH: loop header
LB: loop body
LE: loop exit
PB: predicated region body
PF: predicated region fallthrough
CT: control target
= control target key end

     0   :  { %vm29_vm0 = vcmask 261120   ;;  %vm139_vm1 = vcmask 130048   ;;  %s254_s1 = inlined_call_operand.vmem [shape: f32[32,16], index: 1, kind: input, shape index: {}]   ;;  %s255_s0 = inlined_call_operand.vmem [shape: f32[32,32], index: 0, kind: input, shape index: {}]   ;;  %s256_s2 = inlined_call_operand.vmem [shape: f32[1,16], index: 2, kind: input, shape index: {}]   ;;  %s257_s3 = inlined_call_operand.vmem [shape: f32[32,16], index: 3, kind: output, shape index: {}]  }
   0x1   :  { %v18_v0 = vld [vmem:[%s254_s1] sm:$0xff]  ;;  %v19_v1 = vld [vmem:[%s254_s1 + $0x8] sm:$0xff]  ;;  %v20_v2 = vld [vmem:[%s254_s1 + $0x10] sm:$0xff] }
   0x2   :  { %v175_v3 = vpack.c.bf16 %v19_v1, %v18_v0  ;;  %v21_v4 = vld [vmem:[%s254_s1 + $0x18] sm:$0xff]  ;;  %v14_v5 = vld [vmem:[%s255_s0] sm:$0xff]  ;;  %v16_v6 = vld [vmem:[%s255_s0 + $0x10] sm:$0xff] }
   0x3   :  { %v179_v7 = vpack.c.bf16 %v21_v4, %v20_v2  ;;  %169 = vmatprep.mubr.msk.f32.mxu0 %vm29_vm0, %v14_v5  ;;  %172 = vmatprep.mubr.msk.f32.mxu1 %vm29_vm0, %v16_v6  ;;  %v15_v8 = vld [vmem:[%s255_s0 + $0x8] sm:$0xff]  ;;  %v17_v9 = vld [vmem:[%s255_s0 + $0x18] sm:$0xff]  ;;  %v148_v10 = vld [vmem:[%s256_s2] ss:$0 sm:$0xff] }
   0x4   :  { %176 = vmatprep.subr.bf16.mxu0 %v175_v3  ;;  %183 = vmatprep.subr.bf16.mxu1 %v175_v3 }
   0x5   :  { %178 = vmatpush3.bf16.msra.mxu0 %v175_v3  ;;  %185 = vmatpush3.bf16.msra.mxu1 %v175_v3 }
   0x6   :  { %180 = vmatprep.subr.bf16.mxu0 %v179_v7  ;;  %184 = vmatprep.subr.bf16.mxu1 %v179_v7 }
   0x9   :  { %182 = vmatpush3.bf16.msra.mxu0 %v179_v7  ;;  %186 = vmatpush3.bf16.msra.mxu1 %v179_v7 }
   0xc   :  { %170 = vmatmul.mubr.msk.f32.vlgmr.msra.gmra.mrb[0].mxu0 %vm29_vm0, %v15_v8  ;;  %173 = vmatmul.mubr.msk.f32.vlgmr.msra.gmra.mrb[0].mxu1 %vm29_vm0, %v17_v9 }
  0xdf   :  { %v171_v11 = vpop.f32.mrb[0].mxu0  ;;  %v174_v12 = vpop.f32.mrb[0].mxu1 }
  0xe0   :  { %v114_v13 = vadd.f32 %v171_v11, %v148_v10  ;;  %v124_v14 = vadd.f32 %v174_v12, %v148_v10  ;;  %v108_v15 = vpop.f32.mrb[1].mxu0  ;;  %v118_v16 = vpop.f32.mrb[1].mxu1 }
  0xe1   :  { %v109_v17 = vadd.f32 %v148_v10, %v108_v15  ;;  %v119_v18 = vadd.f32 %v148_v10, %v118_v16 }
  0xe2   :  { %vm128_vm2 = vcmp.ge.f32.partialorder %v114_v13, 0.0  ;;  %v132_v19 = vmul.f32 0.1, %v114_v13  ;;  %vm130_vm3 = vcmp.ge.f32.partialorder %v124_v14, 0.0  ;;  %v134_v20 = vmul.f32 0.1, %v124_v14 }
  0xe3   :  { %vm127_vm4 = vcmp.ge.f32.partialorder %v109_v17, 0.0  ;;  %v131_v21 = vmul.f32 0.1, %v109_v17  ;;  %vm129_vm5 = vcmp.ge.f32.partialorder %v119_v18, 0.0  ;;  %v133_v22 = vmul.f32 0.1, %v119_v18 }
  0xe4   :  { %v136_v23 = vsel %vm128_vm2, %v114_v13, %v132_v19  ;;  %v138_v24 = vsel %vm130_vm3, %v124_v14, %v134_v20 }
  0xe5   :  { %141 = vst.msk [vmem:[%s257_s3 + $0x8] sm:$0xff] %vm139_vm1, %v136_v23  ;;  %143 = vst.msk [vmem:[%s257_s3 + $0x18] sm:$0xff] %vm139_vm1, %v138_v24  ;;  %v135_v25 = vsel %vm127_vm4, %v109_v17, %v131_v21  ;;  %v137_v26 = vsel %vm129_vm5, %v119_v18, %v133_v22 }
  0xe6   :  { %140 = vst.msk [vmem:[%s257_s3] sm:$0xff] %vm139_vm1, %v135_v25  ;;  %142 = vst.msk [vmem:[%s257_s3 + $0x10] sm:$0xff] %vm139_vm1, %v137_v26 }

// kernel: kppr_forward.13
= control target key start
LH: loop header
LB: loop body
LE: loop exit
PB: predicated region body
PF: predicated region fallthrough
CT: control target
= control target key end

     0   :  { %11 = vsyncpa [#allocation3], 0  ;;  %s1370_s0 = inlined_call_operand.vmem [shape: f32[2,16,32], index: 0, kind: input, shape index: {}]   ;;  %s1371_s1 = inlined_call_operand.vmem [shape: f32[2,16,1], index: 1, kind: input, shape index: {}]   ;;  %s1372_s2 = inlined_call_operand.vmem [shape: f32[32,8], index: 2, kind: input, shape index: {}]   ;;  %s1373_s3 = inlined_call_operand.vmem [shape: f32[1,8], index: 3, kind: input, shape index: {}]   ;;  %s1374_s4 = inlined_call_operand.vmem [shape: f32[8,32], index: 4, kind: input, shape index: {}]   ;;  %s1375_s5 = inlined_call_operand.vmem [shape: f32[256,64], index: 5, kind: input, shape index: {}]   ;;  %s1376_s6 = inlined_call_operand.hbm [shape: f32[2,1,64], index: 6, kind: output, shape index: {}]  }
   0x1   :  { %13 = vsyncpa [#allocation3 + $0x1], 0  ;;  %s1137_s21 = smov 0   ;;  %s1139_s22 = smov 0  }
   0x2   :  { %s1141_s23 = smov 0   ;;  %s1143_s24 = smov 0  }
   0x3 LB: > { %s1158_s25 = sadd.s32 4294967295, %s1091_s24   ;;  %s818_s26 = sadd.s32 4294967294, %s1091_s24   ;;  %s1091_s24 = sphi %s1143_s24, %s1382_s24   ;;  %s1087_s23 = sphi %s1141_s23, %s1381_s23   ;;  %s1083_s22 = sphi %s1139_s22, %s1380_s22   ;;  %s1079_s21 = sphi %s1137_s21, %s1379_s21  }
   0x4   : > { %s1162_s27 = sadd.s32 1, %s1091_s24   ;;  %s162_s28 = sadd.s32 1, %s1087_s23 }
   0x5   : > { %s159_s29 = ssub.s32 %s1091_s24, %s1162_s27  ;;  %p172_p0 = scmp.ne.s32.totalorder %s1087_s23, %s1083_s22 }
   0x6   : > { %p160_p1 = scmp.eq.s32.totalorder %s159_s29, 0  ;;  %p173_p2 = scmp.eq.s32.totalorder %s1158_s25, 1 }
   0x7   : > { %p178_p3 = scmp.ne.s32.totalorder %s1083_s22, %s1079_s21  ;;  %p179_p4 = scmp.eq.s32.totalorder %s818_s26, 1 }
   0x8   : > { %s1173_s30 = scalar_select %p160_p1, %s1087_s23, %s162_s28  }
   0x9   : > { %p1175_p5 = por %p173_p2, %p172_p0  ;;  %p1179_p6 = por %p179_p4, %p178_p3 }
   0xa   : > { %p821_p7 = scmp.ge.s32.totalorder %s1091_s24, 1  ;;  %p225_p8 = scmp.lt.s32.totalorder %s1091_s24, 3 }
   0xc   : > { %p226_p9 = pnand %p821_p7, %p225_p8 }
   0xd   : > { %v273_v0 = vld [vmem:[%s1372_s2] sm:$0xff] (!%p226_p9)  ;;  %v274_v1 = vld [vmem:[%s1372_s2 + $0x8] sm:$0xff] (!%p226_p9)  ;;  %v275_v2 = vld [vmem:[%s1372_s2 + $0x10] sm:$0xff] (!%p226_p9)  ;;  %p259_p10 = scmp.lt.s32.totalorder (!%p226_p9), %s1158_s25, 1  ;;  %vm284_vm0 = vcmask (!%p226_p9), 261120   ;;  %vm366_vm1 = vcmask (!%p226_p9), 64512  }
   0xe   : > { %229 = sbr.rel (%p226_p9) target bundleno = 1719 (0x6b7), region = 44  ;;  %v908_v3 = vpack.c.bf16 (!%p226_p9), %v274_v1, %v273_v0  ;;  %v276_v4 = vld [vmem:[%s1372_s2 + $0x18] sm:$0xff] (!%p226_p9)  ;;  %v826_v9 = vld [vmem:[%s1373_s3] ss:$0 sm:$0xff] (!%p226_p9)  ;;  %v1093_v16 = vmov (!%p226_p9), 0   ;;  %v1094_v29 = vmov (!%p226_p9), 0.0|0.0  }
   0xf   : > { %v912_v5 = vpack.c.bf16 (!%p226_p9), %v276_v4, %v275_v2  ;;  %1001 = vset.pattern.permute.xlu1 (!%p226_p9), %v1093_v16  ;;  %1000 = vset.pattern.permute.xlu0 (!%p226_p9), %v1093_v16  ;;  %vm1095_vm2 = vmmov (!%p226_p9), 0   ;;  %v1096_v30 = vmov (!%p226_p9), 0.0   ;;  %vm433_vm3 = vcmask (!%p226_p9), 130048   ;;  %v577_v47 = vld [vmem:[%s1374_s4] sm:$0xff] (!%p226_p9)  ;;  %v644_v54 = vld [vmem:[%s1375_s5 + $0x88] sm:$0xff] (!%p226_p9)  ;;  %v645_v58 = vld [vmem:[%s1375_s5 + $0x90] sm:$0xff] (!%p226_p9) }
  0x10   : > { %909 = vmatprep.subr.bf16.mxu1 (!%p226_p9), %v908_v3  ;;  %v1097_v42 = vmov (!%p226_p9), 1.0|1.0   ;;  %v643_v53 = vld [vmem:[%s1375_s5 + $0x80] sm:$0xff] (!%p226_p9)  ;;  %v628_v57 = vld [vmem:[%s1375_s5 + $0x8] sm:$0xff] (!%p226_p9)  ;;  %v646_v59 = vld [vmem:[%s1375_s5 + $0x98] sm:$0xff] (!%p226_p9)  ;;  %s1099_s19 = smov (!%p226_p9), 32  }
  0x11   : > { %911 = vmatpush3.bf16.msra.mxu1 (!%p226_p9), %v908_v3  ;;  %v627_v55 = vld [vmem:[%s1375_s5] sm:$0xff] (!%p226_p9)  ;;  %v921_v56 = vpack.c.bf16 (!%p226_p9), %v644_v54, %v643_v53  ;;  %v925_v61 = vpack.c.bf16 (!%p226_p9), %v646_v59, %v645_v58  ;;  %v629_v62 = vld [vmem:[%s1375_s5 + $0x10] sm:$0xff] (!%p226_p9)  ;;  %v630_v63 = vld [vmem:[%s1375_s5 + $0x18] sm:$0xff] (!%p226_p9)  ;;  %s1100_s20 = smov (!%p226_p9), 96   ;;  %vm620_vm4 = vcmask (!%p226_p9), 523264   ;;  %vm622_vm5 = vcmask (!%p226_p9), 785408  }
  0x12   : > { %913 = vmatprep.subr.bf16.mxu1 (!%p226_p9), %v912_v5  ;;  %v923_v60 = vpack.c.bf16 (!%p226_p9), %v628_v57, %v627_v55  ;;  %v647_v0 = vld [vmem:[%s1375_s5 + $0xa0] sm:$0xff] (!%p226_p9)  ;;  %v648_v1 = vld [vmem:[%s1375_s5 + $0xa8] sm:$0xff] (!%p226_p9)  ;;  %v927_v2 = vpack.c.bf16 (!%p226_p9), %v630_v63, %v629_v62  ;;  %vm730_vm6 = vcmask (!%p226_p9), 516096   ;;  %s831_s28 = sshll.u32 (!%p226_p9), %s1158_s25, 4 }
  0x13   : > { %922 = vmatprep.subr.bf16.mxu0 (!%p226_p9), %v921_v56  ;;  %v929_v3 = vpack.c.bf16 (!%p226_p9), %v648_v1, %v647_v0  ;;  %v631_v4 = vld [vmem:[%s1375_s5 + $0x20] sm:$0xff] (!%p226_p9)  ;;  %s1328_s12 = scalar_lea.hbm (!%p226_p9), %s1376_s6, %s831_s28 }
  0x14   : > { %924 = vmatpush3.bf16.msra.mxu0 (!%p226_p9), %v923_v60  ;;  %v635_v16 = vld [vmem:[%s1375_s5 + $0x40] sm:$0xff] (!%p226_p9) }
  0x15   : > { %s260_s17 = scalar_select %p259_p10, %s1158_s25, 1  ;;  %915 = vmatpush3.bf16.msra.mxu1 %v912_v5  ;;  %926 = vmatprep.subr.bf16.mxu0 %v925_v61  ;;  %v632_v5 = vld [vmem:[%s1375_s5 + $0x28] sm:$0xff] }
  0x16   : > { %916 = vmatprep.subr.bf16.mxu1 %v1094_v29  ;;  %s1101_s25 = smov [#allocation2]  }
  0x17   : > { %s834_s18 = sshll.u32 %s260_s17, 4  ;;  %s1033_s15 = sshll.u32 %s1101_s25, 4  ;;  %s1034_s15 = int_to_ptr.vmem [resolvable:$false] %s1033_s15 }
  0x18   : > { %s263_s26 = scalar_lea.vmem %s1370_s0, %s834_s18  ;;  %s268_s11 = scalar_lea.vmem %s1371_s1, %s834_s18  ;;  %928 = vmatpush3.bf16.msra.mxu0 %v927_v2 }
  0x19   : > { %v269_v6 = vld [vmem:[%s263_s26] sm:$0xff]  ;;  %v270_v7 = vld [vmem:[%s263_s26 + $0x8] sm:$0xff]  ;;  %930 = vmatprep.subr.bf16.mxu0 %v929_v3  ;;  %s1098_s18 = smov 64   ;;  %s257_s26 = sand.u32 1, %s1083_s22  }
  0x1a   : > { %891 = vmatprep.mubr.msk.f32.mxu1 %vm284_vm0, %v269_v6  ;;  %v917_v8 = vpack.c.bf16 %v270_v7, %v269_v6  ;;  %v271_v17 = vld [vmem:[%s268_s11] sm:$0xff]  ;;  %v272_v28 = vld [vmem:[%s268_s11 + $0x8] sm:$0xff]  ;;  %v649_v6 = vld [vmem:[%s1375_s5 + $0xb0] sm:$0xff]  ;;  %s258_s29 = scalar_lea.vmem [#allocation2], %s257_s26  ;;  %s739_s13 = scalar_lea.sflag [#allocation3], %s257_s26 }
  0x1b   : > { %892 = vmatmul.mubr.msk.f32.vlgmr.msra.gmra.mrb[0].mxu1 %vm284_vm0, %v270_v7  ;;  %v650_v7 = vld [vmem:[%s1375_s5 + $0xb8] sm:$0xff]  ;;  %s751_s9 = sshll.u32 %s258_s29, 4  ;;  %s1035_s16 = scalar_lea.vmem %s1034_s15, 32  ;;  %s1330_s9 = int_to_ptr.vmem [resolvable:$true] %s751_s9 }
  0x1c   : > { %898 = vmatprep.mubr.msk.f32.mxu1 %vm1095_vm2, %v1096_v30  ;;  %918 = vmatpush3.bf16.msra.mxu1 %v917_v8  ;;  %v931_v8 = vpack.c.bf16 %v632_v5, %v631_v4  ;;  %s1029_s14 = scalar_lea.vmem %s1330_s9, 16  ;;  %p1036_p0 = scmp.lt.s32.totalorder %s1330_s9, %s1034_s15 }
  0x1d   : > { %919 = vmatprep.subr.bf16.mxu1 %v1094_v29  ;;  %p1030_p11 = scmp.ne.s32.totalorder %s1330_s9, %s1029_s14  ;;  %p1037_p1 = scmp.lt.s32.totalorder %s1035_s16, %s1029_s14 }
  0x1e   : > { %932 = vmatpush3.bf16.msra.mxu0 %v931_v8 }
  0x1f   : > { %p1031_p12 = pnand %p1030_p11, %p1175_p5  ;;  %p1038_p2 = por %p1037_p1, %p1036_p0 }
  0x21   : > { %p1032_p13 = pneg %p1031_p12 }
  0x23   : > { %p1039_p3 = pnand %p1038_p2, %p1032_p13 }
  0xee   : > { %v893_v10 = vpop.f32.mrb[0].mxu1 }
  0xef   : > { %v357_v11 = vpop.f32.mrb[1].mxu1  ;;  %v363_v13 = vadd.f32 %v893_v10, %v826_v9  ;;  %v633_v10 = vld [vmem:[%s1375_s5 + $0x30] sm:$0xff] }
  0xf0   : > { %v358_v12 = vadd.f32 %v826_v9, %v357_v11  ;;  %v933_v9 = vpack.c.bf16 %v650_v7, %v649_v6  ;;  %v634_v11 = vld [vmem:[%s1375_s5 + $0x38] sm:$0xff] }
  0xf1   : > { %v370_v15 = vsel %vm366_vm1, %v363_v13, -inf }
  0xf2   : > { %v367_v14 = vsel %vm366_vm1, %v358_v12, -inf  ;;  %934 = vmatprep.subr.bf16.mxu0 %v933_v9 }
  0xf3   : > { %368 = vmax.xlane.f32.xlu0 %v367_v14  ;;  %v935_v14 = vpack.c.bf16 %v634_v11, %v633_v10 }
  0xf5   : > { %936 = vmatpush3.bf16.msra.mxu0 %v935_v14 }
  0xf7   : > { %371 = vmax.xlane.f32.xlu0 %v370_v15 }
 0x10d   : > { %391 = vperm.xlu0 %1000, %v271_v17   ;;  %v636_v17 = vld [vmem:[%s1375_s5 + $0x48] sm:$0xff] }
 0x180   : > { %v369_v18 = vpop.xlane.xlu0 %368 }
 0x181   : > { %v373_v19 = vsub.f32 %v358_v12, %v369_v18  ;;  %v651_v12 = vld [vmem:[%s1375_s5 + $0xc0] sm:$0xff]  ;;  %v653_v18 = vld [vmem:[%s1375_s5 + $0xd0] sm:$0xff] }
 0x183   : > { %v375_v22 = vmul.f32 1.442695, %v373_v19  ;;  %v654_v19 = vld [vmem:[%s1375_s5 + $0xd8] sm:$0xff] }
 0x184   : > { %v372_v20 = vpop.xlane.xlu0 %371 }
 0x185   : > { %v374_v21 = vsub.f32 %v363_v13, %v372_v20  ;;  %v652_v13 = vld [vmem:[%s1375_s5 + $0xc8] sm:$0xff]  ;;  %v939_v20 = vpack.c.bf16 %v636_v17, %v635_v16 }
 0x186   : > { %v937_v15 = vpack.c.bf16 %v652_v13, %v651_v12 }
 0x187   : > { %v377_v23 = vmul.f32 1.442695, %v374_v21  ;;  %v941_v21 = vpack.c.bf16 %v654_v19, %v653_v18 }
 0x188   : > { %938 = vmatprep.subr.bf16.mxu0 %v937_v15 }
 0x189   : > { %1017 = vpow2.f32 %v377_v23  ;;  %v638_v23 = vld [vmem:[%s1375_s5 + $0x58] sm:$0xff]  ;;  %940 = vmatpush3.bf16.msra.mxu0 %v939_v20 }
 0x18a   : > { %1019 = vpow2.f32 %v375_v22  ;;  %v637_v22 = vld [vmem:[%s1375_s5 + $0x50] sm:$0xff]  ;;  %942 = vmatprep.subr.bf16.mxu0 %v941_v21 }
 0x18c   : > { %v392_v35 = vpop.permute.xlu0 %391 }
 0x193   : > { %v1018_v24 = vpop.eup %1017 }
 0x194   : > { %v382_v25 = vsel %vm366_vm1, %v1018_v24, 0.0  ;;  %v1020_v26 = vpop.eup %1019 }
 0x195   : > { %383 = vadd.xlane.f32.xlu1 %v382_v25  ;;  %v379_v27 = vsel %vm366_vm1, %v1020_v26, 0.0 }
 0x199   : > { %380 = vadd.xlane.f32.xlu1 %v379_v27  ;;  %v655_v27 = vld [vmem:[%s1375_s5 + $0xe0] sm:$0xff] }
 0x1aa   : > { %396 = vperm.xlu1 %1001, %v272_v28   ;;  %v656_v28 = vld [vmem:[%s1375_s5 + $0xe8] sm:$0xff] }
 0x1ab   : > { %v945_v29 = vpack.c.bf16 %v656_v28, %v655_v27 }
 0x222   : > { %v384_v31 = vpop.xlane.xlu1 %383 }
 0x223   : > { %1021 = vrcp.f32 %v384_v31  ;;  %v640_v31 = vld [vmem:[%s1375_s5 + $0x68] sm:$0xff] }
 0x226   : > { %v381_v32 = vpop.xlane.xlu1 %380 }
 0x227   : > { %1023 = vrcp.f32 %v381_v32 }
 0x22a   : > { %v397_v39 = vpop.permute.xlu1 %396 }
 0x22d   : > { %v1022_v33 = vpop.eup %1021 }
 0x22e   : > { %v388_v37 = vmul.f32 %v1022_v33, %v1018_v24  ;;  %v943_v24 = vpack.c.bf16 %v638_v23, %v637_v22  ;;  %v657_v33 = vld [vmem:[%s1375_s5 + $0xf0] sm:$0xff] }
 0x230   : > { %v400_v40 = vmul.f32 %v397_v39, %v388_v37  ;;  %944 = vmatpush3.bf16.msra.mxu0 %v943_v24  ;;  %v642_v37 = vld [vmem:[%s1375_s5 + $0x78] sm:$0xff] }
 0x231   : > { %v1024_v34 = vpop.eup %1023  ;;  %946 = vmatprep.subr.bf16.mxu0 %v945_v29 }
 0x232   : > { %v387_v36 = vmul.f32 %v1024_v34, %v1020_v26  ;;  %v658_v34 = vld [vmem:[%s1375_s5 + $0xf8] sm:$0xff] }
 0x234   : > { %v399_v38 = vmul.f32 %v392_v35, %v387_v36  ;;  %v949_v35 = vpack.c.bf16 %v658_v34, %v657_v33  ;;  %v641_v36 = vld [vmem:[%s1375_s5 + $0x70] sm:$0xff] }
 0x236   : > { %401 = vxpose.xlu1.b32.start [1/2] (short) (narrow) %v399_v38, 8  ;;  %v951_v38 = vpack.c.bf16 %v642_v37, %v641_v36 }
 0x23a   : > { %402 = vxpose.xlu1.b32.end [2/2] (short) (narrow) %v400_v40, 8 }
 0x2b6   : > { %v417_v41 = vpop.trf.xlu1 }
 0x2b7   : > { %899 = vmatmul.mubr.msk.f32.vlgmr.msra.gmra.mrb[2].mxu1 %vm433_vm3, %v417_v41 }
 0x2b8   : > { %920 = vmatpush3.bf16.msra.mxu1 %v1097_v42  ;;  %905 = vmatprep.mubr.msk.f32.mxu1 %vm1095_vm2, %v1096_v30  ;;  %v639_v30 = vld [vmem:[%s1375_s5 + $0x60] sm:$0xff] }
 0x2b9   : > { %v947_v32 = vpack.c.bf16 %v640_v31, %v639_v30 }
 0x2bb   : > { %906 = vmatmul.mubr.msk.f32.vlgmr.msra.gmra.mrb[4].mxu1 %vm433_vm3, %v417_v41  ;;  %948 = vmatpush3.bf16.msra.mxu0 %v947_v32 }
 0x2bc   : > { %950 = vmatprep.subr.bf16.mxu0 %v949_v35 }
 0x2bf   : > { %952 = vmatpush3.bf16.msra.mxu0 %v951_v38 }
 0x38a   : > { %v503_v43 = vpop.f32.mrb[2].mxu1 }
 0x38b   : > { %v900_v44 = vpop.f32.mrb[3].mxu1 }
 0x38e   : > { %v573_v45 = vpop.f32.mrb[4].mxu1 }
 0x38f   : > { %580 = vperm.xlu0 %1000, %v573_v45   ;;  %v907_v46 = vpop.f32.mrb[5].mxu1 }
 0x40e   : > { %v581_v48 = vpop.permute.xlu0 %580 }
 0x40f   : > { %v583_v49 = vmul.f32 %v581_v48, %v577_v47 }
 0x411   : > { %v1219_v50 = vsub.f32 %v503_v43, %v583_v49 }
 0x413   : > { %v585_v51 = vmul.f32 %v1219_v50, %v1219_v50 }
 0x415   : > { %v586_v52 = vsel %vm284_vm0, %v585_v51, 0.0 }
 0x416   : > { %587 = vadd.xlane.f32.xlu0 %v586_v52 }
 0x4a3   : > { %v588_v25 = vpop.xlane.xlu0 %587 }
 0x4a4   : > { %v589_v26 = vadd.f32 1e-12, %v588_v25 }
 0x4a6   : > { %1025 = vrsqrt.f32 %v589_v26 }
 0x4b0   : > { %v1026_v39 = vpop.eup %1025 }
 0x4b1   : > { %v591_v40 = vmul.f32 %v1026_v39, %v1219_v50 }
 0x4b3   : > { %v597_v41 = vrot.slane %v591_v40, 2  ;;  %v611_v42 = vrot.slane %v591_v40, 6  ;;  %v593_v43 = vrot.slane %v591_v40, 1  ;;  %v607_v44 = vrot.slane %v591_v40, 5 }
 0x4b4   : > { %v601_v47 = vrot.slane %v591_v40, 3  ;;  %v615_v48 = vrot.slane %v591_v40, 7  ;;  %v605_v50 = vrot.slane %v591_v40, 4 }
 0x4b5   : > { %v1007_v45 = vpack.i.bf16 %v597_v41, %v611_v42  ;;  %v1002_v46 = vpack.i.bf16 %v593_v43, %v607_v44 }
 0x4b6   : > { %v1012_v49 = vpack.i.bf16 %v601_v47, %v615_v48 }
 0x4b7   : > { %1008 = vrot.lane.b32.xlu0 %v1007_v45, %s1098_s18  ;;  %1003 = vrot.lane.b32.xlu1 %v1002_v46, %s1099_s19 }
 0x4bb   : > { %1013 = vrot.lane.b32.xlu1 %v1012_v49, %s1100_s20 }
 0x529   : > { %v1009_v51 = vpop.permute.xlu0 %1008  ;;  %v1004_v52 = vpop.permute.xlu1 %1003 }
 0x52a   : > { %v1006_v53 = vunpack.i.h.bf16 %v1004_v52  ;;  %v1005_v54 = vunpack.i.l.bf16 %v1004_v52  ;;  %v1011_v55 = vunpack.i.h.bf16 %v1009_v51  ;;  %v1010_v56 = vunpack.i.l.bf16 %v1009_v51 }
 0x52c   : > { %v624_v57 = vsel %vm284_vm0, %v605_v50, %v1005_v54  ;;  %v619_v58 = vsel %vm284_vm0, %v591_v40, %v1006_v53 }
 0x52d   : > { %v1014_v59 = vpop.permute.xlu1 %1013  ;;  %v625_v62 = vsel %vm620_vm4, %v624_v57, %v1010_v56  ;;  %v621_v63 = vsel %vm620_vm4, %v619_v58, %v1011_v55 }
 0x52e   : > { %v1016_v60 = vunpack.i.h.bf16 %v1014_v59  ;;  %v1015_v61 = vunpack.i.l.bf16 %v1014_v59 }
 0x530   : > { %v626_v0 = vsel %vm622_vm5, %v625_v62, %v1015_v61  ;;  %v623_v1 = vsel %vm622_vm5, %v621_v63, %v1016_v60 }
 0x531   : > { %723 = vmatprep.mubr.f32.mxu0 %v626_v0 }
 0x532   : > { %724 = vmatmul.mubr.f32.vlgmr.msra.gmra.mrb[0].mxu0 %v623_v1 }
 0x605   : > { %v880_v2 = vpop.f32.mrb[0].mxu0 }
 0x606   : > { %v881_v3 = vpop.f32.mrb[1].mxu0 }
 0x607   : > { %v882_v4 = vadd.f32 %v881_v3, %v880_v2 }
 0x609   : > { %v729_v5 = vmul.f32 %v882_v4, %v882_v4 }
 0x60b   : > { %v731_v6 = vsel %vm730_vm6, %v729_v5, 0.0 }
 0x60c   : > { %732 = vadd.xlane.f32.xlu1 %v731_v6 }
 0x699   : > { %v733_v7 = vpop.xlane.xlu1 %732 }
 0x69a   : > { %v734_v8 = vadd.f32 1e-12, %v733_v7 }
 0x69c   : > { %1027 = vrsqrt.f32 %v734_v8 }
 0x6a6   : > { %v1028_v9 = vpop.eup %1027 }
 0x6a7   : > { %v736_v10 = vmul.f32 %v1028_v9, %v882_v4 }
 0x6a9   : > { %737 = vst.msk [vmem:[%s258_s29] sm:$0x1] %vm730_vm6, %v736_v10 }
 0x6aa   : > { %1042 = shalt.err (!%p1039_p3)
}
 0x6ab   : > { %s1043_s17 = scalar_lea.hbm %s1328_s12, 16  ;;  %s1047_s20 = scalar_lea.hbm %s1376_s6, 32 }
 0x6ac   : > { %p1044_p4 = scmp.ne.s32.totalorder %s1328_s12, %s1043_s17  ;;  %p1048_p9 = scmp.lt.u32.totalorder %s1328_s12, %s1376_s6 }
 0x6ad   : > { %p1049_p10 = scmp.lt.u32.totalorder %s1047_s20, %s1043_s17  ;;  %p1051_p12 = scmp.lt.u32.totalorder %s1043_s17, %s1328_s12 }
 0x6ae   : > { %p1045_p7 = pnand %p1044_p4, %p1175_p5 }
 0x6af   : > { %p1050_p11 = por %p1049_p10, %p1048_p9 }
 0x6b0   : > { %p1046_p8 = pneg %p1045_p7 }
 0x6b1   : > { %p1052_p13 = por %p1051_p12, %p1050_p11 }
 0x6b3   : > { %p1053_p0 = pnand %p1052_p13, %p1046_p8 }
 0x6b5   : > { %1056 = shalt.err (!%p1053_p0)
}
 0x6b6   : > { %953 = dma.vmem_to_hbm [thread:$0]  (%p1175_p5), %s1330_s9, 16, %s1328_s12, %s739_s13  }
 0x6b7 PF: > { %p959_p1 = scmp.ge.s32.totalorder %s1091_s24, 2  ;;  %s763_s29 = sand.u32 1, %s1079_s21  }
 0x6b8   : > { %s764_s10 = scalar_lea.sflag [#allocation3], %s763_s29 }
 0x6b9   : > { %p956_p2 = pnand %p959_p1, %p1179_p6 }
 0x6bb   : > { %1074 = dma.done.wait (!%p956_p2), %s764_s10, 16  }
 0x6bc   : > { %1076 = vsyncadd (!%p956_p2), %s764_s10, 4294967280  ;;  %p16_p3 = scmp.ge.s32.totalorder %s1162_s27, 4   ;;  %s1379_s21 = smov %s1083_s22 }
 0x6bd   : > { %s1380_s22 = smov %s1087_s23  ;;  %s1381_s23 = smov %s1173_s30 }
 0x6be   : > { %s1382_s24 = smov %s1162_s27  ;;  %18 = sbr.rel (!%p16_p3) target bundleno = 3 (0x3), region = 82 }
 0x6c5   :  { %768 = vsyncpa [#allocation3], 1 }
 0x6c6   :  { %770 = vsyncpa [#allocation3 + $0x1], 1 }

// kernel: kppr_forward.10
= control target key start
LH: loop header
LB: loop body
LE: loop exit
PB: predicated region body
PF: predicated region fallthrough
CT: control target
= control target key end

     0   :  { %vm125_vm0 = vcmask 23552   ;;  %v7192_v3 = vmov 0   ;;  %s4130_s27 = smov 16   ;;  %s4131_s28 = smov 32   ;;  %s7179_s0 = inlined_call_operand.vmem [shape: f32[32,8,3], index: 0, kind: input, shape index: {}]   ;;  %s7180_s3 = inlined_call_operand.vmem [shape: f32[3,5], index: 3, kind: input, shape index: {}]   ;;  %s7181_s4 = inlined_call_operand.vmem [shape: f32[1,5], index: 4, kind: input, shape index: {}]   ;;  %s7182_s1 = inlined_call_operand.vmem [shape: f32[32,8,16], index: 1, kind: input, shape index: {}]   ;;  %s7183_s5 = inlined_call_operand.vmem [shape: f32[80,16], index: 5, kind: input, shape index: {}]   ;;  %s7184_s6 = inlined_call_operand.vmem [shape: f32[16,32], index: 6, kind: input, shape index: {}]   ;;  %s7185_s7 = inlined_call_operand.vmem [shape: f32[1,32], index: 7, kind: input, shape index: {}]   ;;  %s7186_s2 = inlined_call_operand.vmem [shape: f32[32,32], index: 2, kind: input, shape index: {}]   ;;  %s7187_s8 = inlined_call_operand.vmem [shape: f32[32,32], index: 8, kind: output, shape index: {}]  }
   0x1   :  { %v4182_v0 = vld [vmem:[%s7179_s0 + $0x10] sm:$0xff]  ;;  %v4187_v1 = vld [vmem:[%s7179_s0] sm:$0xff]  ;;  %v4192_v2 = vld [vmem:[%s7179_s0 + $0x18] sm:$0xff]  ;;  %3957 = vset.pattern.permute.xlu1 %v7192_v3  ;;  %3956 = vset.pattern.permute.xlu0 %v7192_v3  ;;  %s4132_s29 = smov 48  }
   0x2   :  { %v95_v4 = vmul.f32 %v4182_v0, %v4182_v0  ;;  %v93_v5 = vmul.f32 %v4187_v1, %v4187_v1  ;;  %v96_v6 = vmul.f32 %v4192_v2, %v4192_v2  ;;  %v4205_v7 = vld [vmem:[%s7179_s0 + $0x8] sm:$0xff]  ;;  %v4217_v10 = vld [vmem:[%s7179_s0 + $0x20] sm:$0xff]  ;;  %v4230_v17 = vld [vmem:[%s7179_s0 + $0x38] sm:$0xff] }
   0x3   :  { %v94_v8 = vmul.f32 %v4205_v7, %v4205_v7  ;;  %v4212_v9 = vld [vmem:[%s7179_s0 + $0x28] sm:$0xff]  ;;  %v97_v16 = vmul.f32 %v4217_v10, %v4217_v10  ;;  %v4235_v18 = vld [vmem:[%s7179_s0 + $0x30] sm:$0xff]  ;;  %v100_v21 = vmul.f32 %v4230_v17, %v4230_v17  ;;  %v4251_v24 = vld [vmem:[%s7179_s0 + $0x40] sm:$0xff] }
   0x4   :  { %v132_v11 = vsel %vm125_vm0, %v95_v4, 0.0  ;;  %v126_v12 = vsel %vm125_vm0, %v93_v5, 0.0  ;;  %v135_v13 = vsel %vm125_vm0, %v96_v6, 0.0  ;;  %v98_v15 = vmul.f32 %v4212_v9, %v4212_v9  ;;  %v4246_v23 = vld [vmem:[%s7179_s0 + $0x48] sm:$0xff]  ;;  %v4262_v29 = vld [vmem:[%s7179_s0 + $0x58] sm:$0xff]  ;;  %v4267_v30 = vld [vmem:[%s7179_s0 + $0x50] sm:$0xff] }
   0x5   :  { %133 = vadd.xlane.f32.xlu1 %v132_v11  ;;  %127 = vadd.xlane.f32.xlu0 %v126_v12  ;;  %v129_v14 = vsel %vm125_vm0, %v94_v8, 0.0  ;;  %v138_v20 = vsel %vm125_vm0, %v97_v16, 0.0  ;;  %v99_v22 = vmul.f32 %v4235_v18, %v4235_v18  ;;  %v147_v25 = vsel %vm125_vm0, %v100_v21, 0.0  ;;  %v4278_v35 = vld [vmem:[%s7179_s0 + $0x68] sm:$0xff]  ;;  %v4283_v36 = vld [vmem:[%s7179_s0 + $0x60] sm:$0xff]  ;;  %v4294_v41 = vld [vmem:[%s7179_s0 + $0x78] sm:$0xff] }
   0x6   :  { %v141_v19 = vsel %vm125_vm0, %v98_v15, 0.0  ;;  %v102_v27 = vmul.f32 %v4246_v23, %v4246_v23  ;;  %v101_v28 = vmul.f32 %v4251_v24, %v4251_v24  ;;  %v104_v33 = vmul.f32 %v4262_v29, %v4262_v29  ;;  %v4299_v42 = vld [vmem:[%s7179_s0 + $0x70] sm:$0xff]  ;;  %v4310_v47 = vld [vmem:[%s7179_s0 + $0x88] sm:$0xff]  ;;  %v4315_v48 = vld [vmem:[%s7179_s0 + $0x80] sm:$0xff] }
   0x7   :  { %v144_v26 = vsel %vm125_vm0, %v99_v22, 0.0  ;;  %v103_v34 = vmul.f32 %v4267_v30, %v4267_v30  ;;  %v106_v39 = vmul.f32 %v4278_v35, %v4278_v35  ;;  %v105_v40 = vmul.f32 %v4283_v36, %v4283_v36  ;;  %v4326_v53 = vld [vmem:[%s7179_s0 + $0x98] sm:$0xff]  ;;  %v4331_v54 = vld [vmem:[%s7179_s0 + $0x90] sm:$0xff]  ;;  %v4342_v59 = vld [vmem:[%s7179_s0 + $0xa8] sm:$0xff] }
   0x8   :  { %v153_v31 = vsel %vm125_vm0, %v102_v27, 0.0  ;;  %v150_v32 = vsel %vm125_vm0, %v101_v28, 0.0  ;;  %v159_v37 = vsel %vm125_vm0, %v104_v33, 0.0  ;;  %v108_v45 = vmul.f32 %v4294_v41, %v4294_v41  ;;  %v4347_v60 = vld [vmem:[%s7179_s0 + $0xa0] sm:$0xff]  ;;  %v4358_v5 = vld [vmem:[%s7179_s0 + $0xb8] sm:$0xff]  ;;  %v4363_v6 = vld [vmem:[%s7179_s0 + $0xb0] sm:$0xff] }
   0x9   :  { %136 = vadd.xlane.f32.xlu1 %v135_v13  ;;  %130 = vadd.xlane.f32.xlu0 %v129_v14  ;;  %v156_v38 = vsel %vm125_vm0, %v103_v34, 0.0  ;;  %v165_v43 = vsel %vm125_vm0, %v106_v39, 0.0  ;;  %v162_v44 = vsel %vm125_vm0, %v105_v40, 0.0  ;;  %v107_v46 = vmul.f32 %v4299_v42, %v4299_v42  ;;  %v4374_v14 = vld [vmem:[%s7179_s0 + $0xc8] sm:$0xff]  ;;  %v4379_v15 = vld [vmem:[%s7179_s0 + $0xc0] sm:$0xff]  ;;  %v4390_v22 = vld [vmem:[%s7179_s0 + $0xd8] sm:$0xff] }
   0xa   :  { %v171_v49 = vsel %vm125_vm0, %v108_v45, 0.0  ;;  %v110_v51 = vmul.f32 %v4310_v47, %v4310_v47  ;;  %v109_v52 = vmul.f32 %v4315_v48, %v4315_v48  ;;  %v112_v57 = vmul.f32 %v4326_v53, %v4326_v53  ;;  %v4411_v33 = vld [vmem:[%s7179_s0 + $0xe0] sm:$0xff]  ;;  %v4422_v40 = vld [vmem:[%s7179_s0 + $0xf8] sm:$0xff] }
   0xb   :  { %v168_v50 = vsel %vm125_vm0, %v107_v46, 0.0  ;;  %v111_v58 = vmul.f32 %v4331_v54, %v4331_v54  ;;  %v114_v63 = vmul.f32 %v4342_v59, %v4342_v59  ;;  %v113_v4 = vmul.f32 %v4347_v60, %v4347_v60 }
   0xc   :  { %v177_v55 = vsel %vm125_vm0, %v110_v51, 0.0  ;;  %v174_v56 = vsel %vm125_vm0, %v109_v52, 0.0  ;;  %v183_v61 = vsel %vm125_vm0, %v112_v57, 0.0  ;;  %v116_v12 = vmul.f32 %v4358_v5, %v4358_v5 }
   0xd   :  { %142 = vadd.xlane.f32.xlu1 %v141_v19  ;;  %139 = vadd.xlane.f32.xlu0 %v138_v20  ;;  %v180_v62 = vsel %vm125_vm0, %v111_v58, 0.0  ;;  %v189_v8 = vsel %vm125_vm0, %v114_v63, 0.0  ;;  %v186_v11 = vsel %vm125_vm0, %v113_v4, 0.0  ;;  %v115_v13 = vmul.f32 %v4363_v6, %v4363_v6 }
   0xe   :  { %v195_v16 = vsel %vm125_vm0, %v116_v12, 0.0  ;;  %v118_v20 = vmul.f32 %v4374_v14, %v4374_v14  ;;  %v117_v21 = vmul.f32 %v4379_v15, %v4379_v15  ;;  %v120_v28 = vmul.f32 %v4390_v22, %v4390_v22 }
   0xf   :  { %v192_v19 = vsel %vm125_vm0, %v115_v13, 0.0  ;;  %v121_v39 = vmul.f32 %v4411_v33, %v4411_v33  ;;  %v124_v46 = vmul.f32 %v4422_v40, %v4422_v40  ;;  %v7188_v52 = vmov 2  }
  0x10   :  { %v198_v27 = vsel %vm125_vm0, %v117_v21, 0.0  ;;  %v207_v34 = vsel %vm125_vm0, %v120_v28, 0.0  ;;  %v7190_v4 = vmov 1  }
  0x11   :  { %148 = vadd.xlane.f32.xlu1 %v147_v25  ;;  %145 = vadd.xlane.f32.xlu0 %v144_v26  ;;  %v4395_v25 = vld [vmem:[%s7179_s0 + $0xd0] sm:$0xff]  ;;  %v201_v26 = vsel %vm125_vm0, %v118_v20, 0.0  ;;  %v210_v45 = vsel %vm125_vm0, %v121_v39, 0.0 }
  0x15   :  { %154 = vadd.xlane.f32.xlu1 %v153_v31  ;;  %151 = vadd.xlane.f32.xlu0 %v150_v32  ;;  %v119_v31 = vmul.f32 %v4395_v25, %v4395_v25  ;;  %v4406_v32 = vld [vmem:[%s7179_s0 + $0xe8] sm:$0xff] }
  0x19   :  { %160 = vadd.xlane.f32.xlu1 %v159_v37  ;;  %157 = vadd.xlane.f32.xlu0 %v156_v38  ;;  %v204_v37 = vsel %vm125_vm0, %v119_v31, 0.0  ;;  %v122_v38 = vmul.f32 %v4406_v32, %v4406_v32 }
  0x1d   :  { %166 = vadd.xlane.f32.xlu1 %v165_v43  ;;  %163 = vadd.xlane.f32.xlu0 %v162_v44  ;;  %v4427_v43 = vld [vmem:[%s7179_s0 + $0xf0] sm:$0xff]  ;;  %v213_v44 = vsel %vm125_vm0, %v122_v38, 0.0 }
  0x21   :  { %172 = vadd.xlane.f32.xlu1 %v171_v49  ;;  %169 = vadd.xlane.f32.xlu0 %v168_v50  ;;  %v123_v49 = vmul.f32 %v4427_v43, %v4427_v43  ;;  %v219_v50 = vsel %vm125_vm0, %v124_v46, 0.0 }
  0x23   :  { %v216_v51 = vsel %vm125_vm0, %v123_v49, 0.0 }
  0x25   :  { %178 = vadd.xlane.f32.xlu1 %v177_v55  ;;  %175 = vadd.xlane.f32.xlu0 %v174_v56 }
  0x29   :  { %184 = vadd.xlane.f32.xlu1 %v183_v61  ;;  %181 = vadd.xlane.f32.xlu0 %v180_v62 }
  0x2d   :  { %190 = vadd.xlane.f32.xlu1 %v189_v8  ;;  %187 = vadd.xlane.f32.xlu0 %v186_v11 }
  0x31   :  { %196 = vadd.xlane.f32.xlu1 %v195_v16  ;;  %193 = vadd.xlane.f32.xlu0 %v192_v19 }
  0x35   :  { %202 = vadd.xlane.f32.xlu1 %v201_v26  ;;  %199 = vadd.xlane.f32.xlu0 %v198_v27 }
  0x39   :  { %208 = vadd.xlane.f32.xlu1 %v207_v34  ;;  %205 = vadd.xlane.f32.xlu0 %v204_v37 }
  0x3d   :  { %214 = vadd.xlane.f32.xlu1 %v213_v44  ;;  %211 = vadd.xlane.f32.xlu0 %v210_v45 }
  0x41   :  { %220 = vadd.xlane.f32.xlu1 %v219_v50  ;;  %217 = vadd.xlane.f32.xlu0 %v216_v51 }
  0x52   :  { %230 = vperm.xlu1 %3957, %v4205_v7  }
  0x56   :  { %235 = vperm.xlu1 %3957, %v4182_v0  }
  0x57   :  { %225 = vperm.xlu0 %3956, %v4187_v1  }
  0x5a   :  { %240 = vperm.xlu1 %3957, %v4192_v2  }
  0x5b   :  { %270 = vperm.xlu0 %3956, %v4246_v23  }
  0x5e   :  { %245 = vperm.xlu1 %3957, %v4217_v10  }
  0x5f   :  { %280 = vperm.xlu0 %3956, %v4262_v29  }
  0x62   :  { %250 = vperm.xlu1 %3957, %v4212_v9  }
  0x63   :  { %290 = vperm.xlu0 %3956, %v4278_v35  }
  0x66   :  { %255 = vperm.xlu1 %3957, %v4235_v18  }
  0x67   :  { %300 = vperm.xlu0 %3956, %v4294_v41  }
  0x6a   :  { %260 = vperm.xlu1 %3957, %v4230_v17  }
  0x6b   :  { %310 = vperm.xlu0 %3956, %v4310_v47  }
  0x6e   :  { %265 = vperm.xlu1 %3957, %v4251_v24  }
  0x6f   :  { %320 = vperm.xlu0 %3956, %v4326_v53  }
  0x72   :  { %275 = vperm.xlu1 %3957, %v4267_v30  }
  0x73   :  { %330 = vperm.xlu0 %3956, %v4342_v59  }
  0x76   :  { %285 = vperm.xlu1 %3957, %v4283_v36  }
  0x77   :  { %340 = vperm.xlu0 %3956, %v4358_v5  }
  0x7a   :  { %295 = vperm.xlu1 %3957, %v4299_v42  }
  0x7b   :  { %350 = vperm.xlu0 %3956, %v4374_v14  }
  0x7e   :  { %305 = vperm.xlu1 %3957, %v4315_v48  }
  0x7f   :  { %360 = vperm.xlu0 %3956, %v4390_v22  }
  0x82   :  { %315 = vperm.xlu1 %3957, %v4331_v54  }
  0x83   :  { %370 = vperm.xlu0 %3956, %v4406_v32  }
  0x86   :  { %325 = vperm.xlu1 %3957, %v4347_v60  }
  0x87   :  { %380 = vperm.xlu0 %3956, %v4422_v40  }
  0x8a   :  { %335 = vperm.xlu1 %3957, %v4363_v6  }
  0x8b   :  { %3959 = vset.pattern.permute.xlu0 %v7188_v52 }
  0x8c   :  { %618 = vperm.xlu0 %3959, %v4187_v1  }
  0x8e   :  { %345 = vperm.xlu1 %3957, %v4379_v15  }
  0x90   :  { %630 = vperm.xlu0 %3959, %v4192_v2  }
  0x92   :  { %v4469_v55 = vpop.xlane.xlu1 %133  ;;  %355 = vperm.xlu1 %3957, %v4395_v25   ;;  %v4472_v56 = vpop.xlane.xlu0 %127 }
  0x94   :  { %638 = vperm.xlu0 %3959, %v4212_v9  }
  0x96   :  { %v4475_v57 = vpop.xlane.xlu1 %136  ;;  %365 = vperm.xlu1 %3957, %v4411_v33   ;;  %v4478_v58 = vpop.xlane.xlu0 %130 }
  0x98   :  { %646 = vperm.xlu0 %3959, %v4230_v17  }
  0x9a   :  { %v4481_v61 = vpop.xlane.xlu1 %142  ;;  %375 = vperm.xlu1 %3957, %v4427_v43   ;;  %v4484_v62 = vpop.xlane.xlu0 %139 }
  0x9b   :  { %7261 = vst [vmem:[#allocation2_spill] sm:$0xff] %v4484_v62 }
  0x9c   :  { %654 = vperm.xlu0 %3959, %v4246_v23  }
  0x9e   :  { %v4487_v63 = vpop.xlane.xlu1 %148  ;;  %3958 = vset.pattern.permute.xlu1 %v7190_v4  ;;  %v4490_v8 = vpop.xlane.xlu0 %145 }
  0x9f   :  { %421 = vperm.xlu1 %3958, %v4187_v1  }
  0xa0   :  { %662 = vperm.xlu0 %3959, %v4262_v29  }
  0xa2   :  { %v4494_v11 = vpop.xlane.xlu1 %154  ;;  %v4496_v12 = vpop.xlane.xlu0 %151 }
  0xa3   :  { %429 = vperm.xlu1 %3958, %v4182_v0  }
  0xa4   :  { %670 = vperm.xlu0 %3959, %v4278_v35  }
  0xa6   :  { %v4500_v13 = vpop.xlane.xlu1 %160  ;;  %v4502_v16 = vpop.xlane.xlu0 %157 }
  0xa7   :  { %433 = vperm.xlu1 %3958, %v4192_v2  }
  0xa8   :  { %678 = vperm.xlu0 %3959, %v4294_v41  }
  0xaa   :  { %v4506_v19 = vpop.xlane.xlu1 %166  ;;  %v4508_v1 = vpop.xlane.xlu0 %163 }
  0xab   :  { %7262 = vst [vmem:[#allocation3_spill] sm:$0xff] %v4508_v1  ;;  %441 = vperm.xlu1 %3958, %v4212_v9  }
  0xac   :  { %686 = vperm.xlu0 %3959, %v4310_v47  }
  0xae   :  { %v4512_v20 = vpop.xlane.xlu1 %172  ;;  %v4514_v21 = vpop.xlane.xlu0 %169 }
  0xaf   :  { %7263 = vst [vmem:[#allocation4_spill] sm:$0xff] %v4514_v21  ;;  %449 = vperm.xlu1 %3958, %v4230_v17  }
  0xb0   :  { %694 = vperm.xlu0 %3959, %v4326_v53  }
  0xb2   :  { %v4518_v26 = vpop.xlane.xlu1 %178  ;;  %v4520_v2 = vpop.xlane.xlu0 %175 }
  0xb3   :  { %457 = vperm.xlu1 %3958, %v4246_v23  }
  0xb4   :  { %702 = vperm.xlu0 %3959, %v4342_v59  }
  0xb6   :  { %v4524_v27 = vpop.xlane.xlu1 %184  ;;  %v4526_v9 = vpop.xlane.xlu0 %181 }
  0xb7   :  { %7264 = vst [vmem:[#allocation5_spill] sm:$0xff] %v4526_v9  ;;  %465 = vperm.xlu1 %3958, %v4262_v29  }
  0xb8   :  { %710 = vperm.xlu0 %3959, %v4358_v5  }
  0xba   :  { %v4530_v28 = vpop.xlane.xlu1 %190  ;;  %v4532_v17 = vpop.xlane.xlu0 %187 }
  0xbb   :  { %7265 = vst [vmem:[#allocation6_spill] sm:$0xff] %v4530_v28  ;;  %473 = vperm.xlu1 %3958, %v4278_v35  }
  0xbc   :  { %718 = vperm.xlu0 %3959, %v4374_v14  }
  0xbe   :  { %v4536_v31 = vpop.xlane.xlu1 %196  ;;  %v4538_v23 = vpop.xlane.xlu0 %193 }
  0xbf   :  { %7266 = vst [vmem:[#allocation7_spill] sm:$0xff] %v4536_v31  ;;  %7267 = vst [vmem:[#allocation8_spill] sm:$0xff] %v4538_v23  ;;  %481 = vperm.xlu1 %3958, %v4294_v41  }
  0xc0   :  { %726 = vperm.xlu0 %3959, %v4390_v22  }
  0xc2   :  { %v4542_v34 = vpop.xlane.xlu1 %202  ;;  %v4544_v29 = vpop.xlane.xlu0 %199 }
  0xc3   :  { %7268 = vst [vmem:[#allocation9_spill] sm:$0xff] %v4542_v34  ;;  %489 = vperm.xlu1 %3958, %v4310_v47  }
  0xc4   :  { %734 = vperm.xlu0 %3959, %v4406_v32  }
  0xc6   :  { %v4548_v37 = vpop.xlane.xlu1 %208  ;;  %v4550_v35 = vpop.xlane.xlu0 %205 }
  0xc7   :  { %7269 = vst [vmem:[#allocation10_spill] sm:$0xff] %v4548_v37  ;;  %497 = vperm.xlu1 %3958, %v4326_v53  }
  0xc8   :  { %742 = vperm.xlu0 %3959, %v4422_v40  }
  0xca   :  { %v4554_v38 = vpop.xlane.xlu1 %214  ;;  %v4556_v41 = vpop.xlane.xlu0 %211 }
  0xcb   :  { %505 = vperm.xlu1 %3958, %v4342_v59  }
  0xcc   :  { %3961 = vset.pattern.permute.xlu0 %v7190_v4 }
  0xcd   :  { %425 = vperm.xlu0 %3961, %v4205_v7  }
  0xce   :  { %v4561_v47 = vpop.xlane.xlu1 %220  ;;  %v4564_v39 = vpop.xlane.xlu0 %217 }
  0xcf   :  { %7270 = vst [vmem:[#allocation11_spill] sm:$0xff] %v4561_v47  ;;  %513 = vperm.xlu1 %3958, %v4358_v5  }
  0xd1   :  { %437 = vperm.xlu0 %3961, %v4217_v10  }
  0xd2   :  { %v4567_v53 = vpop.permute.xlu1 %230 }
  0xd3   :  { %521 = vperm.xlu1 %3958, %v4374_v14  }
  0xd5   :  { %445 = vperm.xlu0 %3961, %v4235_v18  }
  0xd6   :  { %v4571_v44 = vpop.permute.xlu1 %235  ;;  %v4573_v59 = vpop.permute.xlu0 %225 }
  0xd7   :  { %529 = vperm.xlu1 %3958, %v4390_v22  }
  0xd9   :  { %453 = vperm.xlu0 %3961, %v4251_v24  }
  0xda   :  { %v4577_v45 = vpop.permute.xlu1 %240  ;;  %v4579_v5 = vpop.permute.xlu0 %270 }
  0xdb   :  { %537 = vperm.xlu1 %3958, %v4406_v32  }
  0xdd   :  { %461 = vperm.xlu0 %3961, %v4267_v30  }
  0xde   :  { %v4583_v46 = vpop.permute.xlu1 %245  ;;  %v4585_v14 = vpop.permute.xlu0 %280 }
  0xdf   :  { %545 = vperm.xlu1 %3958, %v4422_v40  }
  0xe1   :  { %469 = vperm.xlu0 %3961, %v4283_v36  }
  0xe2   :  { %v4589_v49 = vpop.permute.xlu1 %250  ;;  %v4591_v22 = vpop.permute.xlu0 %290 }
  0xe3   :  { %3960 = vset.pattern.permute.xlu1 %v7188_v52 }
  0xe4   :  { %622 = vperm.xlu1 %3960, %v4205_v7  }
  0xe5   :  { %477 = vperm.xlu0 %3961, %v4299_v42  }
  0xe6   :  { %v4596_v32 = vpop.permute.xlu1 %255  ;;  %v4598_v50 = vpop.permute.xlu0 %300 }
  0xe7   :  { %7271 = vst [vmem:[#allocation12_spill] sm:$0xff] %v4596_v32 }
  0xe8   :  { %626 = vperm.xlu1 %3960, %v4182_v0  }
  0xe9   :  { %485 = vperm.xlu0 %3961, %v4315_v48  }
  0xea   :  { %v4602_v40 = vpop.permute.xlu1 %260  ;;  %v4604_v51 = vpop.permute.xlu0 %310 }
  0xec   :  { %634 = vperm.xlu1 %3960, %v4217_v10  }
  0xed   :  { %493 = vperm.xlu0 %3961, %v4331_v54  }
  0xee   :  { %v4608_v52 = vpop.permute.xlu1 %265  ;;  %v4610_v7 = vpop.permute.xlu0 %320 }
  0xef   :  { %7272 = vst [vmem:[#allocation13_spill] sm:$0xff] %v4608_v52  ;;  %7273 = vst [vmem:[#allocation14_spill] sm:$0xff] %v4610_v7 }
  0xf0   :  { %642 = vperm.xlu1 %3960, %v4235_v18  }
  0xf1   :  { %501 = vperm.xlu0 %3961, %v4347_v60  }
  0xf2   :  { %v4614_v4 = vpop.permute.xlu1 %275  ;;  %v4616_v0 = vpop.permute.xlu0 %330 }
  0xf3   :  { %7274 = vst [vmem:[#allocation15_spill] sm:$0xff] %v4614_v4  ;;  %7275 = vst [vmem:[#allocation16_spill] sm:$0xff] %v4616_v0 }
  0xf4   :  { %650 = vperm.xlu1 %3960, %v4251_v24  }
  0xf5   :  { %509 = vperm.xlu0 %3961, %v4363_v6  }
  0xf6   :  { %v4620_v3 = vpop.permute.xlu1 %285  ;;  %v4622_v10 = vpop.permute.xlu0 %340 }
  0xf7   :  { %7276 = vst [vmem:[#allocation17_spill] sm:$0xff] %v4620_v3  ;;  %7277 = vst [vmem:[#allocation18_spill] sm:$0xff] %v4622_v10  ;;  %v4701_v3 = vld [vmem:[%s7181_s4] ss:$0 sm:$0xff] }
  0xf8   :  { %658 = vperm.xlu1 %3960, %v4267_v30  }
  0xf9   :  { %517 = vperm.xlu0 %3961, %v4379_v15  }
  0xfa   :  { %v4626_v23 = vpop.permute.xlu1 %295  ;;  %v4628_v18 = vpop.permute.xlu0 %350 }
  0xfb   :  { %7278 = vst [vmem:[#allocation19_spill] sm:$0xff] %v4626_v23  ;;  %7279 = vst [vmem:[#allocation20_spill] sm:$0xff] %v4628_v18 }
  0xfc   :  { %666 = vperm.xlu1 %3960, %v4283_v36  }
  0xfd   :  { %525 = vperm.xlu0 %3961, %v4395_v25  }
  0xfe   :  { %v4632_v47 = vpop.permute.xlu1 %305  ;;  %v4634_v24 = vpop.permute.xlu0 %360 }
  0xff   :  { %7280 = vst [vmem:[#allocation21_spill] sm:$0xff] %v4632_v47  ;;  %7281 = vst [vmem:[#allocation22_spill] sm:$0xff] %v4634_v24 }
 0x100   :  { %674 = vperm.xlu1 %3960, %v4299_v42  }
 0x101   :  { %533 = vperm.xlu0 %3961, %v4411_v33  }
 0x102   :  { %v4638_v31 = vpop.permute.xlu1 %315  ;;  %v4640_v30 = vpop.permute.xlu0 %370 }
 0x103   :  { %7282 = vst [vmem:[#allocation23_spill] sm:$0xff] %v4638_v31  ;;  %7283 = vst [vmem:[#allocation24_spill] sm:$0xff] %v4640_v30 }
 0x104   :  { %682 = vperm.xlu1 %3960, %v4315_v48  }
 0x105   :  { %541 = vperm.xlu0 %3961, %v4427_v43  }
 0x106   :  { %v4644_v37 = vpop.permute.xlu1 %325  ;;  %v4646_v36 = vpop.permute.xlu0 %380 }
 0x107   :  { %7284 = vst [vmem:[#allocation25_spill] sm:$0xff] %v4644_v37  ;;  %7285 = vst [vmem:[#allocation26_spill] sm:$0xff] %v4646_v36 }
 0x108   :  { %690 = vperm.xlu1 %3960, %v4331_v54  }
 0x10a   :  { %v4649_v21 = vpop.permute.xlu1 %335 }
 0x10b   :  { %7286 = vst [vmem:[#allocation27_spill] sm:$0xff] %v4649_v21  ;;  %v619_v9 = vpop.permute.xlu0 %618 }
 0x10c   :  { %698 = vperm.xlu1 %3960, %v4347_v60  }
 0x10e   :  { %v4652_v42 = vpop.permute.xlu1 %345 }
 0x10f   :  { %7287 = vst [vmem:[#allocation28_spill] sm:$0xff] %v4652_v42  ;;  %v4654_v10 = vpop.permute.xlu0 %630 }
 0x110   :  { %706 = vperm.xlu1 %3960, %v4363_v6   ;;  %v4674_v6 = vld [vmem:[%s7180_s3 + $0x2] ss:$0 sm:$0xff] }
 0x111   :  { %v749_v31 = vmul.f32 %v4674_v6, %v619_v9  ;;  %v820_v9 = vadd.f32 %v4701_v3, %v4472_v56 }
 0x112   :  { %v4657_v48 = vpop.permute.xlu1 %355 }
 0x113   :  { %7288 = vst [vmem:[#allocation29_spill] sm:$0xff] %v4657_v48  ;;  %v4659_v34 = vpop.permute.xlu0 %638 }
 0x114   :  { %714 = vperm.xlu1 %3960, %v4379_v15   ;;  %v4680_v15 = vld [vmem:[%s7180_s3 + $0x1] ss:$0 sm:$0xff] }
 0x116   :  { %v4662_v36 = vpop.permute.xlu1 %365 }
 0x117   :  { %7289 = vst [vmem:[#allocation30_spill] sm:$0xff] %v4662_v36  ;;  %v4664_v54 = vpop.permute.xlu0 %646 }
 0x118   :  { %722 = vperm.xlu1 %3960, %v4395_v25   ;;  %v4685_v25 = vld [vmem:[%s7180_s3] ss:$0 sm:$0xff] }
 0x119   :  { %v387_v23 = vmul.f32 %v4685_v25, %v4573_v59  ;;  %v7291_v59 = vmov 0  }
 0x11a   :  { %v4667_v21 = vpop.permute.xlu1 %375 }
 0x11b   :  { %7290 = vst [vmem:[#allocation31_spill] sm:$0xff] %v4667_v21  ;;  %v4669_v60 = vpop.permute.xlu0 %654 }
 0x11c   :  { %730 = vperm.xlu1 %3960, %v4411_v33  }
 0x11e   :  { %v422_v24 = vpop.permute.xlu1 %421 }
 0x11f   :  { %v552_v18 = vmul.f32 %v4680_v15, %v422_v24  ;;  %v4691_v28 = vpop.permute.xlu0 %662 }
 0x120   :  { %738 = vperm.xlu1 %3960, %v4427_v43  }
 0x121   :  { %v584_v33 = vadd.f32 %v552_v18, %v387_v23 }
 0x122   :  { %v4694_v0 = vpop.permute.xlu1 %429 }
 0x123   :  { %v781_v1 = vadd.f32 %v749_v31, %v584_v33  ;;  %v4696_v62 = vpop.permute.xlu0 %670 }
 0x124   :  { %3962 = vset.pattern.permute.xlu1 %v7291_v59 }
 0x125   :  { %v852_v24 = vmul.f32 2.0, %v781_v1 }
 0x126   :  { %v434_v21 = vpop.permute.xlu1 %433 }
 0x127   :  { %v884_v36 = vsub.f32 %v820_v9, %v852_v24  ;;  %v4706_v43 = vpop.permute.xlu0 %678 }
 0x129   :  { %v916_v23 = vmax.f32 %v884_v36, 0.0 }
 0x12a   :  { %v442_v18 = vpop.permute.xlu1 %441 }
 0x12b   :  { %4014 = vrsqrt.f32 %v916_v23  ;;  %v4708_v31 = vpop.permute.xlu0 %686  ;;  %vm950_vm1 = vcmp.eq.f32.partialorder %v916_v23, inf  ;;  %v953_v1 = vand.u32 2147483648, %v916_v23  ;;  %vm952_vm2 = vcmp.eq.f32.partialorder %v916_v23, 0.0 }
 0x12c   :  { %7292 = vst [vmem:[#allocation32_spill] sm:$0xff] %v4708_v31 }
 0x12e   :  { %v450_v33 = vpop.permute.xlu1 %449 }
 0x12f   :  { %v4710_v48 = vpop.permute.xlu0 %694 }
 0x130   :  { %7293 = vst [vmem:[#allocation33_spill] sm:$0xff] %v4710_v48 }
 0x132   :  { %v458_v42 = vpop.permute.xlu1 %457 }
 0x133   :  { %v4712_v37 = vpop.permute.xlu0 %702 }
 0x134   :  { %7294 = vst [vmem:[#allocation34_spill] sm:$0xff] %v4712_v37 }
 0x135   :  { %v4015_v59 = vpop.eup %4014 }
 0x136   :  { %v466_v30 = vpop.permute.xlu1 %465  ;;  %v949_v47 = vmul.f32 %v4015_v59, %v916_v23 }
 0x137   :  { %v4714_v56 = vpop.permute.xlu0 %710 }
 0x138   :  { %7295 = vst [vmem:[#allocation35_spill] sm:$0xff] %v4714_v56  ;;  %v951_v9 = vsel %vm950_vm1, %v916_v23, %v949_v47  ;;  %v555_v23 = vmul.f32 %v4680_v15, %v434_v21 }
 0x139   :  { %v954_v36 = vsel %vm952_vm2, %v953_v1, %v951_v9 }
 0x13a   :  { %v474_v24 = vpop.permute.xlu1 %473  ;;  %v1173_v4 = vmul.f32 0.8333333, %v954_v36 }
 0x13b   :  { %v4716_v7 = vpop.permute.xlu0 %718 }
 0x13c   :  { %7296 = vst [vmem:[#allocation36_spill] sm:$0xff] %v4716_v7  ;;  %v1205_v52 = vsub.f32 1.0, %v1173_v4  ;;  %v390_v4 = vmul.f32 %v4685_v25, %v4577_v45 }
 0x13e   :  { %v4718_v32 = vpop.permute.xlu1 %481  ;;  %v4720_v48 = vmax.f32 %v1205_v52, 0.0  ;;  %v752_v52 = vmul.f32 %v4674_v6, %v4654_v10  ;;  %v587_v36 = vadd.f32 %v555_v23, %v390_v4 }
 0x13f   :  { %v4722_v37 = vpop.permute.xlu0 %726 }
 0x140   :  { %7297 = vst [vmem:[#allocation37_spill] sm:$0xff] %v4720_v48  ;;  %7298 = vst [vmem:[#allocation38_spill] sm:$0xff] %v4722_v37  ;;  %1271 = vperm.xlu1 %3962, %v4720_v48   ;;  %v557_v37 = vmul.f32 %v4680_v15, %v442_v18  ;;  %v561_v48 = vmul.f32 %v4680_v15, %v458_v42  ;;  %v784_v45 = vadd.f32 %v752_v52, %v587_v36 }
 0x141   :  { %v758_v18 = vmul.f32 %v4674_v6, %v4669_v60  ;;  %v565_v36 = vmul.f32 %v4680_v15, %v474_v24  ;;  %v400_v24 = vmul.f32 %v4685_v25, %v4591_v22 }
 0x142   :  { %v4725_v59 = vpop.permute.xlu1 %489  ;;  %v855_v4 = vmul.f32 2.0, %v784_v45  ;;  %v829_v45 = vadd.f32 %v4701_v3, %v4494_v11  ;;  %v762_v11 = vmul.f32 %v4674_v6, %v4696_v62  ;;  %v4821_v62 = vadd.f32 %v4701_v3, %v4506_v19 }
 0x143   :  { %v4727_v56 = vpop.permute.xlu0 %734  ;;  %v4839_v19 = vadd.f32 %v4701_v3, %v4520_v2  ;;  %v4855_v2 = vadd.f32 %v4701_v3, %v4532_v17 }
 0x144   :  { %7299 = vst [vmem:[#allocation39_spill] sm:$0xff] %v4727_v56  ;;  %v392_v56 = vmul.f32 %v4685_v25, %v4589_v49  ;;  %v559_v49 = vmul.f32 %v4680_v15, %v450_v33  ;;  %v563_v33 = vmul.f32 %v4680_v15, %v466_v30 }
 0x146   :  { %v4729_v47 = vpop.permute.xlu1 %497 }
 0x147   :  { %7300 = vst [vmem:[#allocation40_spill] sm:$0xff] %v4729_v47  ;;  %v4732_v1 = vpop.permute.xlu0 %742  ;;  %v589_v47 = vadd.f32 %v557_v37, %v392_v56 }
 0x148   :  { %7301 = vst [vmem:[#allocation41_spill] sm:$0xff] %v4732_v1  ;;  %v396_v1 = vmul.f32 %v4685_v25, %v4579_v5  ;;  %v823_v5 = vadd.f32 %v4701_v3, %v4475_v57  ;;  %v4773_v57 = vadd.f32 %v4701_v3, %v4469_v55 }
 0x14a   :  { %v4736_v9 = vpop.permute.xlu1 %505  ;;  %v593_v23 = vadd.f32 %v561_v48, %v396_v1  ;;  %v756_v48 = vmul.f32 %v4674_v6, %v4664_v54  ;;  %v887_v60 = vsub.f32 %v823_v5, %v855_v4  ;;  %v4779_v54 = vadd.f32 %v4701_v3, %v4478_v58 }
 0x14b   :  { %7302 = vst [vmem:[#allocation42_spill] sm:$0xff] %v4736_v9  ;;  %v754_v9 = vmul.f32 %v4674_v6, %v4659_v34  ;;  %v394_v34 = vmul.f32 %v4685_v25, %v4602_v40  ;;  %v825_v40 = vadd.f32 %v4701_v3, %v4481_v61  ;;  %v827_v61 = vadd.f32 %v4701_v3, %v4487_v63 }
 0x14c   :  { %v426_v7 = vpop.permute.xlu0 %425  ;;  %v790_v37 = vadd.f32 %v758_v18, %v593_v23  ;;  %v4789_v55 = vmax.f32 %v887_v60, 0.0  ;;  %v760_v58 = vmul.f32 %v4674_v6, %v4691_v28  ;;  %v597_v5 = vadd.f32 %v565_v36, %v400_v24 }
 0x14d   :  { %v591_v1 = vadd.f32 %v559_v49, %v394_v34  ;;  %v4799_v49 = vadd.f32 %v4701_v3, %v4490_v8  ;;  %v4805_v34 = vadd.f32 %v4701_v3, %v4500_v13  ;;  %v4809_v63 = vadd.f32 %v4701_v3, %v4496_v12 }
 0x14e   :  { %v4744_v21 = vpop.permute.xlu1 %513  ;;  %v4813_v28 = vadd.f32 %v4701_v3, %v4502_v16  ;;  %v567_v8 = vmul.f32 %v4680_v15, %v4718_v32  ;;  %v4825_v13 = vadd.f32 %v4701_v3, %v4512_v20  ;;  %4016 = vrsqrt.f32 %v4789_v55 }
 0x14f   :  { %7303 = vst [vmem:[#allocation43_spill] sm:$0xff] %v4744_v21  ;;  %v786_v21 = vadd.f32 %v754_v9, %v589_v47  ;;  %v861_v9 = vmul.f32 2.0, %v790_v37  ;;  %v788_v18 = vadd.f32 %v756_v48, %v591_v1  ;;  %v402_v16 = vmul.f32 %v4685_v25, %v4598_v50 }
 0x150   :  { %v4750_v10 = vpop.permute.xlu0 %437  ;;  %v553_v32 = vmul.f32 %v4680_v15, %v426_v7  ;;  %v4835_v1 = vadd.f32 %v4701_v3, %v4518_v26  ;;  %v388_v50 = vmul.f32 %v4685_v25, %v4567_v53  ;;  %v764_v7 = vmul.f32 %v4674_v6, %v4706_v43 }
 0x151   :  { %v857_v52 = vmul.f32 2.0, %v786_v21  ;;  %v398_v21 = vmul.f32 %v4685_v25, %v4585_v14  ;;  %v893_v22 = vsub.f32 %v829_v45, %v861_v9  ;;  %v859_v12 = vmul.f32 2.0, %v788_v18 }
 0x152   :  { %v4754_v42 = vpop.permute.xlu1 %521  ;;  %v599_v9 = vadd.f32 %v567_v8, %v402_v16  ;;  %v4859_v36 = vadd.f32 %v4701_v3, %v4544_v29  ;;  %v585_v43 = vadd.f32 %v553_v32, %v388_v50  ;;  %v4867_v24 = vadd.f32 %v4701_v3, %v4550_v35 }
 0x153   :  { %v889_v23 = vsub.f32 %v825_v40, %v857_v52  ;;  %v595_v4 = vadd.f32 %v563_v33, %v398_v21  ;;  %v4841_v20 = vmax.f32 %v893_v22, 0.0  ;;  %v794_v52 = vadd.f32 %v762_v11, %v597_v5 }
 0x154   :  { %v4757_v31 = vpop.permute.xlu0 %445  ;;  %v4845_v33 = vadd.f32 %v4701_v3, %v4524_v27  ;;  %v554_v27 = vmul.f32 %v4680_v15, %v4694_v0  ;;  %v891_v40 = vsub.f32 %v827_v61, %v859_v12  ;;  %v569_v29 = vmul.f32 %v4680_v15, %v4725_v59 }
 0x155   :  { %v4830_v48 = vmax.f32 %v889_v23, 0.0  ;;  %v792_v60 = vadd.f32 %v760_v58, %v595_v4  ;;  %v865_v17 = vmul.f32 2.0, %v794_v52  ;;  %v4874_v0 = vadd.f32 %v4701_v3, %v4554_v38  ;;  %v7307_v52 = vld [vmem:[#allocation40_spill] sm:$0xff] }
 0x156   :  { %v4763_v56 = vpop.permute.xlu1 %529  ;;  %v389_v18 = vmul.f32 %v4685_v25, %v4571_v44  ;;  %v796_v61 = vadd.f32 %v764_v7, %v599_v9  ;;  %v4880_v23 = vadd.f32 %v4701_v3, %v4556_v41  ;;  %v4884_v35 = vadd.f32 %v4701_v3, %v4564_v39  ;;  %v7306_v39 = vld [vmem:[#allocation32_spill] sm:$0xff] }
 0x157   :  { %7304 = vst [vmem:[#allocation44_spill] sm:$0xff] %v4763_v56  ;;  %4018 = vrsqrt.f32 %v4830_v48  ;;  %v863_v53 = vmul.f32 2.0, %v792_v60  ;;  %v404_v59 = vmul.f32 %v4685_v25, %v4604_v51  ;;  %v4888_v4 = vmax.f32 %v891_v40, 0.0  ;;  %v7308_v9 = vld [vmem:[#allocation12_spill] sm:$0xff]  ;;  %v7309_v40 = vld [vmem:[#allocation13_spill] sm:$0xff] }
 0x158   :  { %v4768_v47 = vpop.permute.xlu0 %453  ;;  %4020 = vrsqrt.f32 %v4841_v20  ;;  %v586_v11 = vadd.f32 %v554_v27, %v389_v18  ;;  %v4017_v41 = vpop.eup %4016  ;;  %v4896_v12 = vmul.f32 %v4685_v25, %v4583_v46  ;;  %v766_v16 = vmul.f32 %v4674_v6, %v7306_v39 }
 0x159   :  { %v895_v22 = vsub.f32 %v4805_v34, %v863_v53  ;;  %v897_v51 = vsub.f32 %v4821_v62, %v865_v17  ;;  %v601_v60 = vadd.f32 %v569_v29, %v404_v59  ;;  %v867_v32 = vmul.f32 2.0, %v796_v61  ;;  %v7311_v29 = vld [vmem:[#allocation15_spill] sm:$0xff]  ;;  %v7312_v61 = vld [vmem:[#allocation33_spill] sm:$0xff] }
 0x15a   :  { %v4783_v30 = vpop.permute.xlu1 %537  ;;  %v571_v34 = vmul.f32 %v4680_v15, %v7307_v52  ;;  %v393_v27 = vmul.f32 %v4685_v25, %v7308_v9  ;;  %v4908_v46 = vmul.f32 %v4685_v25, %v7309_v40  ;;  %4022 = vrsqrt.f32 %v4888_v4  ;;  %v7313_v52 = vld [vmem:[#allocation21_spill] sm:$0xff] }
 0x15b   :  { %v970_v17 = vmul.f32 %v4017_v41, %v4789_v55  ;;  %v4922_v18 = vmul.f32 %v4685_v25, %v7311_v29  ;;  %v4926_v59 = vmax.f32 %v897_v51, 0.0  ;;  %vm971_vm3 = vcmp.eq.f32.partialorder %v4789_v55, inf }
 0x15c   :  { %v4795_v14 = vpop.permute.xlu0 %461  ;;  %vm973_vm4 = vcmp.eq.f32.partialorder %v4789_v55, 0.0  ;;  %vm985_vm5 = vcmp.eq.f32.partialorder %v4830_v48, inf  ;;  %vm1013_vm6 = vcmp.eq.f32.partialorder %v4841_v20, inf  ;;  %vm987_vm7 = vcmp.eq.f32.partialorder %v4830_v48, 0.0 }
 0x15d   :  { %vm999_vm8 = vcmp.eq.f32.partialorder %v4888_v4, inf  ;;  %vm1015_vm9 = vcmp.eq.f32.partialorder %v4841_v20, 0.0  ;;  %vm1001_vm10 = vcmp.eq.f32.partialorder %v4888_v4, 0.0  ;;  %vm1041_vm1 = vcmp.eq.f32.partialorder %v4926_v59, inf }
 0x15e   :  { %v4817_v37 = vpop.permute.xlu1 %545  ;;  %vm1043_vm2 = vcmp.eq.f32.partialorder %v4926_v59, 0.0 }
 0x15f   :  { %7305 = vst [vmem:[#allocation45_spill] sm:$0xff] %v4817_v37 }
 0x160   :  { %v4851_v26 = vpop.permute.xlu0 %469 }
 0x163   :  { %v623_v21 = vpop.permute.xlu1 %622 }
 0x164   :  { %v750_v45 = vmul.f32 %v4674_v6, %v623_v21  ;;  %v4891_v5 = vpop.permute.xlu0 %477  ;;  %v7310_v21 = vld [vmem:[#allocation14_spill] sm:$0xff] }
 0x165   :  { %v406_v53 = vmul.f32 %v4685_v25, %v7310_v21 }
 0x166   :  { %v782_v58 = vadd.f32 %v750_v45, %v585_v43  ;;  %v4915_v43 = vmax.f32 %v895_v22, 0.0 }
 0x167   :  { %v627_v38 = vpop.permute.xlu1 %626  ;;  %v603_v22 = vadd.f32 %v571_v34, %v406_v53 }
 0x168   :  { %v853_v44 = vmul.f32 2.0, %v782_v58  ;;  %v751_v8 = vmul.f32 %v4674_v6, %v627_v38  ;;  %v768_v58 = vmul.f32 %v4674_v6, %v7312_v61  ;;  %v798_v38 = vadd.f32 %v766_v16, %v601_v60  ;;  %v4931_v39 = vpop.permute.xlu0 %485 }
 0x169   :  { %v558_v16 = vmul.f32 %v4680_v15, %v4757_v31  ;;  %v972_v60 = vsel %vm971_vm3, %v4789_v55, %v970_v17  ;;  %v7316_v17 = vld [vmem:[#allocation28_spill] sm:$0xff]  ;;  %vm1027_vm13 = vcmp.eq.f32.partialorder %v4915_v43, inf  ;;  %vm1029_vm14 = vcmp.eq.f32.partialorder %v4915_v43, 0.0 }
 0x16a   :  { %v885_v50 = vsub.f32 %v4779_v54, %v853_v44  ;;  %v783_v7 = vadd.f32 %v751_v8, %v586_v11  ;;  %v4019_v11 = vpop.eup %4018  ;;  %v899_v44 = vsub.f32 %v4825_v13, %v867_v32  ;;  %v974_v32 = vand.u32 2147483648, %v4789_v55 }
 0x16b   :  { %v4913_v62 = vpop.permute.xlu1 %634  ;;  %v4021_v41 = vpop.eup %4020  ;;  %v869_v34 = vmul.f32 2.0, %v798_v38  ;;  %v984_v40 = vmul.f32 %v4019_v11, %v4830_v48  ;;  %v800_v31 = vadd.f32 %v768_v58, %v603_v22  ;;  %v4962_v61 = vmul.f32 %v4685_v25, %v7316_v17  ;;  %v7317_v11 = vld [vmem:[#allocation29_spill] sm:$0xff] }
 0x16c   :  { %v4917_v45 = vmax.f32 %v885_v50, 0.0  ;;  %v854_v54 = vmul.f32 2.0, %v783_v7  ;;  %v4935_v50 = vmul.f32 %v4685_v25, %v7313_v52  ;;  %v7314_v7 = vld [vmem:[#allocation24_spill] sm:$0xff]  ;;  %v4952_v21 = vmax.f32 %v899_v44, 0.0  ;;  %v7318_v44 = vld [vmem:[#allocation30_spill] sm:$0xff] }
 0x16d   :  { %v4939_v51 = vmul.f32 %v4685_v25, %v7314_v7  ;;  %v1012_v53 = vmul.f32 %v4021_v41, %v4841_v20  ;;  %v590_v38 = vadd.f32 %v558_v16, %v393_v27  ;;  %v4969_v58 = vmul.f32 %v4685_v25, %v7317_v11  ;;  %v4975_v41 = vpop.permute.xlu0 %493  ;;  %v4023_v7 = vpop.eup %4022 }
 0x16e   :  { %4024 = vrsqrt.f32 %v4917_v45  ;;  %v886_v8 = vsub.f32 %v4773_v57, %v854_v54  ;;  %v7315_v54 = vld [vmem:[#allocation25_spill] sm:$0xff]  ;;  %v4973_v22 = vmul.f32 %v4685_v25, %v7318_v44  ;;  %v975_v52 = vsel %vm973_vm4, %v974_v32, %v972_v60 }
 0x16f   :  { %v643_v13 = vpop.permute.xlu1 %642  ;;  %4026 = vrsqrt.f32 %v4915_v43  ;;  %v4958_v29 = vmul.f32 %v4685_v25, %v7315_v54  ;;  %v901_v27 = vsub.f32 %v4835_v1, %v869_v34  ;;  %v986_v55 = vsel %vm985_vm5, %v4830_v48, %v984_v40 }
 0x170   :  { %v4945_v57 = vmax.f32 %v886_v8, 0.0  ;;  %4028 = vrsqrt.f32 %v4926_v59  ;;  %v755_v9 = vmul.f32 %v4674_v6, %v643_v13  ;;  %v871_v13 = vmul.f32 2.0, %v800_v31 }
 0x171   :  { %v1014_v54 = vsel %vm1013_vm6, %v4841_v20, %v1012_v53  ;;  %v988_v17 = vand.u32 2147483648, %v4830_v48  ;;  %v1016_v60 = vand.u32 2147483648, %v4841_v20  ;;  %v4987_v32 = vmul.f32 0.8333333, %v975_v52  ;;  %v4998_v48 = vpop.permute.xlu0 %501 }
 0x172   :  { %4030 = vrsqrt.f32 %v4945_v57  ;;  %v787_v16 = vadd.f32 %v755_v9, %v590_v38  ;;  %v998_v9 = vmul.f32 %v4023_v7, %v4888_v4  ;;  %v4994_v40 = vmax.f32 %v901_v27, 0.0 }
 0x173   :  { %v4964_v8 = vpop.permute.xlu1 %650  ;;  %4032 = vrsqrt.f32 %v4952_v21  ;;  %v989_v34 = vsel %vm987_vm7, %v988_v17, %v986_v55  ;;  %v1017_v38 = vsel %vm1015_vm9, %v1016_v60, %v1014_v54  ;;  %v903_v52 = vsub.f32 %v4845_v33, %v871_v13 }
 0x174   :  { %v858_v31 = vmul.f32 2.0, %v787_v16  ;;  %vm957_vm11 = vcmp.eq.f32.partialorder %v4917_v45, inf  ;;  %v960_v20 = vand.u32 2147483648, %v4917_v45  ;;  %v1002_v55 = vand.u32 2147483648, %v4888_v4 }
 0x175   :  { %vm959_vm12 = vcmp.eq.f32.partialorder %v4917_v45, 0.0  ;;  %v1182_v54 = vmul.f32 0.8333333, %v1017_v38  ;;  %v5009_v60 = vmul.f32 0.8333333, %v989_v34  ;;  %4034 = vrsqrt.f32 %v4994_v40 }
 0x176   :  { %v890_v37 = vsub.f32 %v4799_v49, %v858_v31  ;;  %v5018_v16 = vmax.f32 %v903_v52, 0.0  ;;  %vm964_vm15 = vcmp.eq.f32.partialorder %v4945_v57, inf  ;;  %v967_v34 = vand.u32 2147483648, %v4945_v57 }
 0x177   :  { %v4984_v11 = vpop.permute.xlu1 %658  ;;  %vm966_vm0 = vcmp.eq.f32.partialorder %v4945_v57, 0.0  ;;  %v568_v52 = vmul.f32 %v4680_v15, %v4931_v39  ;;  %v1214_v56 = vsub.f32 1.0, %v1182_v54  ;;  %vm1055_vm3 = vcmp.eq.f32.partialorder %v4952_v21, inf }
 0x178   :  { %v4025_v1 = vpop.eup %4024  ;;  %4036 = vrsqrt.f32 %v5018_v16  ;;  %vm1057_vm4 = vcmp.eq.f32.partialorder %v4952_v21, 0.0  ;;  %vm1069_vm5 = vcmp.eq.f32.partialorder %v4994_v40, inf  ;;  %vm1071_vm6 = vcmp.eq.f32.partialorder %v4994_v40, 0.0 }
 0x179   :  { %v956_v53 = vmul.f32 %v4025_v1, %v4917_v45  ;;  %v4027_v44 = vpop.eup %4026  ;;  %v1000_v1 = vsel %vm999_vm8, %v4888_v4, %v998_v9  ;;  %v757_v4 = vmul.f32 %v4674_v6, %v4964_v8  ;;  %vm1083_vm7 = vcmp.eq.f32.partialorder %v5018_v16, inf }
 0x17a   :  { %v4029_v7 = vpop.eup %4028  ;;  %v1026_v38 = vmul.f32 %v4027_v44, %v4915_v43  ;;  %v1003_v44 = vsel %vm1001_vm10, %v1002_v55, %v1000_v1  ;;  %v600_v1 = vadd.f32 %v568_v52, %v4935_v50  ;;  %vm1085_vm9 = vcmp.eq.f32.partialorder %v5018_v16, 0.0 }
 0x17b   :  { %v5003_v17 = vpop.permute.xlu1 %666  ;;  %v958_v27 = vsel %vm957_vm11, %v4917_v45, %v956_v53  ;;  %v1040_v49 = vmul.f32 %v4029_v7, %v4926_v59  ;;  %v1030_v7 = vand.u32 2147483648, %v4915_v43 }
 0x17c   :  { %v4031_v33 = vpop.eup %4030  ;;  %v961_v13 = vsel %vm959_vm12, %v960_v20, %v958_v27  ;;  %v1028_v39 = vsel %vm1027_vm13, %v4915_v43, %v1026_v38  ;;  %v1044_v38 = vand.u32 2147483648, %v4926_v59  ;;  %v572_v43 = vmul.f32 %v4680_v15, %v4998_v48 }
 0x17d   :  { %v1174_v53 = vmul.f32 0.8333333, %v961_v13  ;;  %v963_v45 = vmul.f32 %v4031_v33, %v4945_v57  ;;  %v4033_v31 = vpop.eup %4032  ;;  %v5030_v33 = vpop.permute.xlu0 %509 }
 0x17e   :  { %v1054_v54 = vmul.f32 %v4033_v31, %v4952_v21  ;;  %v1031_v31 = vsel %vm1029_vm14, %v1030_v7, %v1028_v39  ;;  %v1180_v7 = vmul.f32 0.8333333, %v1003_v44  ;;  %v7322_v44 = vld [vmem:[#allocation39_spill] sm:$0xff] }
 0x17f   :  { %v5023_v20 = vpop.permute.xlu1 %674  ;;  %v1206_v9 = vsub.f32 1.0, %v1174_v53  ;;  %v965_v27 = vsel %vm964_vm15, %v4945_v57, %v963_v45  ;;  %v560_v53 = vmul.f32 %v4680_v15, %v4768_v47  ;;  %v4035_v52 = vpop.eup %4034 }
 0x180   :  { %7319 = vst [vmem:[#allocation32_spill] sm:$0xff] %v5023_v20  ;;  %v968_v13 = vsel %vm966_vm0, %v967_v34, %v965_v27  ;;  %v5036_v20 = vmax.f32 %v890_v37, 0.0  ;;  %v1042_v37 = vsel %vm1041_vm1, %v4926_v59, %v1040_v49  ;;  %v5059_v27 = vmax.f32 %v1214_v56, 0.0 }
 0x181   :  { %v5038_v45 = vmax.f32 %v1206_v9, 0.0  ;;  %v1175_v57 = vmul.f32 0.8333333, %v968_v13  ;;  %v592_v9 = vadd.f32 %v560_v53, %v4908_v46  ;;  %v518_v13 = vpop.permute.xlu0 %517  ;;  %v1045_v50 = vsel %vm1043_vm2, %v1044_v38, %v1042_v37 }
 0x182   :  { %4038 = vrsqrt.f32 %v5036_v20  ;;  %v581_v59 = vmul.f32 %v4680_v15, %v4783_v30  ;;  %v1210_v56 = vsub.f32 1.0, %v5009_v60  ;;  %v1056_v53 = vsel %vm1055_vm3, %v4952_v21, %v1054_v54 }
 0x183   :  { %v683_v55 = vpop.permute.xlu1 %682  ;;  %1691 = vperm.xlu0 %3961, %v5038_v45   ;;  %v1207_v47 = vsub.f32 1.0, %v1175_v57  ;;  %v789_v57 = vadd.f32 %v757_v4, %v592_v9  ;;  %v7320_v30 = vsub.f32 1.0, %v4987_v32  ;;  %v1186_v37 = vmul.f32 0.8333333, %v1045_v50 }
 0x184   :  { %v765_v34 = vmul.f32 %v4674_v6, %v683_v55  ;;  %v1058_v55 = vand.u32 2147483648, %v4952_v21  ;;  %v1068_v48 = vmul.f32 %v4035_v52, %v4994_v40  ;;  %v778_v38 = vmul.f32 %v4674_v6, %v7322_v44  ;;  %v4037_v21 = vpop.eup %4036 }
 0x185   :  { %v5057_v8 = vmax.f32 %v1207_v47, 0.0  ;;  %v5077_v4 = vmax.f32 %v7320_v30, 0.0  ;;  %v1184_v47 = vmul.f32 0.8333333, %v1031_v31  ;;  %v613_v32 = vadd.f32 %v581_v59, %v4939_v51  ;;  %v526_v30 = vpop.permute.xlu0 %525 }
 0x186   :  { %v797_v49 = vadd.f32 %v765_v34, %v600_v1  ;;  %v7321_v1 = vld [vmem:[#allocation31_spill] sm:$0xff]  ;;  %v1059_v34 = vsel %vm1057_vm4, %v1058_v55, %v1056_v53  ;;  %v860_v9 = vmul.f32 2.0, %v789_v57  ;;  %v5090_v31 = vmax.f32 %v1210_v56, 0.0 }
 0x187   :  { %v5066_v46 = vpop.permute.xlu1 %690  ;;  %1281 = vperm.xlu1 %3962, %v5057_v8   ;;  %1723 = vperm.xlu0 %3961, %v5059_v27   ;;  %v5082_v60 = vmul.f32 %v4685_v25, %v7321_v1  ;;  %v604_v50 = vadd.f32 %v572_v43, %v4958_v29  ;;  %v1212_v52 = vsub.f32 1.0, %v1180_v7  ;;  %v1216_v53 = vsub.f32 1.0, %v1184_v47 }
 0x188   :  { %v868_v39 = vmul.f32 2.0, %v797_v49  ;;  %v1188_v55 = vmul.f32 0.8333333, %v1059_v34  ;;  %v562_v51 = vmul.f32 %v4680_v15, %v4795_v14  ;;  %v1070_v57 = vsel %vm1069_vm5, %v4994_v40, %v1068_v48 }
 0x189   :  { %v810_v56 = vadd.f32 %v778_v38, %v613_v32  ;;  %v892_v43 = vsub.f32 %v4809_v63, %v860_v9  ;;  %v1072_v7 = vand.u32 2147483648, %v4994_v40  ;;  %v1082_v47 = vmul.f32 %v4037_v21, %v5018_v16  ;;  %v534_v32 = vpop.permute.xlu0 %533 }
 0x18a   :  { %v900_v54 = vsub.f32 %v4839_v19, %v868_v39  ;;  %v1218_v39 = vsub.f32 1.0, %v1186_v37  ;;  %v5109_v14 = vmul.f32 %v4680_v15, %v4750_v10  ;;  %v576_v37 = vmul.f32 %v4680_v15, %v518_v13 }
 0x18b   :  { %v699_v49 = vpop.permute.xlu1 %698  ;;  %1286 = vperm.xlu1 %3962, %v5077_v4   ;;  %v5112_v34 = vmax.f32 %v1212_v52, 0.0  ;;  %v759_v63 = vmul.f32 %v4674_v6, %v4984_v11  ;;  %v1220_v44 = vsub.f32 1.0, %v1188_v55  ;;  %v1073_v38 = vsel %vm1071_vm6, %v1072_v7, %v1070_v57 }
 0x18c   :  { %v5093_v1 = vmax.f32 %v900_v54, 0.0  ;;  %v769_v19 = vmul.f32 %v4674_v6, %v699_v49  ;;  %v4039_v29 = vpop.eup %4038  ;;  %v5117_v9 = vmax.f32 %v1216_v53, 0.0  ;;  %v5119_v49 = vmax.f32 %v1218_v39, 0.0 }
 0x18d   :  { %v991_v10 = vmul.f32 %v4039_v29, %v5036_v20  ;;  %v881_v13 = vmul.f32 2.0, %v810_v56  ;;  %v594_v21 = vadd.f32 %v562_v51, %v4922_v18  ;;  %v1084_v11 = vsel %vm1083_vm7, %v5018_v16, %v1082_v47  ;;  %v542_v47 = vpop.permute.xlu0 %541 }
 0x18e   :  { %4040 = vrsqrt.f32 %v5093_v1  ;;  %v801_v59 = vadd.f32 %v769_v19, %v604_v50  ;;  %v5124_v50 = vmax.f32 %v892_v43, 0.0  ;;  %v608_v19 = vadd.f32 %v576_v37, %v4962_v61 }
 0x18f   :  { %v5102_v54 = vpop.permute.xlu1 %706  ;;  %1296 = vperm.xlu1 %3962, %v5090_v31   ;;  %v578_v52 = vmul.f32 %v4680_v15, %v526_v30  ;;  %v5131_v39 = vmul.f32 0.8333333, %v1073_v38  ;;  %v791_v55 = vadd.f32 %v759_v63, %v594_v21  ;;  %v5134_v57 = vmax.f32 %v1220_v44, 0.0 }
 0x190   :  { %v872_v48 = vmul.f32 2.0, %v801_v59  ;;  %vm992_vm8 = vcmp.eq.f32.partialorder %v5036_v20, inf  ;;  %v1086_v61 = vand.u32 2147483648, %v5018_v16  ;;  %v913_v30 = vsub.f32 %v4874_v0, %v881_v13 }
 0x191   :  { %7323 = vst [vmem:[#allocation40_spill] sm:$0xff] %v5134_v57  ;;  %v993_v51 = vsel %vm992_vm8, %v5036_v20, %v991_v10  ;;  %4042 = vrsqrt.f32 %v5124_v50  ;;  %v580_v29 = vmul.f32 %v4680_v15, %v534_v32  ;;  %v610_v7 = vadd.f32 %v578_v52, %v4969_v58 }
 0x192   :  { %v904_v59 = vsub.f32 %v4855_v2, %v872_v48  ;;  %v995_v2 = vand.u32 2147483648, %v5036_v20  ;;  %vm994_vm10 = vcmp.eq.f32.partialorder %v5036_v20, 0.0  ;;  %v862_v48 = vmul.f32 2.0, %v791_v55 }
 0x193   :  { %v715_v40 = vpop.permute.xlu1 %714  ;;  %1306 = vperm.xlu1 %3962, %v5112_v34   ;;  %vm1062_vm11 = vcmp.eq.f32.partialorder %v5093_v1, inf  ;;  %v1065_v13 = vand.u32 2147483648, %v5093_v1  ;;  %v612_v58 = vadd.f32 %v580_v29, %v4973_v22  ;;  %v582_v21 = vmul.f32 %v4680_v15, %v542_v47 }
 0x194   :  { %v773_v53 = vmul.f32 %v4674_v6, %v715_v40  ;;  %v5148_v0 = vmax.f32 %v904_v59, 0.0  ;;  %v996_v38 = vsel %vm994_vm10, %v995_v2, %v993_v51  ;;  %vm1064_vm12 = vcmp.eq.f32.partialorder %v5093_v1, 0.0 }
 0x195   :  { %v894_v55 = vsub.f32 %v4813_v28, %v862_v48  ;;  %v1179_v59 = vmul.f32 0.8333333, %v996_v38  ;;  %v5168_v29 = vmax.f32 %v913_v30, 0.0  ;;  %v7324_v48 = vld [vmem:[#allocation17_spill] sm:$0xff]  ;;  %v564_v38 = vmul.f32 %v4680_v15, %v4851_v26 }
 0x196   :  { %v805_v18 = vadd.f32 %v773_v53, %v608_v19  ;;  %4044 = vrsqrt.f32 %v5148_v0  ;;  %vm1006_vm13 = vcmp.eq.f32.partialorder %v5124_v50, inf  ;;  %vm1008_vm15 = vcmp.eq.f32.partialorder %v5124_v50, 0.0 }
 0x197   :  { %v723_v56 = vpop.permute.xlu1 %722  ;;  %1316 = vperm.xlu1 %3962, %v5059_v27   ;;  %v1211_v30 = vsub.f32 1.0, %v1179_v59  ;;  %v1009_v59 = vand.u32 2147483648, %v5124_v50  ;;  %vm1090_vm2 = vcmp.eq.f32.partialorder %v5148_v0, inf  ;;  %vm1092_vm4 = vcmp.eq.f32.partialorder %v5148_v0, 0.0 }
 0x198   :  { %v4041_v43 = vpop.eup %4040  ;;  %v876_v37 = vmul.f32 2.0, %v805_v18  ;;  %v775_v63 = vmul.f32 %v4674_v6, %v723_v56  ;;  %v753_v56 = vmul.f32 %v4674_v6, %v4913_v62  ;;  %vm1153_vm8 = vcmp.eq.f32.partialorder %v5168_v29, inf }
 0x199   :  { %v1061_v44 = vmul.f32 %v4041_v43, %v5093_v1  ;;  %v1222_v43 = vsub.f32 1.0, %v5131_v39  ;;  %vm1155_vm10 = vcmp.eq.f32.partialorder %v5168_v29, 0.0 }
 0x19a   :  { %v908_v32 = vsub.f32 %v4859_v36, %v876_v37  ;;  %v807_v10 = vadd.f32 %v775_v63, %v610_v7  ;;  %v614_v7 = vadd.f32 %v582_v21, %v5082_v60  ;;  %v588_v63 = vadd.f32 %v5109_v14, %v4896_v12 }
 0x19b   :  { %v731_v40 = vpop.permute.xlu1 %730  ;;  %1326 = vperm.xlu1 %3962, %v5117_v9   ;;  %v1063_v20 = vsel %vm1062_vm11, %v5093_v1, %v1061_v44  ;;  %v1087_v1 = vsel %vm1085_vm9, %v1086_v61, %v1084_v11  ;;  %v4043_v16 = vpop.eup %4042  ;;  %v5178_v11 = vmax.f32 %v894_v55, 0.0  ;;  %v399_v44 = vmul.f32 %v4685_v25, %v7324_v48 }
 0x19c   :  { %v5159_v19 = vmax.f32 %v908_v32, 0.0  ;;  %v878_v52 = vmul.f32 2.0, %v807_v10  ;;  %v777_v36 = vmul.f32 %v4674_v6, %v731_v40  ;;  %v1066_v53 = vsel %vm1064_vm12, %v1065_v13, %v1063_v20 }
 0x19d   :  { %v1189_v22 = vmul.f32 0.8333333, %v1066_v53  ;;  %v1192_v62 = vmul.f32 0.8333333, %v1087_v1  ;;  %v5193_v32 = vmax.f32 %v1222_v43, 0.0  ;;  %v785_v12 = vadd.f32 %v753_v56, %v588_v63 }
 0x19e   :  { %4046 = vrsqrt.f32 %v5159_v19  ;;  %v910_v18 = vsub.f32 %v4867_v24, %v878_v52  ;;  %v809_v51 = vadd.f32 %v777_v36, %v612_v58  ;;  %v761_v25 = vmul.f32 %v4674_v6, %v5003_v17  ;;  %v7326_v52 = vld [vmem:[#allocation2_spill] sm:$0xff] }
 0x19f   :  { %v739_v2 = vpop.permute.xlu1 %738  ;;  %1336 = vperm.xlu1 %3962, %v5119_v49   ;;  %v1221_v28 = vsub.f32 1.0, %v1189_v22  ;;  %v5201_v13 = vmax.f32 %v1211_v30, 0.0  ;;  %v1224_v26 = vsub.f32 1.0, %v1192_v62  ;;  %v596_v40 = vadd.f32 %v564_v38, %v399_v44  ;;  %v7329_v44 = vld [vmem:[#allocation3_spill] sm:$0xff] }
 0x1a0   :  { %v5175_v47 = vmax.f32 %v910_v18, 0.0  ;;  %v880_v24 = vmul.f32 2.0, %v809_v51  ;;  %v779_v37 = vmul.f32 %v4674_v6, %v739_v2  ;;  %v4045_v21 = vpop.eup %4044  ;;  %v824_v36 = vadd.f32 %v4701_v3, %v7326_v52 }
 0x1a1   :  { %v5180_v61 = vmax.f32 %v1221_v28, 0.0  ;;  %7325 = vst [vmem:[#allocation12_spill] sm:$0xff] %v5201_v13  ;;  %v856_v6 = vmul.f32 2.0, %v785_v12  ;;  %v793_v55 = vadd.f32 %v761_v25, %v596_v40  ;;  %v5213_v22 = vmax.f32 %v1224_v26, 0.0 }
 0x1a2   :  { %4048 = vrsqrt.f32 %v5175_v47  ;;  %v912_v39 = vsub.f32 %v4880_v23, %v880_v24  ;;  %v811_v60 = vadd.f32 %v779_v37, %v614_v7  ;;  %v1005_v23 = vmul.f32 %v4043_v16, %v5124_v50 }
 0x1a3   :  { %4050 = vrsqrt.f32 %v5168_v29  ;;  %1346 = vperm.xlu1 %3962, %v5134_v57   ;;  %1751 = vperm.xlu0 %3961, %v5180_v61   ;;  %7327 = vst [vmem:[#allocation13_spill] sm:$0xff] %v5213_v22  ;;  %vm1118_vm14 = vcmp.eq.f32.partialorder %v5159_v19, inf  ;;  %v1121_v18 = vand.u32 2147483648, %v5159_v19  ;;  %vm1120_vm0 = vcmp.eq.f32.partialorder %v5159_v19, 0.0 }
 0x1a4   :  { %v5195_v14 = vmax.f32 %v912_v39, 0.0  ;;  %v882_v10 = vmul.f32 2.0, %v811_v60  ;;  %4052 = vrsqrt.f32 %v5178_v11  ;;  %v1007_v53 = vsel %vm1006_vm13, %v5124_v50, %v1005_v23 }
 0x1a5   :  { %v1010_v1 = vsel %vm1008_vm15, %v1009_v59, %v1007_v53  ;;  %v1089_v56 = vmul.f32 %v4045_v21, %v5148_v0  ;;  %v888_v28 = vsub.f32 %v824_v36, %v856_v6  ;;  %v864_v24 = vmul.f32 2.0, %v793_v55  ;;  %v7332_v53 = vld [vmem:[#allocation42_spill] sm:$0xff] }
 0x1a6   :  { %4054 = vrsqrt.f32 %v5195_v14  ;;  %v914_v58 = vsub.f32 %v4884_v35, %v882_v10  ;;  %v1181_v30 = vmul.f32 0.8333333, %v1010_v1  ;;  %vm1132_vm1 = vcmp.eq.f32.partialorder %v5175_v47, inf  ;;  %v7330_v10 = vld [vmem:[#allocation37_spill] sm:$0xff] }
 0x1a7   :  { %1356 = vperm.xlu1 %3962, %v5193_v32   ;;  %1711 = vperm.xlu0 %3961, %v5201_v13   ;;  %v1135_v50 = vand.u32 2147483648, %v5175_v47  ;;  %vm1134_vm3 = vcmp.eq.f32.partialorder %v5175_v47, 0.0  ;;  %v1091_v60 = vsel %vm1090_vm2, %v5148_v0, %v1089_v56  ;;  %v832_v38 = vadd.f32 %v4701_v3, %v7329_v44 }
 0x1a8   :  { %v4047_v20 = vpop.eup %4046  ;;  %v5210_v17 = vmax.f32 %v914_v58, 0.0  ;;  %v5235_v12 = vmax.f32 %v888_v28, 0.0  ;;  %v1093_v25 = vand.u32 2147483648, %v5148_v0  ;;  %v1213_v21 = vsub.f32 1.0, %v1181_v30 }
 0x1a9   :  { %v1117_v35 = vmul.f32 %v4047_v20, %v5159_v19  ;;  %vm1146_vm5 = vcmp.eq.f32.partialorder %v5195_v14, inf  ;;  %v896_v20 = vsub.f32 %v832_v38, %v864_v24  ;;  %v573_v55 = vmul.f32 %v4680_v15, %v7332_v53 }
 0x1aa   :  { %4056 = vrsqrt.f32 %v5210_v17  ;;  %v1094_v40 = vsel %vm1092_vm4, %v1093_v25, %v1091_v60  ;;  %v1149_v0 = vand.u32 2147483648, %v5195_v14  ;;  %vm1148_vm6 = vcmp.eq.f32.partialorder %v5195_v14, 0.0 }
 0x1ab   :  { %1366 = vperm.xlu1 %3962, %v5213_v22   ;;  %v1119_v51 = vsel %vm1118_vm14, %v5159_v19, %v1117_v35  ;;  %v7328_v19 = vmov 1   ;;  %4058 = vrsqrt.f32 %v5235_v12  ;;  %v1193_v59 = vmul.f32 0.8333333, %v1094_v40 }
 0x1ac   :  { %v4049_v2 = vpop.eup %4048  ;;  %v1122_v43 = vsel %vm1120_vm0, %v1121_v18, %v1119_v51  ;;  %vm1020_vm7 = vcmp.eq.f32.partialorder %v5178_v11, inf  ;;  %v5255_v18 = vmax.f32 %v1213_v21, 0.0  ;;  %v5259_v15 = vmax.f32 %v896_v20, 0.0 }
 0x1ad   :  { %v4051_v7 = vpop.eup %4050  ;;  %v1197_v37 = vmul.f32 0.8333333, %v1122_v43  ;;  %v1131_v16 = vmul.f32 %v4049_v2, %v5175_v47  ;;  %v1023_v56 = vand.u32 2147483648, %v5178_v11  ;;  %v7333_v43 = vld [vmem:[#allocation16_spill] sm:$0xff]  ;;  %vm1022_vm9 = vcmp.eq.f32.partialorder %v5178_v11, 0.0 }
 0x1ae   :  { %v4053_v62 = vpop.eup %4052  ;;  %v1152_v36 = vmul.f32 %v4051_v7, %v5168_v29  ;;  %v1156_v24 = vand.u32 2147483648, %v5168_v29  ;;  %vm1160_vm11 = vcmp.eq.f32.partialorder %v5210_v17, inf  ;;  %4060 = vrsqrt.f32 %v5259_v15 }
 0x1af   :  { %3963 = vset.pattern.permute.xlu1 %v7328_v19  ;;  %v1229_v63 = vsub.f32 1.0, %v1197_v37  ;;  %v1133_v39 = vsel %vm1132_vm1, %v5175_v47, %v1131_v16  ;;  %v1019_v3 = vmul.f32 %v4053_v62, %v5178_v11  ;;  %v1225_v16 = vsub.f32 1.0, %v1193_v59 }
 0x1b0   :  { %v4055_v48 = vpop.eup %4054  ;;  %1687 = vperm.xlu1 %3963, %v7330_v10   ;;  %v1136_v23 = vsel %vm1134_vm3, %v1135_v50, %v1133_v39  ;;  %v1154_v2 = vsel %vm1153_vm8, %v5168_v29, %v1152_v36  ;;  %v7335_v29 = vld [vmem:[#allocation34_spill] sm:$0xff]  ;;  %v1163_v38 = vand.u32 2147483648, %v5210_v17  ;;  %vm1162_vm12 = vcmp.eq.f32.partialorder %v5210_v17, 0.0 }
 0x1b1   :  { %v5239_v26 = vmax.f32 %v1229_v63, 0.0  ;;  %v1199_v58 = vmul.f32 0.8333333, %v1136_v23  ;;  %v1145_v47 = vmul.f32 %v4055_v48, %v5195_v14  ;;  %v1021_v1 = vsel %vm1020_vm7, %v5178_v11, %v1019_v3  ;;  %v5285_v11 = vld [vmem:[%s7180_s3 + $0x2] ss:$0 sm:$0xff] }
 0x1b2   :  { %v1024_v50 = vsel %vm1022_vm9, %v1023_v56, %v1021_v1  ;;  %v1157_v62 = vsel %vm1155_vm10, %v1156_v24, %v1154_v2  ;;  %v770_v60 = vmul.f32 %v5285_v11, %v7335_v29  ;;  %v7336_v48 = vmov 2  }
 0x1b3   :  { %7331 = vst [vmem:[#allocation14_spill] sm:$0xff] %v5239_v26  ;;  %1783 = vperm.xlu0 %3961, %v5239_v26   ;;  %v1147_v52 = vsel %vm1146_vm5, %v5195_v14, %v1145_v47  ;;  %v1231_v35 = vsub.f32 1.0, %v1199_v58  ;;  %v5268_v14 = vld [vmem:[%s7180_s3] ss:$0 sm:$0xff]  ;;  %v1183_v44 = vmul.f32 0.8333333, %v1024_v50 }
 0x1b4   :  { %v4057_v6 = vpop.eup %4056  ;;  %1695 = vperm.xlu1 %3963, %v5057_v8   ;;  %v1150_v51 = vsel %vm1148_vm6, %v1149_v0, %v1147_v52  ;;  %v408_v7 = vmul.f32 %v5268_v14, %v7333_v43  ;;  %v5292_v23 = vmax.f32 %v1225_v16, 0.0  ;;  %v1202_v58 = vmul.f32 0.8333333, %v1157_v62  ;;  %v5308_v0 = vld [vmem:[%s7181_s4] ss:$0 sm:$0xff]  ;;  %s4133_s4 = smov 64  }
 0x1b5   :  { %v1159_v28 = vmul.f32 %v4057_v6, %v5210_v17  ;;  %v5276_v37 = vmax.f32 %v1231_v35, 0.0  ;;  %v1201_v30 = vmul.f32 0.8333333, %v1150_v51  ;;  %v4059_v47 = vpop.eup %4058  ;;  %v1215_v3 = vsub.f32 1.0, %v1183_v44  ;;  %v7338_v35 = vld [vmem:[#allocation6_spill] sm:$0xff] }
 0x1b6   :  { %v605_v63 = vadd.f32 %v573_v55, %v408_v7  ;;  %v1234_v52 = vsub.f32 1.0, %v1202_v58  ;;  %v977_v6 = vmul.f32 %v4059_v47, %v5235_v12  ;;  %vm978_vm13 = vcmp.eq.f32.partialorder %v5235_v12, inf  ;;  %v5348_v58 = vld [vmem:[%s7180_s3 + $0x1] ss:$0 sm:$0xff] }
 0x1b7   :  { %1715 = vperm.xlu0 %3961, %v5112_v34   ;;  %7334 = vst [vmem:[#allocation15_spill] sm:$0xff] %v5276_v37  ;;  %v1161_v39 = vsel %vm1160_vm11, %v5210_v17, %v1159_v28  ;;  %v1233_v25 = vsub.f32 1.0, %v1201_v30  ;;  %v5302_v17 = vmax.f32 %v1215_v3, 0.0  ;;  %v841_v59 = vadd.f32 %v5308_v0, %v7338_v35 }
 0x1b8   :  { %1719 = vperm.xlu1 %3963, %v5255_v18   ;;  %v1164_v21 = vsel %vm1162_vm12, %v1163_v38, %v1161_v39  ;;  %v802_v40 = vadd.f32 %v770_v60, %v605_v63  ;;  %v4061_v55 = vpop.eup %4060  ;;  %v5312_v51 = vmax.f32 %v1234_v52, 0.0  ;;  %v979_v56 = vsel %vm978_vm13, %v5235_v12, %v977_v6 }
 0x1b9   :  { %v5297_v20 = vmax.f32 %v1233_v25, 0.0  ;;  %v1203_v36 = vmul.f32 0.8333333, %v1164_v21  ;;  %v981_v2 = vand.u32 2147483648, %v5235_v12  ;;  %vm980_vm14 = vcmp.eq.f32.partialorder %v5235_v12, 0.0 }
 0x1ba   :  { %v873_v53 = vmul.f32 2.0, %v802_v40  ;;  %7339 = vst [vmem:[#allocation21_spill] sm:$0xff] %v5312_v51  ;;  %v1033_v7 = vmul.f32 %v4061_v55, %v5259_v15  ;;  %vm1034_vm15 = vcmp.eq.f32.partialorder %v5259_v15, inf  ;;  %v1037_v62 = vand.u32 2147483648, %v5259_v15  ;;  %v7341_v40 = vld [vmem:[#allocation20_spill] sm:$0xff]  ;;  %v7342_v55 = vld [vmem:[#allocation23_spill] sm:$0xff] }
 0x1bb   :  { %1791 = vperm.xlu0 %3961, %v5276_v37   ;;  %7337 = vst [vmem:[#allocation33_spill] sm:$0xff] %v5297_v20  ;;  %v1235_v1 = vsub.f32 1.0, %v1203_v36  ;;  %v982_v43 = vsel %vm980_vm14, %v981_v2, %v979_v56  ;;  %vm1036_vm0 = vcmp.eq.f32.partialorder %v5259_v15, 0.0  ;;  %v7198_v12 = vmov 3  }
 0x1bc   :  { %3964 = vset.pattern.permute.xlu1 %v7336_v48  ;;  %v905_v28 = vsub.f32 %v841_v59, %v873_v53  ;;  %v1177_v30 = vmul.f32 0.8333333, %v982_v43  ;;  %v1035_v50 = vsel %vm1034_vm15, %v5259_v15, %v1033_v7  ;;  %v577_v47 = vmul.f32 %v5348_v58, %v4754_v42  ;;  %v7343_v59 = vld [vmem:[#allocation36_spill] sm:$0xff] }
 0x1bd   :  { %2071 = vperm.xlu1 %3964, %v7330_v10   ;;  %v5320_v24 = vmax.f32 %v1235_v1, 0.0  ;;  %v1038_v39 = vsel %vm1036_vm0, %v1037_v62, %v1035_v50  ;;  %v412_v3 = vmul.f32 %v5268_v14, %v7341_v40  ;;  %v570_v36 = vmul.f32 %v5348_v58, %v4975_v41 }
 0x1be   :  { %v937_v16 = vmax.f32 %v905_v28, 0.0  ;;  %v1209_v63 = vsub.f32 1.0, %v1177_v30  ;;  %v1185_v29 = vmul.f32 0.8333333, %v1038_v39  ;;  %v405_v42 = vmul.f32 %v5268_v14, %v7342_v55  ;;  %v7344_v28 = vld [vmem:[#allocation19_spill] sm:$0xff]  ;;  %v7351_v55 = vld [vmem:[#allocation5_spill] sm:$0xff] }
 0x1bf   :  { %1767 = vperm.xlu0 %3961, %v5292_v23   ;;  %7340 = vst [vmem:[#allocation24_spill] sm:$0xff] %v5320_v24  ;;  %v609_v6 = vadd.f32 %v577_v47, %v412_v3  ;;  %v767_v35 = vmul.f32 %v5285_v11, %v5066_v46  ;;  %v774_v1 = vmul.f32 %v5285_v11, %v7343_v59  ;;  %v7346_v46 = vld [vmem:[#allocation32_spill] sm:$0xff]  ;;  %v7196_v47 = vmov 4  }
 0x1c0   :  { %4062 = vrsqrt.f32 %v937_v16  ;;  %v5333_v60 = vmax.f32 %v1209_v63, 0.0  ;;  %v1217_v15 = vsub.f32 1.0, %v1185_v29  ;;  %vm1097_vm1 = vcmp.eq.f32.partialorder %v937_v16, inf  ;;  %v7347_v63 = vld [vmem:[#allocation22_spill] sm:$0xff] }
 0x1c1   :  { %3965 = vset.pattern.permute.xlu1 %v7328_v19  ;;  %v1100_v52 = vand.u32 2147483648, %v937_v16  ;;  %vm1099_vm2 = vcmp.eq.f32.partialorder %v937_v16, 0.0  ;;  %v566_v41 = vmul.f32 %v5348_v58, %v4891_v5  ;;  %v602_v56 = vadd.f32 %v570_v36, %v405_v42 }
 0x1c2   :  { %1699 = vperm.xlu1 %3965, %v5077_v4   ;;  %v5340_v38 = vmax.f32 %v1217_v15, 0.0  ;;  %v401_v43 = vmul.f32 %v5268_v14, %v7344_v28  ;;  %v806_v7 = vadd.f32 %v774_v1, %v609_v6  ;;  %v763_v50 = vmul.f32 %v5285_v11, %v7346_v46  ;;  %v7348_v15 = vld [vmem:[#allocation43_spill] sm:$0xff]  ;;  %v7350_v6 = vld [vmem:[#allocation18_spill] sm:$0xff]  ;;  %v7356_v46 = vld [vmem:[#allocation4_spill] sm:$0xff] }
 0x1c3   :  { %1799 = vperm.xlu0 %3961, %v5297_v20   ;;  %v799_v62 = vadd.f32 %v767_v35, %v602_v56  ;;  %v414_v5 = vmul.f32 %v5268_v14, %v7347_v63  ;;  %v838_v42 = vadd.f32 %v5308_v0, %v7351_v55  ;;  %v7352_v35 = vld [vmem:[#allocation38_spill] sm:$0xff] }
 0x1c4   :  { %v598_v39 = vadd.f32 %v566_v41, %v401_v43  ;;  %v776_v59 = vmul.f32 %v5285_v11, %v7352_v35 }
 0x1c5   :  { %v870_v3 = vmul.f32 2.0, %v799_v62  ;;  %v7357_v62 = vld [vmem:[#allocation26_spill] sm:$0xff] }
 0x1c6   :  { %1727 = vperm.xlu1 %3965, %v5302_v17   ;;  %v795_v40 = vadd.f32 %v763_v50, %v598_v39  ;;  %v834_v50 = vadd.f32 %v5308_v0, %v7356_v46  ;;  %v418_v63 = vmul.f32 %v5268_v14, %v7357_v62 }
 0x1c7   :  { %1803 = vperm.xlu0 %3961, %v5312_v51  }
 0x1c8   :  { %v866_v43 = vmul.f32 2.0, %v795_v40 }
 0x1ca   :  { %3966 = vset.pattern.permute.xlu1 %v7336_v48  ;;  %v4063_v44 = vpop.eup %4062 }
 0x1cb   :  { %2103 = vperm.xlu1 %3966, %v5255_v18   ;;  %1807 = vperm.xlu0 %3961, %v5320_v24   ;;  %v1096_v25 = vmul.f32 %v4063_v44, %v937_v16  ;;  %v575_v44 = vmul.f32 %v5348_v58, %v7348_v15 }
 0x1cd   :  { %v1098_v21 = vsel %vm1097_vm1, %v937_v16, %v1096_v25  ;;  %v7345_v16 = vld [vmem:[#allocation44_spill] sm:$0xff]  ;;  %v877_v25 = vmul.f32 2.0, %v806_v7  ;;  %v902_v7 = vsub.f32 %v838_v42, %v870_v3  ;;  %v7359_v3 = vld [vmem:[#allocation41_spill] sm:$0xff]  ;;  %v7360_v42 = vld [vmem:[#allocation7_spill] sm:$0xff]  ;;  %vm1461_vm1 = vcmask 130048  }
 0x1ce   :  { %v1101_v53 = vsel %vm1099_vm2, %v1100_v52, %v1098_v21  ;;  %v579_v30 = vmul.f32 %v5348_v58, %v7345_v16  ;;  %v7349_v52 = vld [vmem:[#allocation9_spill] sm:$0xff]  ;;  %v7355_v16 = vld [vmem:[#allocation35_spill] sm:$0xff]  ;;  %v843_v35 = vadd.f32 %v5308_v0, %v7360_v42  ;;  %vm3254_vm2 = vcmask 1041409  }
 0x1cf   :  { %3967 = vset.pattern.permute.xlu1 %v7198_v12  ;;  %3997 = vset.pattern.permute.xlu0 %v7198_v12  ;;  %v1194_v2 = vmul.f32 0.8333333, %v1101_v53  ;;  %v845_v36 = vadd.f32 %v5308_v0, %v7349_v52  ;;  %v410_v53 = vmul.f32 %v5268_v14, %v7350_v6  ;;  %v780_v52 = vmul.f32 %v5285_v11, %v7359_v3 }
 0x1d0   :  { %2455 = vperm.xlu1 %3967, %v7330_v10   ;;  %2459 = vperm.xlu0 %3997, %v5038_v45   ;;  %v611_v21 = vadd.f32 %v579_v30, %v414_v5  ;;  %v772_v30 = vmul.f32 %v5285_v11, %v7355_v16 }
 0x1d1   :  { %v1226_v29 = vsub.f32 1.0, %v1194_v2  ;;  %v607_v41 = vadd.f32 %v575_v44, %v410_v53  ;;  %v909_v56 = vsub.f32 %v845_v36, %v877_v25  ;;  %v898_v44 = vsub.f32 %v834_v50, %v866_v43 }
 0x1d2   :  { %v808_v2 = vadd.f32 %v776_v59, %v611_v21  ;;  %v934_v25 = vmax.f32 %v902_v7, 0.0  ;;  %v7358_v21 = vld [vmem:[#allocation10_spill] sm:$0xff] }
 0x1d3   :  { %v5391_v1 = vmax.f32 %v1226_v29, 0.0  ;;  %v804_v5 = vadd.f32 %v772_v30, %v607_v41  ;;  %v941_v39 = vmax.f32 %v909_v56, 0.0  ;;  %v847_v40 = vadd.f32 %v5308_v0, %v7358_v21  ;;  %v5426_v30 = vpop.permute.xlu1 %1271 }
 0x1d4   :  { %3968 = vset.pattern.permute.xlu1 %v7328_v19  ;;  %2487 = vperm.xlu0 %3997, %v5255_v18   ;;  %v879_v29 = vmul.f32 2.0, %v808_v2  ;;  %v930_v55 = vmax.f32 %v898_v44, 0.0  ;;  %v7361_v2 = vld [vmem:[#allocation11_spill] sm:$0xff]  ;;  %vm1076_vm4 = vcmp.eq.f32.partialorder %v934_v25, inf  ;;  %vm1078_vm6 = vcmp.eq.f32.partialorder %v934_v25, 0.0 }
 0x1d5   :  { %1703 = vperm.xlu1 %3968, %v5333_v60   ;;  %7353 = vst [vmem:[#allocation25_spill] sm:$0xff] %v5391_v1  ;;  %v875_v36 = vmul.f32 2.0, %v804_v5  ;;  %4064 = vrsqrt.f32 %v941_v39  ;;  %vm1125_vm3 = vcmp.eq.f32.partialorder %v941_v39, inf  ;;  %v1128_v44 = vand.u32 2147483648, %v941_v39 }
 0x1d6   :  { %v911_v6 = vsub.f32 %v847_v40, %v879_v29  ;;  %4066 = vrsqrt.f32 %v934_v25  ;;  %vm1127_vm5 = vcmp.eq.f32.partialorder %v941_v39, 0.0  ;;  %vm1048_vm7 = vcmp.eq.f32.partialorder %v930_v55, inf }
 0x1d7   :  { %v907_v59 = vsub.f32 %v843_v35, %v875_v36  ;;  %4068 = vrsqrt.f32 %v930_v55  ;;  %vm1050_vm8 = vcmp.eq.f32.partialorder %v930_v55, 0.0 }
 0x1d8   :  { %2499 = vperm.xlu0 %3997, %v5117_v9   ;;  %v5415_v41 = vmax.f32 %v911_v6, 0.0 }
 0x1d9   :  { %1731 = vperm.xlu1 %3968, %v5117_v9  }
 0x1da   :  { %4070 = vrsqrt.f32 %v5415_v41  ;;  %vm1139_vm9 = vcmp.eq.f32.partialorder %v5415_v41, inf  ;;  %vm1141_vm10 = vcmp.eq.f32.partialorder %v5415_v41, 0.0 }
 0x1dc   :  { %2503 = vperm.xlu0 %3997, %v5340_v38  }
 0x1dd   :  { %3969 = vset.pattern.permute.xlu1 %v7336_v48 }
 0x1de   :  { %2111 = vperm.xlu1 %3969, %v5302_v17  }
 0x1df   :  { %v4065_v7 = vpop.eup %4064 }
 0x1e0   :  { %2479 = vperm.xlu0 %3997, %v5201_v13   ;;  %v4067_v16 = vpop.eup %4066  ;;  %v1124_v50 = vmul.f32 %v4065_v7, %v941_v39 }
 0x1e1   :  { %v1075_v62 = vmul.f32 %v4067_v16, %v934_v25 }
 0x1e2   :  { %3970 = vset.pattern.permute.xlu1 %v7198_v12  ;;  %v1126_v29 = vsel %vm1125_vm3, %v941_v39, %v1124_v50  ;;  %vm3256_vm3 = vcmask 1042434  }
 0x1e3   :  { %2463 = vperm.xlu1 %3970, %v5057_v8   ;;  %v1129_v36 = vsel %vm1127_vm5, %v1128_v44, %v1126_v29  ;;  %vm3260_vm5 = vcmask 1044484  }
 0x1e4   :  { %2551 = vperm.xlu0 %3997, %v5239_v26  }
 0x1e7   :  { %2491 = vperm.xlu1 %3970, %v5059_v27  }
 0x1e8   :  { %2531 = vperm.xlu0 %3997, %v5213_v22  }
 0x1eb   :  { %3971 = vset.pattern.permute.xlu1 %v7196_v47 }
 0x1ec   :  { %2839 = vperm.xlu1 %3971, %v7330_v10   ;;  %2515 = vperm.xlu0 %3997, %v5134_v57   ;;  %v7354_v10 = vld [vmem:[#allocation45_spill] sm:$0xff] }
 0x1ed   :  { %v583_v28 = vmul.f32 %v5348_v58, %v7354_v10  ;;  %v851_v10 = vadd.f32 %v5308_v0, %v7361_v2  ;;  %v1051_v2 = vand.u32 2147483648, %v930_v55 }
 0x1ef   :  { %v615_v15 = vadd.f32 %v583_v28, %v418_v63  ;;  %v5422_v28 = vmax.f32 %v907_v59, 0.0  ;;  %v4069_v63 = vpop.eup %4068 }
 0x1f0   :  { %3972 = vset.pattern.permute.xlu1 %v7328_v19  ;;  %2539 = vperm.xlu0 %3997, %v5391_v1   ;;  %v1047_v21 = vmul.f32 %v4069_v63, %v930_v55  ;;  %v4071_v40 = vpop.eup %4070 }
 0x1f1   :  { %1707 = vperm.xlu1 %3972, %v5090_v31   ;;  %v812_v53 = vadd.f32 %v780_v52, %v615_v15  ;;  %4072 = vrsqrt.f32 %v5422_v28  ;;  %v1077_v15 = vsel %vm1076_vm4, %v934_v25, %v1075_v62  ;;  %v1079_v52 = vand.u32 2147483648, %v934_v25 }
 0x1f2   :  { %v1138_v42 = vmul.f32 %v4071_v40, %v5415_v41  ;;  %v1142_v62 = vand.u32 2147483648, %v5415_v41  ;;  %vm1111_vm11 = vcmp.eq.f32.partialorder %v5422_v28, inf  ;;  %v1114_v40 = vand.u32 2147483648, %v5422_v28 }
 0x1f3   :  { %v883_v56 = vmul.f32 2.0, %v812_v53  ;;  %v1080_v6 = vsel %vm1078_vm6, %v1079_v52, %v1077_v15  ;;  %v1049_v53 = vsel %vm1048_vm7, %v930_v55, %v1047_v21  ;;  %vm1113_vm12 = vcmp.eq.f32.partialorder %v5422_v28, 0.0 }
 0x1f4   :  { %2571 = vperm.xlu0 %3997, %v5312_v51   ;;  %v1052_v39 = vsel %vm1050_vm8, %v1051_v2, %v1049_v53  ;;  %v1140_v25 = vsel %vm1139_vm9, %v5415_v41, %v1138_v42  ;;  %vm3258_vm4 = vcmask 1043459   ;;  %vm3262_vm6 = vcmask 1045509  }
 0x1f5   :  { %1735 = vperm.xlu1 %3972, %v5340_v38   ;;  %v915_v43 = vsub.f32 %v851_v10, %v883_v56  ;;  %v1198_v56 = vmul.f32 0.8333333, %v1129_v36  ;;  %v1191_v10 = vmul.f32 0.8333333, %v1080_v6  ;;  %v1187_v29 = vmul.f32 0.8333333, %v1052_v39 }
 0x1f6   :  { %vm3264_vm7 = vcmask 1046534   ;;  %vm3266_vm8 = vcmask 1047559   ;;  %vm3585_vm9 = vcmask 261120  }
 0x1f7   :  { %v5431_v46 = vmax.f32 %v915_v43, 0.0  ;;  %v1230_v50 = vsub.f32 1.0, %v1198_v56  ;;  %v1223_v63 = vsub.f32 1.0, %v1191_v10  ;;  %v1219_v52 = vsub.f32 1.0, %v1187_v29 }
 0x1f8   :  { %4004 = vset.pattern.permute.xlu0 %v7336_v48 }
 0x1f9   :  { %1755 = vperm.xlu1 %3972, %v5193_v32   ;;  %2075 = vperm.xlu0 %4004, %v5038_v45   ;;  %4074 = vrsqrt.f32 %v5431_v46  ;;  %v5464_v21 = vmax.f32 %v1230_v50, 0.0  ;;  %v5467_v41 = vmax.f32 %v1223_v63, 0.0  ;;  %vm1167_vm13 = vcmp.eq.f32.partialorder %v5431_v46, inf  ;;  %v7367_v63 = vld [vmem:[#allocation27_spill] sm:$0xff] }
 0x1fa   :  { %v5477_v56 = vmax.f32 %v1219_v52, 0.0  ;;  %vm1169_vm14 = vcmp.eq.f32.partialorder %v5431_v46, 0.0  ;;  %v409_v29 = vmul.f32 %v5268_v14, %v7367_v63 }
 0x1fb   :  { %v4073_v35 = vpop.eup %4072  ;;  %7363 = vst [vmem:[#allocation29_spill] sm:$0xff] %v5467_v41 }
 0x1fc   :  { %v1110_v43 = vmul.f32 %v4073_v35, %v5422_v28  ;;  %v1170_v35 = vand.u32 2147483648, %v5431_v46 }
 0x1fd   :  { %3973 = vset.pattern.permute.xlu1 %v7336_v48  ;;  %2079 = vperm.xlu0 %4004, %v5057_v8  }
 0x1fe   :  { %2087 = vperm.xlu1 %3973, %v5333_v60   ;;  %v1112_v55 = vsel %vm1111_vm11, %v5422_v28, %v1110_v43  ;;  %v574_v43 = vmul.f32 %v5348_v58, %v5030_v33  ;;  %vm3590_vm11 = vcmask 392192  }
 0x1ff   :  { %v1115_v6 = vsel %vm1113_vm12, %v1114_v40, %v1112_v55  ;;  %vm3610_vm12 = vcmask 654336  }
 0x200   :  { %v1196_v10 = vmul.f32 0.8333333, %v1115_v6  ;;  %v606_v55 = vadd.f32 %v574_v43, %v409_v29  ;;  %v7373_v6 = vld [vmem:[#allocation8_spill] sm:$0xff] }
 0x201   :  { %2107 = vperm.xlu0 %4004, %v5059_v27  }
 0x202   :  { %3974 = vset.pattern.permute.xlu1 %v7198_v12  ;;  %v5482_v39 = vpop.permute.xlu0 %1691  ;;  %v1228_v50 = vsub.f32 1.0, %v1196_v10 }
 0x203   :  { %2467 = vperm.xlu1 %3974, %v5077_v4   ;;  %v4075_v7 = vpop.eup %4074 }
 0x204   :  { %v1166_v15 = vmul.f32 %v4075_v7, %v5431_v46  ;;  %v5499_v33 = vmax.f32 %v1228_v50, 0.0 }
 0x205   :  { %2083 = vperm.xlu0 %4004, %v5077_v4  }
 0x206   :  { %v5434_v5 = vpop.permute.xlu1 %1281  ;;  %v1168_v53 = vsel %vm1167_vm13, %v5431_v46, %v1166_v15  ;;  %v771_v46 = vmul.f32 %v5285_v11, %v5102_v54  ;;  %7369 = vst [vmem:[#allocation2_spill] sm:$0xff] %v5499_v33  ;;  %v5501_v15 = vpop.permute.xlu0 %1723 }
 0x207   :  { %2495 = vperm.xlu1 %3974, %v5302_v17   ;;  %v1171_v28 = vsel %vm1169_vm14, %v1170_v35, %v1168_v53  ;;  %v842_v53 = vadd.f32 %v5308_v0, %v7373_v6 }
 0x208   :  { %v803_v40 = vadd.f32 %v771_v46, %v606_v55 }
 0x209   :  { %2115 = vperm.xlu0 %4004, %v5117_v9  }
 0x20a   :  { %v5439_v3 = vpop.permute.xlu1 %1286  ;;  %v874_v52 = vmul.f32 2.0, %v803_v40 }
 0x20b   :  { %3975 = vset.pattern.permute.xlu1 %v7196_v47 }
 0x20c   :  { %2871 = vperm.xlu1 %3975, %v5255_v18   ;;  %v906_v35 = vsub.f32 %v842_v53, %v874_v52 }
 0x20d   :  { %2091 = vperm.xlu0 %4004, %v5090_v31  }
 0x20e   :  { %v5445_v59 = vpop.permute.xlu1 %1296 }
 0x210   :  { %2875 = vperm.xlu1 %3975, %v5059_v27   ;;  %v1143_v27 = vsel %vm1141_vm10, %v1142_v62, %v1140_v25  ;;  %v1204_v62 = vmul.f32 0.8333333, %v1171_v28  ;;  %v938_v28 = vmax.f32 %v906_v35, 0.0  ;;  %vm3595_vm10 = vcmask 523264  }
 0x211   :  { %2139 = vperm.xlu0 %4004, %v5193_v32   ;;  %v1200_v36 = vmul.f32 0.8333333, %v1143_v27 }
 0x212   :  { %v5452_v16 = vpop.permute.xlu1 %1306  ;;  %v1236_v58 = vsub.f32 1.0, %v1204_v62  ;;  %4076 = vrsqrt.f32 %v938_v28  ;;  %vm1104_vm15 = vcmp.eq.f32.partialorder %v938_v28, inf  ;;  %v1107_v6 = vand.u32 2147483648, %v938_v28 }
 0x213   :  { %v1232_v2 = vsub.f32 1.0, %v1200_v36  ;;  %vm1106_vm0 = vcmp.eq.f32.partialorder %v938_v28, 0.0 }
 0x214   :  { %3976 = vset.pattern.permute.xlu1 %v7328_v19  ;;  %v5507_v54 = vmax.f32 %v1236_v58, 0.0 }
 0x215   :  { %1739 = vperm.xlu1 %3976, %v5119_v49   ;;  %2123 = vperm.xlu0 %4004, %v5119_v49   ;;  %v5488_v7 = vmax.f32 %v1232_v2, 0.0 }
 0x216   :  { %v5462_v44 = vpop.permute.xlu1 %1316  ;;  %7371 = vst [vmem:[#allocation37_spill] sm:$0xff] %v5507_v54 }
 0x217   :  { %7362 = vst [vmem:[#allocation28_spill] sm:$0xff] %v5462_v44  ;;  %7366 = vst [vmem:[#allocation39_spill] sm:$0xff] %v5488_v7  ;;  %v5619_v44 = vld [vmem:[%s7182_s1 + $0x8] sm:$0xff] }
 0x218   :  { %v1815_v24 = vmul.f32 %v5482_v39, %v5619_v44 }
 0x219   :  { %1759 = vperm.xlu1 %3976, %v5467_v41   ;;  %2171 = vperm.xlu0 %4004, %v5464_v21  }
 0x21a   :  { %v5474_v42 = vpop.permute.xlu1 %1326  ;;  %v1853_v39 = vsel %vm1461_vm1, %v1815_v24, 0.0 }
 0x21b   :  { %7364 = vst [vmem:[#allocation30_spill] sm:$0xff] %v5474_v42 }
 0x21c   :  { %v4077_v29 = vpop.eup %4076 }
 0x21d   :  { %1787 = vperm.xlu1 %3976, %v5464_v21   ;;  %2127 = vperm.xlu0 %4004, %v5477_v56   ;;  %v1103_v55 = vmul.f32 %v4077_v29, %v938_v28 }
 0x21e   :  { %v5484_v25 = vpop.permute.xlu1 %1336 }
 0x21f   :  { %7365 = vst [vmem:[#allocation31_spill] sm:$0xff] %v5484_v25  ;;  %v1105_v52 = vsel %vm1104_vm15, %v938_v28, %v1103_v55 }
 0x220   :  { %v1108_v35 = vsel %vm1106_vm0, %v1107_v6, %v1105_v52 }
 0x221   :  { %3977 = vset.pattern.permute.xlu1 %v7336_v48  ;;  %2179 = vperm.xlu0 %4004, %v5488_v7   ;;  %v1195_v29 = vmul.f32 0.8333333, %v1108_v35 }
 0x222   :  { %v5496_v27 = vpop.permute.xlu1 %1346  ;;  %2119 = vperm.xlu1 %3977, %v5340_v38   ;;  %v5509_v11 = vpop.permute.xlu0 %1751 }
 0x223   :  { %7368 = vst [vmem:[#allocation17_spill] sm:$0xff] %v5496_v27  ;;  %v1227_v28 = vsub.f32 1.0, %v1195_v29  ;;  %v7377_v29 = vmov 4   ;;  %v7381_v27 = vmov 0  }
 0x225   :  { %2163 = vperm.xlu0 %4004, %v5499_v33   ;;  %v5576_v52 = vmax.f32 %v1227_v28, 0.0 }
 0x226   :  { %v5504_v14 = vpop.permute.xlu1 %1356  ;;  %2135 = vperm.xlu1 %3977, %v5180_v61   ;;  %v5519_v2 = vpop.permute.xlu0 %1711 }
 0x227   :  { %7370 = vst [vmem:[#allocation3_spill] sm:$0xff] %v5504_v14  ;;  %7374 = vst [vmem:[#allocation16_spill] sm:$0xff] %v5576_v52 }
 0x229   :  { %2195 = vperm.xlu0 %4004, %v5507_v54  }
 0x22a   :  { %v5512_v36 = vpop.permute.xlu1 %1366  ;;  %3978 = vset.pattern.permute.xlu1 %v7198_v12 }
 0x22b   :  { %7372 = vst [vmem:[#allocation42_spill] sm:$0xff] %v5512_v36  ;;  %2471 = vperm.xlu1 %3978, %v5333_v60  }
 0x22d   :  { %4006 = vset.pattern.permute.xlu0 %v7196_v47 }
 0x22e   :  { %2843 = vperm.xlu0 %4006, %v5038_v45  }
 0x22f   :  { %v5522_v10 = vpop.permute.xlu1 %1687  ;;  %3979 = vset.pattern.permute.xlu1 %v7196_v47 }
 0x230   :  { %2851 = vperm.xlu1 %3979, %v5077_v4  }
 0x232   :  { %2847 = vperm.xlu0 %4006, %v5057_v8   ;;  %v5527_v43 = vpop.permute.xlu0 %1783 }
 0x233   :  { %v5529_v0 = vpop.permute.xlu1 %1695 }
 0x234   :  { %2879 = vperm.xlu1 %3979, %v5302_v17  }
 0x236   :  { %2855 = vperm.xlu0 %4006, %v5333_v60   ;;  %v5533_v50 = vpop.permute.xlu0 %1715 }
 0x237   :  { %v5535_v62 = vpop.permute.xlu1 %1719 }
 0x238   :  { %3980 = vset.pattern.permute.xlu1 %v7328_v19 }
 0x239   :  { %1743 = vperm.xlu1 %3980, %v5477_v56  }
 0x23a   :  { %2859 = vperm.xlu0 %4006, %v5090_v31   ;;  %v5540_v8 = vpop.permute.xlu0 %1791 }
 0x23c   :  { %v5542_v4 = vpop.permute.xlu1 %2071 }
 0x23d   :  { %1763 = vperm.xlu1 %3980, %v5213_v22  }
 0x23e   :  { %2907 = vperm.xlu0 %4006, %v5193_v32   ;;  %v5546_v63 = vpop.permute.xlu0 %1767 }
 0x241   :  { %v5548_v46 = vpop.permute.xlu1 %1699  ;;  %3981 = vset.pattern.permute.xlu1 %v7336_v48 }
 0x242   :  { %2095 = vperm.xlu1 %3981, %v5201_v13   ;;  %2891 = vperm.xlu0 %4006, %v5119_v49   ;;  %v5553_v58 = vpop.permute.xlu0 %1799 }
 0x245   :  { %v5555_v40 = vpop.permute.xlu1 %1727 }
 0x246   :  { %2143 = vperm.xlu1 %3981, %v5467_v41   ;;  %2939 = vperm.xlu0 %4006, %v5464_v21   ;;  %v5559_v53 = vpop.permute.xlu0 %1803 }
 0x24a   :  { %v5561_v47 = vpop.permute.xlu1 %2103  ;;  %2167 = vperm.xlu1 %3981, %v5239_v26   ;;  %2867 = vperm.xlu0 %4006, %v5112_v34   ;;  %v5567_v36 = vpop.permute.xlu0 %1807  ;;  %v7391_v26 = vmov 3  }
 0x24e   :  { %3982 = vset.pattern.permute.xlu1 %v7198_v12  ;;  %2943 = vperm.xlu0 %4006, %v5276_v37  }
 0x24f   :  { %v5569_v14 = vpop.permute.xlu1 %2455  ;;  %2475 = vperm.xlu1 %3982, %v5090_v31   ;;  %v5578_v6 = vpop.permute.xlu0 %2459 }
 0x252   :  { %2919 = vperm.xlu0 %4006, %v5292_v23  }
 0x253   :  { %2519 = vperm.xlu1 %3982, %v5180_v61   ;;  %v5585_v31 = vpop.permute.xlu0 %2487 }
 0x254   :  { %v5574_v55 = vpop.permute.xlu1 %1703  ;;  %7376 = vst [vmem:[#allocation6_spill] sm:$0xff] %v5585_v31 }
 0x256   :  { %2927 = vperm.xlu0 %4006, %v5576_v52  }
 0x257   :  { %2523 = vperm.xlu1 %3982, %v5193_v32   ;;  %v5593_v28 = vpop.permute.xlu0 %2499 }
 0x258   :  { %v5582_v35 = vpop.permute.xlu1 %1731  ;;  %7379 = vst [vmem:[#allocation23_spill] sm:$0xff] %v5593_v28 }
 0x259   :  { %7375 = vst [vmem:[#allocation34_spill] sm:$0xff] %v5582_v35 }
 0x25a   :  { %2931 = vperm.xlu0 %4006, %v5499_v33  }
 0x25b   :  { %3983 = vset.pattern.permute.xlu1 %v7377_v29 }
 0x25c   :  { %2883 = vperm.xlu1 %3983, %v5117_v9   ;;  %v5603_v9 = vpop.permute.xlu0 %2503 }
 0x25d   :  { %v5589_v12 = vpop.permute.xlu1 %2111  ;;  %7383 = vst [vmem:[#allocation44_spill] sm:$0xff] %v5603_v9 }
 0x25e   :  { %7378 = vst [vmem:[#allocation20_spill] sm:$0xff] %v5589_v12  ;;  %2963 = vperm.xlu0 %4006, %v5507_v54  }
 0x260   :  { %3984 = vset.pattern.permute.xlu1 %v7328_v19 }
 0x261   :  { %1747 = vperm.xlu1 %3984, %v5134_v57  }
 0x262   :  { %v5596_v32 = vpop.permute.xlu1 %2463  ;;  %4011 = vset.pattern.permute.xlu0 %v7381_v27  ;;  %v5621_v27 = vpop.permute.xlu0 %2479 }
 0x263   :  { %7380 = vst [vmem:[#allocation36_spill] sm:$0xff] %v5596_v32  ;;  %1276 = vperm.xlu0 %4011, %v5038_v45   ;;  %v5614_v45 = vld [vmem:[%s7182_s1] sm:$0xff]  ;;  %7385 = vst [vmem:[#allocation22_spill] sm:$0xff] %v5621_v27  ;;  %v1854_v27 = vrot.slane %v1853_v39, 4 }
 0x265   :  { %1795 = vperm.xlu1 %3984, %v5488_v7   ;;  %v5635_v7 = vld [vmem:[%s7182_s1 + $0x10] sm:$0xff] }
 0x266   :  { %v5601_v25 = vpop.permute.xlu1 %2491  ;;  %7387 = vst [vmem:[#allocation9_spill] sm:$0xff] %v5635_v7  ;;  %v1431_v20 = vmul.f32 %v5434_v5, %v5635_v7 }
 0x267   :  { %7382 = vst [vmem:[#allocation19_spill] sm:$0xff] %v5601_v25  ;;  %1291 = vperm.xlu0 %4011, %v5333_v60   ;;  %v1429_v60 = vmul.f32 %v5426_v30, %v5614_v45 }
 0x268   :  { %v1476_v24 = vsel %vm1461_vm1, %v1431_v20, 0.0 }
 0x269   :  { %3985 = vset.pattern.permute.xlu1 %v7336_v48  ;;  %v1462_v30 = vsel %vm1461_vm1, %v1429_v60, 0.0 }
 0x26a   :  { %2099 = vperm.xlu1 %3985, %v5112_v34   ;;  %v1463_v25 = vrot.slane %v1462_v30, 4 }
 0x26b   :  { %v5608_v42 = vpop.permute.xlu1 %2839  ;;  %1301 = vperm.xlu0 %4011, %v5201_v13  }
 0x26c   :  { %7384 = vst [vmem:[#allocation32_spill] sm:$0xff] %v5608_v42  ;;  %v1464_v5 = vadd.f32 %v1463_v25, %v1462_v30  ;;  %v5678_v30 = vld [vmem:[%s7182_s1 + $0x30] sm:$0xff] }
 0x26d   :  { %7396 = vst [vmem:[#allocation10_spill] sm:$0xff] %v5678_v30  ;;  %v1820_v32 = vmul.f32 %v5519_v2, %v5678_v30  ;;  %v68_v30 = vld [vmem:[%s7182_s1 + $0x38] sm:$0xff] }
 0x26e   :  { %2147 = vperm.xlu1 %3985, %v5213_v22   ;;  %v5642_v22 = vpop.permute.xlu0 %2551  ;;  %v1465_v25 = vrot.slane %v1464_v5, 2 }
 0x26f   :  { %1311 = vperm.xlu0 %4011, %v5255_v18   ;;  %v5640_v18 = vld [vmem:[%s7182_s1 + $0x48] sm:$0xff]  ;;  %7389 = vst [vmem:[#allocation5_spill] sm:$0xff] %v5642_v22  ;;  %v1855_v22 = vadd.f32 %v1854_v27, %v1853_v39  ;;  %v1814_v39 = vmul.f32 %v5522_v10, %v5614_v45  ;;  %v5694_v10 = vld [vmem:[%s7182_s1 + $0xc0] sm:$0xff] }
 0x270   :  { %v5629_v51 = vpop.permute.xlu1 %1707  ;;  %7388 = vst [vmem:[#allocation18_spill] sm:$0xff] %v5640_v18  ;;  %v1823_v42 = vmul.f32 %v5501_v15, %v5640_v18  ;;  %v77_v15 = vld [vmem:[%s7182_s1 + $0x80] sm:$0xff]  ;;  %7398 = vst [vmem:[#allocation7_spill] sm:$0xff] %v5694_v10  ;;  %v1466_v13 = vadd.f32 %v1465_v25, %v1464_v5  ;;  %v1838_v5 = vmul.f32 %v5527_v43, %v5694_v10 }
 0x271   :  { %7386 = vst [vmem:[#allocation43_spill] sm:$0xff] %v5629_v51  ;;  %v1856_v27 = vrot.slane %v1855_v22, 2 }
 0x272   :  { %2175 = vperm.xlu1 %3985, %v5276_v37   ;;  %v5658_v60 = vpop.permute.xlu0 %2531  ;;  %v87_v37 = vld [vmem:[%s7182_s1 + $0xd0] sm:$0xff] }
 0x273   :  { %1321 = vperm.xlu0 %4011, %v5302_v17   ;;  %7393 = vst [vmem:[#allocation35_spill] sm:$0xff] %v5658_v60  ;;  %v1857_v28 = vadd.f32 %v1856_v27, %v1855_v22  ;;  %v5713_v22 = vld [vmem:[%s7182_s1 + $0x28] sm:$0xff] }
 0x274   :  { %v5647_v51 = vpop.permute.xlu1 %1735 }
 0x275   :  { %7390 = vst [vmem:[#allocation38_spill] sm:$0xff] %v5647_v51  ;;  %v1909_v51 = vsel %vm1461_vm1, %v1823_v42, 0.0  ;;  %v1830_v42 = vmul.f32 %v5509_v11, %v77_v15 }
 0x276   :  { %3986 = vset.pattern.permute.xlu1 %v7391_v26  ;;  %v1910_v18 = vrot.slane %v1909_v51, 4  ;;  %v5682_v60 = vpop.permute.xlu0 %2515 }
 0x277   :  { %2507 = vperm.xlu1 %3986, %v5119_v49   ;;  %1331 = vperm.xlu0 %4011, %v5340_v38   ;;  %v1477_v49 = vrot.slane %v1476_v24, 4  ;;  %7397 = vst [vmem:[#allocation41_spill] sm:$0xff] %v5682_v60  ;;  %v1958_v12 = vsel %vm1461_vm1, %v1830_v42, 0.0  ;;  %v1816_v60 = vmul.f32 %v5529_v0, %v5635_v7  ;;  %v1888_v42 = vsel %vm1461_vm1, %v1820_v32, 0.0 }
 0x278   :  { %v5656_v17 = vpop.permute.xlu1 %1755  ;;  %v1911_v15 = vadd.f32 %v1910_v18, %v1909_v51  ;;  %v5704_v51 = vld [vmem:[%s7182_s1 + $0x40] sm:$0xff]  ;;  %v1434_v32 = vmul.f32 %v5445_v59, %v5713_v22 }
 0x279   :  { %7392 = vst [vmem:[#allocation45_spill] sm:$0xff] %v5656_v17  ;;  %v5670_v17 = vld [vmem:[%s7182_s1 + $0x18] sm:$0xff]  ;;  %v1478_v11 = vadd.f32 %v1477_v49, %v1476_v24  ;;  %7400 = vst [vmem:[#allocation27_spill] sm:$0xff] %v5704_v51  ;;  %v1959_v24 = vrot.slane %v1958_v12, 4 }
 0x27a   :  { %7394 = vst [vmem:[#allocation4_spill] sm:$0xff] %v5670_v17  ;;  %v1912_v18 = vrot.slane %v1911_v15, 2  ;;  %v5717_v49 = vpop.permute.xlu0 %2539 }
 0x27b   :  { %2527 = vperm.xlu1 %3986, %v5467_v41   ;;  %1341 = vperm.xlu0 %4011, %v5477_v56   ;;  %v1479_v0 = vrot.slane %v1478_v11, 2  ;;  %7401 = vst [vmem:[#allocation8_spill] sm:$0xff] %v5717_v49  ;;  %v1821_v49 = vmul.f32 %v5533_v50, %v68_v30 }
 0x27c   :  { %v1913_v7 = vadd.f32 %v1912_v18, %v1911_v15  ;;  %v81_v18 = vld [vmem:[%s7182_s1 + $0xa0] sm:$0xff] }
 0x27d   :  { %v5672_v20 = vpop.permute.xlu1 %2087 }
 0x27e   :  { %7395 = vst [vmem:[#allocation26_spill] sm:$0xff] %v5672_v20  ;;  %v1432_v20 = vmul.f32 %v5439_v3, %v5670_v17  ;;  %v1846_v3 = vsel %vm1461_vm1, %v1814_v39, 0.0  ;;  %v1467_v39 = vrot.slane %v1466_v13, 1 }
 0x27f   :  { %2555 = vperm.xlu1 %3986, %v5464_v21   ;;  %1351 = vperm.xlu0 %4011, %v5180_v61   ;;  %v1847_v25 = vrot.slane %v1846_v3, 4 }
 0x280   :  { %v1483_v2 = vsel %vm1461_vm1, %v1432_v20, 0.0  ;;  %v1860_v20 = vsel %vm1461_vm1, %v1816_v60, 0.0  ;;  %v5733_v60 = vadd.f32 %v1479_v0, %v1478_v11  ;;  %v5740_v59 = vadd.f32 %v1467_v39, %v1466_v13 }
 0x281   :  { %v1484_v43 = vrot.slane %v1483_v2, 4  ;;  %v1861_v10 = vrot.slane %v1860_v20, 4  ;;  %v1848_v35 = vadd.f32 %v1847_v25, %v1846_v3  ;;  %v1895_v3 = vsel %vm1461_vm1, %v1821_v49, 0.0 }
 0x282   :  { %v5698_v9 = vpop.permute.xlu1 %2467  ;;  %7403 = vst [vmem:[#allocation47_spill] sm:$0xff] %v5733_v60  ;;  %7404 = vst [vmem:[#allocation48_spill] sm:$0xff] %v5740_v59  ;;  %v2198_v39 = vmul.f32 %v5542_v4, %v5614_v45  ;;  %v5774_v4 = vld [vmem:[%s7182_s1 + $0x50] sm:$0xff] }
 0x283   :  { %7399 = vst [vmem:[#allocation11_spill] sm:$0xff] %v5698_v9  ;;  %3987 = vset.pattern.permute.xlu1 %v7377_v29  ;;  %1361 = vperm.xlu0 %4011, %v5467_v41   ;;  %v1858_v9 = vrot.slane %v1857_v28, 1  ;;  %v1960_v41 = vadd.f32 %v1959_v24, %v1958_v12  ;;  %v1485_v0 = vadd.f32 %v1484_v43, %v1483_v2  ;;  %v1497_v12 = vsel %vm1461_vm1, %v1434_v32, 0.0 }
 0x284   :  { %2887 = vperm.xlu1 %3987, %v5340_v38   ;;  %v1822_v38 = vmul.f32 %v5535_v62, %v5704_v51  ;;  %v1889_v62 = vrot.slane %v1888_v42, 4  ;;  %v1840_v24 = vmul.f32 %v5540_v8, %v87_v37  ;;  %v1849_v25 = vrot.slane %v1848_v35, 2 }
 0x285   :  { %v5742_v50 = vadd.f32 %v1858_v9, %v1857_v28  ;;  %v1862_v28 = vadd.f32 %v1861_v10, %v1860_v20  ;;  %v1961_v49 = vrot.slane %v1960_v41, 2  ;;  %v1834_v10 = vmul.f32 %v5546_v63, %v81_v18 }
 0x286   :  { %v5723_v27 = vpop.permute.xlu1 %2495  ;;  %v1902_v31 = vsel %vm1461_vm1, %v1822_v38, 0.0  ;;  %v1890_v13 = vadd.f32 %v1889_v62, %v1888_v42  ;;  %v1896_v38 = vrot.slane %v1895_v3, 4  ;;  %v1817_v37 = vmul.f32 %v5548_v46, %v5670_v17 }
 0x287   :  { %7402 = vst [vmem:[#allocation46_spill] sm:$0xff] %v5723_v27  ;;  %1371 = vperm.xlu0 %4011, %v5292_v23   ;;  %v2014_v27 = vsel %vm1461_vm1, %v1838_v5, 0.0  ;;  %v1903_v9 = vrot.slane %v1902_v31, 4  ;;  %v1914_v5 = vrot.slane %v1913_v7, 1  ;;  %v1486_v42 = vrot.slane %v1485_v0, 2 }
 0x288   :  { %2903 = vperm.xlu1 %3987, %v5180_v61   ;;  %v5744_v61 = vpop.permute.xlu0 %2571  ;;  %v2015_v15 = vrot.slane %v2014_v27, 4  ;;  %v1498_v20 = vrot.slane %v1497_v12, 4  ;;  %v1891_v62 = vrot.slane %v1890_v13, 2  ;;  %v1863_v2 = vrot.slane %v1862_v28, 2 }
 0x289   :  { %v1904_v59 = vadd.f32 %v1903_v9, %v1902_v31  ;;  %v2028_v60 = vsel %vm1461_vm1, %v1840_v24, 0.0  ;;  %v5779_v46 = vadd.f32 %v1914_v5, %v1913_v7  ;;  %v5785_v31 = vld [vmem:[%s7182_s1 + $0xe8] sm:$0xff]  ;;  %v1897_v18 = vadd.f32 %v1896_v38, %v1895_v3 }
 0x28a   :  { %v2016_v43 = vadd.f32 %v2015_v15, %v2014_v27  ;;  %v1436_v27 = vmul.f32 %v5452_v16, %v68_v30  ;;  %v1962_v15 = vadd.f32 %v1961_v49, %v1960_v41  ;;  %v2230_v9 = vsel %vm1461_vm1, %v2198_v39, 0.0 }
 0x28b   :  { %v5746_v11 = vpop.permute.xlu1 %2871  ;;  %1396 = vperm.xlu0 %4011, %v5464_v21   ;;  %v89_v21 = vld [vmem:[%s7182_s1 + $0xe0] sm:$0xff]  ;;  %v1986_v24 = vsel %vm1461_vm1, %v1834_v10, 0.0  ;;  %v2029_v41 = vrot.slane %v2028_v60, 4  ;;  %v1892_v5 = vadd.f32 %v1891_v62, %v1890_v13  ;;  %v1864_v3 = vadd.f32 %v1863_v2, %v1862_v28 }
 0x28c   :  { %7405 = vst [vmem:[#allocation49_spill] sm:$0xff] %v5746_v11  ;;  %3988 = vset.pattern.permute.xlu1 %v7328_v19  ;;  %v1842_v32 = vmul.f32 %v5553_v58, %v89_v21  ;;  %v5776_v63 = vpop.permute.xlu0 %2075  ;;  %v1850_v58 = vadd.f32 %v1849_v25, %v1848_v35  ;;  %v1867_v21 = vsel %vm1461_vm1, %v1817_v37, 0.0  ;;  %v2017_v16 = vrot.slane %v2016_v43, 2 }
 0x28d   :  { %1771 = vperm.xlu1 %3988, %v5391_v1   ;;  %v1824_v35 = vmul.f32 %v5555_v40, %v5774_v4  ;;  %v1905_v49 = vrot.slane %v1904_v59, 2  ;;  %v1843_v25 = vmul.f32 %v5559_v53, %v5785_v31  ;;  %v5799_v38 = vadd.f32 %v1486_v42, %v1485_v0 }
 0x28e   :  { %v2042_v7 = vsel %vm1461_vm1, %v1842_v32, 0.0  ;;  %v2231_v39 = vrot.slane %v2230_v9, 4  ;;  %v1987_v10 = vrot.slane %v1986_v24, 4  ;;  %v1868_v37 = vrot.slane %v1867_v21, 4 }
 0x28f   :  { %v5766_v8 = vpop.permute.xlu1 %2875  ;;  %1376 = vperm.xlu0 %4011, %v5391_v1   ;;  %7408 = vst [vmem:[#allocation52_spill] sm:$0xff] %v5799_v38  ;;  %v5802_v32 = vadd.f32 %v1498_v20, %v1497_v12  ;;  %v1898_v40 = vrot.slane %v1897_v18, 2  ;;  %v1963_v13 = vrot.slane %v1962_v15, 1  ;;  %v2018_v28 = vadd.f32 %v2017_v16, %v2016_v43 }
 0x290   :  { %7406 = vst [vmem:[#allocation50_spill] sm:$0xff] %v5766_v8  ;;  %v1851_v8 = vrot.slane %v1850_v58, 1  ;;  %v5804_v11 = vpop.permute.xlu0 %2079  ;;  %v2030_v53 = vadd.f32 %v2029_v41, %v2028_v60  ;;  %v1916_v0 = vsel %vm1461_vm1, %v1824_v35, 0.0  ;;  %v1893_v42 = vrot.slane %v1892_v5, 1 }
 0x291   :  { %3989 = vset.pattern.permute.xlu1 %v7336_v48  ;;  %7409 = vst [vmem:[#allocation53_spill] sm:$0xff] %v5802_v32  ;;  %v1865_v62 = vrot.slane %v1864_v3, 1  ;;  %v1906_v38 = vadd.f32 %v1905_v49, %v1904_v59  ;;  %v2049_v12 = vsel %vm1461_vm1, %v1843_v25, 0.0  ;;  %v5812_v20 = vsel %vm1461_vm1, %v1436_v27, 0.0 }
 0x292   :  { %2131 = vperm.xlu1 %3989, %v5134_v57   ;;  %v2043_v57 = vrot.slane %v2042_v7, 4  ;;  %7411 = vst [vmem:[#allocation55_spill] sm:$0xff] %v5812_v20  ;;  %v2232_v32 = vadd.f32 %v2231_v39, %v2230_v9  ;;  %v1869_v17 = vadd.f32 %v1868_v37, %v1867_v21  ;;  %v1899_v43 = vadd.f32 %v1898_v40, %v1897_v18  ;;  %v91_v18 = vld [vmem:[%s7182_s1 + $0xf0] sm:$0xff] }
 0x293   :  { %1381 = vperm.xlu0 %4011, %v5576_v52   ;;  %v1917_v16 = vrot.slane %v1916_v0, 4  ;;  %v5816_v41 = vadd.f32 %v1963_v13, %v1962_v15  ;;  %v2019_v35 = vrot.slane %v2018_v28, 1  ;;  %v2031_v59 = vrot.slane %v2030_v53, 2  ;;  %v5842_v13 = vld [vmem:[%s7182_s1 + $0x20] sm:$0xff] }
 0x294   :  { %v5795_v30 = vpop.permute.xlu1 %1739  ;;  %v2044_v60 = vadd.f32 %v2043_v57, %v2042_v7  ;;  %v2050_v49 = vrot.slane %v2049_v12, 4  ;;  %v5821_v9 = vadd.f32 %v1893_v42, %v1892_v5  ;;  %v1907_v21 = vrot.slane %v1906_v38, 1  ;;  %v5825_v57 = vpop.permute.xlu0 %2107 }
 0x295   :  { %7407 = vst [vmem:[#allocation51_spill] sm:$0xff] %v5795_v30  ;;  %v1988_v30 = vadd.f32 %v1987_v10, %v1986_v24  ;;  %7412 = vst [vmem:[#allocation56_spill] sm:$0xff] %v5816_v41  ;;  %v1866_v24 = vadd.f32 %v1865_v62, %v1864_v3  ;;  %v1870_v15 = vrot.slane %v1869_v17, 2  ;;  %v2582_v7 = vmul.f32 %v5569_v14, %v5614_v45 }
 0x296   :  { %2151 = vperm.xlu1 %3989, %v5292_v23   ;;  %7414 = vst [vmem:[#allocation58_spill] sm:$0xff] %v5821_v9  ;;  %v1900_v3 = vrot.slane %v1899_v43, 1  ;;  %v2045_v25 = vrot.slane %v2044_v60, 2  ;;  %v1918_v39 = vadd.f32 %v1917_v16, %v1916_v0  ;;  %v2032_v10 = vadd.f32 %v2031_v59, %v2030_v53  ;;  %v7443_v9 = vld [vmem:[#allocation14_spill] sm:$0xff] }
 0x297   :  { %1386 = vperm.xlu0 %4011, %v5499_v33   ;;  %v1852_v33 = vadd.f32 %v1851_v8, %v1850_v58  ;;  %v2206_v8 = vmul.f32 %v5561_v47, %v5704_v51  ;;  %v2233_v58 = vrot.slane %v2232_v32, 2  ;;  %v5835_v47 = vadd.f32 %v2019_v35, %v2018_v28 }
 0x298   :  { %v5808_v2 = vpop.permute.xlu1 %1759  ;;  %v2051_v37 = vadd.f32 %v2050_v49, %v2049_v12  ;;  %v2583_v40 = vmul.f32 %v5578_v6, %v5619_v44  ;;  %v1908_v14 = vadd.f32 %v1907_v21, %v1906_v38  ;;  %v1844_v28 = vmul.f32 %v5567_v36, %v91_v18  ;;  %v5855_v59 = vpop.permute.xlu0 %2083  ;;  %v7417_v38 = vld [vmem:[#allocation15_spill] sm:$0xff]  ;;  %v5863_v36 = vld [vmem:[%s7182_s1 + $0x58] sm:$0xff]  ;;  %v7419_v21 = vld [vmem:[#allocation6_spill] sm:$0xff] }
 0x299   :  { %7410 = vst [vmem:[#allocation54_spill] sm:$0xff] %v5808_v2  ;;  %v3325_v5 = vsel %vm3254_vm2, %v5742_v50, %v1852_v33  ;;  %7415 = vst [vmem:[#allocation59_spill] sm:$0xff] %v5835_v47  ;;  %v2286_v50 = vsel %vm1461_vm1, %v2206_v8, 0.0  ;;  %v2234_v0 = vadd.f32 %v2233_v58, %v2232_v32  ;;  %v1871_v6 = vadd.f32 %v1870_v15, %v1869_v17  ;;  %v7420_v58 = vld [vmem:[#allocation34_spill] sm:$0xff]  ;;  %v7423_v47 = vld [vmem:[#allocation23_spill] sm:$0xff] }
 0x29a   :  { %3990 = vset.pattern.permute.xlu1 %v7391_v26  ;;  %v5846_v33 = vsel %vm3256_vm3, %v1866_v24, %v3325_v5  ;;  %v2614_v62 = vsel %vm1461_vm1, %v2582_v7, 0.0  ;;  %v2046_v12 = vadd.f32 %v2045_v25, %v2044_v60  ;;  %v1919_v16 = vrot.slane %v1918_v39, 2 }
 0x29b   :  { %2483 = vperm.xlu1 %3990, %v5112_v34   ;;  %1426 = vperm.xlu0 %4011, %v5507_v54   ;;  %v1989_v34 = vrot.slane %v1988_v30, 2  ;;  %v1818_v35 = vmul.f32 %v5574_v55, %v5842_v13  ;;  %v5858_v49 = vadd.f32 %v1900_v3, %v1899_v43  ;;  %v2033_v17 = vrot.slane %v2032_v10, 1  ;;  %v7437_v54 = vld [vmem:[#allocation7_spill] sm:$0xff] }
 0x29c   :  { %v5819_v27 = vpop.permute.xlu1 %1787  ;;  %v2287_v32 = vrot.slane %v2286_v50, 4  ;;  %v2621_v60 = vsel %vm1461_vm1, %v2583_v40, 0.0  ;;  %v2056_v24 = vsel %vm1461_vm1, %v1844_v28, 0.0  ;;  %v2615_v55 = vrot.slane %v2614_v62, 4 }
 0x29d   :  { %7413 = vst [vmem:[#allocation57_spill] sm:$0xff] %v5819_v27  ;;  %v1990_v42 = vadd.f32 %v1989_v34, %v1988_v30  ;;  %7418 = vst [vmem:[#allocation61_spill] sm:$0xff] %v5858_v49  ;;  %v2052_v30 = vrot.slane %v2051_v37, 2  ;;  %v2590_v8 = vmul.f32 %v7419_v21, %v5704_v51  ;;  %v1825_v43 = vmul.f32 %v7420_v58, %v5863_v36  ;;  %v7441_v49 = vld [vmem:[#allocation18_spill] sm:$0xff] }
 0x29e   :  { %v5875_v15 = vsel %vm3254_vm2, %v5779_v46, %v1908_v14  ;;  %v2235_v18 = vrot.slane %v2234_v0, 1  ;;  %v1872_v5 = vrot.slane %v1871_v6, 1  ;;  %v2047_v3 = vrot.slane %v2046_v12, 1  ;;  %v5886_v46 = vld [vmem:[%s7182_s1 + $0x60] sm:$0xff]  ;;  %v7424_v14 = vld [vmem:[#allocation12_spill] sm:$0xff] }
 0x29f   :  { %2511 = vperm.xlu1 %3990, %v5477_v56   ;;  %4013 = vset.pattern.permute.xlu0 %v7377_v29  ;;  %v1991_v7 = vrot.slane %v1990_v42, 1  ;;  %v1920_v25 = vadd.f32 %v1919_v16, %v1918_v39  ;;  %v2622_v40 = vrot.slane %v2621_v60, 4  ;;  %v1874_v28 = vsel %vm1461_vm1, %v1818_v35, 0.0 }
 0x2a0   :  { %v5879_v21 = vadd.f32 %v2033_v17, %v2032_v10  ;;  %v2053_v20 = vadd.f32 %v2052_v30, %v2051_v37  ;;  %v2057_v58 = vrot.slane %v2056_v24, 4  ;;  %v2593_v41 = vmul.f32 %v7423_v47, %v5863_v36  ;;  %v5891_v10 = vpop.permute.xlu0 %2115 }
 0x2a1   :  { %v5850_v53 = vpop.permute.xlu1 %2119  ;;  %v2288_v39 = vadd.f32 %v2287_v32, %v2286_v50  ;;  %v2616_v16 = vadd.f32 %v2615_v55, %v2614_v62  ;;  %v2670_v35 = vsel %vm1461_vm1, %v2590_v8, 0.0  ;;  %7425 = vst [vmem:[#allocation23_spill] sm:$0xff] %v5891_v10  ;;  %v5893_v37 = vadd.f32 %v2235_v18, %v2234_v0  ;;  %v7430_v50 = vld [vmem:[#allocation44_spill] sm:$0xff]  ;;  %v7431_v0 = vld [vmem:[#allocation29_spill] sm:$0xff] }
 0x2a2   :  { %7416 = vst [vmem:[#allocation60_spill] sm:$0xff] %v5850_v53  ;;  %7422 = vst [vmem:[#allocation34_spill] sm:$0xff] %v5879_v21  ;;  %v5895_v17 = vadd.f32 %v1991_v7, %v1990_v42  ;;  %v1873_v47 = vadd.f32 %v1872_v5, %v1871_v6  ;;  %v1875_v30 = vrot.slane %v1874_v28, 4  ;;  %v5899_v27 = vadd.f32 %v2047_v3, %v2046_v12  ;;  %v7432_v7 = vld [vmem:[#allocation9_spill] sm:$0xff]  ;;  %v7433_v5 = vld [vmem:[#allocation36_spill] sm:$0xff] }
 0x2a3   :  { %2559 = vperm.xlu1 %3990, %v7417_v38   ;;  %v1923_v38 = vsel %vm1461_vm1, %v1825_v43, 0.0  ;;  %7426 = vst [vmem:[#allocation12_spill] sm:$0xff] %v5893_v37  ;;  %v1921_v2 = vrot.slane %v1920_v25, 1  ;;  %v2594_v62 = vmul.f32 %v7430_v50, %v5886_v46  ;;  %v2058_v32 = vadd.f32 %v2057_v58, %v2056_v24  ;;  %v7434_v3 = vld [vmem:[#allocation20_spill] sm:$0xff] }
 0x2a4   :  { %7427 = vst [vmem:[#allocation62_spill] sm:$0xff] %v5895_v17  ;;  %7429 = vst [vmem:[#allocation64_spill] sm:$0xff] %v5899_v27  ;;  %v2671_v55 = vrot.slane %v2670_v35, 4  ;;  %v2691_v8 = vsel %vm1461_vm1, %v2593_v41, 0.0  ;;  %v1924_v43 = vrot.slane %v1923_v38, 4  ;;  %v2054_v42 = vrot.slane %v2053_v20, 1 }
 0x2a5   :  { %v5871_v34 = vpop.permute.xlu1 %2135  ;;  %v2289_v18 = vrot.slane %v2288_v39, 2  ;;  %v2617_v6 = vrot.slane %v2616_v16, 2  ;;  %v2584_v17 = vmul.f32 %v7433_v5, %v7432_v7  ;;  %v1876_v12 = vadd.f32 %v1875_v30, %v1874_v28  ;;  %v7436_v27 = vld [vmem:[#allocation22_spill] sm:$0xff] }
 0x2a6   :  { %7421 = vst [vmem:[#allocation6_spill] sm:$0xff] %v5871_v34  ;;  %v5913_v24 = vsel %vm3258_vm4, %v1873_v47, %v5846_v33  ;;  %v2692_v58 = vrot.slane %v2691_v8, 4  ;;  %v5918_v34 = vpop.permute.xlu0 %2091  ;;  %v1922_v30 = vadd.f32 %v1921_v2, %v1920_v25  ;;  %v2672_v5 = vadd.f32 %v2671_v55, %v2670_v35 }
 0x2a7   :  { %3991 = vset.pattern.permute.xlu1 %v7377_v29  ;;  %7439 = vst [vmem:[#allocation44_spill] sm:$0xff] %v5918_v34  ;;  %v5925_v33 = vadd.f32 %v2054_v42, %v2053_v20  ;;  %v2059_v47 = vrot.slane %v2058_v32, 2  ;;  %v2618_v37 = vadd.f32 %v2617_v6, %v2616_v16  ;;  %v1877_v51 = vrot.slane %v1876_v12, 2 }
 0x2a8   :  { %2863 = vperm.xlu1 %3991, %v7424_v14   ;;  %v2623_v14 = vadd.f32 %v2622_v40, %v2621_v60  ;;  %v2208_v60 = vmul.f32 %v7434_v3, %v5774_v4  ;;  %v7435_v40 = vld [vmem:[#allocation10_spill] sm:$0xff]  ;;  %v1925_v3 = vadd.f32 %v1924_v43, %v1923_v38  ;;  %v2290_v2 = vadd.f32 %v2289_v18, %v2288_v39 }
 0x2a9   :  { %v2588_v50 = vmul.f32 %v7436_v27, %v7435_v40  ;;  %v7442_v27 = vld [vmem:[#allocation19_spill] sm:$0xff]  ;;  %7444 = vst [vmem:[#allocation9_spill] sm:$0xff] %v5925_v33  ;;  %v2693_v38 = vadd.f32 %v2692_v58, %v2691_v8  ;;  %v2673_v43 = vrot.slane %v2672_v5, 2  ;;  %v2060_v6 = vadd.f32 %v2059_v47, %v2058_v32 }
 0x2aa   :  { %v5897_v21 = vpop.permute.xlu1 %2471  ;;  %v2624_v41 = vrot.slane %v2623_v14, 2  ;;  %v2591_v40 = vmul.f32 %v7442_v27, %v7441_v49  ;;  %v1926_v20 = vrot.slane %v1925_v3, 2  ;;  %v2619_v39 = vrot.slane %v2618_v37, 1  ;;  %v5940_v18 = vpop.permute.xlu0 %2139 }
 0x2ab   :  { %7428 = vst [vmem:[#allocation63_spill] sm:$0xff] %v5897_v21  ;;  %v7438_v21 = vld [vmem:[#allocation5_spill] sm:$0xff]  ;;  %7447 = vst [vmem:[#allocation10_spill] sm:$0xff] %v5940_v18  ;;  %v5947_v27 = vsel %vm3256_vm3, %v1922_v30, %v5875_v15  ;;  %v2694_v33 = vrot.slane %v2693_v38, 2  ;;  %v2291_v47 = vrot.slane %v2290_v2, 1 }
 0x2ac   :  { %2911 = vperm.xlu1 %3991, %v7431_v0   ;;  %v2698_v0 = vsel %vm1461_vm1, %v2594_v62, 0.0  ;;  %v2606_v53 = vmul.f32 %v7438_v21, %v7437_v54  ;;  %v2628_v62 = vsel %vm1461_vm1, %v2584_v17, 0.0  ;;  %v2300_v21 = vsel %vm1461_vm1, %v2208_v60, 0.0  ;;  %v5938_v17 = vld [vmem:[%s7182_s1 + $0x98] sm:$0xff] }
 0x2ad   :  { %v2699_v54 = vrot.slane %v2698_v0, 4  ;;  %v2625_v25 = vadd.f32 %v2624_v41, %v2623_v14  ;;  %v2629_v42 = vrot.slane %v2628_v62, 4  ;;  %v2677_v16 = vsel %vm1461_vm1, %v2591_v40, 0.0  ;;  %7446 = vst [vmem:[#allocation20_spill] sm:$0xff] %v5938_v17  ;;  %v7448_v41 = vld [vmem:[#allocation35_spill] sm:$0xff] }
 0x2ae   :  { %v2782_v35 = vsel %vm1461_vm1, %v2606_v53, 0.0  ;;  %v2301_v14 = vrot.slane %v2300_v21, 4  ;;  %v1878_v53 = vadd.f32 %v1877_v51, %v1876_v12  ;;  %v2601_v58 = vmul.f32 %v7448_v41, %v5938_v17 }
 0x2af   :  { %v5920_v28 = vpop.permute.xlu1 %2851  ;;  %v2700_v60 = vadd.f32 %v2699_v54, %v2698_v0  ;;  %v2626_v40 = vrot.slane %v2625_v25, 1  ;;  %v2678_v32 = vrot.slane %v2677_v16, 4  ;;  %v2630_v18 = vadd.f32 %v2629_v42, %v2628_v62 }
 0x2b0   :  { %7440 = vst [vmem:[#allocation29_spill] sm:$0xff] %v5920_v28  ;;  %2935 = vperm.xlu1 %3991, %v7443_v9   ;;  %v2656_v28 = vsel %vm1461_vm1, %v2588_v50, 0.0  ;;  %v2783_v50 = vrot.slane %v2782_v35, 4  ;;  %v2674_v9 = vadd.f32 %v2673_v43, %v2672_v5  ;;  %v2061_v51 = vrot.slane %v2060_v6, 1  ;;  %v5956_v43 = vpop.permute.xlu0 %2123 }
 0x2b1   :  { %v2657_v8 = vrot.slane %v2656_v28, 4  ;;  %v2620_v12 = vadd.f32 %v2619_v39, %v2618_v37  ;;  %v2302_v0 = vadd.f32 %v2301_v14, %v2300_v21  ;;  %v1879_v41 = vrot.slane %v1878_v53, 1  ;;  %v5961_v37 = vld [vmem:[%s7182_s1 + $0x78] sm:$0xff] }
 0x2b2   :  { %v2701_v17 = vrot.slane %v2700_v60, 2  ;;  %v2784_v15 = vadd.f32 %v2783_v50, %v2782_v35  ;;  %v2747_v30 = vsel %vm1461_vm1, %v2601_v58, 0.0  ;;  %v2695_v10 = vadd.f32 %v2694_v33, %v2693_v38  ;;  %v7453_v58 = vld [vmem:[#allocation33_spill] sm:$0xff] }
 0x2b3   :  { %v5931_v55 = vpop.permute.xlu1 %2879  ;;  %v2658_v54 = vadd.f32 %v2657_v8, %v2656_v28  ;;  %v2679_v5 = vadd.f32 %v2678_v32, %v2677_v16  ;;  %v5963_v28 = vadd.f32 %v2291_v47, %v2290_v2  ;;  %v2675_v21 = vrot.slane %v2674_v9, 1  ;;  %v7451_v16 = vld [vmem:[#allocation41_spill] sm:$0xff] }
 0x2b4   :  { %7445 = vst [vmem:[#allocation36_spill] sm:$0xff] %v5931_v55  ;;  %3992 = vset.pattern.permute.xlu1 %v7328_v19  ;;  %v1927_v55 = vadd.f32 %v1926_v20, %v1925_v3  ;;  %v7449_v3 = vld [vmem:[#allocation32_spill] sm:$0xff]  ;;  %v2631_v20 = vrot.slane %v2630_v18, 2  ;;  %v2748_v38 = vrot.slane %v2747_v30, 4  ;;  %v5969_v39 = vadd.f32 %v2061_v51, %v2060_v6 }
 0x2b5   :  { %1775 = vperm.xlu1 %3992, %v5576_v52   ;;  %v2627_v52 = vadd.f32 %v2626_v40, %v2625_v25  ;;  %v2966_v62 = vmul.f32 %v7449_v3, %v5614_v45  ;;  %v2303_v25 = vrot.slane %v2302_v0, 2  ;;  %v2659_v33 = vrot.slane %v2658_v54, 2 }
 0x2b6   :  { %v1928_v35 = vrot.slane %v1927_v55, 1  ;;  %v2597_v45 = vmul.f32 %v7451_v16, %v5961_v37  ;;  %7452 = vst [vmem:[#allocation7_spill] sm:$0xff] %v5969_v39  ;;  %v1880_v14 = vadd.f32 %v1879_v41, %v1878_v53  ;;  %v2702_v8 = vadd.f32 %v2701_v17, %v2700_v60  ;;  %v7454_v16 = vld [vmem:[#allocation43_spill] sm:$0xff] }
 0x2b7   :  { %v2785_v50 = vrot.slane %v2784_v15, 2  ;;  %v5973_v2 = vsel %vm3254_vm2, %v2627_v52, %v2620_v12  ;;  %v2696_v40 = vrot.slane %v2695_v10, 1  ;;  %v2680_v32 = vrot.slane %v2679_v5, 2  ;;  %v82_v52 = vld [vmem:[%s7182_s1 + $0xa8] sm:$0xff]  ;;  %v5984_v12 = vpop.permute.xlu0 %2171 }
 0x2b8   :  { %v5949_v34 = vpop.permute.xlu1 %1743  ;;  %v2998_v47 = vsel %vm1461_vm1, %v2966_v62, 0.0  ;;  %v5976_v3 = vadd.f32 %v2675_v21, %v2674_v9  ;;  %v1819_v6 = vmul.f32 %v7454_v16, %v5713_v22  ;;  %v2304_v51 = vadd.f32 %v2303_v25, %v2302_v0  ;;  %v7457_v25 = vld [vmem:[#allocation8_spill] sm:$0xff] }
 0x2b9   :  { %3993 = vset.pattern.permute.xlu1 %v7336_v48  ;;  %v2660_v53 = vadd.f32 %v2659_v33, %v2658_v54  ;;  %v2749_v17 = vadd.f32 %v2748_v38, %v2747_v30  ;;  %v2719_v60 = vsel %vm1461_vm1, %v2597_v45, 0.0  ;;  %v2703_v9 = vrot.slane %v2702_v8, 1  ;;  %v7456_v30 = vld [vmem:[#allocation38_spill] sm:$0xff] }
 0x2ba   :  { %2155 = vperm.xlu1 %3993, %v5391_v1   ;;  %v2632_v1 = vadd.f32 %v2631_v20, %v2630_v18  ;;  %v2786_v62 = vadd.f32 %v2785_v50, %v2784_v15  ;;  %v5991_v18 = vsel %vm3260_vm5, %v1880_v14, %v5913_v24  ;;  %v5993_v0 = vadd.f32 %v2696_v40, %v2695_v10 }
 0x2bb   :  { %v2681_v54 = vadd.f32 %v2680_v32, %v2679_v5  ;;  %v1826_v21 = vmul.f32 %v7456_v30, %v5886_v46  ;;  %v2720_v15 = vrot.slane %v2719_v60, 4  ;;  %v2603_v33 = vmul.f32 %v7457_v25, %v82_v52  ;;  %v6014_v52 = vpop.permute.xlu0 %2127  ;;  %v7460_v30 = vld [vmem:[#allocation39_spill] sm:$0xff] }
 0x2bc   :  { %v5965_v42 = vpop.permute.xlu1 %1763  ;;  %v2633_v20 = vrot.slane %v2632_v1, 1  ;;  %v1881_v38 = vsel %vm1461_vm1, %v1819_v6, 0.0  ;;  %v2305_v45 = vrot.slane %v2304_v51, 1  ;;  %v2661_v24 = vrot.slane %v2660_v53, 1 }
 0x2bd   :  { %7450 = vst [vmem:[#allocation22_spill] sm:$0xff] %v5965_v42  ;;  %v1929_v42 = vadd.f32 %v1928_v35, %v1927_v55  ;;  %v2999_v55 = vrot.slane %v2998_v47, 4  ;;  %v2199_v35 = vmul.f32 %v5776_v63, %v5619_v44  ;;  %v2750_v14 = vrot.slane %v2749_v17, 2 }
 0x2be   :  { %2183 = vperm.xlu1 %3993, %v7453_v58   ;;  %v6008_v50 = vadd.f32 %v2703_v9, %v2702_v8  ;;  %v2787_v44 = vrot.slane %v2786_v62, 1  ;;  %v2682_v40 = vrot.slane %v2681_v54, 1  ;;  %v1882_v32 = vrot.slane %v1881_v38, 4  ;;  %v7463_v9 = vld [vmem:[#allocation26_spill] sm:$0xff] }
 0x2bf   :  { %v6006_v5 = vsel %vm3258_vm4, %v1929_v42, %v5947_v27  ;;  %v3000_v63 = vadd.f32 %v2999_v55, %v2998_v47  ;;  %v1930_v16 = vsel %vm1461_vm1, %v1826_v21, 0.0  ;;  %v2237_v6 = vsel %vm1461_vm1, %v2199_v35, 0.0 }
 0x2c0   :  { %7459 = vst [vmem:[#allocation19_spill] sm:$0xff] %v6008_v50  ;;  %v2634_v25 = vadd.f32 %v2633_v20, %v2632_v1  ;;  %v2721_v27 = vadd.f32 %v2720_v15, %v2719_v60  ;;  %v2761_v42 = vsel %vm1461_vm1, %v2603_v33, 0.0  ;;  %v2207_v8 = vmul.f32 %v5825_v57, %v7441_v49 }
 0x2c1   :  { %v5986_v41 = vpop.permute.xlu1 %2095  ;;  %v6020_v47 = vadd.f32 %v2305_v45, %v2304_v51  ;;  %v2202_v55 = vmul.f32 %v7463_v9, %v5842_v13  ;;  %v3001_v35 = vrot.slane %v3000_v63, 2  ;;  %v1931_v39 = vrot.slane %v1930_v16, 4 }
 0x2c2   :  { %7455 = vst [vmem:[#allocation5_spill] sm:$0xff] %v5986_v41  ;;  %3994 = vset.pattern.permute.xlu1 %v7391_v26  ;;  %v2238_v1 = vrot.slane %v2237_v6, 4  ;;  %v6031_v20 = vadd.f32 %v2787_v44, %v2786_v62  ;;  %v2683_v15 = vadd.f32 %v2682_v40, %v2681_v54  ;;  %v2762_v57 = vrot.slane %v2761_v42, 4  ;;  %v6045_v62 = vld [vmem:[%s7182_s1 + $0x88] sm:$0xff]  ;;  %v6051_v44 = vpop.permute.xlu0 %2179 }
 0x2c3   :  { %2535 = vperm.xlu1 %3994, %v5292_v23   ;;  %v2200_v23 = vmul.f32 %v5804_v11, %v7432_v7  ;;  %v6022_v11 = vadd.f32 %v2661_v24, %v2660_v53  ;;  %v6024_v7 = vadd.f32 %v2750_v14, %v2749_v17  ;;  %v1883_v49 = vadd.f32 %v1882_v32, %v1881_v38  ;;  %v7467_v24 = vld [vmem:[#allocation11_spill] sm:$0xff] }
 0x2c4   :  { %7465 = vst [vmem:[#allocation33_spill] sm:$0xff] %v6031_v20  ;;  %v6036_v51 = vsel %vm3256_vm3, %v2634_v25, %v5973_v2  ;;  %v2722_v53 = vrot.slane %v2721_v27, 2  ;;  %v2611_v17 = vmul.f32 %v5744_v61, %v5785_v31  ;;  %v2293_v33 = vsel %vm1461_vm1, %v2207_v8, 0.0  ;;  %v7466_v2 = vld [vmem:[#allocation4_spill] sm:$0xff]  ;;  %v6060_v25 = vld [vmem:[%s7182_s1 + $0x68] sm:$0xff] }
 0x2c5   :  { %v6002_v10 = vpop.permute.xlu1 %2143  ;;  %7461 = vst [vmem:[#allocation35_spill] sm:$0xff] %v6022_v11  ;;  %7462 = vst [vmem:[#allocation32_spill] sm:$0xff] %v6024_v7  ;;  %v2244_v60 = vsel %vm1461_vm1, %v2200_v23, 0.0  ;;  %v2258_v45 = vsel %vm1461_vm1, %v2202_v55, 0.0  ;;  %v2585_v14 = vmul.f32 %v7467_v24, %v7466_v2  ;;  %v3002_v61 = vadd.f32 %v3001_v35, %v3000_v63  ;;  %v7468_v23 = vld [vmem:[#allocation45_spill] sm:$0xff] }
 0x2c6   :  { %7458 = vst [vmem:[#allocation18_spill] sm:$0xff] %v6002_v10  ;;  %v2245_v38 = vrot.slane %v2244_v60, 4  ;;  %v1932_v31 = vadd.f32 %v1931_v39, %v1930_v16  ;;  %v2239_v40 = vadd.f32 %v2238_v1, %v2237_v6  ;;  %v6064_v8 = vsel %vm3254_vm2, %v2683_v15, %v5976_v3  ;;  %v7470_v6 = vld [vmem:[#allocation51_spill] sm:$0xff]  ;;  %v6072_v1 = vld [vmem:[%s7182_s1 + $0x70] sm:$0xff] }
 0x2c7   :  { %2563 = vperm.xlu1 %3994, %v7460_v30   ;;  %v2763_v9 = vadd.f32 %v2762_v57, %v2761_v42  ;;  %v1884_v55 = vrot.slane %v1883_v49, 2  ;;  %v2294_v24 = vrot.slane %v2293_v33, 4  ;;  %v2723_v63 = vadd.f32 %v2722_v53, %v2721_v27 }
 0x2c8   :  { %v2817_v39 = vsel %vm1461_vm1, %v2611_v17, 0.0  ;;  %v2259_v16 = vrot.slane %v2258_v45, 4  ;;  %v1827_v35 = vmul.f32 %v7470_v6, %v6060_v25  ;;  %v2246_v54 = vadd.f32 %v2245_v38, %v2244_v60  ;;  %v7473_v60 = vld [vmem:[#allocation46_spill] sm:$0xff] }
 0x2c9   :  { %v6028_v21 = vpop.permute.xlu1 %2167  ;;  %v2635_v3 = vsel %vm1461_vm1, %v2585_v14, 0.0  ;;  %v2201_v42 = vmul.f32 %v5855_v59, %v7466_v2  ;;  %v1828_v27 = vmul.f32 %v5949_v34, %v6072_v1  ;;  %v3003_v15 = vrot.slane %v3002_v61, 1  ;;  %v6085_v14 = vpop.permute.xlu0 %2163 }
 0x2ca   :  { %7464 = vst [vmem:[#allocation41_spill] sm:$0xff] %v6028_v21  ;;  %v1933_v57 = vrot.slane %v1932_v31, 2  ;;  %v2240_v17 = vrot.slane %v2239_v40, 2  ;;  %v2764_v7 = vrot.slane %v2763_v9, 2  ;;  %v1885_v11 = vadd.f32 %v1884_v55, %v1883_v49  ;;  %7474 = vst [vmem:[#allocation8_spill] sm:$0xff] %v6085_v14 }
 0x2cb   :  { %3995 = vset.pattern.permute.xlu1 %v7377_v29  ;;  %v2295_v20 = vadd.f32 %v2294_v24, %v2293_v33  ;;  %v2592_v38 = vmul.f32 %v7473_v60, %v5774_v4  ;;  %v2260_v59 = vadd.f32 %v2259_v16, %v2258_v45  ;;  %v2636_v2 = vrot.slane %v2635_v3, 4  ;;  %v7475_v33 = vld [vmem:[#allocation2_spill] sm:$0xff] }
 0x2cc   :  { %2895 = vperm.xlu1 %3995, %v5477_v56   ;;  %v1831_v56 = vmul.f32 %v7468_v23, %v6045_v62  ;;  %v7471_v23 = vld [vmem:[#allocation13_spill] sm:$0xff]  ;;  %v1937_v34 = vsel %vm1461_vm1, %v1827_v35, 0.0  ;;  %v2247_v50 = vrot.slane %v2246_v54, 2  ;;  %v1944_v49 = vsel %vm1461_vm1, %v1828_v27, 0.0 }
 0x2cd   :  { %v6092_v55 = vadd.f32 %v3003_v15, %v3002_v61  ;;  %v2724_v4 = vrot.slane %v2723_v63, 1  ;;  %v1934_v24 = vadd.f32 %v1933_v57, %v1932_v31  ;;  %v2241_v60 = vadd.f32 %v2240_v17, %v2239_v40  ;;  %v6103_v40 = vpop.permute.xlu0 %2195 }
 0x2ce   :  { %v6055_v32 = vpop.permute.xlu1 %2475  ;;  %v1965_v53 = vsel %vm1461_vm1, %v1831_v56, 0.0  ;;  %v1886_v16 = vrot.slane %v1885_v11, 1  ;;  %v2296_v35 = vrot.slane %v2295_v20, 2  ;;  %v1938_v41 = vrot.slane %v1937_v34, 4  ;;  %7481 = vst [vmem:[#allocation51_spill] sm:$0xff] %v6103_v40  ;;  %v7489_v40 = vld [vmem:[#allocation12_spill] sm:$0xff] }
 0x2cf   :  { %7469 = vst [vmem:[#allocation43_spill] sm:$0xff] %v6055_v32  ;;  %v1966_v56 = vrot.slane %v1965_v53, 4  ;;  %7476 = vst [vmem:[#allocation39_spill] sm:$0xff] %v6092_v55  ;;  %v2684_v32 = vsel %vm1461_vm1, %v2592_v38, 0.0  ;;  %v2261_v21 = vrot.slane %v2260_v59, 2  ;;  %v2637_v10 = vadd.f32 %v2636_v2, %v2635_v3  ;;  %v7482_v38 = vld [vmem:[#allocation23_spill] sm:$0xff] }
 0x2d0   :  { %2915 = vperm.xlu1 %3995, %v7471_v23   ;;  %v2818_v23 = vrot.slane %v2817_v39, 4  ;;  %v1945_v14 = vrot.slane %v1944_v49, 4  ;;  %v6097_v27 = vadd.f32 %v2764_v7, %v2763_v9  ;;  %v2248_v31 = vadd.f32 %v2247_v50, %v2246_v54  ;;  %v7483_v3 = vld [vmem:[#allocation16_spill] sm:$0xff] }
 0x2d1   :  { %v6101_v61 = vadd.f32 %v1966_v56, %v1965_v53  ;;  %v1935_v15 = vrot.slane %v1934_v24, 1  ;;  %v2242_v57 = vrot.slane %v2241_v60, 1  ;;  %v2685_v17 = vrot.slane %v2684_v32, 4 }
 0x2d2   :  { %v6081_v6 = vpop.permute.xlu1 %2519  ;;  %7478 = vst [vmem:[#allocation4_spill] sm:$0xff] %v6097_v27  ;;  %v1887_v2 = vadd.f32 %v1886_v16, %v1885_v11  ;;  %v2297_v7 = vadd.f32 %v2296_v35, %v2295_v20  ;;  %v1939_v9 = vadd.f32 %v1938_v41, %v1937_v34  ;;  %v6111_v53 = vadd.f32 %v2724_v4, %v2723_v63  ;;  %v7485_v34 = vld [vmem:[#allocation21_spill] sm:$0xff] }
 0x2d3   :  { %7472 = vst [vmem:[#allocation38_spill] sm:$0xff] %v6081_v6  ;;  %v2251_v6 = vsel %vm1461_vm1, %v2201_v42, 0.0  ;;  %7480 = vst [vmem:[#allocation45_spill] sm:$0xff] %v6101_v61  ;;  %v2262_v50 = vadd.f32 %v2261_v21, %v2260_v59  ;;  %v2638_v54 = vrot.slane %v2637_v10, 2  ;;  %v1946_v56 = vadd.f32 %v1945_v14, %v1944_v49  ;;  %v7486_v21 = vld [vmem:[#allocation44_spill] sm:$0xff]  ;;  %v6120_v14 = vpop.permute.xlu0 %2843 }
 0x2d4   :  { %3996 = vset.pattern.permute.xlu1 %v7328_v19  ;;  %v2252_v42 = vrot.slane %v2251_v6, 4  ;;  %v2243_v11 = vadd.f32 %v2242_v57, %v2241_v60  ;;  %v2686_v20 = vadd.f32 %v2685_v17, %v2684_v32  ;;  %v2298_v63 = vrot.slane %v2297_v7, 1 }
 0x2d5   :  { %1779 = vperm.xlu1 %3996, %v7475_v33   ;;  %v6099_v33 = vadd.f32 %v2818_v23, %v2817_v39  ;;  %v2203_v59 = vmul.f32 %v7486_v21, %v5713_v22  ;;  %v3329_v49 = vsel %vm3262_vm6, %v1887_v2, %v5991_v18  ;;  %v2263_v4 = vrot.slane %v2262_v50, 1 }
 0x2d6   :  { %v6094_v45 = vpop.permute.xlu1 %2523  ;;  %v2253_v23 = vadd.f32 %v2252_v42, %v2251_v6  ;;  %v1940_v6 = vrot.slane %v1939_v9, 2  ;;  %v2639_v16 = vadd.f32 %v2638_v54, %v2637_v10  ;;  %v3397_v22 = vsel %vm3254_vm2, %v2243_v11, %v7489_v40  ;;  %v7490_v10 = vld [vmem:[#allocation58_spill] sm:$0xff] }
 0x2d7   :  { %7477 = vst [vmem:[#allocation26_spill] sm:$0xff] %v6094_v45  ;;  %7479 = vst [vmem:[#allocation11_spill] sm:$0xff] %v6099_v33  ;;  %v2209_v45 = vmul.f32 %v7482_v38, %v5863_v36  ;;  %v2249_v38 = vrot.slane %v2248_v31, 1  ;;  %v2687_v21 = vrot.slane %v2686_v20, 2  ;;  %v3330_v2 = vsel %vm3264_vm7, %v7490_v10, %v3329_v49  ;;  %v7492_v49 = vld [vmem:[#allocation10_spill] sm:$0xff]  ;;  %v4082_v10 = vld [vmem:[%s7182_s1 + $0x48] sm:$0xff] }
 0x2d8   :  { %v2254_v35 = vrot.slane %v2253_v23, 2  ;;  %v2265_v54 = vsel %vm1461_vm1, %v2203_v59, 0.0  ;;  %v2640_v40 = vrot.slane %v2639_v16, 1 }
 0x2d9   :  { %3998 = vset.pattern.permute.xlu1 %v7336_v48  ;;  %v2307_v41 = vsel %vm1461_vm1, %v2209_v45, 0.0  ;;  %v2250_v32 = vadd.f32 %v2249_v38, %v2248_v31  ;;  %v7487_v45 = vld [vmem:[#allocation27_spill] sm:$0xff]  ;;  %v2299_v31 = vadd.f32 %v2298_v63, %v2297_v7  ;;  %v1941_v38 = vadd.f32 %v1940_v6, %v1939_v9  ;;  %v6147_v63 = vpop.permute.xlu0 %2847 }
 0x2da   :  { %2159 = vperm.xlu1 %3998, %v7483_v3   ;;  %v1936_v3 = vadd.f32 %v1935_v15, %v1934_v24  ;;  %v1947_v24 = vrot.slane %v1946_v56, 2  ;;  %v2308_v42 = vrot.slane %v2307_v41, 4  ;;  %v7488_v15 = vld [vmem:[#allocation49_spill] sm:$0xff]  ;;  %v2255_v11 = vadd.f32 %v2254_v35, %v2253_v23  ;;  %v6154_v23 = vld [vmem:[%s7182_s1 + $0xc8] sm:$0xff] }
 0x2db   :  { %v6109_v39 = vpop.permute.xlu1 %2883  ;;  %v2974_v57 = vmul.f32 %v7488_v15, %v7487_v45  ;;  %v2688_v59 = vadd.f32 %v2687_v21, %v2686_v20  ;;  %v2266_v6 = vrot.slane %v2265_v54, 4  ;;  %v1942_v35 = vrot.slane %v1941_v38, 1 }
 0x2dc   :  { %7484 = vst [vmem:[#allocation13_spill] sm:$0xff] %v6109_v39  ;;  %v6132_v18 = vsel %vm3260_vm5, %v1936_v3, %v6006_v5  ;;  %v1948_v15 = vadd.f32 %v1947_v24, %v1946_v56  ;;  %v6144_v5 = vsel %vm3256_vm3, %v2250_v32, %v3397_v22  ;;  %v2309_v3 = vadd.f32 %v2308_v42, %v2307_v41  ;;  %v7493_v56 = vld [vmem:[#allocation61_spill] sm:$0xff]  ;;  %v7494_v22 = vld [vmem:[#allocation40_spill] sm:$0xff] }
 0x2dd   :  { %v3054_v7 = vsel %vm1461_vm1, %v2974_v57, 0.0  ;;  %v3404_v41 = vsel %vm3254_vm2, %v2299_v31, %v5963_v28  ;;  %v2211_v20 = vmul.f32 %v5956_v43, %v6060_v25  ;;  %v2641_v32 = vadd.f32 %v2640_v40, %v2639_v16 }
 0x2de   :  { %2187 = vperm.xlu1 %3998, %v7485_v34   ;;  %v2256_v42 = vrot.slane %v2255_v11, 1  ;;  %v3055_v57 = vrot.slane %v3054_v7, 4  ;;  %v2310_v21 = vrot.slane %v2309_v3, 2  ;;  %v2223_v31 = vmul.f32 %v5984_v12, %v6154_v23  ;;  %v6185_v12 = vld [vmem:[%s7182_s1 + $0xd8] sm:$0xff] }
 0x2df   :  { %v6176_v16 = vsel %vm3256_vm3, %v6020_v47, %v3404_v41  ;;  %v2267_v40 = vadd.f32 %v2266_v6, %v2265_v54  ;;  %7496 = vst [vmem:[#allocation23_spill] sm:$0xff] %v6185_v12  ;;  %v6194_v54 = vld [vmem:[%s7182_s1 + $0x80] sm:$0xff] }
 0x2e0   :  { %v1748_v60 = vpop.permute.xlu1 %1747  ;;  %v6189_v47 = vadd.f32 %v3055_v57, %v3054_v7  ;;  %v2225_v57 = vmul.f32 %v6051_v44, %v6185_v12 }
 0x2e1   :  { %v1829_v17 = vmul.f32 %v1748_v60, %v5961_v37  ;;  %v6139_v60 = vadd.f32 %v2263_v4, %v2262_v50  ;;  %v2215_v50 = vmul.f32 %v7492_v49, %v6045_v62  ;;  %v6158_v4 = vsel %vm3266_vm8, %v7493_v56, %v3330_v2  ;;  %v7495_v2 = vld [vmem:[#allocation50_spill] sm:$0xff] }
 0x2e2   :  { %3999 = vset.pattern.permute.xlu1 %v7391_v26  ;;  %v2975_v28 = vmul.f32 %v4082_v10, %v7495_v2  ;;  %v1943_v56 = vadd.f32 %v1942_v35, %v1941_v38  ;;  %v2212_v10 = vmul.f32 %v6014_v52, %v6072_v1  ;;  %v6187_v2 = vpop.permute.xlu0 %2855  ;;  %7497 = vst [vmem:[#allocation21_spill] sm:$0xff] %v6189_v47  ;;  %v7498_v38 = vld [vmem:[#allocation6_spill] sm:$0xff]  ;;  %v2405_v35 = vsel %vm1461_vm1, %v2223_v31, 0.0  ;;  %v7500_v31 = vld [vmem:[#allocation63_spill] sm:$0xff] }
 0x2e3   :  { %v1951_v45 = vsel %vm1461_vm1, %v1829_v17, 0.0  ;;  %2567 = vperm.xlu1 %3999, %v7453_v58   ;;  %v1949_v17 = vrot.slane %v1948_v15, 1  ;;  %v2349_v49 = vsel %vm1461_vm1, %v2215_v50, 0.0  ;;  %v2214_v6 = vmul.f32 %v6194_v54, %v7498_v38 }
 0x2e4   :  { %v6141_v55 = vpop.permute.xlu1 %1795  ;;  %v1952_v9 = vrot.slane %v1951_v45, 4  ;;  %v2311_v50 = vadd.f32 %v2310_v21, %v2309_v3  ;;  %v3061_v41 = vsel %vm1461_vm1, %v2975_v28, 0.0  ;;  %v2268_v7 = vrot.slane %v2267_v40, 2 }
 0x2e5   :  { %7491 = vst [vmem:[#allocation46_spill] sm:$0xff] %v6141_v55  ;;  %v2257_v55 = vadd.f32 %v2256_v42, %v2255_v11  ;;  %v1950_v52 = vadd.f32 %v1949_v17, %v1948_v15  ;;  %v7499_v15 = vld [vmem:[#allocation60_spill] sm:$0xff]  ;;  %v3336_v3 = vsel %vm3262_vm6, %v1943_v56, %v6132_v18  ;;  %v2406_v21 = vrot.slane %v2405_v35, 4 }
 0x2e6   :  { %v1953_v24 = vadd.f32 %v1952_v9, %v1951_v45  ;;  %v2689_v9 = vrot.slane %v2688_v59, 1  ;;  %v2210_v17 = vmul.f32 %v7499_v15, %v5886_v46  ;;  %v2342_v28 = vsel %vm1461_vm1, %v2214_v6, 0.0  ;;  %v7501_v46 = vld [vmem:[#allocation37_spill] sm:$0xff] }
 0x2e7   :  { %4000 = vset.pattern.permute.xlu1 %v7377_v29  ;;  %v2586_v39 = vmul.f32 %v7500_v31, %v5842_v13  ;;  %v3337_v33 = vsel %vm3264_vm7, %v1950_v52, %v3336_v3  ;;  %v3062_v12 = vrot.slane %v3061_v41, 4  ;;  %v6223_v18 = vsel %vm3258_vm4, %v2641_v32, %v6036_v51 }
 0x2e8   :  { %2899 = vperm.xlu1 %4000, %v7494_v22   ;;  %v1954_v43 = vrot.slane %v1953_v24, 2  ;;  %v2321_v22 = vsel %vm1461_vm1, %v2211_v20, 0.0  ;;  %v2690_v44 = vadd.f32 %v2689_v9, %v2688_v59  ;;  %7502 = vst [vmem:[#allocation44_spill] sm:$0xff] %v6223_v18  ;;  %v2312_v56 = vrot.slane %v2311_v50, 1 }
 0x2e9   :  { %v6172_v45 = vpop.permute.xlu1 %2099  ;;  %v2322_v42 = vrot.slane %v2321_v22, 4  ;;  %v2419_v9 = vsel %vm1461_vm1, %v2225_v57, 0.0  ;;  %v2314_v51 = vsel %vm1461_vm1, %v2210_v17, 0.0  ;;  %v2343_v32 = vrot.slane %v2342_v28, 4 }
 0x2ea   :  { %v1955_v36 = vadd.f32 %v1954_v43, %v1953_v24  ;;  %v2350_v24 = vrot.slane %v2349_v49, 4  ;;  %v2328_v43 = vsel %vm1461_vm1, %v2212_v10, 0.0  ;;  %v6215_v10 = vpop.permute.xlu0 %2859  ;;  %v2407_v15 = vadd.f32 %v2406_v21, %v2405_v35 }
 0x2eb   :  { %v2329_v59 = vrot.slane %v2328_v43, 4  ;;  %v2642_v57 = vsel %vm1461_vm1, %v2586_v39, 0.0  ;;  %v6244_v3 = vadd.f32 %v3062_v12, %v3061_v41  ;;  %v2420_v17 = vrot.slane %v2419_v9, 4  ;;  %v4085_v12 = vld [vmem:[%s7182_s1 + $0x18] sm:$0xff] }
 0x2ec   :  { %2947 = vperm.xlu1 %4000, %v7460_v30   ;;  %v1956_v20 = vrot.slane %v1955_v36, 1  ;;  %v2351_v6 = vadd.f32 %v2350_v24, %v2349_v49  ;;  %v4084_v49 = vld [vmem:[%s7182_s1 + $0x8] sm:$0xff]  ;;  %v2323_v24 = vadd.f32 %v2322_v42, %v2321_v22  ;;  %v2313_v31 = vadd.f32 %v2312_v56, %v2311_v50  ;;  %v7505_v22 = vld [vmem:[#allocation24_spill] sm:$0xff]  ;;  %v7506_v41 = vld [vmem:[#allocation29_spill] sm:$0xff] }
 0x2ed   :  { %v6201_v11 = vpop.permute.xlu1 %2147  ;;  %v2967_v52 = vmul.f32 %v4084_v49, %v6120_v14  ;;  %7503 = vst [vmem:[#allocation27_spill] sm:$0xff] %v6244_v3  ;;  %v2330_v47 = vadd.f32 %v2329_v59, %v2328_v43  ;;  %v2315_v14 = vrot.slane %v2314_v51, 4  ;;  %v2344_v39 = vadd.f32 %v2343_v32, %v2342_v28  ;;  %v4086_v59 = vld [vmem:[%s7182_s1 + $0x10] sm:$0xff] }
 0x2ee   :  { %v1957_v38 = vadd.f32 %v1956_v20, %v1955_v36  ;;  %v2269_v20 = vadd.f32 %v2268_v7, %v2267_v40  ;;  %v2643_v35 = vrot.slane %v2642_v57, 4  ;;  %v2969_v7 = vmul.f32 %v4085_v12, %v7506_v41  ;;  %v2908_v42 = vpop.permute.xlu0 %2907 }
 0x2ef   :  { %v2324_v50 = vrot.slane %v2323_v24, 2  ;;  %v2408_v21 = vrot.slane %v2407_v15, 2  ;;  %v2421_v56 = vadd.f32 %v2420_v17, %v2419_v9  ;;  %v2968_v32 = vmul.f32 %v4086_v59, %v6147_v63 }
 0x2f0   :  { %4001 = vset.pattern.permute.xlu1 %v7328_v19  ;;  %v3338_v36 = vsel %vm3266_vm8, %v1957_v38, %v3337_v33  ;;  %v6228_v19 = vld [vmem:[%s7182_s1 + $0x90] sm:$0xff]  ;;  %v6234_v33 = vsel %vm3258_vm4, %v2257_v55, %v6144_v5  ;;  %v3477_v38 = vsel %vm3256_vm3, %v2690_v44, %v6064_v8  ;;  %v7504_v55 = vld [vmem:[#allocation54_spill] sm:$0xff]  ;;  %v3005_v8 = vsel %vm1461_vm1, %v2967_v52, 0.0 }
 0x2f1   :  { %v6217_v27 = vpop.permute.xlu1 %2175  ;;  %1811 = vperm.xlu1 %4001, %v7501_v46   ;;  %3355 = vrot.lane.b32.xlu0 %v3338_v36, %s4130_s27  ;;  %v1832_v5 = vmul.f32 %v7504_v55, %v6228_v19  ;;  %v2352_v36 = vrot.slane %v2351_v6, 2  ;;  %v6259_v43 = vsel %vm3258_vm4, %v5993_v0, %v3477_v38  ;;  %v2331_v52 = vrot.slane %v2330_v47, 2 }
 0x2f2   :  { %v3006_v55 = vrot.slane %v3005_v8, 4  ;;  %v2983_v12 = vmul.f32 %v2908_v42, %v6045_v62  ;;  %v2316_v0 = vadd.f32 %v2315_v14, %v2314_v51  ;;  %v2345_v38 = vrot.slane %v2344_v39, 2  ;;  %v7509_v62 = vld [vmem:[#allocation57_spill] sm:$0xff] }
 0x2f3   :  { %v1972_v28 = vsel %vm1461_vm1, %v1832_v5, 0.0  ;;  %v2353_v49 = vadd.f32 %v2352_v36, %v2351_v6  ;;  %v2644_v44 = vadd.f32 %v2643_v35, %v2642_v57  ;;  %v3019_v9 = vsel %vm1461_vm1, %v2969_v7, 0.0  ;;  %v7508_v5 = vld [vmem:[#allocation16_spill] sm:$0xff]  ;;  %v6285_v14 = vld [vmem:[%s7182_s1 + $0xb8] sm:$0xff] }
 0x2f4   :  { %v6275_v17 = vsel %vm3258_vm4, %v2313_v31, %v6176_v16  ;;  %v2325_v63 = vadd.f32 %v2324_v50, %v2323_v24  ;;  %v1973_v6 = vrot.slane %v1972_v28, 4  ;;  %v2409_v36 = vadd.f32 %v2408_v21, %v2407_v15  ;;  %7510 = vst [vmem:[#allocation12_spill] sm:$0xff] %v6285_v14 }
 0x2f5   :  { %4002 = vset.pattern.permute.xlu1 %v7336_v48  ;;  %v2270_v48 = vrot.slane %v2269_v20, 1  ;;  %v1839_v42 = vmul.f32 %v7509_v62, %v6154_v23  ;;  %v3012_v51 = vsel %vm1461_vm1, %v2968_v32, 0.0  ;;  %v2354_v57 = vrot.slane %v2353_v49, 1  ;;  %v7512_v62 = vld [vmem:[#allocation25_spill] sm:$0xff] }
 0x2f6   :  { %v6249_v40 = vpop.permute.xlu1 %2507  ;;  %2191 = vperm.xlu1 %4002, %v7505_v22   ;;  %v3007_v35 = vadd.f32 %v3006_v55, %v3005_v8  ;;  %v3020_v16 = vrot.slane %v3019_v9, 4  ;;  %v3117_v24 = vsel %vm1461_vm1, %v2983_v12, 0.0  ;;  %v2317_v15 = vrot.slane %v2316_v0, 2  ;;  %v7514_v12 = vld [vmem:[#allocation8_spill] sm:$0xff] }
 0x2f7   :  { %v6277_v59 = vadd.f32 %v2270_v48, %v2269_v20  ;;  %v2332_v20 = vadd.f32 %v2331_v52, %v2330_v47  ;;  %v2346_v7 = vadd.f32 %v2345_v38, %v2344_v39  ;;  %v2645_v48 = vrot.slane %v2644_v44, 2  ;;  %v92_v39 = vld [vmem:[%s7182_s1 + $0xf8] sm:$0xff] }
 0x2f8   :  { %v2326_v50 = vrot.slane %v2325_v63, 1  ;;  %v6291_v21 = vadd.f32 %v1973_v6, %v1972_v28  ;;  %v2410_v32 = vrot.slane %v2409_v36, 1  ;;  %v6295_v8 = vsel %vm1461_vm1, %v1839_v42, 0.0 }
 0x2f9   :  { %7513 = vst [vmem:[#allocation10_spill] sm:$0xff] %v6295_v8  ;;  %v2221_v3 = vmul.f32 %v7514_v12, %v6285_v14  ;;  %v3118_v47 = vrot.slane %v3117_v24, 4  ;;  %v2355_v52 = vadd.f32 %v2354_v57, %v2353_v49  ;;  %v3008_v38 = vrot.slane %v3007_v35, 2 }
 0x2fa   :  { %v6268_v41 = vpop.permute.xlu1 %2527  ;;  %4003 = vset.pattern.permute.xlu1 %v7391_v26  ;;  %7511 = vst [vmem:[#allocation58_spill] sm:$0xff] %v6291_v21  ;;  %v3021_v28 = vadd.f32 %v3020_v16, %v3019_v9  ;;  %v2970_v6 = vmul.f32 %v6187_v2, %v5842_v13  ;;  %v2333_v21 = vrot.slane %v2332_v20, 1  ;;  %v2347_v61 = vrot.slane %v2346_v7, 1  ;;  %v7517_v13 = vld [vmem:[#allocation51_spill] sm:$0xff] }
 0x2fb   :  { %7507 = vst [vmem:[#allocation49_spill] sm:$0xff] %v6268_v41  ;;  %2543 = vperm.xlu1 %4003, %v7508_v5   ;;  %v2422_v41 = vrot.slane %v2421_v56, 2  ;;  %v3013_v5 = vrot.slane %v3012_v51, 4  ;;  %v2646_v42 = vadd.f32 %v2645_v48, %v2644_v44  ;;  %v6313_v9 = vsel %vm1461_vm1, %v2221_v3, 0.0  ;;  %v6318_v44 = vpop.permute.xlu0 %2891 }
 0x2fc   :  { %7516 = vst [vmem:[#allocation40_spill] sm:$0xff] %v6313_v9  ;;  %v6316_v2 = vmul.f32 %v7517_v13, %v92_v39  ;;  %7519 = vst [vmem:[#allocation6_spill] sm:$0xff] %v6318_v44  ;;  %v3009_v16 = vadd.f32 %v3008_v38, %v3007_v35  ;;  %v6332_v35 = vld [vmem:[%s7182_s1 + $0xc0] sm:$0xff]  ;;  %v7521_v39 = vld [vmem:[#allocation41_spill] sm:$0xff] }
 0x2fd   :  { %v2423_v55 = vadd.f32 %v2422_v41, %v2421_v56  ;;  %v6306_v56 = vadd.f32 %v2326_v50, %v2325_v63  ;;  %v6308_v41 = vadd.f32 %v2410_v32, %v2409_v36  ;;  %v3014_v57 = vadd.f32 %v3013_v5, %v3012_v51  ;;  %v4090_v44 = vld [vmem:[%s7182_s1 + $0x50] sm:$0xff] }
 0x2fe   :  { %v6288_v31 = vpop.permute.xlu1 %2555  ;;  %7518 = vst [vmem:[#allocation50_spill] sm:$0xff] %v6316_v2  ;;  %v3022_v63 = vrot.slane %v3021_v28, 2  ;;  %v3026_v36 = vsel %vm1461_vm1, %v2970_v6, 0.0  ;;  %v6323_v51 = vadd.f32 %v2333_v21, %v2332_v20  ;;  %v2348_v32 = vadd.f32 %v2347_v61, %v2346_v7  ;;  %v7522_v6 = vld [vmem:[#allocation5_spill] sm:$0xff] }
 0x2ff   :  { %4005 = vset.pattern.permute.xlu1 %v7377_v29  ;;  %v2424_v12 = vrot.slane %v2423_v55, 1  ;;  %v2647_v5 = vrot.slane %v2646_v42, 1  ;;  %v3015_v49 = vrot.slane %v3014_v57, 2  ;;  %v2222_v20 = vmul.f32 %v6332_v35, %v7521_v39 }
 0x300   :  { %2923 = vperm.xlu1 %4005, %v7512_v62   ;;  %v2318_v62 = vadd.f32 %v2317_v15, %v2316_v0  ;;  %v3119_v0 = vadd.f32 %v3118_v47, %v3117_v24  ;;  %v7520_v15 = vld [vmem:[#allocation18_spill] sm:$0xff]  ;;  %v4087_v24 = vld [vmem:[%s7182_s1 + $0x28] sm:$0xff]  ;;  %v3027_v7 = vrot.slane %v3026_v36, 4  ;;  %v3010_v14 = vrot.slane %v3009_v16, 1 }
 0x301   :  { %v2216_v48 = vmul.f32 %v7520_v15, %v6228_v19  ;;  %v2971_v47 = vmul.f32 %v4087_v24, %v6215_v10  ;;  %v6338_v61 = vadd.f32 %v2424_v12, %v2423_v55  ;;  %v6343_v10 = vld [vmem:[%s7182_s1 + $0x30] sm:$0xff]  ;;  %v7523_v15 = vld [vmem:[#allocation2_spill] sm:$0xff]  ;;  %v6348_v39 = vadd.f32 %v3022_v63, %v3021_v28 }
 0x302   :  { %v2319_v50 = vrot.slane %v2318_v62, 1  ;;  %v3120_v38 = vrot.slane %v3119_v0, 2  ;;  %v2204_v13 = vmul.f32 %v6343_v10, %v7522_v6  ;;  %v7525_v6 = vld [vmem:[#allocation36_spill] sm:$0xff]  ;;  %v6363_v28 = vadd.f32 %v3015_v49, %v3014_v57 }
 0x303   :  { %v6304_v18 = vpop.permute.xlu1 %2887  ;;  %v6361_v9 = vmul.f32 %v4090_v44, %v7525_v6  ;;  %v3033_v63 = vsel %vm1461_vm1, %v2971_v47, 0.0  ;;  %v6373_v44 = vadd.f32 %v3010_v14, %v3009_v16  ;;  %v2595_v6 = vmul.f32 %v6249_v40, %v6060_v25  ;;  %v6385_v14 = vld [vmem:[%s7182_s1 + $0xd0] sm:$0xff] }
 0x304   :  { %7515 = vst [vmem:[#allocation61_spill] sm:$0xff] %v6304_v18  ;;  %2951 = vperm.xlu1 %4005, %v7453_v58   ;;  %v2320_v12 = vadd.f32 %v2319_v50, %v2318_v62  ;;  %v6355_v18 = vadd.f32 %v2647_v5, %v2646_v42  ;;  %v3121_v42 = vadd.f32 %v3120_v38, %v3119_v0  ;;  %v7528_v25 = vld [vmem:[#allocation20_spill] sm:$0xff] }
 0x305   :  { %7526 = vst [vmem:[#allocation63_spill] sm:$0xff] %v6361_v9  ;;  %v2224_v16 = vmul.f32 %v6385_v14, %v6217_v27  ;;  %v2217_v40 = vmul.f32 %v6201_v11, %v7528_v25 }
 0x306   :  { %7524 = vst [vmem:[#allocation60_spill] sm:$0xff] %v6355_v18  ;;  %v3407_v0 = vsel %vm3260_vm5, %v2320_v12, %v6275_v17 }
 0x307   :  { %v2904_v3 = vpop.permute.xlu1 %2903  ;;  %v6399_v27 = vsel %vm3262_vm6, %v6306_v56, %v3407_v0 }
 0x308   :  { %v2982_v21 = vmul.f32 %v6194_v54, %v2904_v3  ;;  %4007 = vset.pattern.permute.xlu1 %v7391_v26  ;;  %v2356_v54 = vsel %vm1461_vm1, %v2216_v48, 0.0  ;;  %v6353_v3 = vsel %vm3254_vm2, %v2355_v52, %v2348_v32  ;;  %v2398_v48 = vsel %vm1461_vm1, %v2222_v20, 0.0 }
 0x309   :  { %2547 = vperm.xlu1 %4007, %v7523_v15   ;;  %v2940_v15 = vpop.permute.xlu0 %2939  ;;  %v6369_v52 = vadd.f32 %v3027_v7, %v3026_v36  ;;  %v2272_v32 = vsel %vm1461_vm1, %v2204_v13, 0.0  ;;  %v2357_v5 = vrot.slane %v2356_v54, 4  ;;  %v2399_v20 = vrot.slane %v2398_v48, 4 }
 0x30a   :  { %v3110_v55 = vsel %vm1461_vm1, %v2982_v21, 0.0  ;;  %v2991_v57 = vmul.f32 %v2940_v15, %v6154_v23  ;;  %v3034_v21 = vrot.slane %v3033_v63, 4  ;;  %v2273_v7 = vrot.slane %v2272_v32, 4 }
 0x30b   :  { %v3111_v62 = vrot.slane %v3110_v55, 4  ;;  %v3029_v13 = vrot.slane %v6369_v52, 2  ;;  %v2358_v15 = vadd.f32 %v2357_v5, %v2356_v54  ;;  %v2400_v54 = vadd.f32 %v2399_v20, %v2398_v48 }
 0x30c   :  { %v6367_v50 = vpop.permute.xlu1 %1771  ;;  %v3173_v12 = vsel %vm1461_vm1, %v2991_v57, 0.0  ;;  %v3035_v49 = vadd.f32 %v3034_v21, %v3033_v63  ;;  %v2705_v5 = vsel %vm1461_vm1, %v2595_v6, 0.0  ;;  %v2274_v25 = vadd.f32 %v2273_v7, %v2272_v32 }
 0x30d   :  { %7527 = vst [vmem:[#allocation37_spill] sm:$0xff] %v6367_v50  ;;  %2575 = vperm.xlu1 %4007, %v7505_v22   ;;  %v3112_v47 = vadd.f32 %v3111_v62, %v3110_v55  ;;  %v3122_v55 = vrot.slane %v3121_v42, 1  ;;  %v2607_v62 = vmul.f32 %v6288_v31, %v6154_v23  ;;  %v7529_v50 = vld [vmem:[#allocation43_spill] sm:$0xff]  ;;  %v2412_v57 = vsel %vm1461_vm1, %v2224_v16, 0.0 }
 0x30e   :  { %v2587_v9 = vmul.f32 %v4087_v24, %v7529_v50  ;;  %v2359_v31 = vrot.slane %v2358_v15, 2  ;;  %v2706_v56 = vrot.slane %v2705_v5, 4  ;;  %v2401_v32 = vrot.slane %v2400_v54, 2  ;;  %v2868_v24 = vpop.permute.xlu0 %2867 }
 0x30f   :  { %v3113_v38 = vrot.slane %v3112_v47, 2  ;;  %v3123_v23 = vadd.f32 %v3122_v55, %v3121_v42  ;;  %v2789_v63 = vsel %vm1461_vm1, %v2607_v62, 0.0  ;;  %v2413_v50 = vrot.slane %v2412_v57, 4 }
 0x310   :  { %v2649_v42 = vsel %vm1461_vm1, %v2587_v9, 0.0  ;;  %v2360_v7 = vadd.f32 %v2359_v31, %v2358_v15  ;;  %v2790_v16 = vrot.slane %v2789_v63, 4  ;;  %v2402_v15 = vadd.f32 %v2401_v32, %v2400_v54 }
 0x311   :  { %v2132_v17 = vpop.permute.xlu1 %2131  ;;  %4008 = vset.pattern.permute.xlu1 %v7377_v29  ;;  %v3114_v36 = vadd.f32 %v3113_v38, %v3112_v47  ;;  %v3174_v47 = vrot.slane %v3173_v12, 4  ;;  %v2363_v38 = vsel %vm1461_vm1, %v2217_v40, 0.0 }
 0x312   :  { %2955 = vperm.xlu1 %4008, %v7485_v34   ;;  %v2213_v11 = vmul.f32 %v2132_v17, %v5961_v37  ;;  %v3036_v37 = vrot.slane %v3035_v49, 2  ;;  %v2364_v6 = vrot.slane %v2363_v38, 4  ;;  %v2707_v17 = vadd.f32 %v2706_v56, %v2705_v5 }
 0x313   :  { %v3115_v8 = vrot.slane %v3114_v36, 1  ;;  %v6420_v40 = vadd.f32 %v3174_v47, %v3173_v12  ;;  %v2361_v5 = vrot.slane %v2360_v7, 1  ;;  %v2791_v56 = vadd.f32 %v2790_v16, %v2789_v63 }
 0x314   :  { %v2335_v21 = vsel %vm1461_vm1, %v2213_v11, 0.0  ;;  %v2365_v31 = vadd.f32 %v2364_v6, %v2363_v38  ;;  %v6432_v47 = vadd.f32 %v3036_v37, %v3035_v49  ;;  %v2403_v32 = vrot.slane %v2402_v15, 1 }
 0x315   :  { %v2152_v2 = vpop.permute.xlu1 %2151  ;;  %v3116_v48 = vadd.f32 %v3115_v8, %v3114_v36  ;;  %v2336_v20 = vrot.slane %v2335_v21, 4  ;;  %v6417_v8 = vld [vmem:[%s7182_s1 + $0xa0] sm:$0xff]  ;;  %v2275_v36 = vrot.slane %v2274_v25, 2 }
 0x316   :  { %4009 = vset.pattern.permute.xlu1 %v7391_v26  ;;  %v2218_v26 = vmul.f32 %v6417_v8, %v2152_v2  ;;  %v6428_v2 = vadd.f32 %v3029_v13, %v6369_v52  ;;  %v3176_v13 = vrot.slane %v6420_v40, 2  ;;  %v2366_v37 = vrot.slane %v2365_v31, 2 }
 0x317   :  { %2579 = vperm.xlu1 %4009, %v7501_v46   ;;  %v6412_v0 = vsel %vm3254_vm2, %v3123_v23, %v3116_v48  ;;  %v2337_v55 = vadd.f32 %v2336_v20, %v2335_v21  ;;  %v4093_v46 = vld [vmem:[%s7182_s1 + $0x38] sm:$0xff]  ;;  %v2650_v23 = vrot.slane %v2649_v42, 4  ;;  %v2414_v48 = vadd.f32 %v2413_v50, %v2412_v57 }
 0x318   :  { %7530 = vst [vmem:[#allocation54_spill] sm:$0xff] %v6412_v0  ;;  %v2973_v9 = vmul.f32 %v4093_v46, %v2868_v24  ;;  %v2370_v62 = vsel %vm1461_vm1, %v2218_v26, 0.0  ;;  %v2205_v12 = vmul.f32 %v4093_v46, %v6172_v45  ;;  %v6434_v24 = vadd.f32 %v2275_v36, %v2274_v25  ;;  %v7532_v36 = vld [vmem:[#allocation14_spill] sm:$0xff] }
 0x319   :  { %v2338_v18 = vrot.slane %v2337_v55, 2  ;;  %v2371_v0 = vrot.slane %v2370_v62, 4  ;;  %v2651_v54 = vadd.f32 %v2650_v23, %v2649_v42  ;;  %v2415_v45 = vrot.slane %v2414_v48, 2 }
 0x31a   :  { %v2484_v11 = vpop.permute.xlu1 %2483  ;;  %v6437_v57 = vsel %vm1461_vm1, %v2973_v9, 0.0  ;;  %v2279_v49 = vsel %vm1461_vm1, %v2205_v12, 0.0  ;;  %v2362_v25 = vadd.f32 %v2361_v5, %v2360_v7  ;;  %v2792_v20 = vrot.slane %v2791_v56, 2 }
 0x31b   :  { %4010 = vset.pattern.permute.xlu1 %v7377_v29  ;;  %v2339_v21 = vadd.f32 %v2338_v18, %v2337_v55  ;;  %v2708_v29 = vrot.slane %v2707_v17, 2  ;;  %v2372_v50 = vadd.f32 %v2371_v0, %v2370_v62  ;;  %v7531_v18 = vmov 0  }
 0x31c   :  { %2959 = vperm.xlu1 %4010, %v7505_v22   ;;  %v2589_v26 = vmul.f32 %v4093_v46, %v2484_v11  ;;  %v3409_v9 = vsel %vm3264_vm7, %v6323_v51, %v6399_v27  ;;  %v2280_v62 = vrot.slane %v2279_v49, 4  ;;  %v2416_v23 = vadd.f32 %v2415_v45, %v2414_v48  ;;  %v7533_v51 = vld [vmem:[#allocation15_spill] sm:$0xff] }
 0x31d   :  { %v2340_v38 = vrot.slane %v2339_v21, 1  ;;  %v2709_v0 = vadd.f32 %v2708_v29, %v2707_v17  ;;  %v2373_v16 = vrot.slane %v2372_v50, 2  ;;  %v2404_v7 = vadd.f32 %v2403_v32, %v2402_v15 }
 0x31e   :  { %v2512_v52 = vpop.permute.xlu1 %2511  ;;  %v2652_v5 = vrot.slane %v2651_v54, 2  ;;  %v2793_v11 = vadd.f32 %v2792_v20, %v2791_v56  ;;  %v2663_v17 = vsel %vm1461_vm1, %v2589_v26, 0.0  ;;  %v3048_v27 = vrot.slane %v6437_v57, 4 }
 0x31f   :  { %v2596_v63 = vmul.f32 %v2512_v52, %v6072_v1  ;;  %v2341_v6 = vadd.f32 %v2340_v38, %v2339_v21  ;;  %v2367_v21 = vadd.f32 %v2366_v37, %v2365_v31  ;;  %v2710_v48 = vrot.slane %v2709_v0, 1 }
 0x320   :  { %4012 = vset.pattern.permute.xlu1 %v7531_v18  ;;  %v2374_v45 = vadd.f32 %v2373_v16, %v2372_v50  ;;  %v3412_v31 = vsel %vm3256_vm3, %v2362_v25, %v6353_v3  ;;  %v2281_v38 = vadd.f32 %v2280_v62, %v2279_v49  ;;  %v2417_v56 = vrot.slane %v2416_v23, 1 }
 0x321   :  { %1391 = vperm.xlu1 %4012, %v7532_v36   ;;  %v2712_v42 = vsel %vm1461_vm1, %v2596_v63, 0.0  ;;  %v3410_v46 = vsel %vm3266_vm8, %v2341_v6, %v3409_v9  ;;  %v6457_v63 = vadd.f32 %v2652_v5, %v2651_v54  ;;  %v2664_v18 = vrot.slane %v2663_v17, 4 }
 0x322   :  { %v2560_v55 = vpop.permute.xlu1 %2559  ;;  %v2713_v1 = vrot.slane %v2712_v42, 4  ;;  %3427 = vrot.lane.b32.xlu0 %v3410_v46, %s4131_s28  ;;  %v3418_v26 = vsel %vm3254_vm2, %v6308_v41, %v2404_v7  ;;  %v2368_v36 = vrot.slane %v2367_v21, 1  ;;  %v2711_v16 = vadd.f32 %v2710_v48, %v2709_v0  ;;  %v7534_v41 = vld [vmem:[#allocation19_spill] sm:$0xff] }
 0x323   :  { %v2608_v12 = vmul.f32 %v6385_v14, %v2560_v55  ;;  %v2375_v3 = vrot.slane %v2374_v45, 1  ;;  %v2282_v55 = vrot.slane %v2281_v38, 2  ;;  %v2418_v54 = vadd.f32 %v2417_v56, %v2416_v23 }
 0x324   :  { %v2714_v29 = vadd.f32 %v2713_v1, %v2712_v42  ;;  %v2794_v42 = vrot.slane %v2793_v11, 1  ;;  %v3479_v7 = vsel %vm3260_vm5, %v7534_v41, %v6259_v43  ;;  %v2369_v46 = vadd.f32 %v2368_v36, %v2367_v21 }
 0x325   :  { %v2796_v52 = vsel %vm1461_vm1, %v2608_v12, 0.0  ;;  %1401 = vperm.xlu1 %4012, %v7533_v51   ;;  %v2665_v12 = vadd.f32 %v2664_v18, %v2663_v17  ;;  %v3480_v48 = vsel %vm3262_vm6, %v2711_v16, %v3479_v7  ;;  %v2283_v17 = vadd.f32 %v2282_v55, %v2281_v38 }
 0x326   :  { %v2797_v15 = vrot.slane %v2796_v52, 4  ;;  %v2715_v32 = vrot.slane %v2714_v29, 2  ;;  %v3413_v38 = vsel %vm3258_vm4, %v2369_v46, %v3412_v31  ;;  %v2277_v36 = vrot.slane %v6434_v24, 1 }
 0x327   :  { %v2864_v37 = vpop.permute.xlu1 %2863  ;;  %v2666_v43 = vrot.slane %v2665_v12, 2  ;;  %v2654_v31 = vrot.slane %v6457_v63, 1  ;;  %v2284_v16 = vrot.slane %v2283_v17, 1 }
 0x328   :  { %v2798_v20 = vadd.f32 %v2797_v15, %v2796_v52  ;;  %v2972_v6 = vmul.f32 %v6343_v10, %v2864_v37  ;;  %v2716_v50 = vadd.f32 %v2715_v32, %v2714_v29  ;;  %v2376_v52 = vadd.f32 %v2375_v3, %v2374_v45  ;;  %v7535_v45 = vld [vmem:[#allocation33_spill] sm:$0xff] }
 0x329   :  { %1406 = vperm.xlu1 %4012, %v7460_v30   ;;  %v2795_v30 = vadd.f32 %v2794_v42, %v2793_v11  ;;  %v3419_v15 = vsel %vm3256_vm3, %v2418_v54, %v3418_v26  ;;  %v3177_v42 = vadd.f32 %v3176_v13, %v6420_v40  ;;  %v7537_v40 = vld [vmem:[#allocation39_spill] sm:$0xff]  ;;  %v2655_v46 = vadd.f32 %v2654_v31, %v6457_v63  ;;  %v7546_v31 = vld [vmem:[#allocation40_spill] sm:$0xff] }
 0x32a   :  { %v2799_v49 = vrot.slane %v2798_v20, 2  ;;  %v3040_v25 = vsel %vm1461_vm1, %v2972_v6, 0.0  ;;  %v2717_v9 = vrot.slane %v2716_v50, 1  ;;  %v3049_v6 = vadd.f32 %v3048_v27, %v6437_v57 }
 0x32b   :  { %v3041_v62 = vrot.slane %v3040_v25, 4  ;;  %v2912_v1 = vpop.permute.xlu1 %2911  ;;  %v3490_v37 = vsel %vm3254_vm2, %v2795_v30, %v7535_v45  ;;  %v2667_v57 = vadd.f32 %v2666_v43, %v2665_v12  ;;  %v6498_v3 = vsel %vm3258_vm4, %v6338_v61, %v3419_v15 }
 0x32c   :  { %v2800_v10 = vadd.f32 %v2799_v49, %v2798_v20  ;;  %v2984_v5 = vmul.f32 %v2912_v1, %v6228_v19  ;;  %v2718_v0 = vadd.f32 %v2717_v9, %v2716_v50  ;;  %v7536_v49 = vrot.slane %v6348_v39, 1 }
 0x32d   :  { %v3042_v29 = vadd.f32 %v3041_v62, %v3040_v25  ;;  %1411 = vperm.xlu1 %4012, %v7453_v58   ;;  %v3541_v13 = vsel %vm3254_vm2, %v6373_v44, %v7537_v40  ;;  %v7538_v62 = vrot.slane %v6363_v28, 1  ;;  %v3031_v61 = vrot.slane %v6428_v2, 1  ;;  %v7548_v40 = vld [vmem:[#allocation63_spill] sm:$0xff] }
 0x32e   :  { %v2801_v51 = vrot.slane %v2800_v10, 1  ;;  %v3124_v23 = vsel %vm1461_vm1, %v2984_v5, 0.0  ;;  %v3481_v32 = vsel %vm3264_vm7, %v2718_v0, %v3480_v48  ;;  %v3025_v25 = vadd.f32 %v7536_v49, %v6348_v39  ;;  %v6513_v5 = vpop.permute.xlu0 %2943  ;;  %v7547_v49 = vld [vmem:[#allocation35_spill] sm:$0xff] }
 0x32f   :  { %v3125_v19 = vrot.slane %v3124_v23, 4  ;;  %v2936_v56 = vpop.permute.xlu1 %2935  ;;  %v3482_v58 = vsel %vm3266_vm8, %v6111_v53, %v3481_v32  ;;  %v3043_v18 = vrot.slane %v3042_v29, 2  ;;  %v6487_v53 = vsel %vm3260_vm5, %v2376_v52, %v3413_v38  ;;  %v7541_v32 = vld [vmem:[#allocation60_spill] sm:$0xff]  ;;  %v7543_v38 = vld [vmem:[#allocation10_spill] sm:$0xff] }
 0x330   :  { %v2802_v21 = vadd.f32 %v2801_v51, %v2800_v10  ;;  %v2990_v11 = vmul.f32 %v6332_v35, %v2936_v56  ;;  %3499 = vrot.lane.b32.xlu0 %v3482_v58, %s4132_s29  ;;  %v3018_v1 = vadd.f32 %v7538_v62, %v6363_v28  ;;  %v3050_v12 = vrot.slane %v3049_v6, 2 }
 0x331   :  { %v3126_v20 = vadd.f32 %v3125_v19, %v3124_v23  ;;  %1416 = vperm.xlu1 %4012, %v7485_v34   ;;  %v3044_v55 = vadd.f32 %v3043_v18, %v3042_v29  ;;  %v3038_v10 = vrot.slane %v6432_v47, 1  ;;  %v2278_v39 = vadd.f32 %v2277_v36, %v6434_v24  ;;  %v7545_v36 = vld [vmem:[#allocation22_spill] sm:$0xff] }
 0x332   :  { %v6483_v26 = vsel %vm3256_vm3, %v2802_v21, %v3490_v37  ;;  %v3166_v35 = vsel %vm1461_vm1, %v2990_v11, 0.0  ;;  %v2668_v30 = vrot.slane %v2667_v57, 1  ;;  %v2285_v44 = vadd.f32 %v2284_v16, %v2283_v17  ;;  %v7539_v17 = vld [vmem:[#allocation54_spill] sm:$0xff]  ;;  %v6540_v45 = vpop.permute.xlu0 %2919 }
 0x333   :  { %v3127_v50 = vrot.slane %v3126_v20, 2  ;;  %v3167_v34 = vrot.slane %v3166_v35, 4  ;;  %v3045_v0 = vrot.slane %v3044_v55, 1  ;;  %v3400_v24 = vsel %vm3260_vm5, %v6139_v60, %v6234_v33  ;;  %v7542_v11 = vld [vmem:[#allocation50_spill] sm:$0xff] }
 0x334   :  { %v6494_v27 = vpop.permute.xlu1 %1775  ;;  %v3542_v51 = vsel %vm3256_vm3, %v3018_v1, %v3541_v13  ;;  %v3032_v23 = vadd.f32 %v3031_v61, %v6428_v2  ;;  %v3051_v48 = vadd.f32 %v3050_v12, %v3049_v6  ;;  %v3401_v63 = vsel %vm3262_vm6, %v6277_v59, %v3400_v24  ;;  %v7549_v61 = vld [vmem:[#allocation45_spill] sm:$0xff] }
 0x335   :  { %v3128_v54 = vadd.f32 %v3127_v50, %v3126_v20  ;;  %v3168_v9 = vadd.f32 %v3167_v34, %v3166_v35  ;;  %1421 = vperm.xlu1 %4012, %v7505_v22   ;;  %v3178_v22 = vrot.slane %v3177_v42, 1  ;;  %v3402_v56 = vsel %vm3264_vm7, %v2278_v39, %v3401_v63  ;;  %v6551_v35 = vld [vmem:[%s7182_s1 + $0x98] sm:$0xff]  ;;  %v7555_v63 = vld [vmem:[#allocation32_spill] sm:$0xff] }
 0x336   :  { %v3039_v60 = vadd.f32 %v3038_v10, %v6432_v47  ;;  %v2669_v33 = vadd.f32 %v2668_v30, %v2667_v57  ;;  %v3403_v2 = vsel %vm3266_vm8, %v2285_v44, %v3402_v56  ;;  %v2447_v59 = vsel %vm1461_vm1, %v7542_v11, 0.0  ;;  %v7551_v10 = vld [vmem:[#allocation21_spill] sm:$0xff]  ;;  %v7553_v30 = vld [vmem:[#allocation58_spill] sm:$0xff] }
 0x337   :  { %v3129_v41 = vrot.slane %v3128_v54, 1  ;;  %v3169_v7 = vrot.slane %v3168_v9, 2  ;;  %v3179_v58 = vadd.f32 %v3178_v22, %v3177_v42  ;;  %v3046_v37 = vadd.f32 %v3045_v0, %v3044_v55  ;;  %v7554_v24 = vld [vmem:[#allocation37_spill] sm:$0xff] }
 0x338   :  { %v7544_v47 = vrot.slane %v7543_v38, 4  ;;  %v1833_v42 = vmul.f32 %v6551_v35, %v7545_v36  ;;  %v3052_v50 = vrot.slane %v3051_v48, 1  ;;  %v3543_v34 = vsel %vm3258_vm4, %v3025_v25, %v3542_v51 }
 0x339   :  { %v3130_v29 = vadd.f32 %v3129_v41, %v3128_v54  ;;  %v3170_v52 = vadd.f32 %v3169_v7, %v3168_v9  ;;  %v6516_v28 = vpop.permute.xlu1 %2155  ;;  %3353 = vrot.lane.b32.xlu1 %v6158_v4, %s4130_s27  ;;  %v7540_v4 = vld [vmem:[#allocation44_spill] sm:$0xff]  ;;  %v2392_v16 = vrot.slane %v7546_v31, 4  ;;  %v3544_v54 = vsel %vm3260_vm5, %v3032_v23, %v3543_v34  ;;  %v4095_v41 = vld [vmem:[%s7182_s1 + $0x68] sm:$0xff]  ;;  %v7552_v7 = vld [vmem:[#allocation6_spill] sm:$0xff] }
 0x33a   :  { %v3472_v43 = vsel %vm3260_vm5, %v7541_v32, %v7540_v4  ;;  %v2023_v6 = vadd.f32 %v7544_v47, %v7543_v38  ;;  %v2448_v9 = vrot.slane %v2447_v59, 4  ;;  %v3068_v13 = vsel %vm1461_vm1, %v7548_v40, 0.0  ;;  %v7561_v47 = vld [vmem:[#allocation11_spill] sm:$0xff] }
 0x33b   :  { %v6529_v15 = vsel %vm3256_vm3, %v3130_v29, %v7539_v17  ;;  %v3171_v19 = vrot.slane %v3170_v52, 1  ;;  %v3473_v21 = vsel %vm3262_vm6, %v2655_v46, %v3472_v43  ;;  %v3545_v1 = vsel %vm3262_vm6, %v3039_v60, %v3544_v54  ;;  %v6599_v43 = vpop.permute.xlu0 %2927  ;;  %v7557_v60 = vld [vmem:[#allocation27_spill] sm:$0xff] }
 0x33c   :  { %v3474_v55 = vsel %vm3264_vm7, %v7547_v49, %v3473_v21  ;;  %v7550_v25 = vrot.slane %v7549_v61, 2  ;;  %v3057_v39 = vrot.slane %v7551_v10, 2  ;;  %v2979_v22 = vmul.f32 %v4095_v41, %v7552_v7  ;;  %v7563_v40 = vld [vmem:[#allocation23_spill] sm:$0xff] }
 0x33d   :  { %v3172_v18 = vadd.f32 %v3171_v19, %v3170_v52  ;;  %v6542_v20 = vpop.permute.xlu1 %2183  ;;  %3425 = vrot.lane.b32.xlu1 %v3403_v2, %s4131_s28  ;;  %v3475_v62 = vsel %vm3266_vm8, %v2669_v33, %v3474_v55  ;;  %v3546_v46 = vsel %vm3264_vm7, %v3046_v37, %v3545_v1  ;;  %v1975_v44 = vrot.slane %v7553_v30, 2  ;;  %v6582_v52 = vld [vmem:[%s7182_s1 + $0xa8] sm:$0xff]  ;;  %v7559_v37 = vld [vmem:[#allocation4_spill] sm:$0xff] }
 0x33e   :  { %v1969_v12 = vadd.f32 %v7550_v25, %v7549_v61  ;;  %v1979_v0 = vsel %vm1461_vm1, %v1833_v42, 0.0  ;;  %v3053_v29 = vadd.f32 %v3052_v50, %v3051_v48  ;;  %v1835_v51 = vmul.f32 %v6582_v52, %v7554_v24  ;;  %v6597_v48 = vld [vmem:[%s7182_s1 + $0xb0] sm:$0xff] }
 0x33f   :  { %v6558_v57 = vsel %vm3254_vm2, %v3179_v58, %v3172_v18  ;;  %v7556_v17 = vrot.slane %v7555_v63, 1  ;;  %v2024_v56 = vrot.slane %v2023_v6, 2  ;;  %v2393_v4 = vadd.f32 %v2392_v16, %v7546_v31 }
 0x340   :  { %v3069_v32 = vrot.slane %v3068_v13, 4  ;;  %v7558_v33 = vrot.slane %v7557_v60, 2  ;;  %v2449_v21 = vadd.f32 %v2448_v9, %v2447_v59  ;;  %v1836_v11 = vmul.f32 %v6494_v27, %v6597_v48 }
 0x341   :  { %3497 = vrot.lane.b32.xlu1 %v3475_v62, %s4132_s29  ;;  %v6591_v19 = vadd.f32 %v7556_v17, %v7555_v63  ;;  %v3547_v58 = vsel %vm3266_vm8, %v3053_v29, %v3546_v46  ;;  %v7560_v18 = vrot.slane %v7559_v37, 1  ;;  %v7562_v36 = vrot.slane %v7561_v47, 2 }
 0x342   :  { %v6586_v23 = vpop.permute.xlu1 %2535  ;;  %v3065_v2 = vadd.f32 %v7558_v33, %v7557_v60  ;;  %v1980_v50 = vrot.slane %v1979_v0, 4  ;;  %v3089_v34 = vsel %vm1461_vm1, %v2979_v22, 0.0  ;;  %v1970_v59 = vrot.slane %v1969_v12, 1  ;;  %v6624_v22 = vpop.permute.xlu0 %2931 }
 0x343   :  { %v6610_v38 = vadd.f32 %v7560_v18, %v7559_v37  ;;  %v6615_v42 = vadd.f32 %v7562_v36, %v7561_v47  ;;  %v3058_v27 = vadd.f32 %v3057_v39, %v7551_v10  ;;  %v1976_v31 = vadd.f32 %v1975_v44, %v7553_v30  ;;  %v7564_v37 = vld [vmem:[#allocation56_spill] sm:$0xff] }
 0x344   :  { %v1993_v16 = vsel %vm1461_vm1, %v1835_v51, 0.0  ;;  %v2025_v55 = vadd.f32 %v2024_v56, %v2023_v6  ;;  %v2394_v54 = vrot.slane %v2393_v4, 2  ;;  %v3070_v9 = vadd.f32 %v3069_v32, %v3068_v13 }
 0x345   :  { %3569 = vrot.lane.b32.xlu1 %v3547_v58, %s4133_s4  ;;  %v3066_v1 = vrot.slane %v3065_v2, 1  ;;  %v2450_v61 = vrot.slane %v2449_v21, 2  ;;  %v3090_v25 = vrot.slane %v3089_v34, 4  ;;  %v2000_v41 = vsel %vm1461_vm1, %v1836_v11, 0.0 }
 0x346   :  { %v2564_v49 = vpop.permute.xlu1 %2563  ;;  %v1981_v7 = vadd.f32 %v1980_v50, %v1979_v0  ;;  %v1994_v46 = vrot.slane %v1993_v16, 4  ;;  %v2219_v10 = vmul.f32 %v6582_v52, %v6516_v28  ;;  %v1971_v30 = vadd.f32 %v1970_v59, %v1969_v12 }
 0x347   :  { %v2609_v62 = vmul.f32 %v2564_v49, %v7563_v40  ;;  %v3059_v6 = vrot.slane %v3058_v27, 1  ;;  %v1977_v44 = vrot.slane %v1976_v31, 1  ;;  %v2026_v29 = vrot.slane %v2025_v55, 1  ;;  %v6633_v49 = vpop.permute.xlu0 %2963 }
 0x348   :  { %v2395_v24 = vadd.f32 %v2394_v54, %v2393_v4  ;;  %v3071_v51 = vrot.slane %v3070_v9, 2  ;;  %v2001_v63 = vrot.slane %v2000_v41, 4  ;;  %v2451_v0 = vadd.f32 %v2450_v61, %v2449_v21 }
 0x349   :  { %v2803_v39 = vsel %vm1461_vm1, %v2609_v62, 0.0  ;;  %v3091_v32 = vadd.f32 %v3090_v25, %v3089_v34  ;;  %v3067_v33 = vadd.f32 %v3066_v1, %v3065_v2  ;;  %v1982_v11 = vrot.slane %v1981_v7, 2 }
 0x34a   :  { %v2804_v13 = vrot.slane %v2803_v39, 4  ;;  %v1995_v58 = vadd.f32 %v1994_v46, %v1993_v16  ;;  %v2377_v28 = vsel %vm1461_vm1, %v2219_v10, 0.0  ;;  %v3339_v12 = vsel %vm3254_vm2, %v1971_v30, %v7564_v37  ;;  %v6655_v46 = vld [vmem:[%s7182_s1 + $0x60] sm:$0xff]  ;;  %v7568_v30 = vld [vmem:[#allocation59_spill] sm:$0xff] }
 0x34b   :  { %v2896_v17 = vpop.permute.xlu1 %2895  ;;  %v3060_v18 = vadd.f32 %v3059_v6, %v3058_v27  ;;  %v1978_v47 = vadd.f32 %v1977_v44, %v1976_v31  ;;  %v2027_v4 = vadd.f32 %v2026_v29, %v2025_v55  ;;  %v2396_v50 = vrot.slane %v2395_v24, 1  ;;  %v6643_v27 = vld [vmem:[%s7182_s1 + $0x58] sm:$0xff]  ;;  %7566 = vst [vmem:[#allocation24_spill] sm:$0xff] %v6655_v46  ;;  %v6670_v37 = vpop.permute.xlu0 %1276 }
 0x34c   :  { %v2805_v60 = vadd.f32 %v2804_v13, %v2803_v39  ;;  %v3072_v59 = vadd.f32 %v3071_v51, %v3070_v9  ;;  %v2002_v54 = vadd.f32 %v2001_v63, %v2000_v41  ;;  %v2452_v34 = vrot.slane %v2451_v0, 1  ;;  %v7565_v31 = vld [vmem:[#allocation13_spill] sm:$0xff] }
 0x34d   :  { %v3092_v2 = vrot.slane %v3091_v32, 2  ;;  %v2378_v62 = vrot.slane %v2377_v28, 4  ;;  %v6638_v1 = vsel %vm3254_vm2, %v3067_v33, %v3060_v18  ;;  %v1983_v61 = vadd.f32 %v1982_v11, %v1981_v7  ;;  %v7567_v7 = vld [vmem:[#allocation61_spill] sm:$0xff]  ;;  %v7569_v18 = vld [vmem:[#allocation12_spill] sm:$0xff] }
 0x34e   :  { %v2806_v36 = vrot.slane %v2805_v60, 2  ;;  %v2977_v55 = vmul.f32 %v6643_v27, %v7565_v31  ;;  %v1996_v9 = vrot.slane %v1995_v58, 2  ;;  %v6648_v25 = vsel %vm3256_vm3, %v1978_v47, %v3339_v12 }
 0x34f   :  { %v6635_v21 = vpop.permute.xlu1 %2915  ;;  %v2992_v41 = vmul.f32 %v6385_v14, %v6513_v5  ;;  %v2978_v10 = vmul.f32 %v6655_v46, %v7567_v7  ;;  %v6661_v6 = vsel %vm3254_vm2, %v2027_v4, %v7568_v30  ;;  %v6663_v44 = vadd.f32 %v2396_v50, %v2395_v24  ;;  %v3602_v7 = vld [vmem:[%s7183_s5 + $0x10] sm:$0xff] }
 0x350   :  { %v2807_v16 = vadd.f32 %v2806_v36, %v2805_v60  ;;  %v3073_v13 = vrot.slane %v3072_v59, 1  ;;  %v2003_v29 = vrot.slane %v2002_v54, 2  ;;  %v6665_v51 = vadd.f32 %v2452_v34, %v2451_v0  ;;  %v7570_v36 = vld [vmem:[#allocation46_spill] sm:$0xff] }
 0x351   :  { %v6667_v14 = vadd.f32 %v3092_v2, %v3091_v32  ;;  %v2379_v5 = vadd.f32 %v2378_v62, %v2377_v28  ;;  %v1984_v33 = vrot.slane %v1983_v61, 1  ;;  %v3075_v11 = vsel %vm1461_vm1, %v2977_v55, 0.0 }
 0x352   :  { %v2808_v39 = vrot.slane %v2807_v16, 1  ;;  %v1997_v12 = vadd.f32 %v1996_v9, %v1995_v58  ;;  %v3180_v24 = vsel %vm1461_vm1, %v2992_v41, 0.0  ;;  %v1841_v4 = vmul.f32 %v7570_v36, %v7563_v40  ;;  %v6686_v58 = vld [vmem:[%s7182_s1 + $0x70] sm:$0xff]  ;;  %v3605_v36 = vld [vmem:[%s7183_s5 + $0x28] sm:$0xff] }
 0x353   :  { %v3082_v0 = vsel %vm1461_vm1, %v2978_v10, 0.0  ;;  %v6681_v28 = vadd.f32 %v3073_v13, %v3072_v59  ;;  %v2004_v50 = vadd.f32 %v2003_v29, %v2002_v54  ;;  %7571 = vst [vmem:[#allocation29_spill] sm:$0xff] %v6686_v58  ;;  %v2980_v34 = vmul.f32 %v6686_v58, %v2896_v17  ;;  %v3600_v54 = vld [vmem:[%s7183_s5] sm:$0xff]  ;;  %v3601_v17 = vld [vmem:[%s7183_s5 + $0x8] sm:$0xff]  ;;  %v3603_v13 = vld [vmem:[%s7183_s5 + $0x18] sm:$0xff] }
 0x354   :  { %v2809_v63 = vadd.f32 %v2808_v39, %v2807_v16  ;;  %v1780_v60 = vpop.permute.xlu1 %1779  ;;  %v3076_v62 = vrot.slane %v3075_v11, 4  ;;  %v2380_v16 = vrot.slane %v2379_v5, 2  ;;  %v1985_v55 = vadd.f32 %v1984_v33, %v1983_v61 }
 0x355   :  { %v1837_v47 = vmul.f32 %v1780_v60, %v7569_v18  ;;  %v3083_v9 = vrot.slane %v3082_v0, 4  ;;  %v1998_v59 = vrot.slane %v1997_v12, 1  ;;  %v2035_v10 = vsel %vm1461_vm1, %v1841_v4, 0.0 }
 0x356   :  { %v6679_v32 = vsel %vm3258_vm4, %v2809_v63, %v6483_v26  ;;  %v3181_v26 = vrot.slane %v3180_v24, 4  ;;  %v3923_v30 = vpack.c.bf16 %v3601_v17, %v3600_v54  ;;  %v2986_v29 = vmul.f32 %v6417_v8, %v6540_v45  ;;  %v6707_v63 = vpop.permute.xlu0 %1291 }
 0x357   :  { %v2007_v2 = vsel %vm1461_vm1, %v1837_v47, 0.0  ;;  %v2005_v60 = vrot.slane %v2004_v50, 1  ;;  %v3096_v33 = vsel %vm1461_vm1, %v2980_v34, 0.0  ;;  %v3927_v18 = vpack.c.bf16 %v3603_v13, %v3602_v7  ;;  %v3604_v47 = vld [vmem:[%s7183_s5 + $0x20] sm:$0xff] }
 0x358   :  { %v2008_v31 = vrot.slane %v2007_v2, 4  ;;  %v3077_v4 = vadd.f32 %v3076_v62, %v3075_v11  ;;  %3924 = vmatprep.subr.bf16.mxu0 %v3923_v30  ;;  %v2036_v45 = vrot.slane %v2035_v10, 4  ;;  %v3084_v54 = vadd.f32 %v3083_v9, %v3082_v0  ;;  %v7572_v11 = vld [vmem:[#allocation38_spill] sm:$0xff] }
 0x359   :  { %v2160_v41 = vpop.permute.xlu1 %2159  ;;  %v1999_v17 = vadd.f32 %v1998_v59, %v1997_v12  ;;  %3926 = vmatpush3.bf16.msra.mxu0 %v3923_v30  ;;  %v3097_v7 = vrot.slane %v3096_v33, 4  ;;  %v3341_v40 = vsel %vm3258_vm4, %v1985_v55, %v6648_v25  ;;  %v3931_v58 = vpack.c.bf16 %v3605_v36, %v3604_v47  ;;  %v3607_v25 = vld [vmem:[%s7183_s5 + $0x38] sm:$0xff] }
 0x35a   :  { %v2009_v39 = vadd.f32 %v2008_v31, %v2007_v2  ;;  %v2220_v61 = vmul.f32 %v2160_v41, %v6597_v48  ;;  %v2381_v2 = vadd.f32 %v2380_v16, %v2379_v5  ;;  %3928 = vmatprep.subr.bf16.mxu0 %v3927_v18  ;;  %v6719_v46 = vadd.f32 %v3181_v26, %v3180_v24  ;;  %v4100_v5 = vld [vmem:[%s7182_s1 + $0x80] sm:$0xff]  ;;  %v3606_v16 = vld [vmem:[%s7183_s5 + $0x30] sm:$0xff] }
 0x35b   :  { %v2598_v62 = vmul.f32 %v4100_v5, %v7572_v11  ;;  %v2006_v0 = vadd.f32 %v2005_v60, %v2004_v50  ;;  %v3138_v55 = vsel %vm1461_vm1, %v2986_v29, 0.0  ;;  %v3078_v24 = vrot.slane %v3077_v4, 2  ;;  %v7573_v50 = vld [vmem:[#allocation62_spill] sm:$0xff] }
 0x35c   :  { %v2010_v31 = vrot.slane %v2009_v39, 2  ;;  %v2384_v41 = vsel %vm1461_vm1, %v2220_v61, 0.0  ;;  %v2382_v26 = vrot.slane %v2381_v2, 1  ;;  %v2037_v59 = vadd.f32 %v2036_v45, %v2035_v10  ;;  %v3608_v11 = vld [vmem:[%s7183_s5 + $0x40] sm:$0xff] }
 0x35d   :  { %v2385_v56 = vrot.slane %v2384_v41, 4  ;;  %v2188_v34 = vpop.permute.xlu1 %2187  ;;  %v3085_v61 = vrot.slane %v3084_v54, 2  ;;  %3930 = vmatpush3.bf16.msra.mxu0 %v3927_v18  ;;  %v3098_v60 = vadd.f32 %v3097_v7, %v3096_v33  ;;  %v3935_v29 = vpack.c.bf16 %v3607_v25, %v3606_v16  ;;  %v6760_v16 = vld [vmem:[%s7182_s1 + $0xe8] sm:$0xff] }
 0x35e   :  { %v2011_v13 = vadd.f32 %v2010_v31, %v2009_v39  ;;  %v6732_v39 = vpop.permute.xlu0 %1301  ;;  %3932 = vmatprep.subr.bf16.mxu0 %v3931_v58  ;;  %v2726_v5 = vsel %vm1461_vm1, %v2598_v62, 0.0  ;;  %v2988_v33 = vmul.f32 %v6599_v43, %v6597_v48  ;;  %v2383_v18 = vadd.f32 %v2382_v26, %v2381_v2 }
 0x35f   :  { %v2386_v12 = vadd.f32 %v2385_v56, %v2384_v41  ;;  %v3342_v56 = vsel %vm3260_vm5, %v7573_v50, %v3341_v40  ;;  %v3139_v41 = vrot.slane %v3138_v55, 4  ;;  %v3609_v40 = vld [vmem:[%s7183_s5 + $0x48] sm:$0xff]  ;;  %v3079_v62 = vadd.f32 %v3078_v24, %v3077_v4 }
 0x360   :  { %v2012_v9 = vrot.slane %v2011_v13, 1  ;;  %v3343_v31 = vsel %vm3262_vm6, %v1999_v17, %v3342_v56  ;;  %v6752_v17 = vld [vmem:[%s7182_s1 + $0xe0] sm:$0xff]  ;;  %v2227_v43 = vmul.f32 %v6760_v16, %v2188_v34  ;;  %v3183_v2 = vrot.slane %v6719_v46, 2  ;;  %v6768_v24 = vld [vmem:[%s7182_s1 + $0x88] sm:$0xff] }
 0x361   :  { %v2387_v30 = vrot.slane %v2386_v12, 2  ;;  %v3344_v45 = vsel %vm3264_vm7, %v2006_v0, %v3343_v31  ;;  %v2226_v7 = vmul.f32 %v6752_v17, %v6542_v20  ;;  %v2038_v0 = vrot.slane %v2037_v59, 2  ;;  %3934 = vmatpush3.bf16.msra.mxu0 %v3931_v58  ;;  %7574 = vst [vmem:[#allocation16_spill] sm:$0xff] %v6768_v24 }
 0x362   :  { %v2013_v47 = vadd.f32 %v2012_v9, %v2011_v13  ;;  %v6736_v36 = vpop.permute.xlu1 %2567  ;;  %v3086_v25 = vadd.f32 %v3085_v61, %v3084_v54  ;;  %v3099_v26 = vrot.slane %v3098_v60, 2  ;;  %3936 = vmatprep.subr.bf16.mxu0 %v3935_v29  ;;  %v3939_v20 = vpack.c.bf16 %v3609_v40, %v3608_v11  ;;  %v6772_v34 = vpop.permute.xlu0 %1311 }
 0x363   :  { %v2388_v10 = vadd.f32 %v2387_v30, %v2386_v12  ;;  %v3140_v9 = vadd.f32 %v3139_v41, %v3138_v55  ;;  %v2727_v4 = vrot.slane %v2726_v5, 4  ;;  %v7575_v30 = vld [vmem:[#allocation26_spill] sm:$0xff]  ;;  %v2426_v54 = vsel %vm1461_vm1, %v2226_v7, 0.0  ;;  %v6779_v55 = vld [vmem:[%s7182_s1 + $0x78] sm:$0xff] }
 0x364   :  { %v3345_v13 = vsel %vm3266_vm8, %v2013_v47, %v3344_v45  ;;  %v2599_v50 = vmul.f32 %v6768_v24, %v7575_v30  ;;  %v3152_v47 = vsel %vm1461_vm1, %v2988_v33, 0.0  ;;  %7576 = vst [vmem:[#allocation57_spill] sm:$0xff] %v6779_v55  ;;  %v3415_v31 = vsel %vm3262_vm6, %v2383_v18, %v6487_v53 }
 0x365   :  { %v2389_v12 = vrot.slane %v2388_v10, 1  ;;  %3357 = vrot.lane.b32.xlu0 %v3345_v13, %s4130_s27  ;;  %v3080_v41 = vrot.slane %v3079_v62, 1  ;;  %v2039_v45 = vadd.f32 %v2038_v0, %v2037_v59  ;;  %v2433_v11 = vsel %vm1461_vm1, %v2227_v43, 0.0  ;;  %3938 = vmatpush3.bf16.msra.mxu0 %v3935_v29 }
 0x366   :  { %v3087_v40 = vrot.slane %v3086_v25, 1  ;;  %v3100_v33 = vadd.f32 %v3099_v26, %v3098_v60  ;;  %3940 = vmatprep.subr.bf16.mxu0 %v3939_v20  ;;  %v2728_v53 = vadd.f32 %v2727_v4, %v2726_v5  ;;  %v2427_v18 = vrot.slane %v2426_v54, 4  ;;  %v6808_v4 = vld [vmem:[%s7182_s1 + $0x90] sm:$0xff] }
 0x367   :  { %v2390_v56 = vadd.f32 %v2389_v12, %v2388_v10  ;;  %v2900_v58 = vpop.permute.xlu1 %2899  ;;  %v6792_v12 = vadd.f32 %v3183_v2, %v6719_v46  ;;  %v3549_v29 = vsel %vm3256_vm3, %v6681_v28, %v6638_v1  ;;  %v3141_v60 = vrot.slane %v3140_v9, 2  ;;  %7578 = vst [vmem:[#allocation25_spill] sm:$0xff] %v6808_v4  ;;  %v7579_v1 = vld [vmem:[#allocation49_spill] sm:$0xff] }
 0x368   :  { %v2981_v61 = vmul.f32 %v6779_v55, %v2900_v58  ;;  %v3153_v43 = vrot.slane %v3152_v47, 4  ;;  %v2434_v26 = vrot.slane %v2433_v11, 4  ;;  %v2733_v30 = vsel %vm1461_vm1, %v2599_v50, 0.0  ;;  %v6800_v58 = vpop.permute.xlu0 %1321 }
 0x369   :  { %v3416_v10 = vsel %vm3264_vm7, %v2390_v56, %v3415_v31  ;;  %v2040_v56 = vrot.slane %v2039_v45, 1  ;;  %3942 = vmatpush3.bf16.msra.mxu0 %v3939_v20  ;;  %v7577_v5 = vrot.slane %v6667_v14, 1  ;;  %v2600_v28 = vmul.f32 %v6808_v4, %v7579_v1  ;;  %v6820_v1 = vld [vmem:[%s7182_s1 + $0xf8] sm:$0xff]  ;;  %v7583_v4 = vld [vmem:[#allocation7_spill] sm:$0xff] }
 0x36a   :  { %v3103_v7 = vsel %vm1461_vm1, %v2981_v61, 0.0  ;;  %v6789_v13 = vsel %vm3266_vm8, %v6663_v44, %v3416_v10  ;;  %v3081_v44 = vadd.f32 %v3080_v41, %v3079_v62  ;;  %v3088_v61 = vadd.f32 %v3087_v40, %v3086_v25 }
 0x36b   :  { %v3104_v59 = vrot.slane %v3103_v7, 4  ;;  %v6794_v0 = vpop.permute.xlu1 %2947  ;;  %v3095_v2 = vadd.f32 %v7577_v5, %v6667_v14  ;;  %v3101_v50 = vrot.slane %v3100_v33, 1  ;;  %v2729_v31 = vrot.slane %v2728_v53, 2 }
 0x36c   :  { %v2428_v41 = vadd.f32 %v2427_v18, %v2426_v54  ;;  %v6813_v20 = vadd.f32 %v3141_v60, %v3140_v9  ;;  %v2734_v14 = vrot.slane %v2733_v30, 4  ;;  %v2041_v24 = vadd.f32 %v2040_v56, %v2039_v45  ;;  %v6828_v18 = vpop.permute.xlu0 %1331 }
 0x36d   :  { %v3105_v46 = vadd.f32 %v3104_v59, %v3103_v7  ;;  %v6815_v7 = vadd.f32 %v3153_v43, %v3152_v47  ;;  %v2435_v59 = vadd.f32 %v2434_v26, %v2433_v11  ;;  %v3550_v40 = vsel %vm3258_vm4, %v3081_v44, %v3549_v29  ;;  %v6836_v29 = vld [vmem:[%s7182_s1 + $0xb8] sm:$0xff]  ;;  %v7580_v44 = vld [vmem:[#allocation34_spill] sm:$0xff] }
 0x36e   :  { %v2740_v54 = vsel %vm1461_vm1, %v2600_v28, 0.0  ;;  %v3102_v9 = vadd.f32 %v3101_v50, %v3100_v33  ;;  %v2985_v47 = vmul.f32 %v6551_v35, %v6635_v21  ;;  %v3551_v11 = vsel %vm3260_vm5, %v3088_v61, %v3550_v40 }
 0x36f   :  { %v3106_v10 = vrot.slane %v3105_v46, 2  ;;  %v2429_v45 = vrot.slane %v2428_v41, 2  ;;  %v2602_v60 = vmul.f32 %v6417_v8, %v6586_v23  ;;  %v2989_v33 = vmul.f32 %v6836_v29, %v6624_v22  ;;  %v6849_v22 = vld [vmem:[%s7182_s1 + $0xf0] sm:$0xff] }
 0x370   :  { %v1812_v5 = vpop.permute.xlu1 %1811  ;;  %v2436_v35 = vrot.slane %v2435_v59, 2  ;;  %v3347_v56 = vsel %vm3256_vm3, %v7580_v44, %v6661_v6  ;;  %v3552_v23 = vsel %vm3262_vm6, %v3095_v2, %v3551_v11  ;;  %v3131_v50 = vsel %vm1461_vm1, %v2985_v47, 0.0 }
 0x371   :  { %v3107_v55 = vadd.f32 %v3106_v10, %v3105_v46  ;;  %v1845_v25 = vmul.f32 %v6820_v1, %v1812_v5  ;;  %v2741_v46 = vrot.slane %v2740_v54, 4  ;;  %v3348_v61 = vsel %vm3258_vm4, %v2041_v24, %v3347_v56 }
 0x372   :  { %v6853_v6 = vadd.f32 %v2729_v31, %v2728_v53  ;;  %v2754_v40 = vsel %vm1461_vm1, %v2602_v60, 0.0  ;;  %v2735_v24 = vadd.f32 %v2734_v14, %v2733_v30  ;;  %v2437_v11 = vadd.f32 %v2436_v35, %v2435_v59  ;;  %v7581_v53 = vld [vmem:[#allocation64_spill] sm:$0xff] }
 0x373   :  { %v3108_v43 = vrot.slane %v3107_v55, 1  ;;  %v2063_v26 = vsel %vm1461_vm1, %v1845_v25, 0.0  ;;  %v3553_v25 = vsel %vm3264_vm7, %v3102_v9, %v3552_v23  ;;  %v3132_v44 = vrot.slane %v3131_v50, 4 }
 0x374   :  { %v2064_v21 = vrot.slane %v2063_v26, 4  ;;  %v3349_v31 = vsel %vm3260_vm5, %v7581_v53, %v3348_v61  ;;  %v2755_v60 = vrot.slane %v2754_v40, 4  ;;  %v3155_v59 = vrot.slane %v6815_v7, 2 }
 0x375   :  { %v3109_v28 = vadd.f32 %v3108_v43, %v3107_v55  ;;  %v2192_v8 = vpop.permute.xlu1 %2191  ;;  %v2430_v55 = vadd.f32 %v2429_v45, %v2428_v41  ;;  %v3143_v41 = vrot.slane %v6813_v20, 1  ;;  %v2742_v45 = vadd.f32 %v2741_v46, %v2740_v54 }
 0x376   :  { %v2065_v10 = vadd.f32 %v2064_v21, %v2063_v26  ;;  %v2228_v5 = vmul.f32 %v6849_v22, %v2192_v8  ;;  %v3159_v26 = vsel %vm1461_vm1, %v2989_v33, 0.0  ;;  %v6860_v21 = vpop.permute.xlu0 %1341  ;;  %v2438_v8 = vrot.slane %v2437_v11, 1 }
 0x377   :  { %v3554_v2 = vsel %vm3266_vm8, %v3109_v28, %v3553_v25  ;;  %v2431_v35 = vrot.slane %v2430_v55, 1  ;;  %v3160_v33 = vrot.slane %v3159_v26, 4  ;;  %v2736_v25 = vrot.slane %v2735_v24, 2 }
 0x378   :  { %v2066_v47 = vrot.slane %v2065_v10, 2  ;;  %v2440_v43 = vsel %vm1461_vm1, %v2228_v5, 0.0  ;;  %3571 = vrot.lane.b32.xlu1 %v3554_v2, %s4133_s4  ;;  %v7582_v5 = vld [vmem:[#allocation9_spill] sm:$0xff]  ;;  %v3133_v54 = vadd.f32 %v3132_v44, %v3131_v50  ;;  %v2997_v2 = vmul.f32 %v6820_v1, %v6633_v49 }
 0x379   :  { %v2441_v9 = vrot.slane %v2440_v43, 4  ;;  %v3350_v61 = vsel %vm3262_vm6, %v7582_v5, %v3349_v31  ;;  %v2432_v53 = vadd.f32 %v2431_v35, %v2430_v55  ;;  %v2439_v5 = vadd.f32 %v2438_v8, %v2437_v11 }
 0x37a   :  { %v2067_v30 = vadd.f32 %v2066_v47, %v2065_v10  ;;  %v2544_v14 = vpop.permute.xlu1 %2543  ;;  %v2743_v47 = vrot.slane %v2742_v45, 2  ;;  %v3351_v31 = vsel %vm3264_vm7, %v7583_v4, %v3350_v61  ;;  %v2610_v50 = vmul.f32 %v6752_v17, %v6736_v36 }
 0x37b   :  { %v2442_v56 = vadd.f32 %v2441_v9, %v2440_v43  ;;  %v2604_v28 = vmul.f32 %v2544_v14, %v6597_v48  ;;  %v2756_v43 = vadd.f32 %v2755_v60, %v2754_v40  ;;  %v6874_v9 = vpop.permute.xlu0 %1351  ;;  %v2731_v40 = vrot.slane %v6853_v6, 1 }
 0x37c   :  { %v2068_v23 = vrot.slane %v2067_v30, 1  ;;  %3429 = vrot.lane.b32.xlu1 %v6789_v13, %s4131_s28  ;;  %v2737_v60 = vadd.f32 %v2736_v25, %v2735_v24  ;;  %v3156_v55 = vadd.f32 %v3155_v59, %v6815_v7  ;;  %v2744_v35 = vadd.f32 %v2743_v47, %v2742_v45 }
 0x37d   :  { %v2443_v46 = vrot.slane %v2442_v56, 2  ;;  %v2768_v10 = vsel %vm1461_vm1, %v2604_v28, 0.0  ;;  %v3161_v61 = vadd.f32 %v3160_v33, %v3159_v26  ;;  %v3215_v24 = vsel %vm1461_vm1, %v2997_v2, 0.0 }
 0x37e   :  { %v2069_v48 = vadd.f32 %v2068_v23, %v2067_v30  ;;  %v2769_v62 = vrot.slane %v2768_v10, 4  ;;  %v3134_v30 = vrot.slane %v3133_v54, 2  ;;  %v2810_v25 = vsel %vm1461_vm1, %v2610_v50, 0.0 }
 0x37f   :  { %v2444_v14 = vadd.f32 %v2443_v46, %v2442_v56  ;;  %v2924_v13 = vpop.permute.xlu1 %2923  ;;  %v2757_v56 = vrot.slane %v2756_v43, 2  ;;  %v6891_v7 = vpop.permute.xlu0 %1361  ;;  %v2811_v33 = vrot.slane %v2810_v25, 4 }
 0x380   :  { %v2987_v44 = vmul.f32 %v6582_v52, %v2924_v13  ;;  %v3352_v49 = vsel %vm3266_vm8, %v2069_v48, %v3351_v31  ;;  %v2770_v8 = vadd.f32 %v2769_v62, %v2768_v10  ;;  %v3421_v52 = vsel %vm3260_vm5, %v2432_v53, %v6498_v3 }
 0x381   :  { %v2445_v28 = vrot.slane %v2444_v14, 1  ;;  %3359 = vrot.lane.b32.xlu0 %v3352_v49, %s4130_s27  ;;  %v3422_v46 = vsel %vm3262_vm6, %v2439_v5, %v3421_v52  ;;  %v2738_v48 = vrot.slane %v2737_v60, 1  ;;  %v3135_v45 = vadd.f32 %v3134_v30, %v3133_v54 }
 0x382   :  { %v3145_v4 = vsel %vm1461_vm1, %v2987_v44, 0.0  ;;  %v6895_v62 = vadd.f32 %v3143_v41, %v6813_v20  ;;  %v3157_v10 = vrot.slane %v3156_v55, 1  ;;  %v2758_v26 = vadd.f32 %v2757_v56, %v2756_v43  ;;  %v4109_v20 = vld [vmem:[%s7182_s1 + $0x8] sm:$0xff] }
 0x383   :  { %v2446_v11 = vadd.f32 %v2445_v28, %v2444_v14  ;;  %v3146_v36 = vrot.slane %v3145_v4, 4  ;;  %v2952_v23 = vpop.permute.xlu1 %2951  ;;  %v2745_v14 = vrot.slane %v2744_v35, 1  ;;  %v2771_v2 = vrot.slane %v2770_v8, 2 }
 0x384   :  { %v2732_v13 = vadd.f32 %v2731_v40, %v6853_v6  ;;  %v3162_v54 = vrot.slane %v3161_v61, 2  ;;  %v3216_v31 = vrot.slane %v3215_v24, 4  ;;  %v1430_v41 = vmul.f32 %v4109_v20, %v6670_v37  ;;  %v6916_v37 = vpop.permute.xlu0 %1371 }
 0x385   :  { %v3147_v59 = vadd.f32 %v3146_v36, %v3145_v4  ;;  %v3423_v47 = vsel %vm3264_vm7, %v2446_v11, %v3422_v46  ;;  %v2739_v50 = vadd.f32 %v2738_v48, %v2737_v60  ;;  %v3136_v44 = vrot.slane %v3135_v45, 1 }
 0x386   :  { %v3424_v3 = vsel %vm3266_vm8, %v6665_v51, %v3423_v47  ;;  %v6908_v51 = vld [vmem:[%s7182_s1 + $0xd8] sm:$0xff]  ;;  %v6913_v49 = vadd.f32 %v3157_v10, %v3156_v55  ;;  %v2746_v40 = vadd.f32 %v2745_v14, %v2744_v35  ;;  %v2994_v28 = vmul.f32 %v6752_v17, %v2952_v23 }
 0x387   :  { %v3148_v53 = vrot.slane %v3147_v59, 2  ;;  %3431 = vrot.lane.b32.xlu0 %v3424_v3, %s4131_s28  ;;  %v2993_v43 = vmul.f32 %v6908_v51, %v6794_v0  ;;  %v2759_v60 = vrot.slane %v2758_v26, 1  ;;  %v2812_v56 = vadd.f32 %v2811_v33, %v2810_v25 }
 0x388   :  { %v2548_v5 = vpop.permute.xlu1 %2547  ;;  %v2772_v4 = vadd.f32 %v2771_v2, %v2770_v8  ;;  %v6919_v36 = vadd.f32 %v3162_v54, %v3161_v61  ;;  %v3217_v52 = vadd.f32 %v3216_v31, %v3215_v24  ;;  %v1469_v0 = vsel %vm1461_vm1, %v1430_v41, 0.0  ;;  %v1397_v54 = vpop.permute.xlu0 %1396 }
 0x389   :  { %v2605_v6 = vmul.f32 %v6836_v29, %v2548_v5  ;;  %v3149_v30 = vadd.f32 %v3148_v53, %v3147_v59  ;;  %v3483_v55 = vsel %vm3254_vm2, %v2739_v50, %v2732_v13  ;;  %v3137_v35 = vadd.f32 %v3136_v44, %v3135_v45 }
 0x38a   :  { %v3187_v59 = vsel %vm1461_vm1, %v2993_v43, 0.0  ;;  %v3484_v47 = vsel %vm3256_vm3, %v2746_v40, %v3483_v55  ;;  %v3194_v8 = vsel %vm1461_vm1, %v2994_v28, 0.0  ;;  %v2760_v61 = vadd.f32 %v2759_v60, %v2758_v26 }
 0x38b   :  { %v2775_v11 = vsel %vm1461_vm1, %v2605_v6, 0.0  ;;  %v3150_v25 = vrot.slane %v3149_v30, 1  ;;  %v2813_v14 = vrot.slane %v2812_v56, 2  ;;  %v2773_v24 = vrot.slane %v2772_v4, 1 }
 0x38c   :  { %v2776_v46 = vrot.slane %v2775_v11, 4  ;;  %v2576_v48 = vpop.permute.xlu1 %2575  ;;  %v3218_v33 = vrot.slane %v3217_v52, 2  ;;  %v3188_v2 = vrot.slane %v3187_v59, 4  ;;  %v1470_v45 = vrot.slane %v1469_v0, 4 }
 0x38d   :  { %v2612_v23 = vmul.f32 %v6849_v22, %v2576_v48  ;;  %v3557_v31 = vsel %vm3258_vm4, %v3137_v35, %v6529_v15  ;;  %v3195_v20 = vrot.slane %v3194_v8, 4  ;;  %v3485_v5 = vsel %vm3258_vm4, %v6591_v19, %v3484_v47  ;;  %v4111_v15 = vld [vmem:[%s7182_s1 + $0xc8] sm:$0xff] }
 0x38e   :  { %v2777_v10 = vadd.f32 %v2776_v46, %v2775_v11  ;;  %v3151_v50 = vadd.f32 %v3150_v25, %v3149_v30  ;;  %v3164_v6 = vrot.slane %v6919_v36, 1  ;;  %v2814_v40 = vadd.f32 %v2813_v14, %v2812_v56  ;;  %v4112_v56 = vld [vmem:[%s7182_s1 + $0x20] sm:$0xff] }
 0x38f   :  { %v2824_v3 = vsel %vm1461_vm1, %v2612_v23, 0.0  ;;  %v2774_v28 = vadd.f32 %v2773_v24, %v2772_v4  ;;  %v3486_v60 = vsel %vm3260_vm5, %v2760_v61, %v3485_v5  ;;  %v1454_v11 = vmul.f32 %v4111_v15, %v1397_v54 }
 0x390   :  { %v2778_v53 = vrot.slane %v2777_v10, 2  ;;  %v2825_v13 = vrot.slane %v2824_v3, 4  ;;  %v3189_v46 = vadd.f32 %v3188_v2, %v3187_v59  ;;  %v3196_v30 = vadd.f32 %v3195_v20, %v3194_v8 }
 0x391   :  { %v2956_v41 = vpop.permute.xlu1 %2955  ;;  %v3558_v23 = vsel %vm3260_vm5, %v6895_v62, %v3557_v31  ;;  %v1433_v4 = vmul.f32 %v4112_v56, %v6707_v63  ;;  %v3487_v59 = vsel %vm3262_vm6, %v6610_v38, %v3486_v60  ;;  %v2815_v61 = vrot.slane %v2814_v40, 1 }
 0x392   :  { %v2779_v26 = vadd.f32 %v2778_v53, %v2777_v10  ;;  %v2826_v44 = vadd.f32 %v2825_v13, %v2824_v3  ;;  %v2995_v43 = vmul.f32 %v6760_v16, %v2956_v41  ;;  %v3559_v10 = vsel %vm3262_vm6, %v3151_v50, %v3558_v23 }
 0x393   :  { %v3488_v24 = vsel %vm3264_vm7, %v2774_v28, %v3487_v59  ;;  %v3219_v62 = vadd.f32 %v3218_v33, %v3217_v52  ;;  %v1637_v3 = vsel %vm1461_vm1, %v1454_v11, 0.0  ;;  %v3190_v2 = vrot.slane %v3189_v46, 2  ;;  %v4113_v33 = vld [vmem:[%s7182_s1 + $0x30] sm:$0xff] }
 0x394   :  { %v2780_v48 = vrot.slane %v2779_v26, 1  ;;  %v3201_v19 = vsel %vm1461_vm1, %v2995_v43, 0.0  ;;  %v2827_v55 = vrot.slane %v2826_v44, 2  ;;  %v3197_v63 = vrot.slane %v3196_v30, 2 }
 0x395   :  { %v3202_v35 = vrot.slane %v3201_v19, 4  ;;  %v3560_v38 = vsel %vm3264_vm7, %v6913_v49, %v3559_v10  ;;  %v3165_v31 = vadd.f32 %v3164_v6, %v6919_v36  ;;  %v1471_v20 = vadd.f32 %v1470_v45, %v1469_v0 }
 0x396   :  { %v2781_v47 = vadd.f32 %v2780_v48, %v2779_v26  ;;  %v2580_v25 = vpop.permute.xlu1 %2579  ;;  %v2828_v13 = vadd.f32 %v2827_v55, %v2826_v44  ;;  %v1490_v52 = vsel %vm1461_vm1, %v1433_v4, 0.0  ;;  %v1435_v50 = vmul.f32 %v4113_v33, %v6732_v39 }
 0x397   :  { %v3203_v8 = vadd.f32 %v3202_v35, %v3201_v19  ;;  %v2613_v14 = vmul.f32 %v6820_v1, %v2580_v25  ;;  %v1638_v26 = vrot.slane %v1637_v3, 4  ;;  %v2816_v44 = vadd.f32 %v2815_v61, %v2814_v40 }
 0x398   :  { %v3489_v53 = vsel %vm3266_vm8, %v2781_v47, %v3488_v24  ;;  %v3191_v28 = vadd.f32 %v3190_v2, %v3189_v46  ;;  %v3561_v36 = vsel %vm3266_vm8, %v3165_v31, %v3560_v38  ;;  %v7584_v0 = vrot.slane %v6615_v42, 1 }
 0x399   :  { %v2831_v54 = vsel %vm1461_vm1, %v2613_v14, 0.0  ;;  %3501 = vrot.lane.b32.xlu1 %v3489_v53, %s4132_s29  ;;  %v3204_v41 = vrot.slane %v3203_v8, 2  ;;  %v3220_v6 = vrot.slane %v3219_v62, 1  ;;  %v3198_v15 = vadd.f32 %v3197_v63, %v3196_v30 }
 0x39a   :  { %v2832_v5 = vrot.slane %v2831_v54, 4  ;;  %v2823_v45 = vadd.f32 %v7584_v0, %v6615_v42  ;;  %v2829_v11 = vrot.slane %v2828_v13, 1  ;;  %v1472_v48 = vrot.slane %v1471_v20, 2 }
 0x39b   :  { %v2960_v43 = vpop.permute.xlu1 %2959  ;;  %v3205_v39 = vadd.f32 %v3204_v41, %v3203_v8  ;;  %v7585_v46 = vrot.slane %v6792_v12, 1  ;;  %v1491_v35 = vrot.slane %v1490_v52, 4  ;;  %v1639_v23 = vadd.f32 %v1638_v26, %v1637_v3  ;;  %v4114_v8 = vld [vmem:[%s7182_s1 + $0xc0] sm:$0xff] }
 0x39c   :  { %v2833_v60 = vadd.f32 %v2832_v5, %v2831_v54  ;;  %v2996_v49 = vmul.f32 %v6849_v22, %v2960_v43  ;;  %v1504_v4 = vsel %vm1461_vm1, %v1435_v50, 0.0  ;;  %v3192_v42 = vrot.slane %v3191_v28, 1 }
 0x39d   :  { %3573 = vrot.lane.b32.xlu1 %v3561_v36, %s4133_s4  ;;  %v3186_v55 = vadd.f32 %v7585_v46, %v6792_v12  ;;  %v3493_v25 = vsel %vm3260_vm5, %v2816_v44, %v6679_v32  ;;  %v3199_v59 = vrot.slane %v3198_v15, 1  ;;  %v2830_v10 = vadd.f32 %v2829_v11, %v2828_v13 }
 0x39e   :  { %v2834_v19 = vrot.slane %v2833_v60, 2  ;;  %v3208_v40 = vsel %vm1461_vm1, %v2996_v49, 0.0  ;;  %v3221_v12 = vadd.f32 %v3220_v6, %v3219_v62  ;;  %v1473_v24 = vadd.f32 %v1472_v48, %v1471_v20  ;;  %v4115_v62 = vld [vmem:[%s7182_s1 + $0xd0] sm:$0xff] }
 0x39f   :  { %v3209_v56 = vrot.slane %v3208_v40, 4  ;;  %v3206_v3 = vrot.slane %v3205_v39, 1  ;;  %v1505_v53 = vrot.slane %v1504_v4, 4  ;;  %v1640_v63 = vrot.slane %v1639_v23, 2 }
 0x3a0   :  { %v2835_v47 = vadd.f32 %v2834_v19, %v2833_v60  ;;  %v1392_v30 = vpop.permute.xlu1 %1391  ;;  %v3193_v31 = vadd.f32 %v3192_v42, %v3191_v28  ;;  %v3494_v13 = vsel %vm3262_vm6, %v2823_v45, %v3493_v25  ;;  %v3200_v33 = vadd.f32 %v3199_v59, %v3198_v15  ;;  %v7586_v42 = vld [vmem:[#allocation55_spill] sm:$0xff] }
 0x3a1   :  { %v3210_v61 = vadd.f32 %v3209_v56, %v3208_v40  ;;  %v1453_v14 = vmul.f32 %v4114_v8, %v1392_v30  ;;  %v3495_v26 = vsel %vm3264_vm7, %v2830_v10, %v3494_v13  ;;  %v1492_v44 = vadd.f32 %v1491_v35, %v1490_v52  ;;  %v7587_v8 = vld [vmem:[#allocation53_spill] sm:$0xff] }
 0x3a2   :  { %v2836_v2 = vrot.slane %v2835_v47, 1  ;;  %v3207_v43 = vadd.f32 %v3206_v3, %v3205_v39  ;;  %v1474_v28 = vrot.slane %v1473_v24, 1  ;;  %v3563_v36 = vsel %vm3256_vm3, %v3186_v55, %v6558_v57 }
 0x3a3   :  { %v3211_v54 = vrot.slane %v3210_v61, 2  ;;  %v1630_v38 = vsel %vm1461_vm1, %v1453_v14, 0.0  ;;  %v1506_v6 = vadd.f32 %v1505_v53, %v1504_v4  ;;  %v3564_v15 = vsel %vm3258_vm4, %v3193_v31, %v3563_v36 }
 0x3a4   :  { %v2837_v41 = vadd.f32 %v2836_v2, %v2835_v47  ;;  %v1631_v32 = vrot.slane %v1630_v38, 4  ;;  %v1402_v5 = vpop.permute.xlu1 %1401  ;;  %v1641_v52 = vadd.f32 %v1640_v63, %v1639_v23  ;;  %v3565_v46 = vsel %vm3260_vm5, %v3200_v33, %v3564_v15  ;;  %v7588_v63 = vld [vmem:[#allocation47_spill] sm:$0xff] }
 0x3a5   :  { %v3212_v50 = vadd.f32 %v3211_v54, %v3210_v61  ;;  %v1455_v20 = vmul.f32 %v4115_v62, %v1402_v5  ;;  %v1493_v35 = vrot.slane %v1492_v44, 2  ;;  %v3566_v55 = vsel %vm3262_vm6, %v3207_v43, %v3565_v46 }
 0x3a6   :  { %v1632_v60 = vadd.f32 %v1631_v32, %v1630_v38  ;;  %v3496_v49 = vsel %vm3266_vm8, %v2837_v41, %v3495_v26  ;;  %v1512_v47 = vrot.slane %v7586_v42, 4  ;;  %v1475_v30 = vadd.f32 %v1474_v28, %v1473_v24  ;;  %v7590_v32 = vld [vmem:[#allocation52_spill] sm:$0xff] }
 0x3a7   :  { %v3213_v0 = vrot.slane %v3212_v50, 1  ;;  %v1644_v45 = vsel %vm1461_vm1, %v1455_v20, 0.0  ;;  %3503 = vrot.lane.b32.xlu0 %v3496_v49, %s4132_s29  ;;  %v1500_v14 = vrot.slane %v7587_v8, 2  ;;  %v1507_v3 = vrot.slane %v1506_v6, 2 }
 0x3a8   :  { %v1633_v11 = vrot.slane %v1632_v60, 2  ;;  %v1645_v48 = vrot.slane %v1644_v45, 4  ;;  %v1407_v19 = vpop.permute.xlu1 %1406  ;;  %v1642_v2 = vrot.slane %v1641_v52, 1  ;;  %v7589_v24 = vrot.slane %v7588_v63, 1 }
 0x3a9   :  { %v3214_v39 = vadd.f32 %v3213_v0, %v3212_v50  ;;  %v1456_v40 = vmul.f32 %v6908_v51, %v1407_v19  ;;  %v1494_v38 = vadd.f32 %v1493_v35, %v1492_v44  ;;  %v1488_v5 = vrot.slane %v7590_v32, 1  ;;  %v7591_v50 = vld [vmem:[#allocation48_spill] sm:$0xff] }
 0x3aa   :  { %v1634_v56 = vadd.f32 %v1633_v11, %v1632_v60  ;;  %v1646_v57 = vadd.f32 %v1645_v48, %v1644_v45  ;;  %v1482_v54 = vadd.f32 %v7589_v24, %v7588_v63  ;;  %v1513_v13 = vadd.f32 %v1512_v47, %v7586_v42 }
 0x3ab   :  { %v1651_v4 = vsel %vm1461_vm1, %v1456_v40, 0.0  ;;  %v3567_v25 = vsel %vm3264_vm7, %v3214_v39, %v3566_v55  ;;  %v3255_v62 = vsel %vm3254_vm2, %v1475_v30, %v7591_v50  ;;  %v1501_v60 = vadd.f32 %v1500_v14, %v7587_v8 }
 0x3ac   :  { %v1635_v59 = vrot.slane %v1634_v56, 1  ;;  %v1647_v10 = vrot.slane %v1646_v57, 2  ;;  %v1652_v23 = vrot.slane %v1651_v4, 4  ;;  %v1412_v61 = vpop.permute.xlu1 %1411  ;;  %v3568_v51 = vsel %vm3266_vm8, %v3221_v12, %v3567_v25 }
 0x3ad   :  { %v1457_v53 = vmul.f32 %v6752_v17, %v1412_v61  ;;  %3575 = vrot.lane.b32.xlu0 %v3568_v51, %s4133_s4  ;;  %v1508_v49 = vadd.f32 %v1507_v3, %v1506_v6  ;;  %v1643_v44 = vadd.f32 %v1642_v2, %v1641_v52  ;;  %v1495_v36 = vrot.slane %v1494_v38, 1 }
 0x3ae   :  { %v1648_v31 = vadd.f32 %v1647_v10, %v1646_v57  ;;  %v1653_v41 = vadd.f32 %v1652_v23, %v1651_v4  ;;  %v1636_v12 = vadd.f32 %v1635_v59, %v1634_v56  ;;  %v1514_v11 = vrot.slane %v1513_v13, 2 }
 0x3af   :  { %v1658_v33 = vsel %vm1461_vm1, %v1457_v53, 0.0  ;;  %v3257_v48 = vsel %vm3256_vm3, %v1482_v54, %v3255_v62  ;;  %v1489_v52 = vadd.f32 %v1488_v5, %v7590_v32  ;;  %v1496_v55 = vadd.f32 %v1495_v36, %v1494_v38  ;;  %v4116_v38 = vld [vmem:[%s7182_s1 + $0x48] sm:$0xff]  ;;  %v4117_v32 = vld [vmem:[%s7182_s1 + $0x40] sm:$0xff]  ;;  %v4118_v62 = vld [vmem:[%s7182_s1 + $0x50] sm:$0xff] }
 0x3b0   :  { %v1649_v17 = vrot.slane %v1648_v31, 1  ;;  %v1654_v20 = vrot.slane %v1653_v41, 2  ;;  %v1659_v26 = vrot.slane %v1658_v33, 4  ;;  %v1417_v43 = vpop.permute.xlu1 %1416  ;;  %v3282_v19 = vsel %vm3254_vm2, %v1643_v44, %v1636_v12 }
 0x3b1   :  { %v1458_v28 = vmul.f32 %v6760_v16, %v1417_v43  ;;  %v1509_v16 = vrot.slane %v1508_v49, 1  ;;  %v1502_v4 = vrot.slane %v1501_v60, 1  ;;  %v1515_v25 = vadd.f32 %v1514_v11, %v1513_v13  ;;  %v7594_v11 = vld [vmem:[#allocation24_spill] sm:$0xff] }
 0x3b2   :  { %v1650_v0 = vadd.f32 %v1649_v17, %v1648_v31  ;;  %v1655_v45 = vadd.f32 %v1654_v20, %v1653_v41  ;;  %v1660_v15 = vadd.f32 %v1659_v26, %v1658_v33  ;;  %v3259_v10 = vsel %vm3258_vm4, %v1489_v52, %v3257_v48  ;;  %v7592_v31 = vld [vmem:[#allocation28_spill] sm:$0xff] }
 0x3b3   :  { %v1665_v39 = vsel %vm1461_vm1, %v1458_v28, 0.0  ;;  %v1510_v3 = vadd.f32 %v1509_v16, %v1508_v49  ;;  %v3261_v63 = vsel %vm3260_vm5, %v1496_v55, %v3259_v10  ;;  %v1503_v24 = vadd.f32 %v1502_v4, %v1501_v60  ;;  %v7596_v4 = vld [vmem:[#allocation31_spill] sm:$0xff] }
 0x3b4   :  { %v3283_v40 = vsel %vm3256_vm3, %v1650_v0, %v3282_v19  ;;  %v1656_v46 = vrot.slane %v1655_v45, 1  ;;  %v1661_v35 = vrot.slane %v1660_v15, 2  ;;  %v1666_v56 = vrot.slane %v1665_v39, 4  ;;  %v1422_v6 = vpop.permute.xlu1 %1421 }
 0x3b5   :  { %v1459_v57 = vmul.f32 %v6849_v22, %v1422_v6  ;;  %v1516_v54 = vrot.slane %v1515_v25, 1  ;;  %v1438_v41 = vmul.f32 %v4116_v38, %v7592_v31  ;;  %v1437_v5 = vmul.f32 %v4117_v32, %v6772_v34 }
 0x3b6   :  { %v1657_v42 = vadd.f32 %v1656_v46, %v1655_v45  ;;  %v1662_v47 = vadd.f32 %v1661_v35, %v1660_v15  ;;  %v1667_v30 = vadd.f32 %v1666_v56, %v1665_v39  ;;  %v1439_v17 = vmul.f32 %v4118_v62, %v6800_v58  ;;  %v7593_v45 = vld [vmem:[#allocation30_spill] sm:$0xff] }
 0x3b7   :  { %v1672_v59 = vsel %vm1461_vm1, %v1459_v57, 0.0  ;;  %v3263_v20 = vsel %vm3262_vm6, %v1503_v24, %v3261_v63  ;;  %v1517_v49 = vadd.f32 %v1516_v54, %v1515_v25  ;;  %v1525_v34 = vsel %vm1461_vm1, %v1438_v41, 0.0  ;;  %v7595_v57 = vld [vmem:[#allocation29_spill] sm:$0xff] }
 0x3b8   :  { %v3284_v23 = vsel %vm3258_vm4, %v1657_v42, %v3283_v40  ;;  %v1663_v61 = vrot.slane %v1662_v47, 1  ;;  %v1668_v51 = vrot.slane %v1667_v30, 2  ;;  %v1673_v8 = vrot.slane %v1672_v59, 4  ;;  %v3354_v14 = vpop.permute.xlu1 %3353 }
 0x3b9   :  { %v3265_v60 = vsel %vm3264_vm7, %v1510_v3, %v3263_v20  ;;  %v1518_v44 = vsel %vm1461_vm1, %v1437_v5, 0.0  ;;  %v1440_v15 = vmul.f32 %v6643_v27, %v7593_v45  ;;  %v1532_v58 = vsel %vm1461_vm1, %v1439_v17, 0.0  ;;  %v7597_v3 = vld [vmem:[#allocation17_spill] sm:$0xff] }
 0x3ba   :  { %v1664_v2 = vadd.f32 %v1663_v61, %v1662_v47  ;;  %v1669_v53 = vadd.f32 %v1668_v51, %v1667_v30  ;;  %v1674_v22 = vadd.f32 %v1673_v8, %v1672_v59  ;;  %v1441_v48 = vmul.f32 %v7594_v11, %v6828_v18  ;;  %v4119_v30 = vld [vmem:[%s7182_s1 + $0x68] sm:$0xff] }
 0x3bb   :  { %v3267_v19 = vsel %vm3266_vm8, %v1517_v49, %v3265_v60  ;;  %v1519_v46 = vrot.slane %v1518_v44, 4  ;;  %v1533_v56 = vrot.slane %v1532_v58, 4  ;;  %v1526_v18 = vrot.slane %v1525_v34, 4 }
 0x3bc   :  { %v1670_v13 = vrot.slane %v1669_v53, 1  ;;  %v1675_v12 = vrot.slane %v1674_v22, 2  ;;  %v3426_v33 = vpop.permute.xlu1 %3425  ;;  %v3285_v50 = vsel %vm3260_vm5, %v1664_v2, %v3284_v23  ;;  %v3581_v40 = vsel %vm1461_vm1, %v3267_v19, %v3354_v14  ;;  %v7598_v2 = vld [vmem:[#allocation57_spill] sm:$0xff] }
 0x3bd   :  { %v3586_v35 = vsel %vm3585_vm9, %v3581_v40, %v3426_v33  ;;  %v1546_v16 = vsel %vm1461_vm1, %v1441_v48, 0.0  ;;  %v1443_v55 = vmul.f32 %v7595_v57, %v6860_v21  ;;  %v1539_v47 = vsel %vm1461_vm1, %v1440_v15, 0.0  ;;  %v7061_v21 = vpop.permute.xlu0 %1376 }
 0x3be   :  { %v1671_v26 = vadd.f32 %v1670_v13, %v1669_v53  ;;  %v1676_v43 = vadd.f32 %v1675_v12, %v1674_v22  ;;  %v1442_v25 = vmul.f32 %v4119_v30, %v7596_v4  ;;  %v1520_v59 = vadd.f32 %v1519_v46, %v1518_v44 }
 0x3bf   :  { %v1534_v10 = vadd.f32 %v1533_v56, %v1532_v58  ;;  %v1547_v23 = vrot.slane %v1546_v16, 4  ;;  %v1527_v61 = vadd.f32 %v1526_v18, %v1525_v34  ;;  %v1540_v51 = vrot.slane %v1539_v47, 4 }
 0x3c0   :  { %v1677_v28 = vrot.slane %v1676_v43, 1  ;;  %v3498_v36 = vpop.permute.xlu1 %3497  ;;  %v3286_v0 = vsel %vm3262_vm6, %v1671_v26, %v3285_v50  ;;  %v1560_v8 = vsel %vm1461_vm1, %v1443_v55, 0.0  ;;  %v1553_v14 = vsel %vm1461_vm1, %v1442_v25, 0.0 }
 0x3c1   :  { %v3591_v27 = vsel %vm3590_vm11, %v3586_v35, %v3498_v36  ;;  %v1444_v53 = vmul.f32 %v7598_v2, %v7597_v3  ;;  %v1521_v22 = vrot.slane %v1520_v59, 2  ;;  %v1535_v63 = vrot.slane %v1534_v10, 2  ;;  %v7067_v13 = vpop.permute.xlu0 %1381  ;;  %v7599_v3 = vld [vmem:[#allocation25_spill] sm:$0xff] }
 0x3c2   :  { %v1678_v39 = vadd.f32 %v1677_v28, %v1676_v43  ;;  %v1548_v24 = vadd.f32 %v1547_v23, %v1546_v16  ;;  %v1561_v54 = vrot.slane %v1560_v8, 4  ;;  %v1528_v38 = vrot.slane %v1527_v61, 2 }
 0x3c3   :  { %v1541_v31 = vadd.f32 %v1540_v51, %v1539_v47  ;;  %v1554_v41 = vrot.slane %v1553_v14, 4  ;;  %v1567_v32 = vsel %vm1461_vm1, %v1444_v53, 0.0  ;;  %v1522_v5 = vadd.f32 %v1521_v22, %v1520_v59  ;;  %v4120_v51 = vld [vmem:[%s7182_s1 + $0x80] sm:$0xff]  ;;  %v7600_v53 = vld [vmem:[#allocation3_spill] sm:$0xff]  ;;  %v7601_v22 = vld [vmem:[#allocation16_spill] sm:$0xff] }
 0x3c4   :  { %v3570_v6 = vpop.permute.xlu1 %3569  ;;  %v7048_v52 = vsel %vm3264_vm7, %v1678_v39, %v3286_v0  ;;  %v1536_v12 = vadd.f32 %v1535_v63, %v1534_v10  ;;  %v1549_v33 = vrot.slane %v1548_v24, 2  ;;  %v1562_v50 = vadd.f32 %v1561_v54, %v1560_v8 }
 0x3c5   :  { %v3596_v42 = vsel %vm3595_vm10, %v3591_v27, %v3570_v6  ;;  %v1529_v62 = vadd.f32 %v1528_v38, %v1527_v61  ;;  %v1542_v17 = vrot.slane %v1541_v31, 2  ;;  %v1555_v20 = vadd.f32 %v1554_v41, %v1553_v14  ;;  %v1387_v45 = vpop.permute.xlu0 %1386 }
 0x3c6   :  { %3907 = vmatprep.mubr.msk.f32.mxu0 %vm3610_vm12, %v3596_v42  ;;  %v1568_v26 = vrot.slane %v1567_v32, 4  ;;  %v1523_v43 = vrot.slane %v1522_v5, 1  ;;  %v1537_v60 = vrot.slane %v1536_v12, 1  ;;  %v1550_v49 = vadd.f32 %v1549_v33, %v1548_v24 }
 0x3c7   :  { %v1563_v34 = vrot.slane %v1562_v50, 2  ;;  %v1530_v44 = vrot.slane %v1529_v62, 1  ;;  %v1543_v28 = vadd.f32 %v1542_v17, %v1541_v31  ;;  %v1556_v36 = vrot.slane %v1555_v20, 2 }
 0x3c8   :  { %v1569_v0 = vadd.f32 %v1568_v26, %v1567_v32  ;;  %v1524_v15 = vadd.f32 %v1523_v43, %v1522_v5  ;;  %v1538_v58 = vadd.f32 %v1537_v60, %v1536_v12  ;;  %v1551_v11 = vrot.slane %v1550_v49, 1  ;;  %v4124_v60 = vld [vmem:[%s7182_s1 + $0xb0] sm:$0xff] }
 0x3c9   :  { %v1564_v48 = vadd.f32 %v1563_v34, %v1562_v50  ;;  %v1531_v19 = vadd.f32 %v1530_v44, %v1529_v62  ;;  %v1544_v39 = vrot.slane %v1543_v28, 1  ;;  %v1557_v40 = vadd.f32 %v1556_v36, %v1555_v20  ;;  %v7070_v56 = vpop.permute.xlu0 %1426  ;;  %v4122_v50 = vld [vmem:[%s7182_s1 + $0x98] sm:$0xff]  ;;  %v7602_v62 = vld [vmem:[#allocation42_spill] sm:$0xff]  ;;  %v4123_v20 = vld [vmem:[%s7182_s1 + $0xa8] sm:$0xff] }
 0x3ca   :  { %v1570_v46 = vrot.slane %v1569_v0, 2  ;;  %v1552_v6 = vadd.f32 %v1551_v11, %v1550_v49  ;;  %v1445_v8 = vmul.f32 %v4120_v51, %v6874_v9  ;;  %v1447_v2 = vmul.f32 %v7599_v3, %v6891_v7  ;;  %v4121_v9 = vld [vmem:[%s7182_s1 + $0xa0] sm:$0xff] }
 0x3cb   :  { %v3268_v35 = vsel %vm3254_vm2, %v1531_v19, %v1524_v15  ;;  %v1565_v18 = vrot.slane %v1564_v48, 1  ;;  %v1545_v16 = vadd.f32 %v1544_v39, %v1543_v28  ;;  %v1558_v57 = vrot.slane %v1557_v40, 1 }
 0x3cc   :  { %v3269_v27 = vsel %vm3256_vm3, %v1538_v58, %v3268_v35  ;;  %v1571_v55 = vadd.f32 %v1570_v46, %v1569_v0  ;;  %v1446_v63 = vmul.f32 %v7601_v22, %v7600_v53  ;;  %v1574_v31 = vsel %vm1461_vm1, %v1445_v8, 0.0 }
 0x3cd   :  { %v3270_v42 = vsel %vm3258_vm4, %v1545_v16, %v3269_v27  ;;  %v3356_v47 = vpop.permute.xlu0 %3355  ;;  %v1566_v30 = vadd.f32 %v1565_v18, %v1564_v48  ;;  %v1559_v25 = vadd.f32 %v1558_v57, %v1557_v40  ;;  %v1588_v32 = vsel %vm1461_vm1, %v1447_v2, 0.0 }
 0x3ce   :  { %v3271_v4 = vsel %vm3260_vm5, %v1552_v6, %v3270_v42  ;;  %v1572_v59 = vrot.slane %v1571_v55, 1  ;;  %v1449_v7 = vmul.f32 %v4121_v9, %v6916_v37  ;;  %v1581_v33 = vsel %vm1461_vm1, %v1446_v63, 0.0 }
 0x3cf   :  { %v3272_v10 = vsel %vm3262_vm6, %v1559_v25, %v3271_v4  ;;  %v1448_v17 = vmul.f32 %v4122_v50, %v7602_v62  ;;  %v1450_v26 = vmul.f32 %v4123_v20, %v7061_v21  ;;  %v1575_v37 = vrot.slane %v1574_v31, 4 }
 0x3d0   :  { %v3273_v61 = vsel %vm3264_vm7, %v1566_v30, %v3272_v10  ;;  %v1573_v14 = vadd.f32 %v1572_v59, %v1571_v55  ;;  %v1451_v49 = vmul.f32 %v4124_v60, %v7067_v13  ;;  %v1589_v34 = vrot.slane %v1588_v32, 4 }
 0x3d1   :  { %v3428_v23 = vpop.permute.xlu0 %3427  ;;  %v1452_v44 = vmul.f32 %v6836_v29, %v1387_v45  ;;  %v1582_v28 = vrot.slane %v1581_v33, 4  ;;  %v1602_v36 = vsel %vm1461_vm1, %v1449_v7, 0.0  ;;  %v1595_v0 = vsel %vm1461_vm1, %v1448_v17, 0.0 }
 0x3d2   :  { %v3274_v24 = vsel %vm3266_vm8, %v1573_v14, %v3273_v61  ;;  %v1609_v21 = vsel %vm1461_vm1, %v1450_v26, 0.0  ;;  %v1576_v15 = vadd.f32 %v1575_v37, %v1574_v31  ;;  %v1616_v58 = vsel %vm1461_vm1, %v1451_v49, 0.0 }
 0x3d3   :  { %v3582_v38 = vsel %vm1461_vm1, %v3274_v24, %v3356_v47  ;;  %v1590_v11 = vadd.f32 %v1589_v34, %v1588_v32  ;;  %v1603_v48 = vrot.slane %v1602_v36, 4  ;;  %v1623_v19 = vsel %vm1461_vm1, %v1452_v44, 0.0 }
 0x3d4   :  { %v3587_v41 = vsel %vm3585_vm9, %v3582_v38, %v3428_v23  ;;  %v1583_v13 = vadd.f32 %v1582_v28, %v1581_v33  ;;  %v1596_v39 = vrot.slane %v1595_v0, 4  ;;  %v1610_v40 = vrot.slane %v1609_v21, 4 }
 0x3d5   :  { %v3500_v54 = vpop.permute.xlu0 %3499  ;;  %v1617_v46 = vrot.slane %v1616_v58, 4  ;;  %v1577_v35 = vrot.slane %v1576_v15, 2  ;;  %v1624_v29 = vrot.slane %v1623_v19, 4  ;;  %v1591_v45 = vrot.slane %v1590_v11, 2 }
 0x3d6   :  { %v3592_v5 = vsel %vm3590_vm11, %v3587_v41, %v3500_v54  ;;  %v1604_v27 = vadd.f32 %v1603_v48, %v1602_v36  ;;  %v1584_v6 = vrot.slane %v1583_v13, 2  ;;  %v1597_v18 = vadd.f32 %v1596_v39, %v1595_v0 }
 0x3d7   :  { %v1611_v16 = vadd.f32 %v1610_v40, %v1609_v21  ;;  %v1618_v57 = vadd.f32 %v1617_v46, %v1616_v58  ;;  %v1578_v55 = vadd.f32 %v1577_v35, %v1576_v15  ;;  %v1625_v42 = vadd.f32 %v1624_v29, %v1623_v19 }
 0x3d8   :  { %v1592_v47 = vadd.f32 %v1591_v45, %v1590_v11  ;;  %v1605_v30 = vrot.slane %v1604_v27, 2  ;;  %v1585_v4 = vadd.f32 %v1584_v6, %v1583_v13  ;;  %v1598_v25 = vrot.slane %v1597_v18, 2 }
 0x3d9   :  { %v1612_v59 = vrot.slane %v1611_v16, 2  ;;  %v1619_v10 = vrot.slane %v1618_v57, 2  ;;  %v1579_v23 = vrot.slane %v1578_v55, 1  ;;  %v1626_v61 = vrot.slane %v1625_v42, 2  ;;  %v3358_v34 = vpop.permute.xlu0 %3357 }
 0x3da   :  { %v1593_v51 = vrot.slane %v1592_v47, 1  ;;  %v1606_v8 = vadd.f32 %v1605_v30, %v1604_v27  ;;  %v1586_v14 = vrot.slane %v1585_v4, 1  ;;  %v1599_v3 = vadd.f32 %v1598_v25, %v1597_v18 }
 0x3db   :  { %v1613_v2 = vadd.f32 %v1612_v59, %v1611_v16  ;;  %v1620_v53 = vadd.f32 %v1619_v10, %v1618_v57  ;;  %v1460_v22 = vmul.f32 %v6820_v1, %v7070_v56  ;;  %v1580_v63 = vadd.f32 %v1579_v23, %v1578_v55  ;;  %v3720_v57 = vld [vmem:[%s7184_s6] sm:$0xff]  ;;  %v3721_v55 = vld [vmem:[%s7184_s6 + $0x8] sm:$0xff] }
 0x3dc   :  { %v1627_v24 = vadd.f32 %v1626_v61, %v1625_v42  ;;  %v1594_v54 = vadd.f32 %v1593_v51, %v1592_v47  ;;  %v1607_v38 = vrot.slane %v1606_v8, 1  ;;  %v1587_v31 = vadd.f32 %v1586_v14, %v1585_v4 }
 0x3dd   :  { %v1600_v41 = vrot.slane %v1599_v3, 1  ;;  %v1614_v32 = vrot.slane %v1613_v2, 1  ;;  %v1621_v9 = vrot.slane %v1620_v53, 1  ;;  %v1679_v7 = vsel %vm1461_vm1, %v1460_v22, 0.0 }
 0x3de   :  { %v1608_v50 = vadd.f32 %v1607_v38, %v1606_v8  ;;  %v1680_v20 = vrot.slane %v1679_v7, 4 }
 0x3df   :  { %v1601_v62 = vadd.f32 %v1600_v41, %v1599_v3  ;;  %v1615_v17 = vadd.f32 %v1614_v32, %v1613_v2  ;;  %v1622_v1 = vadd.f32 %v1621_v9, %v1620_v53  ;;  %v3862_v3 = vld [vmem:[%s7185_s7] ss:$0 sm:$0xff]  ;;  %v3827_v53 = vld [vmem:[%s7186_s2 + $0x8] sm:$0xff] }
 0x3e0   :  { %v1681_v60 = vadd.f32 %v1680_v20, %v1679_v7 }
 0x3e2   :  { %v1682_v21 = vrot.slane %v1681_v60, 2 }
 0x3e4   :  { %v1683_v19 = vadd.f32 %v1682_v21, %v1681_v60 }
 0x3e6   :  { %v1684_v39 = vrot.slane %v1683_v19, 1 }
 0x3e8   :  { %v1685_v46 = vadd.f32 %v1684_v39, %v1683_v19 }
 0x3ea   :  { %v3572_v12 = vpop.permute.xlu1 %3571  ;;  %v3288_v29 = vsel %vm3266_vm8, %v1685_v46, %v7048_v52  ;;  %v3943_v52 = vpack.c.bf16 %v3721_v55, %v3720_v57 }
 0x3eb   :  { %v3597_v43 = vsel %vm3595_vm10, %v3592_v5, %v3572_v12  ;;  %v3275_v5 = vsel %vm3254_vm2, %v1587_v31, %v1580_v63  ;;  %v1628_v12 = vrot.slane %v1627_v24, 1 }
 0x3ec   :  { %3908 = vmatmul.mubr.msk.f32.vlgmr.msra.gmra.mrb[0].mxu0 %vm3610_vm12, %v3597_v43  ;;  %v3276_v33 = vsel %vm3256_vm3, %v1594_v54, %v3275_v5  ;;  %3944 = vmatprep.subr.bf16.mxu1 %v3943_v52 }
 0x3ed   :  { %v1629_v26 = vadd.f32 %v1628_v12, %v1627_v24  ;;  %v3277_v43 = vsel %vm3258_vm4, %v1601_v62, %v3276_v33  ;;  %3946 = vmatpush3.bf16.msra.mxu1 %v3943_v52  ;;  %v3826_v24 = vld [vmem:[%s7186_s2] sm:$0xff]  ;;  %v3829_v12 = vld [vmem:[%s7186_s2 + $0x18] sm:$0xff]  ;;  %v3828_v62 = vld [vmem:[%s7186_s2 + $0x10] sm:$0xff] }
 0x3ee   :  { %v3430_v56 = vpop.permute.xlu1 %3429  ;;  %v3278_v37 = vsel %vm3260_vm5, %v1608_v50, %v3277_v43 }
 0x3ef   :  { %v3279_v49 = vsel %vm3262_vm6, %v1615_v17, %v3278_v37 }
 0x3f0   :  { %v3280_v44 = vsel %vm3264_vm7, %v1622_v1, %v3279_v49 }
 0x3f1   :  { %v3281_v36 = vsel %vm3266_vm8, %v1629_v26, %v3280_v44 }
 0x3f2   :  { %v3583_v0 = vsel %vm1461_vm1, %v3281_v36, %v3358_v34 }
 0x3f3   :  { %v3588_v15 = vsel %vm3585_vm9, %v3583_v0, %v3430_v56  ;;  %v3360_v13 = vpop.permute.xlu0 %3359 }
 0x3f4   :  { %v3584_v45 = vsel %vm1461_vm1, %v3288_v29, %v3360_v13 }
 0x3f9   :  { %v3432_v40 = vpop.permute.xlu0 %3431 }
 0x3fa   :  { %v3589_v27 = vsel %vm3585_vm9, %v3584_v45, %v3432_v40 }
 0x40b   :  { %v3502_v28 = vpop.permute.xlu1 %3501 }
 0x40c   :  { %v3593_v58 = vsel %vm3590_vm11, %v3588_v15, %v3502_v28 }
 0x40f   :  { %v3574_v11 = vpop.permute.xlu1 %3573 }
 0x410   :  { %v3598_v48 = vsel %vm3595_vm10, %v3593_v58, %v3574_v11 }
 0x411   :  { %3910 = vmatprep.mubr.msk.f32.mxu0 %vm3610_vm12, %v3598_v48 }
 0x419   :  { %v3504_v35 = vpop.permute.xlu0 %3503 }
 0x41a   :  { %v3594_v6 = vsel %vm3590_vm11, %v3589_v27, %v3504_v35 }
 0x41f   :  { %v3576_v18 = vpop.permute.xlu0 %3575 }
 0x420   :  { %v3599_v16 = vsel %vm3595_vm10, %v3594_v6, %v3576_v18 }
 0x421   :  { %3911 = vmatmul.mubr.msk.f32.gmra.mrb[2].mxu0 %vm3610_vm12, %v3599_v16 }
 0x4bf   :  { %v3909_v42 = vpop.f32.mrb[0].mxu0 }
 0x4c0   :  { %v3713_v47 = vmul.f32 0.1, %v3909_v42  ;;  %v3689_v30 = vpop.f32.mrb[1].mxu0  ;;  %vm3709_vm13 = vcmp.ge.f32.partialorder %v3909_v42, 0.0 }
 0x4c1   :  { %v3712_v4 = vmul.f32 0.1, %v3689_v30  ;;  %vm3708_vm14 = vcmp.ge.f32.partialorder %v3689_v30, 0.0 }
 0x4c2   :  { %v3717_v59 = vsel %vm3709_vm13, %v3909_v42, %v3713_v47 }
 0x4c3   :  { %v3716_v25 = vsel %vm3708_vm14, %v3689_v30, %v3712_v4 }
 0x4c4   :  { %3917 = vmatprep.mubr.msk.f32.mxu1 %vm1461_vm1, %v3716_v25 }
 0x4c5   :  { %3918 = vmatmul.mubr.msk.f32.vlgmr.msra.gmra.mrb[0].mxu1 %vm1461_vm1, %v3717_v59 }
 0x4f4   :  { %v3912_v10 = vpop.f32.mrb[2].mxu0 }
 0x4f5   :  { %v3715_v23 = vmul.f32 0.1, %v3912_v10  ;;  %v3699_v61 = vpop.f32.mrb[3].mxu0  ;;  %vm3711_vm15 = vcmp.ge.f32.partialorder %v3912_v10, 0.0 }
 0x4f6   :  { %vm3710_vm0 = vcmp.ge.f32.partialorder %v3699_v61, 0.0  ;;  %v3714_v51 = vmul.f32 0.1, %v3699_v61 }
 0x4f7   :  { %v3719_v14 = vsel %vm3711_vm15, %v3912_v10, %v3715_v23 }
 0x4f8   :  { %v3718_v8 = vsel %vm3710_vm0, %v3699_v61, %v3714_v51 }
 0x4f9   :  { %3920 = vmatprep.mubr.msk.f32.mxu1 %vm1461_vm1, %v3718_v8 }
 0x4fa   :  { %3921 = vmatmul.mubr.msk.f32.gmra.mrb[2].mxu1 %vm1461_vm1, %v3719_v14 }
 0x598   :  { %v3919_v2 = vpop.f32.mrb[0].mxu1 }
 0x599   :  { %v3813_v22 = vadd.f32 %v3919_v2, %v3862_v3  ;;  %v3807_v63 = vpop.f32.mrb[1].mxu1 }
 0x59a   :  { %v3808_v54 = vadd.f32 %v3862_v3, %v3807_v63 }
 0x59b   :  { %v3831_v38 = vadd.f32 %v3827_v53, %v3813_v22 }
 0x59c   :  { %v3830_v31 = vadd.f32 %v3826_v24, %v3808_v54 }
 0x59d   :  { %vm3835_vm2 = vcmp.ge.f32.partialorder %v3831_v38, 0.0  ;;  %v3839_v41 = vmul.f32 0.1, %v3831_v38 }
 0x59e   :  { %vm3834_vm1 = vcmp.ge.f32.partialorder %v3830_v31, 0.0  ;;  %v3838_v32 = vmul.f32 0.1, %v3830_v31 }
 0x59f   :  { %v3843_v9 = vsel %vm3835_vm2, %v3831_v38, %v3839_v41 }
 0x5a0   :  { %3847 = vst.msk [vmem:[%s7187_s8 + $0x8] sm:$0xff] %vm3585_vm9, %v3843_v9  ;;  %v3842_v7 = vsel %vm3834_vm1, %v3830_v31, %v3838_v32 }
 0x5a1   :  { %3846 = vst.msk [vmem:[%s7187_s8] sm:$0xff] %vm3585_vm9, %v3842_v7 }
 0x5cd   :  { %v3922_v5 = vpop.f32.mrb[2].mxu1 }
 0x5ce   :  { %v3823_v33 = vadd.f32 %v3922_v5, %v3862_v3  ;;  %v3817_v50 = vpop.f32.mrb[3].mxu1 }
 0x5cf   :  { %v3818_v17 = vadd.f32 %v3862_v3, %v3817_v50 }
 0x5d0   :  { %v3833_v20 = vadd.f32 %v3829_v12, %v3823_v33 }
 0x5d1   :  { %v3832_v1 = vadd.f32 %v3828_v62, %v3818_v17 }
 0x5d2   :  { %vm3837_vm3 = vcmp.ge.f32.partialorder %v3833_v20, 0.0  ;;  %v3841_v56 = vmul.f32 0.1, %v3833_v20 }
 0x5d3   :  { %vm3836_vm4 = vcmp.ge.f32.partialorder %v3832_v1, 0.0  ;;  %v3840_v26 = vmul.f32 0.1, %v3832_v1 }
 0x5d4   :  { %v3845_v43 = vsel %vm3837_vm3, %v3833_v20, %v3841_v56 }
 0x5d5   :  { %3849 = vst.msk [vmem:[%s7187_s8 + $0x18] sm:$0xff] %vm3585_vm9, %v3845_v43  ;;  %v3844_v37 = vsel %vm3836_vm4, %v3832_v1, %v3840_v26 }
 0x5d6   :  { %3848 = vst.msk [vmem:[%s7187_s8 + $0x10] sm:$0xff] %vm3585_vm9, %v3844_v37 }

</bundles_post_ra>
